<compile_context>
chip_gen: v7x
topology: tpu7x:2x2x1
jax: 0.10.0
libtpu: 0.0.40
codegen_flags: <defaults>
</compile_context>

<pallas_src>
import functools

import jax
import jax.numpy as jnp
from jax import lax
from jax.experimental import pallas as pl
from jax.experimental.pallas import tpu as pltpu

MARGIN = 1.0
_KU = 8  # k rows consumed per inner mining step (one aligned full-width sublane load)


@functools.lru_cache(maxsize=None)
def _device_kind() -> str:
    try:
        return jax.devices()[0].device_kind.lower()
    except Exception:  # pragma: no cover - defensive
        return ""


@functools.lru_cache(maxsize=None)
def _vmem_capacity_bytes() -> int:
    try:
        return int(pltpu.get_tpu_info().vmem_capacity_bytes)
    except Exception:  # pragma: no cover - defensive
        return 128 << 20


def _prefers_small_tiles() -> bool:
    # Dual-TensorCore chips want >=2 grid steps on the "parallel" axis.
    kind = _device_kind()
    return any(tag in kind for tag in ("v7", "v4", "v5p"))


def _plan_tiles(batch: int):
    """Return (anchor_tile, padded_batch, num_tiles); tiles are lane-dense multiples of 128."""
    if batch <= 128 or _prefers_small_tiles():
        ta = 128          # small batches / dual-TC chips: 128-wide anchor tiles
    else:
        ta = 256          # single-TC chips (v5e/v6e): fewer, larger tiles
    b_pad = -(-batch // ta) * ta
    return ta, b_pad, b_pad // ta


def _mining_chunk(ta: int) -> int:
    # 8 vregs of (chunk, ta) f32 per live array -> run_min/pt/acc all stay in registers.
    return max(8, min(64, 8192 // ta))


def _triplet_semihard_kernel(xt_ref, xf_ref, sqc_ref, sqr_ref, labc_ref, labr_ref,
                             out_ref, ploss_ref, pneg_ref, *, n_valid, margin):
    i = pl.program_id(0)
    b_pad, ta = ploss_ref.shape
    chunk = _mining_chunk(ta)
    n_chunks = b_pad // chunk
    n_ksteps = b_pad // _KU
    k_unroll = True if n_ksteps <= 32 else 4

    # ---- pairwise squared distances for this anchor tile (transposed layout) ----
    # pt[b, a] = pdist[anchor a, sample b]; anchors on lanes, samples on sublanes.
    # NN contraction: (B_pad, D) @ (D, ta) with f32 accumulation on the MXU.
    gram_t = jnp.dot(xf_ref[...], xt_ref[...], preferred_element_type=jnp.float32)
    pt = jnp.maximum(sqc_ref[...] + sqr_ref[...] - 2.0 * gram_t, 0.0)

    b_idx = lax.broadcasted_iota(jnp.int32, (b_pad, ta), 0)
    a_idx = lax.broadcasted_iota(jnp.int32, (b_pad, ta), 1) + i * ta      # global anchor id
    is_diag = b_idx == a_idx
    valid = (b_idx < n_valid) & (a_idx < n_valid)     # exclude batch padding entirely
    pt = jnp.where(is_diag, 0.0, pt)                  # zero the diagonal

    # ---- label masks ----
    same = labc_ref[...] == labr_ref[...]             # (b_pad, ta): labels[b] == labels[a]
    adjn = jnp.logical_not(same) & valid              # valid negative candidates
    pos = same & jnp.logical_not(is_diag) & valid     # valid (anchor, positive) pairs
    part_npos = jnp.sum(pos.astype(jnp.float32))      # reduce now; only the scalar stays live

    # ---- negatives_inside (reference masked-max formulation), one (1, ta) row ----
    adjn_f = adjn.astype(jnp.float32)
    minrow = jnp.min(pt, axis=0, keepdims=True)
    neg_in = jnp.max((pt - minrow) * adjn_f, axis=0, keepdims=True) + minrow

    # ---- stage the two sentinel-masked views of pt for the mining loop ----
    #  * pneg_ref : candidate distances; -1 on non-negatives never wins "pdk > pt" (pt >= 0).
    #  * ploss_ref: compare / loss side; -inf on non-positive entries forces their relu'd
    #    loss contribution to exactly 0, so no per-chunk label masking is needed.
    pneg_ref[...] = jnp.where(adjn, pt, -1.0)
    ploss_ref[...] = jnp.where(pos, pt, -jnp.inf)

    inf = jnp.float32(jnp.inf)

    # ---- semi-hard mining: chunk the sample axis so pt/run_min/acc stay in vregs ----
    def chunk_body(ci, acc):
        b0 = pl.multiple_of(ci * chunk, chunk)
        pt_c = ploss_ref[pl.ds(b0, chunk), :]         # (chunk, ta), register-resident

        def k_body(k, run_min):
            k0 = pl.multiple_of(k * _KU, _KU)
            kblk = pneg_ref[pl.ds(k0, _KU), :]        # aligned full-width (8, ta) load
            for r in range(_KU):                      # python unroll over the 8 rows
                pdk = kblk[r:r + 1, :]                # (1, ta): pd[a, k] for negatives k
                run_min = jnp.minimum(run_min, jnp.where(pdk > pt_c, pdk, inf))
            return run_min

        run_min = lax.fori_loop(0, n_ksteps, k_body,
                                jnp.full((chunk, ta), inf, jnp.float32),
                                unroll=k_unroll)

        found = run_min < inf                         # mask_final (transposed)
        semi_hard = jnp.where(found, run_min, neg_in) # negatives_outside / negatives_inside
        # -inf sentinel at non-positive entries makes this relu contribution exactly 0.
        return acc + jnp.maximum(margin + pt_c - semi_hard, 0.0)

    acc = lax.fori_loop(0, n_chunks, chunk_body,
                        jnp.zeros((chunk, ta), jnp.float32))
    part_loss = jnp.sum(acc)

    # Lane-dense (8, 128) output block; partial loss at [0,0], partial num_pos at [0,1].
    rr = lax.broadcasted_iota(jnp.int32, (8, 128), 0)
    cc = lax.broadcasted_iota(jnp.int32, (8, 128), 1)
    out_ref[...] = jnp.where((rr == 0) & (cc == 0), part_loss,
                             jnp.where((rr == 0) & (cc == 1), part_npos, 0.0))


@jax.jit
def triplet_semihard_loss(embeddings, labels):
    b, d = embeddings.shape
    ta, b_pad, nt = _plan_tiles(b)
    chunk = _mining_chunk(ta)
    assert b_pad % ta == 0 and b_pad % chunk == 0 and b_pad % _KU == 0

    # Cheap hoists: f32 cast, zero-padding, wrapper-side transpose, norms, labels.
    xf = embeddings.astype(jnp.float32)
    if b_pad != b:
        xf = jnp.pad(xf, ((0, b_pad - b), (0, 0)))
    x_t = xf.T                                        # (d, b_pad): NN gram, no in-kernel transpose

    sq = jnp.sum(xf * xf, axis=-1)
    sq_col, sq_row = sq[:, None], sq[None, :]

    lab = labels.reshape(b).astype(jnp.int32)
    if b_pad != b:
        lab = jnp.pad(lab, (0, b_pad - b), constant_values=-1)   # value irrelevant (masked)
    lab_col, lab_row = lab[:, None], lab[None, :]

    # Double-buffered footprint estimate + compiler-scratch margin, generation-aware cap.
    footprint = 4 * (2 * d * ta            # anchor tile (transposed)
                     + 2 * b_pad * d       # full embeddings
                     + 4 * b_pad * 128     # sq / label columns (lane-padded)
                     + 4 * 8 * ta          # sq / label anchor rows (sublane-padded)
                     + 2 * 8 * 128         # output block
                     + 2 * b_pad * ta)     # the two mining scratch buffers
    cap = _vmem_capacity_bytes()
    vmem_bytes = min(max(footprint + (8 << 20), 16 << 20), max(cap - (8 << 20), 32 << 20))

    kernel = functools.partial(_triplet_semihard_kernel, n_valid=b, margin=MARGIN)
    out = pl.pallas_call(
        kernel,
        out_shape=jax.ShapeDtypeStruct((nt * 8, 128), jnp.float32),
        grid=(nt,),
        in_specs=[
            pl.BlockSpec((d, ta), lambda i: (0, i)),       # anchor tile of x^T
            pl.BlockSpec((b_pad, d), lambda i: (0, 0)),    # full (padded) embeddings
            pl.BlockSpec((b_pad, 1), lambda i: (0, 0)),    # squared norms, column form
            pl.BlockSpec((1, ta), lambda i: (0, i)),       # squared norms, anchor row form
            pl.BlockSpec((b_pad, 1), lambda i: (0, 0)),    # labels, column form
            pl.BlockSpec((1, ta), lambda i: (0, i)),       # labels, anchor row form
        ],
        out_specs=pl.BlockSpec((8, 128), lambda i: (i, 0)),
        scratch_shapes=[pltpu.VMEM((b_pad, ta), jnp.float32),   # loss-side pt (-inf sentinel)
                        pltpu.VMEM((b_pad, ta), jnp.float32)],  # negative candidates (-1 sentinel)
        compiler_params=pltpu.CompilerParams(
            dimension_semantics=("parallel",),
            vmem_limit_bytes=vmem_bytes,
        ),
    )(x_t, xf, sq_col, sq_row, lab_col, lab_row)

    total_loss = jnp.sum(out[:, 0])
    total_npos = jnp.sum(out[:, 1])
    # Faithful to the PyTorch reference: no guard against num_positives == 0.
    return (total_loss / total_npos).astype(embeddings.dtype)


def reference_loss(embeddings, labels, margin=1.0):
    """Pure-JAX literal translation of the PyTorch code (sanity check)."""
    x = embeddings.astype(jnp.float32)
    B = x.shape[0]
    c1 = jnp.sum(x ** 2, axis=-1)[:, None]
    c2 = jnp.sum(x ** 2, axis=-1)[None, :]
    c3 = x @ x.T
    pds = jnp.maximum(c1 + c2 - 2.0 * c3, 0.0)
    err = (pds > 0.0).astype(jnp.float32)
    pd = pds * err * (1.0 - jnp.eye(B))
    lab = labels.reshape(B, 1)
    adjacency = lab == lab.T
    adjacency_not = ~adjacency
    pd_tile = jnp.tile(pd, (B, 1))
    adjn_tile = jnp.tile(adjacency_not, (B, 1))
    transpose_reshape = pd.T.reshape(-1, 1)
    mask = adjn_tile & (pd_tile > transpose_reshape)
    mask_f = mask.astype(jnp.float32)
    mask_final = (jnp.sum(mask_f, axis=1) > 0.0).reshape(B, B).T
    axis_max = jnp.max(pd_tile, axis=1, keepdims=True)
    masked_min = jnp.min((pd_tile - axis_max) * mask_f, axis=1, keepdims=True) + axis_max
    neg_out = masked_min.reshape(B, B).T
    axis_min = jnp.min(pd, axis=1, keepdims=True)
    masked_max = jnp.max((pd - axis_min) * adjacency_not.astype(jnp.float32),
                         axis=1, keepdims=True) + axis_min
    neg_in = jnp.tile(masked_max, (1, B))
    semi_hard = jnp.where(mask_final, neg_out, neg_in)
    loss_mat = margin + pd - semi_hard
    mask_pos = adjacency.astype(jnp.float32) - jnp.eye(B)
    num_pos = jnp.sum(mask_pos)
    return (jnp.sum(jnp.maximum(loss_mat * mask_pos, 0.0)) / num_pos).astype(embeddings.dtype)


if __name__ == "__main__":
    # Small primary test (B=8 -> padded to one 128-wide anchor tile).
    key = jax.random.PRNGKey(0)
    B, D = 8, 32
    k_emb, k_lab = jax.random.split(key)
    embeddings = jax.random.normal(k_emb, (B, D), dtype=jnp.float32)
    labels = jax.random.randint(k_lab, (B,), 0, 3, dtype=jnp.int32)

    loss = triplet_semihard_loss(embeddings, labels)
    jax.block_until_ready(loss)
    ref = reference_loss(embeddings, labels)
    assert jnp.isfinite(loss), f"non-finite loss: {loss}"
    assert jnp.allclose(loss, ref, atol=1e-4, rtol=1e-4), (loss, ref)

    # Secondary test exercising the multi-chunk mining path (and multi-tile grid on
    # dual-TensorCore chips).
    key2 = jax.random.PRNGKey(1)
    B2, D2 = 256, 32
    k_emb2, k_lab2 = jax.random.split(key2)
    emb2 = jax.random.normal(k_emb2, (B2, D2), dtype=jnp.float32)
    lab2 = jax.random.randint(k_lab2, (B2,), 0, 8, dtype=jnp.int32)

    loss2 = triplet_semihard_loss(emb2, lab2)
    jax.block_until_ready(loss2)
    ref2 = reference_loss(emb2, lab2)
    assert jnp.isfinite(loss2), f"non-finite loss: {loss2}"
    assert jnp.allclose(loss2, ref2, atol=5e-3, rtol=5e-3), (loss2, ref2)

    print("KERNEL_OK")
</pallas_src>

<mosaic_0001>
module attributes {stable_mosaic.version = 11 : i64} {
  func.func @_triplet_semihard_kernel(%arg0: i32, %arg1: memref<32x128xf32, #tpu.memory_space<vmem>>, %arg2: memref<128x32xf32, #tpu.memory_space<vmem>>, %arg3: memref<128x1xf32, #tpu.memory_space<vmem>>, %arg4: memref<1x128xf32, #tpu.memory_space<vmem>>, %arg5: memref<128x1xi32, #tpu.memory_space<vmem>>, %arg6: memref<1x128xi32, #tpu.memory_space<vmem>>, %arg7: memref<8x128xf32, #tpu.memory_space<vmem>>, %arg8: memref<128x128xf32, #tpu.memory_space<vmem>>, %arg9: memref<128x128xf32, #tpu.memory_space<vmem>>) attributes {dimension_semantics = [#tpu.dimension_semantics<parallel>], iteration_bounds = array<i64: 1>, scalar_prefetch = 0 : i64, scratch_operands = 2 : i64, tpu.core_type = #tpu.core_type<tc>, window_params = [{transform_indices = @transform_0, window_bounds = array<i64: 32, 128>}, {pipeline_mode = #tpu.pipeline_mode<synchronous>, transform_indices = @transform_1, window_bounds = array<i64: 128, 32>}, {pipeline_mode = #tpu.pipeline_mode<synchronous>, transform_indices = @transform_2, window_bounds = array<i64: 128, 1>}, {transform_indices = @transform_3, window_bounds = array<i64: 1, 128>}, {pipeline_mode = #tpu.pipeline_mode<synchronous>, transform_indices = @transform_4, window_bounds = array<i64: 128, 1>}, {transform_indices = @transform_5, window_bounds = array<i64: 1, 128>}, {transform_indices = @transform_6, window_bounds = array<i64: 8, 128>}]} {
    %c0 = arith.constant 0 : index
    %c0_0 = arith.constant 0 : index
    %0 = vector.load %arg2[%c0, %c0_0] : memref<128x32xf32, #tpu.memory_space<vmem>>, vector<128x32xf32>
    %c0_1 = arith.constant 0 : index
    %c0_2 = arith.constant 0 : index
    %1 = vector.load %arg1[%c0_1, %c0_2] : memref<32x128xf32, #tpu.memory_space<vmem>>, vector<32x128xf32>
    %cst = arith.constant dense<0.000000e+00> : vector<128x128xf32>
    %2 = tpu.matmul %0, %1, %cst {dimension_numbers = #tpu.dot_dimension_numbers<[1], [0], [0], [1], [0, 0, 1, 1], [], []>} : vector<128x32xf32>, vector<32x128xf32>, vector<128x128xf32> -> vector<128x128xf32>
    %c0_3 = arith.constant 0 : index
    %c0_4 = arith.constant 0 : index
    %3 = vector.load %arg3[%c0_3, %c0_4] : memref<128x1xf32, #tpu.memory_space<vmem>>, vector<128x1xf32>
    %c0_5 = arith.constant 0 : index
    %c0_6 = arith.constant 0 : index
    %4 = vector.load %arg4[%c0_5, %c0_6] : memref<1x128xf32, #tpu.memory_space<vmem>>, vector<1x128xf32>
    %5 = vector.broadcast %3 : vector<128x1xf32> to vector<128x128xf32>
    %6 = vector.broadcast %4 : vector<1x128xf32> to vector<128x128xf32>
    %7 = arith.addf %5, %6 : vector<128x128xf32>
    %cst_7 = arith.constant 2.000000e+00 : f32
    %8 = vector.broadcast %cst_7 : f32 to vector<128x128xf32>
    %9 = arith.mulf %8, %2 : vector<128x128xf32>
    %10 = arith.subf %7, %9 : vector<128x128xf32>
    %cst_8 = arith.constant 0.000000e+00 : f32
    %11 = vector.broadcast %cst_8 : f32 to vector<128x128xf32>
    %12 = arith.maximumf %10, %11 : vector<128x128xf32>
    %13 = tpu.iota {dimensions = array<i32: 0>} : vector<128x128xi32>
    %14 = tpu.iota {dimensions = array<i32: 1>} : vector<128x128xi32>
    %c128_i32 = arith.constant 128 : i32
    %15 = arith.muli %arg0, %c128_i32 : i32
    %16 = vector.broadcast %15 : i32 to vector<128x128xi32>
    %17 = arith.addi %14, %16 : vector<128x128xi32>
    %18 = arith.cmpi eq, %13, %17 : vector<128x128xi32>
    %c8_i32 = arith.constant 8 : i32
    %19 = vector.broadcast %c8_i32 : i32 to vector<128x128xi32>
    %20 = arith.cmpi slt, %13, %19 : vector<128x128xi32>
    %c8_i32_9 = arith.constant 8 : i32
    %21 = vector.broadcast %c8_i32_9 : i32 to vector<128x128xi32>
    %22 = arith.cmpi slt, %17, %21 : vector<128x128xi32>
    %23 = arith.andi %20, %22 : vector<128x128xi1>
    %cst_10 = arith.constant 0.000000e+00 : f32
    %24 = vector.broadcast %cst_10 : f32 to vector<128x128xf32>
    %25 = arith.select %18, %24, %12 : vector<128x128xi1>, vector<128x128xf32>
    %c0_11 = arith.constant 0 : index
    %c0_12 = arith.constant 0 : index
    %26 = vector.load %arg5[%c0_11, %c0_12] : memref<128x1xi32, #tpu.memory_space<vmem>>, vector<128x1xi32>
    %c0_13 = arith.constant 0 : index
    %c0_14 = arith.constant 0 : index
    %27 = vector.load %arg6[%c0_13, %c0_14] : memref<1x128xi32, #tpu.memory_space<vmem>>, vector<1x128xi32>
    %28 = vector.broadcast %26 : vector<128x1xi32> to vector<128x128xi32>
    %29 = vector.broadcast %27 : vector<1x128xi32> to vector<128x128xi32>
    %30 = arith.cmpi eq, %28, %29 : vector<128x128xi32>
    %cst_15 = arith.constant dense<true> : vector<128x128xi1>
    %31 = arith.xori %30, %cst_15 : vector<128x128xi1>
    %32 = arith.andi %31, %23 : vector<128x128xi1>
    %cst_16 = arith.constant dense<true> : vector<128x128xi1>
    %33 = arith.xori %18, %cst_16 : vector<128x128xi1>
    %34 = arith.andi %30, %33 : vector<128x128xi1>
    %35 = arith.andi %34, %23 : vector<128x128xi1>
    %36 = arith.extui %35 : vector<128x128xi1> to vector<128x128xi32>
    %37 = arith.sitofp %36 : vector<128x128xi32> to vector<128x128xf32>
    %38 = vector.shape_cast %37 : vector<128x128xf32> to vector<1x128x128xf32>
    %cst_17 = arith.constant dense<0.000000e+00> : vector<1xf32>
    %39 = vector.multi_reduction <add>, %38, %cst_17 [1, 2] : vector<1x128x128xf32> to vector<1xf32>
    %40 = vector.shape_cast %39 : vector<1xf32> to vector<1x1x1xf32>
    %41 = vector.extract %40[0, 0, 0] : f32 from vector<1x1x1xf32>
    %42 = arith.extui %32 : vector<128x128xi1> to vector<128x128xi32>
    %43 = arith.sitofp %42 : vector<128x128xi32> to vector<128x128xf32>
    %cst_18 = arith.constant dense<0x7F800000> : vector<128xf32>
    %44 = vector.multi_reduction <minimumf>, %25, %cst_18 [0] : vector<128x128xf32> to vector<128xf32>
    %45 = vector.shape_cast %44 : vector<128xf32> to vector<1x128xf32>
    %46 = vector.broadcast %45 : vector<1x128xf32> to vector<128x128xf32>
    %47 = arith.subf %25, %46 : vector<128x128xf32>
    %48 = arith.mulf %47, %43 : vector<128x128xf32>
    %cst_19 = arith.constant dense<0xFF800000> : vector<128xf32>
    %49 = vector.multi_reduction <maximumf>, %48, %cst_19 [0] : vector<128x128xf32> to vector<128xf32>
    %50 = vector.shape_cast %49 : vector<128xf32> to vector<1x128xf32>
    %51 = arith.addf %50, %45 : vector<1x128xf32>
    %cst_20 = arith.constant -1.000000e+00 : f32
    %52 = vector.broadcast %cst_20 : f32 to vector<128x128xf32>
    %53 = arith.select %32, %25, %52 : vector<128x128xi1>, vector<128x128xf32>
    %c0_21 = arith.constant 0 : index
    %c0_22 = arith.constant 0 : index
    %54 = vector.load %arg9[%c0_21, %c0_22] : memref<128x128xf32, #tpu.memory_space<vmem>>, vector<128x128xf32>
    tpu.vector_store %arg9[%c0_21, %c0_22], %53 {strides = array<i32>} : memref<128x128xf32, #tpu.memory_space<vmem>>, vector<128x128xf32>,
    %cst_23 = arith.constant 0xFF800000 : f32
    %55 = vector.broadcast %cst_23 : f32 to vector<128x128xf32>
    %56 = arith.select %35, %25, %55 : vector<128x128xi1>, vector<128x128xf32>
    %c0_24 = arith.constant 0 : index
    %c0_25 = arith.constant 0 : index
    %57 = vector.load %arg8[%c0_24, %c0_25] : memref<128x128xf32, #tpu.memory_space<vmem>>, vector<128x128xf32>
    tpu.vector_store %arg8[%c0_24, %c0_25], %56 {strides = array<i32>} : memref<128x128xf32, #tpu.memory_space<vmem>>, vector<128x128xf32>,
    %cst_26 = arith.constant 0.000000e+00 : f32
    %58 = vector.broadcast %cst_26 : f32 to vector<64x128xf32>
    %cst_27 = arith.constant 0x7F800000 : f32
    %c0_i32 = arith.constant 0 : i32
    %c2_i32 = arith.constant 2 : i32
    %59 = arith.addi %c0_i32, %c2_i32 : i32
    %c1_i32 = arith.constant 1 : i32
    %60 = scf.for %arg10 = %c0_i32 to %59 step %c1_i32 iter_args(%arg11 = %58) -> (vector<64x128xf32>)  : i32 {
      %c64_i32 = arith.constant 64 : i32
      %83 = arith.muli %arg10, %c64_i32 : i32
      %84 = tpu.assume_multiple %83, 64 : i32
      %85 = arith.index_cast %84 : i32 to index
      %c0_37 = arith.constant 0 : index
      %86 = vector.load %arg8[%85, %c0_37] : memref<128x128xf32, #tpu.memory_space<vmem>>, vector<64x128xf32>
      %87 = vector.broadcast %cst_27 : f32 to vector<64x128xf32>
      %c0_i32_38 = arith.constant 0 : i32
      %c8_i32_39 = arith.constant 8 : i32
      %88 = arith.muli %c0_i32_38, %c8_i32_39 : i32
      %89 = tpu.assume_multiple %88, 8 : i32
      %90 = arith.index_cast %89 : i32 to index
      %c0_40 = arith.constant 0 : index
      %91 = vector.load %arg9[%90, %c0_40] : memref<128x128xf32, #tpu.memory_space<vmem>>, vector<8x128xf32>
      %92 = vector.extract_strided_slice %91 {offsets = [0, 0], sizes = [1, 128], strides = [1, 1]} : vector<8x128xf32> to vector<1x128xf32>
      %93 = vector.broadcast %92 : vector<1x128xf32> to vector<64x128xf32>
      %94 = arith.cmpf ogt, %93, %86 : vector<64x128xf32>
      %95 = vector.shape_cast %92 : vector<1x128xf32> to vector<1x128xf32>
      %96 = vector.broadcast %95 : vector<1x128xf32> to vector<64x128xf32>
      %97 = vector.broadcast %cst_27 : f32 to vector<64x128xf32>
      %98 = arith.select %94, %96, %97 : vector<64x128xi1>, vector<64x128xf32>
      %99 = arith.minimumf %87, %98 : vector<64x128xf32>
      %100 = vector.extract_strided_slice %91 {offsets = [1, 0], sizes = [1, 128], strides = [1, 1]} : vector<8x128xf32> to vector<1x128xf32>
      %101 = vector.broadcast %100 : vector<1x128xf32> to vector<64x128xf32>
      %102 = arith.cmpf ogt, %101, %86 : vector<64x128xf32>
      %103 = vector.shape_cast %100 : vector<1x128xf32> to vector<1x128xf32>
      %104 = vector.broadcast %103 : vector<1x128xf32> to vector<64x128xf32>
      %105 = vector.broadcast %cst_27 : f32 to vector<64x128xf32>
      %106 = arith.select %102, %104, %105 : vector<64x128xi1>, vector<64x128xf32>
      %107 = arith.minimumf %99, %106 : vector<64x128xf32>
      %108 = vector.extract_strided_slice %91 {offsets = [2, 0], sizes = [1, 128], strides = [1, 1]} : vector<8x128xf32> to vector<1x128xf32>
      %109 = vector.broadcast %108 : vector<1x128xf32> to vector<64x128xf32>
      %110 = arith.cmpf ogt, %109, %86 : vector<64x128xf32>
      %111 = vector.shape_cast %108 : vector<1x128xf32> to vector<1x128xf32>
      %112 = vector.broadcast %111 : vector<1x128xf32> to vector<64x128xf32>
      %113 = vector.broadcast %cst_27 : f32 to vector<64x128xf32>
      %114 = arith.select %110, %112, %113 : vector<64x128xi1>, vector<64x128xf32>
      %115 = arith.minimumf %107, %114 : vector<64x128xf32>
      %116 = vector.extract_strided_slice %91 {offsets = [3, 0], sizes = [1, 128], strides = [1, 1]} : vector<8x128xf32> to vector<1x128xf32>
      %117 = vector.broadcast %116 : vector<1x128xf32> to vector<64x128xf32>
      %118 = arith.cmpf ogt, %117, %86 : vector<64x128xf32>
      %119 = vector.shape_cast %116 : vector<1x128xf32> to vector<1x128xf32>
      %120 = vector.broadcast %119 : vector<1x128xf32> to vector<64x128xf32>
      %121 = vector.broadcast %cst_27 : f32 to vector<64x128xf32>
      %122 = arith.select %118, %120, %121 : vector<64x128xi1>, vector<64x128xf32>
      %123 = arith.minimumf %115, %122 : vector<64x128xf32>
      %124 = vector.extract_strided_slice %91 {offsets = [4, 0], sizes = [1, 128], strides = [1, 1]} : vector<8x128xf32> to vector<1x128xf32>
      %125 = vector.broadcast %124 : vector<1x128xf32> to vector<64x128xf32>
      %126 = arith.cmpf ogt, %125, %86 : vector<64x128xf32>
      %127 = vector.shape_cast %124 : vector<1x128xf32> to vector<1x128xf32>
      %128 = vector.broadcast %127 : vector<1x128xf32> to vector<64x128xf32>
      %129 = vector.broadcast %cst_27 : f32 to vector<64x128xf32>
      %130 = arith.select %126, %128, %129 : vector<64x128xi1>, vector<64x128xf32>
      %131 = arith.minimumf %123, %130 : vector<64x128xf32>
      %132 = vector.extract_strided_slice %91 {offsets = [5, 0], sizes = [1, 128], strides = [1, 1]} : vector<8x128xf32> to vector<1x128xf32>
      %133 = vector.broadcast %132 : vector<1x128xf32> to vector<64x128xf32>
      %134 = arith.cmpf ogt, %133, %86 : vector<64x128xf32>
      %135 = vector.shape_cast %132 : vector<1x128xf32> to vector<1x128xf32>
      %136 = vector.broadcast %135 : vector<1x128xf32> to vector<64x128xf32>
      %137 = vector.broadcast %cst_27 : f32 to vector<64x128xf32>
      %138 = arith.select %134, %136, %137 : vector<64x128xi1>, vector<64x128xf32>
      %139 = arith.minimumf %131, %138 : vector<64x128xf32>
      %140 = vector.extract_strided_slice %91 {offsets = [6, 0], sizes = [1, 128], strides = [1, 1]} : vector<8x128xf32> to vector<1x128xf32>
      %141 = vector.broadcast %140 : vector<1x128xf32> to vector<64x128xf32>
      %142 = arith.cmpf ogt, %141, %86 : vector<64x128xf32>
      %143 = vector.shape_cast %140 : vector<1x128xf32> to vector<1x128xf32>
      %144 = vector.broadcast %143 : vector<1x128xf32> to vector<64x128xf32>
      %145 = vector.broadcast %cst_27 : f32 to vector<64x128xf32>
      %146 = arith.select %142, %144, %145 : vector<64x128xi1>, vector<64x128xf32>
      %147 = arith.minimumf %139, %146 : vector<64x128xf32>
      %148 = vector.extract_strided_slice %91 {offsets = [7, 0], sizes = [1, 128], strides = [1, 1]} : vector<8x128xf32> to vector<1x128xf32>
      %149 = vector.broadcast %148 : vector<1x128xf32> to vector<64x128xf32>
      %150 = arith.cmpf ogt, %149, %86 : vector<64x128xf32>
      %151 = vector.shape_cast %148 : vector<1x128xf32> to vector<1x128xf32>
      %152 = vector.broadcast %151 : vector<1x128xf32> to vector<64x128xf32>
      %153 = vector.broadcast %cst_27 : f32 to vector<64x128xf32>
      %154 = arith.select %150, %152, %153 : vector<64x128xi1>, vector<64x128xf32>
      %155 = arith.minimumf %147, %154 : vector<64x128xf32>
      %c1_i32_41 = arith.constant 1 : i32
      %c8_i32_42 = arith.constant 8 : i32
      %156 = arith.muli %c1_i32_41, %c8_i32_42 : i32
      %157 = tpu.assume_multiple %156, 8 : i32
      %158 = arith.index_cast %157 : i32 to index
      %c0_43 = arith.constant 0 : index
      %159 = vector.load %arg9[%158, %c0_43] : memref<128x128xf32, #tpu.memory_space<vmem>>, vector<8x128xf32>
      %160 = vector.extract_strided_slice %159 {offsets = [0, 0], sizes = [1, 128], strides = [1, 1]} : vector<8x128xf32> to vector<1x128xf32>
      %161 = vector.broadcast %160 : vector<1x128xf32> to vector<64x128xf32>
      %162 = arith.cmpf ogt, %161, %86 : vector<64x128xf32>
      %163 = vector.shape_cast %160 : vector<1x128xf32> to vector<1x128xf32>
      %164 = vector.broadcast %163 : vector<1x128xf32> to vector<64x128xf32>
      %165 = vector.broadcast %cst_27 : f32 to vector<64x128xf32>
      %166 = arith.select %162, %164, %165 : vector<64x128xi1>, vector<64x128xf32>
      %167 = arith.minimumf %155, %166 : vector<64x128xf32>
      %168 = vector.extract_strided_slice %159 {offsets = [1, 0], sizes = [1, 128], strides = [1, 1]} : vector<8x128xf32> to vector<1x128xf32>
      %169 = vector.broadcast %168 : vector<1x128xf32> to vector<64x128xf32>
      %170 = arith.cmpf ogt, %169, %86 : vector<64x128xf32>
      %171 = vector.shape_cast %168 : vector<1x128xf32> to vector<1x128xf32>
      %172 = vector.broadcast %171 : vector<1x128xf32> to vector<64x128xf32>
      %173 = vector.broadcast %cst_27 : f32 to vector<64x128xf32>
      %174 = arith.select %170, %172, %173 : vector<64x128xi1>, vector<64x128xf32>
      %175 = arith.minimumf %167, %174 : vector<64x128xf32>
      %176 = vector.extract_strided_slice %159 {offsets = [2, 0], sizes = [1, 128], strides = [1, 1]} : vector<8x128xf32> to vector<1x128xf32>
      %177 = vector.broadcast %176 : vector<1x128xf32> to vector<64x128xf32>
      %178 = arith.cmpf ogt, %177, %86 : vector<64x128xf32>
      %179 = vector.shape_cast %176 : vector<1x128xf32> to vector<1x128xf32>
      %180 = vector.broadcast %179 : vector<1x128xf32> to vector<64x128xf32>
      %181 = vector.broadcast %cst_27 : f32 to vector<64x128xf32>
      %182 = arith.select %178, %180, %181 : vector<64x128xi1>, vector<64x128xf32>
      %183 = arith.minimumf %175, %182 : vector<64x128xf32>
      %184 = vector.extract_strided_slice %159 {offsets = [3, 0], sizes = [1, 128], strides = [1, 1]} : vector<8x128xf32> to vector<1x128xf32>
      %185 = vector.broadcast %184 : vector<1x128xf32> to vector<64x128xf32>
      %186 = arith.cmpf ogt, %185, %86 : vector<64x128xf32>
      %187 = vector.shape_cast %184 : vector<1x128xf32> to vector<1x128xf32>
      %188 = vector.broadcast %187 : vector<1x128xf32> to vector<64x128xf32>
      %189 = vector.broadcast %cst_27 : f32 to vector<64x128xf32>
      %190 = arith.select %186, %188, %189 : vector<64x128xi1>, vector<64x128xf32>
      %191 = arith.minimumf %183, %190 : vector<64x128xf32>
      %192 = vector.extract_strided_slice %159 {offsets = [4, 0], sizes = [1, 128], strides = [1, 1]} : vector<8x128xf32> to vector<1x128xf32>
      %193 = vector.broadcast %192 : vector<1x128xf32> to vector<64x128xf32>
      %194 = arith.cmpf ogt, %193, %86 : vector<64x128xf32>
      %195 = vector.shape_cast %192 : vector<1x128xf32> to vector<1x128xf32>
      %196 = vector.broadcast %195 : vector<1x128xf32> to vector<64x128xf32>
      %197 = vector.broadcast %cst_27 : f32 to vector<64x128xf32>
      %198 = arith.select %194, %196, %197 : vector<64x128xi1>, vector<64x128xf32>
      %199 = arith.minimumf %191, %198 : vector<64x128xf32>
      %200 = vector.extract_strided_slice %159 {offsets = [5, 0], sizes = [1, 128], strides = [1, 1]} : vector<8x128xf32> to vector<1x128xf32>
      %201 = vector.broadcast %200 : vector<1x128xf32> to vector<64x128xf32>
      %202 = arith.cmpf ogt, %201, %86 : vector<64x128xf32>
      %203 = vector.shape_cast %200 : vector<1x128xf32> to vector<1x128xf32>
      %204 = vector.broadcast %203 : vector<1x128xf32> to vector<64x128xf32>
      %205 = vector.broadcast %cst_27 : f32 to vector<64x128xf32>
      %206 = arith.select %202, %204, %205 : vector<64x128xi1>, vector<64x128xf32>
      %207 = arith.minimumf %199, %206 : vector<64x128xf32>
      %208 = vector.extract_strided_slice %159 {offsets = [6, 0], sizes = [1, 128], strides = [1, 1]} : vector<8x128xf32> to vector<1x128xf32>
      %209 = vector.broadcast %208 : vector<1x128xf32> to vector<64x128xf32>
      %210 = arith.cmpf ogt, %209, %86 : vector<64x128xf32>
      %211 = vector.shape_cast %208 : vector<1x128xf32> to vector<1x128xf32>
      %212 = vector.broadcast %211 : vector<1x128xf32> to vector<64x128xf32>
      %213 = vector.broadcast %cst_27 : f32 to vector<64x128xf32>
      %214 = arith.select %210, %212, %213 : vector<64x128xi1>, vector<64x128xf32>
      %215 = arith.minimumf %207, %214 : vector<64x128xf32>
      %216 = vector.extract_strided_slice %159 {offsets = [7, 0], sizes = [1, 128], strides = [1, 1]} : vector<8x128xf32> to vector<1x128xf32>
      %217 = vector.broadcast %216 : vector<1x128xf32> to vector<64x128xf32>
      %218 = arith.cmpf ogt, %217, %86 : vector<64x128xf32>
      %219 = vector.shape_cast %216 : vector<1x128xf32> to vector<1x128xf32>
      %220 = vector.broadcast %219 : vector<1x128xf32> to vector<64x128xf32>
      %221 = vector.broadcast %cst_27 : f32 to vector<64x128xf32>
      %222 = arith.select %218, %220, %221 : vector<64x128xi1>, vector<64x128xf32>
      %223 = arith.minimumf %215, %222 : vector<64x128xf32>
      %c2_i32_44 = arith.constant 2 : i32
      %c8_i32_45 = arith.constant 8 : i32
      %224 = arith.muli %c2_i32_44, %c8_i32_45 : i32
      %225 = tpu.assume_multiple %224, 8 : i32
      %226 = arith.index_cast %225 : i32 to index
      %c0_46 = arith.constant 0 : index
      %227 = vector.load %arg9[%226, %c0_46] : memref<128x128xf32, #tpu.memory_space<vmem>>, vector<8x128xf32>
      %228 = vector.extract_strided_slice %227 {offsets = [0, 0], sizes = [1, 128], strides = [1, 1]} : vector<8x128xf32> to vector<1x128xf32>
      %229 = vector.broadcast %228 : vector<1x128xf32> to vector<64x128xf32>
      %230 = arith.cmpf ogt, %229, %86 : vector<64x128xf32>
      %231 = vector.shape_cast %228 : vector<1x128xf32> to vector<1x128xf32>
      %232 = vector.broadcast %231 : vector<1x128xf32> to vector<64x128xf32>
      %233 = vector.broadcast %cst_27 : f32 to vector<64x128xf32>
      %234 = arith.select %230, %232, %233 : vector<64x128xi1>, vector<64x128xf32>
      %235 = arith.minimumf %223, %234 : vector<64x128xf32>
      %236 = vector.extract_strided_slice %227 {offsets = [1, 0], sizes = [1, 128], strides = [1, 1]} : vector<8x128xf32> to vector<1x128xf32>
      %237 = vector.broadcast %236 : vector<1x128xf32> to vector<64x128xf32>
      %238 = arith.cmpf ogt, %237, %86 : vector<64x128xf32>
      %239 = vector.shape_cast %236 : vector<1x128xf32> to vector<1x128xf32>
      %240 = vector.broadcast %239 : vector<1x128xf32> to vector<64x128xf32>
      %241 = vector.broadcast %cst_27 : f32 to vector<64x128xf32>
      %242 = arith.select %238, %240, %241 : vector<64x128xi1>, vector<64x128xf32>
      %243 = arith.minimumf %235, %242 : vector<64x128xf32>
      %244 = vector.extract_strided_slice %227 {offsets = [2, 0], sizes = [1, 128], strides = [1, 1]} : vector<8x128xf32> to vector<1x128xf32>
      %245 = vector.broadcast %244 : vector<1x128xf32> to vector<64x128xf32>
      %246 = arith.cmpf ogt, %245, %86 : vector<64x128xf32>
      %247 = vector.shape_cast %244 : vector<1x128xf32> to vector<1x128xf32>
      %248 = vector.broadcast %247 : vector<1x128xf32> to vector<64x128xf32>
      %249 = vector.broadcast %cst_27 : f32 to vector<64x128xf32>
      %250 = arith.select %246, %248, %249 : vector<64x128xi1>, vector<64x128xf32>
      %251 = arith.minimumf %243, %250 : vector<64x128xf32>
      %252 = vector.extract_strided_slice %227 {offsets = [3, 0], sizes = [1, 128], strides = [1, 1]} : vector<8x128xf32> to vector<1x128xf32>
      %253 = vector.broadcast %252 : vector<1x128xf32> to vector<64x128xf32>
      %254 = arith.cmpf ogt, %253, %86 : vector<64x128xf32>
      %255 = vector.shape_cast %252 : vector<1x128xf32> to vector<1x128xf32>
      %256 = vector.broadcast %255 : vector<1x128xf32> to vector<64x128xf32>
      %257 = vector.broadcast %cst_27 : f32 to vector<64x128xf32>
      %258 = arith.select %254, %256, %257 : vector<64x128xi1>, vector<64x128xf32>
      %259 = arith.minimumf %251, %258 : vector<64x128xf32>
      %260 = vector.extract_strided_slice %227 {offsets = [4, 0], sizes = [1, 128], strides = [1, 1]} : vector<8x128xf32> to vector<1x128xf32>
      %261 = vector.broadcast %260 : vector<1x128xf32> to vector<64x128xf32>
      %262 = arith.cmpf ogt, %261, %86 : vector<64x128xf32>
      %263 = vector.shape_cast %260 : vector<1x128xf32> to vector<1x128xf32>
      %264 = vector.broadcast %263 : vector<1x128xf32> to vector<64x128xf32>
      %265 = vector.broadcast %cst_27 : f32 to vector<64x128xf32>
      %266 = arith.select %262, %264, %265 : vector<64x128xi1>, vector<64x128xf32>
      %267 = arith.minimumf %259, %266 : vector<64x128xf32>
      %268 = vector.extract_strided_slice %227 {offsets = [5, 0], sizes = [1, 128], strides = [1, 1]} : vector<8x128xf32> to vector<1x128xf32>
      %269 = vector.broadcast %268 : vector<1x128xf32> to vector<64x128xf32>
      %270 = arith.cmpf ogt, %269, %86 : vector<64x128xf32>
      %271 = vector.shape_cast %268 : vector<1x128xf32> to vector<1x128xf32>
      %272 = vector.broadcast %271 : vector<1x128xf32> to vector<64x128xf32>
      %273 = vector.broadcast %cst_27 : f32 to vector<64x128xf32>
      %274 = arith.select %270, %272, %273 : vector<64x128xi1>, vector<64x128xf32>
      %275 = arith.minimumf %267, %274 : vector<64x128xf32>
      %276 = vector.extract_strided_slice %227 {offsets = [6, 0], sizes = [1, 128], strides = [1, 1]} : vector<8x128xf32> to vector<1x128xf32>
      %277 = vector.broadcast %276 : vector<1x128xf32> to vector<64x128xf32>
      %278 = arith.cmpf ogt, %277, %86 : vector<64x128xf32>
      %279 = vector.shape_cast %276 : vector<1x128xf32> to vector<1x128xf32>
      %280 = vector.broadcast %279 : vector<1x128xf32> to vector<64x128xf32>
      %281 = vector.broadcast %cst_27 : f32 to vector<64x128xf32>
      %282 = arith.select %278, %280, %281 : vector<64x128xi1>, vector<64x128xf32>
      %283 = arith.minimumf %275, %282 : vector<64x128xf32>
      %284 = vector.extract_strided_slice %227 {offsets = [7, 0], sizes = [1, 128], strides = [1, 1]} : vector<8x128xf32> to vector<1x128xf32>
      %285 = vector.broadcast %284 : vector<1x128xf32> to vector<64x128xf32>
      %286 = arith.cmpf ogt, %285, %86 : vector<64x128xf32>
      %287 = vector.shape_cast %284 : vector<1x128xf32> to vector<1x128xf32>
      %288 = vector.broadcast %287 : vector<1x128xf32> to vector<64x128xf32>
      %289 = vector.broadcast %cst_27 : f32 to vector<64x128xf32>
      %290 = arith.select %286, %288, %289 : vector<64x128xi1>, vector<64x128xf32>
      %291 = arith.minimumf %283, %290 : vector<64x128xf32>
      %c3_i32 = arith.constant 3 : i32
      %c8_i32_47 = arith.constant 8 : i32
      %292 = arith.muli %c3_i32, %c8_i32_47 : i32
      %293 = tpu.assume_multiple %292, 8 : i32
      %294 = arith.index_cast %293 : i32 to index
      %c0_48 = arith.constant 0 : index
      %295 = vector.load %arg9[%294, %c0_48] : memref<128x128xf32, #tpu.memory_space<vmem>>, vector<8x128xf32>
      %296 = vector.extract_strided_slice %295 {offsets = [0, 0], sizes = [1, 128], strides = [1, 1]} : vector<8x128xf32> to vector<1x128xf32>
      %297 = vector.broadcast %296 : vector<1x128xf32> to vector<64x128xf32>
      %298 = arith.cmpf ogt, %297, %86 : vector<64x128xf32>
      %299 = vector.shape_cast %296 : vector<1x128xf32> to vector<1x128xf32>
      %300 = vector.broadcast %299 : vector<1x128xf32> to vector<64x128xf32>
      %301 = vector.broadcast %cst_27 : f32 to vector<64x128xf32>
      %302 = arith.select %298, %300, %301 : vector<64x128xi1>, vector<64x128xf32>
      %303 = arith.minimumf %291, %302 : vector<64x128xf32>
      %304 = vector.extract_strided_slice %295 {offsets = [1, 0], sizes = [1, 128], strides = [1, 1]} : vector<8x128xf32> to vector<1x128xf32>
      %305 = vector.broadcast %304 : vector<1x128xf32> to vector<64x128xf32>
      %306 = arith.cmpf ogt, %305, %86 : vector<64x128xf32>
      %307 = vector.shape_cast %304 : vector<1x128xf32> to vector<1x128xf32>
      %308 = vector.broadcast %307 : vector<1x128xf32> to vector<64x128xf32>
      %309 = vector.broadcast %cst_27 : f32 to vector<64x128xf32>
      %310 = arith.select %306, %308, %309 : vector<64x128xi1>, vector<64x128xf32>
      %311 = arith.minimumf %303, %310 : vector<64x128xf32>
      %312 = vector.extract_strided_slice %295 {offsets = [2, 0], sizes = [1, 128], strides = [1, 1]} : vector<8x128xf32> to vector<1x128xf32>
      %313 = vector.broadcast %312 : vector<1x128xf32> to vector<64x128xf32>
      %314 = arith.cmpf ogt, %313, %86 : vector<64x128xf32>
      %315 = vector.shape_cast %312 : vector<1x128xf32> to vector<1x128xf32>
      %316 = vector.broadcast %315 : vector<1x128xf32> to vector<64x128xf32>
      %317 = vector.broadcast %cst_27 : f32 to vector<64x128xf32>
      %318 = arith.select %314, %316, %317 : vector<64x128xi1>, vector<64x128xf32>
      %319 = arith.minimumf %311, %318 : vector<64x128xf32>
      %320 = vector.extract_strided_slice %295 {offsets = [3, 0], sizes = [1, 128], strides = [1, 1]} : vector<8x128xf32> to vector<1x128xf32>
      %321 = vector.broadcast %320 : vector<1x128xf32> to vector<64x128xf32>
      %322 = arith.cmpf ogt, %321, %86 : vector<64x128xf32>
      %323 = vector.shape_cast %320 : vector<1x128xf32> to vector<1x128xf32>
      %324 = vector.broadcast %323 : vector<1x128xf32> to vector<64x128xf32>
      %325 = vector.broadcast %cst_27 : f32 to vector<64x128xf32>
      %326 = arith.select %322, %324, %325 : vector<64x128xi1>, vector<64x128xf32>
      %327 = arith.minimumf %319, %326 : vector<64x128xf32>
      %328 = vector.extract_strided_slice %295 {offsets = [4, 0], sizes = [1, 128], strides = [1, 1]} : vector<8x128xf32> to vector<1x128xf32>
      %329 = vector.broadcast %328 : vector<1x128xf32> to vector<64x128xf32>
      %330 = arith.cmpf ogt, %329, %86 : vector<64x128xf32>
      %331 = vector.shape_cast %328 : vector<1x128xf32> to vector<1x128xf32>
      %332 = vector.broadcast %331 : vector<1x128xf32> to vector<64x128xf32>
      %333 = vector.broadcast %cst_27 : f32 to vector<64x128xf32>
      %334 = arith.select %330, %332, %333 : vector<64x128xi1>, vector<64x128xf32>
      %335 = arith.minimumf %327, %334 : vector<64x128xf32>
      %336 = vector.extract_strided_slice %295 {offsets = [5, 0], sizes = [1, 128], strides = [1, 1]} : vector<8x128xf32> to vector<1x128xf32>
      %337 = vector.broadcast %336 : vector<1x128xf32> to vector<64x128xf32>
      %338 = arith.cmpf ogt, %337, %86 : vector<64x128xf32>
      %339 = vector.shape_cast %336 : vector<1x128xf32> to vector<1x128xf32>
      %340 = vector.broadcast %339 : vector<1x128xf32> to vector<64x128xf32>
      %341 = vector.broadcast %cst_27 : f32 to vector<64x128xf32>
      %342 = arith.select %338, %340, %341 : vector<64x128xi1>, vector<64x128xf32>
      %343 = arith.minimumf %335, %342 : vector<64x128xf32>
      %344 = vector.extract_strided_slice %295 {offsets = [6, 0], sizes = [1, 128], strides = [1, 1]} : vector<8x128xf32> to vector<1x128xf32>
      %345 = vector.broadcast %344 : vector<1x128xf32> to vector<64x128xf32>
      %346 = arith.cmpf ogt, %345, %86 : vector<64x128xf32>
      %347 = vector.shape_cast %344 : vector<1x128xf32> to vector<1x128xf32>
      %348 = vector.broadcast %347 : vector<1x128xf32> to vector<64x128xf32>
      %349 = vector.broadcast %cst_27 : f32 to vector<64x128xf32>
      %350 = arith.select %346, %348, %349 : vector<64x128xi1>, vector<64x128xf32>
      %351 = arith.minimumf %343, %350 : vector<64x128xf32>
      %352 = vector.extract_strided_slice %295 {offsets = [7, 0], sizes = [1, 128], strides = [1, 1]} : vector<8x128xf32> to vector<1x128xf32>
      %353 = vector.broadcast %352 : vector<1x128xf32> to vector<64x128xf32>
      %354 = arith.cmpf ogt, %353, %86 : vector<64x128xf32>
      %355 = vector.shape_cast %352 : vector<1x128xf32> to vector<1x128xf32>
      %356 = vector.broadcast %355 : vector<1x128xf32> to vector<64x128xf32>
      %357 = vector.broadcast %cst_27 : f32 to vector<64x128xf32>
      %358 = arith.select %354, %356, %357 : vector<64x128xi1>, vector<64x128xf32>
      %359 = arith.minimumf %351, %358 : vector<64x128xf32>
      %c4_i32 = arith.constant 4 : i32
      %c8_i32_49 = arith.constant 8 : i32
      %360 = arith.muli %c4_i32, %c8_i32_49 : i32
      %361 = tpu.assume_multiple %360, 8 : i32
      %362 = arith.index_cast %361 : i32 to index
      %c0_50 = arith.constant 0 : index
      %363 = vector.load %arg9[%362, %c0_50] : memref<128x128xf32, #tpu.memory_space<vmem>>, vector<8x128xf32>
      %364 = vector.extract_strided_slice %363 {offsets = [0, 0], sizes = [1, 128], strides = [1, 1]} : vector<8x128xf32> to vector<1x128xf32>
      %365 = vector.broadcast %364 : vector<1x128xf32> to vector<64x128xf32>
      %366 = arith.cmpf ogt, %365, %86 : vector<64x128xf32>
      %367 = vector.shape_cast %364 : vector<1x128xf32> to vector<1x128xf32>
      %368 = vector.broadcast %367 : vector<1x128xf32> to vector<64x128xf32>
      %369 = vector.broadcast %cst_27 : f32 to vector<64x128xf32>
      %370 = arith.select %366, %368, %369 : vector<64x128xi1>, vector<64x128xf32>
      %371 = arith.minimumf %359, %370 : vector<64x128xf32>
      %372 = vector.extract_strided_slice %363 {offsets = [1, 0], sizes = [1, 128], strides = [1, 1]} : vector<8x128xf32> to vector<1x128xf32>
      %373 = vector.broadcast %372 : vector<1x128xf32> to vector<64x128xf32>
      %374 = arith.cmpf ogt, %373, %86 : vector<64x128xf32>
      %375 = vector.shape_cast %372 : vector<1x128xf32> to vector<1x128xf32>
      %376 = vector.broadcast %375 : vector<1x128xf32> to vector<64x128xf32>
      %377 = vector.broadcast %cst_27 : f32 to vector<64x128xf32>
      %378 = arith.select %374, %376, %377 : vector<64x128xi1>, vector<64x128xf32>
      %379 = arith.minimumf %371, %378 : vector<64x128xf32>
      %380 = vector.extract_strided_slice %363 {offsets = [2, 0], sizes = [1, 128], strides = [1, 1]} : vector<8x128xf32> to vector<1x128xf32>
      %381 = vector.broadcast %380 : vector<1x128xf32> to vector<64x128xf32>
      %382 = arith.cmpf ogt, %381, %86 : vector<64x128xf32>
      %383 = vector.shape_cast %380 : vector<1x128xf32> to vector<1x128xf32>
      %384 = vector.broadcast %383 : vector<1x128xf32> to vector<64x128xf32>
      %385 = vector.broadcast %cst_27 : f32 to vector<64x128xf32>
      %386 = arith.select %382, %384, %385 : vector<64x128xi1>, vector<64x128xf32>
      %387 = arith.minimumf %379, %386 : vector<64x128xf32>
      %388 = vector.extract_strided_slice %363 {offsets = [3, 0], sizes = [1, 128], strides = [1, 1]} : vector<8x128xf32> to vector<1x128xf32>
      %389 = vector.broadcast %388 : vector<1x128xf32> to vector<64x128xf32>
      %390 = arith.cmpf ogt, %389, %86 : vector<64x128xf32>
      %391 = vector.shape_cast %388 : vector<1x128xf32> to vector<1x128xf32>
      %392 = vector.broadcast %391 : vector<1x128xf32> to vector<64x128xf32>
      %393 = vector.broadcast %cst_27 : f32 to vector<64x128xf32>
      %394 = arith.select %390, %392, %393 : vector<64x128xi1>, vector<64x128xf32>
      %395 = arith.minimumf %387, %394 : vector<64x128xf32>
      %396 = vector.extract_strided_slice %363 {offsets = [4, 0], sizes = [1, 128], strides = [1, 1]} : vector<8x128xf32> to vector<1x128xf32>
      %397 = vector.broadcast %396 : vector<1x128xf32> to vector<64x128xf32>
      %398 = arith.cmpf ogt, %397, %86 : vector<64x128xf32>
      %399 = vector.shape_cast %396 : vector<1x128xf32> to vector<1x128xf32>
      %400 = vector.broadcast %399 : vector<1x128xf32> to vector<64x128xf32>
      %401 = vector.broadcast %cst_27 : f32 to vector<64x128xf32>
      %402 = arith.select %398, %400, %401 : vector<64x128xi1>, vector<64x128xf32>
      %403 = arith.minimumf %395, %402 : vector<64x128xf32>
      %404 = vector.extract_strided_slice %363 {offsets = [5, 0], sizes = [1, 128], strides = [1, 1]} : vector<8x128xf32> to vector<1x128xf32>
      %405 = vector.broadcast %404 : vector<1x128xf32> to vector<64x128xf32>
      %406 = arith.cmpf ogt, %405, %86 : vector<64x128xf32>
      %407 = vector.shape_cast %404 : vector<1x128xf32> to vector<1x128xf32>
      %408 = vector.broadcast %407 : vector<1x128xf32> to vector<64x128xf32>
      %409 = vector.broadcast %cst_27 : f32 to vector<64x128xf32>
      %410 = arith.select %406, %408, %409 : vector<64x128xi1>, vector<64x128xf32>
      %411 = arith.minimumf %403, %410 : vector<64x128xf32>
      %412 = vector.extract_strided_slice %363 {offsets = [6, 0], sizes = [1, 128], strides = [1, 1]} : vector<8x128xf32> to vector<1x128xf32>
      %413 = vector.broadcast %412 : vector<1x128xf32> to vector<64x128xf32>
      %414 = arith.cmpf ogt, %413, %86 : vector<64x128xf32>
      %415 = vector.shape_cast %412 : vector<1x128xf32> to vector<1x128xf32>
      %416 = vector.broadcast %415 : vector<1x128xf32> to vector<64x128xf32>
      %417 = vector.broadcast %cst_27 : f32 to vector<64x128xf32>
      %418 = arith.select %414, %416, %417 : vector<64x128xi1>, vector<64x128xf32>
      %419 = arith.minimumf %411, %418 : vector<64x128xf32>
      %420 = vector.extract_strided_slice %363 {offsets = [7, 0], sizes = [1, 128], strides = [1, 1]} : vector<8x128xf32> to vector<1x128xf32>
      %421 = vector.broadcast %420 : vector<1x128xf32> to vector<64x128xf32>
      %422 = arith.cmpf ogt, %421, %86 : vector<64x128xf32>
      %423 = vector.shape_cast %420 : vector<1x128xf32> to vector<1x128xf32>
      %424 = vector.broadcast %423 : vector<1x128xf32> to vector<64x128xf32>
      %425 = vector.broadcast %cst_27 : f32 to vector<64x128xf32>
      %426 = arith.select %422, %424, %425 : vector<64x128xi1>, vector<64x128xf32>
      %427 = arith.minimumf %419, %426 : vector<64x128xf32>
      %c5_i32 = arith.constant 5 : i32
      %c8_i32_51 = arith.constant 8 : i32
      %428 = arith.muli %c5_i32, %c8_i32_51 : i32
      %429 = tpu.assume_multiple %428, 8 : i32
      %430 = arith.index_cast %429 : i32 to index
      %c0_52 = arith.constant 0 : index
      %431 = vector.load %arg9[%430, %c0_52] : memref<128x128xf32, #tpu.memory_space<vmem>>, vector<8x128xf32>
      %432 = vector.extract_strided_slice %431 {offsets = [0, 0], sizes = [1, 128], strides = [1, 1]} : vector<8x128xf32> to vector<1x128xf32>
      %433 = vector.broadcast %432 : vector<1x128xf32> to vector<64x128xf32>
      %434 = arith.cmpf ogt, %433, %86 : vector<64x128xf32>
      %435 = vector.shape_cast %432 : vector<1x128xf32> to vector<1x128xf32>
      %436 = vector.broadcast %435 : vector<1x128xf32> to vector<64x128xf32>
      %437 = vector.broadcast %cst_27 : f32 to vector<64x128xf32>
      %438 = arith.select %434, %436, %437 : vector<64x128xi1>, vector<64x128xf32>
      %439 = arith.minimumf %427, %438 : vector<64x128xf32>
      %440 = vector.extract_strided_slice %431 {offsets = [1, 0], sizes = [1, 128], strides = [1, 1]} : vector<8x128xf32> to vector<1x128xf32>
      %441 = vector.broadcast %440 : vector<1x128xf32> to vector<64x128xf32>
      %442 = arith.cmpf ogt, %441, %86 : vector<64x128xf32>
      %443 = vector.shape_cast %440 : vector<1x128xf32> to vector<1x128xf32>
      %444 = vector.broadcast %443 : vector<1x128xf32> to vector<64x128xf32>
      %445 = vector.broadcast %cst_27 : f32 to vector<64x128xf32>
      %446 = arith.select %442, %444, %445 : vector<64x128xi1>, vector<64x128xf32>
      %447 = arith.minimumf %439, %446 : vector<64x128xf32>
      %448 = vector.extract_strided_slice %431 {offsets = [2, 0], sizes = [1, 128], strides = [1, 1]} : vector<8x128xf32> to vector<1x128xf32>
      %449 = vector.broadcast %448 : vector<1x128xf32> to vector<64x128xf32>
      %450 = arith.cmpf ogt, %449, %86 : vector<64x128xf32>
      %451 = vector.shape_cast %448 : vector<1x128xf32> to vector<1x128xf32>
      %452 = vector.broadcast %451 : vector<1x128xf32> to vector<64x128xf32>
      %453 = vector.broadcast %cst_27 : f32 to vector<64x128xf32>
      %454 = arith.select %450, %452, %453 : vector<64x128xi1>, vector<64x128xf32>
      %455 = arith.minimumf %447, %454 : vector<64x128xf32>
      %456 = vector.extract_strided_slice %431 {offsets = [3, 0], sizes = [1, 128], strides = [1, 1]} : vector<8x128xf32> to vector<1x128xf32>
      %457 = vector.broadcast %456 : vector<1x128xf32> to vector<64x128xf32>
      %458 = arith.cmpf ogt, %457, %86 : vector<64x128xf32>
      %459 = vector.shape_cast %456 : vector<1x128xf32> to vector<1x128xf32>
      %460 = vector.broadcast %459 : vector<1x128xf32> to vector<64x128xf32>
      %461 = vector.broadcast %cst_27 : f32 to vector<64x128xf32>
      %462 = arith.select %458, %460, %461 : vector<64x128xi1>, vector<64x128xf32>
      %463 = arith.minimumf %455, %462 : vector<64x128xf32>
      %464 = vector.extract_strided_slice %431 {offsets = [4, 0], sizes = [1, 128], strides = [1, 1]} : vector<8x128xf32> to vector<1x128xf32>
      %465 = vector.broadcast %464 : vector<1x128xf32> to vector<64x128xf32>
      %466 = arith.cmpf ogt, %465, %86 : vector<64x128xf32>
      %467 = vector.shape_cast %464 : vector<1x128xf32> to vector<1x128xf32>
      %468 = vector.broadcast %467 : vector<1x128xf32> to vector<64x128xf32>
      %469 = vector.broadcast %cst_27 : f32 to vector<64x128xf32>
      %470 = arith.select %466, %468, %469 : vector<64x128xi1>, vector<64x128xf32>
      %471 = arith.minimumf %463, %470 : vector<64x128xf32>
      %472 = vector.extract_strided_slice %431 {offsets = [5, 0], sizes = [1, 128], strides = [1, 1]} : vector<8x128xf32> to vector<1x128xf32>
      %473 = vector.broadcast %472 : vector<1x128xf32> to vector<64x128xf32>
      %474 = arith.cmpf ogt, %473, %86 : vector<64x128xf32>
      %475 = vector.shape_cast %472 : vector<1x128xf32> to vector<1x128xf32>
      %476 = vector.broadcast %475 : vector<1x128xf32> to vector<64x128xf32>
      %477 = vector.broadcast %cst_27 : f32 to vector<64x128xf32>
      %478 = arith.select %474, %476, %477 : vector<64x128xi1>, vector<64x128xf32>
      %479 = arith.minimumf %471, %478 : vector<64x128xf32>
      %480 = vector.extract_strided_slice %431 {offsets = [6, 0], sizes = [1, 128], strides = [1, 1]} : vector<8x128xf32> to vector<1x128xf32>
      %481 = vector.broadcast %480 : vector<1x128xf32> to vector<64x128xf32>
      %482 = arith.cmpf ogt, %481, %86 : vector<64x128xf32>
      %483 = vector.shape_cast %480 : vector<1x128xf32> to vector<1x128xf32>
      %484 = vector.broadcast %483 : vector<1x128xf32> to vector<64x128xf32>
      %485 = vector.broadcast %cst_27 : f32 to vector<64x128xf32>
      %486 = arith.select %482, %484, %485 : vector<64x128xi1>, vector<64x128xf32>
      %487 = arith.minimumf %479, %486 : vector<64x128xf32>
      %488 = vector.extract_strided_slice %431 {offsets = [7, 0], sizes = [1, 128], strides = [1, 1]} : vector<8x128xf32> to vector<1x128xf32>
      %489 = vector.broadcast %488 : vector<1x128xf32> to vector<64x128xf32>
      %490 = arith.cmpf ogt, %489, %86 : vector<64x128xf32>
      %491 = vector.shape_cast %488 : vector<1x128xf32> to vector<1x128xf32>
      %492 = vector.broadcast %491 : vector<1x128xf32> to vector<64x128xf32>
      %493 = vector.broadcast %cst_27 : f32 to vector<64x128xf32>
      %494 = arith.select %490, %492, %493 : vector<64x128xi1>, vector<64x128xf32>
      %495 = arith.minimumf %487, %494 : vector<64x128xf32>
      %c6_i32 = arith.constant 6 : i32
      %c8_i32_53 = arith.constant 8 : i32
      %496 = arith.muli %c6_i32, %c8_i32_53 : i32
      %497 = tpu.assume_multiple %496, 8 : i32
      %498 = arith.index_cast %497 : i32 to index
      %c0_54 = arith.constant 0 : index
      %499 = vector.load %arg9[%498, %c0_54] : memref<128x128xf32, #tpu.memory_space<vmem>>, vector<8x128xf32>
      %500 = vector.extract_strided_slice %499 {offsets = [0, 0], sizes = [1, 128], strides = [1, 1]} : vector<8x128xf32> to vector<1x128xf32>
      %501 = vector.broadcast %500 : vector<1x128xf32> to vector<64x128xf32>
      %502 = arith.cmpf ogt, %501, %86 : vector<64x128xf32>
      %503 = vector.shape_cast %500 : vector<1x128xf32> to vector<1x128xf32>
      %504 = vector.broadcast %503 : vector<1x128xf32> to vector<64x128xf32>
      %505 = vector.broadcast %cst_27 : f32 to vector<64x128xf32>
      %506 = arith.select %502, %504, %505 : vector<64x128xi1>, vector<64x128xf32>
      %507 = arith.minimumf %495, %506 : vector<64x128xf32>
      %508 = vector.extract_strided_slice %499 {offsets = [1, 0], sizes = [1, 128], strides = [1, 1]} : vector<8x128xf32> to vector<1x128xf32>
      %509 = vector.broadcast %508 : vector<1x128xf32> to vector<64x128xf32>
      %510 = arith.cmpf ogt, %509, %86 : vector<64x128xf32>
      %511 = vector.shape_cast %508 : vector<1x128xf32> to vector<1x128xf32>
      %512 = vector.broadcast %511 : vector<1x128xf32> to vector<64x128xf32>
      %513 = vector.broadcast %cst_27 : f32 to vector<64x128xf32>
      %514 = arith.select %510, %512, %513 : vector<64x128xi1>, vector<64x128xf32>
      %515 = arith.minimumf %507, %514 : vector<64x128xf32>
      %516 = vector.extract_strided_slice %499 {offsets = [2, 0], sizes = [1, 128], strides = [1, 1]} : vector<8x128xf32> to vector<1x128xf32>
      %517 = vector.broadcast %516 : vector<1x128xf32> to vector<64x128xf32>
      %518 = arith.cmpf ogt, %517, %86 : vector<64x128xf32>
      %519 = vector.shape_cast %516 : vector<1x128xf32> to vector<1x128xf32>
      %520 = vector.broadcast %519 : vector<1x128xf32> to vector<64x128xf32>
      %521 = vector.broadcast %cst_27 : f32 to vector<64x128xf32>
      %522 = arith.select %518, %520, %521 : vector<64x128xi1>, vector<64x128xf32>
      %523 = arith.minimumf %515, %522 : vector<64x128xf32>
      %524 = vector.extract_strided_slice %499 {offsets = [3, 0], sizes = [1, 128], strides = [1, 1]} : vector<8x128xf32> to vector<1x128xf32>
      %525 = vector.broadcast %524 : vector<1x128xf32> to vector<64x128xf32>
      %526 = arith.cmpf ogt, %525, %86 : vector<64x128xf32>
      %527 = vector.shape_cast %524 : vector<1x128xf32> to vector<1x128xf32>
      %528 = vector.broadcast %527 : vector<1x128xf32> to vector<64x128xf32>
      %529 = vector.broadcast %cst_27 : f32 to vector<64x128xf32>
      %530 = arith.select %526, %528, %529 : vector<64x128xi1>, vector<64x128xf32>
      %531 = arith.minimumf %523, %530 : vector<64x128xf32>
      %532 = vector.extract_strided_slice %499 {offsets = [4, 0], sizes = [1, 128], strides = [1, 1]} : vector<8x128xf32> to vector<1x128xf32>
      %533 = vector.broadcast %532 : vector<1x128xf32> to vector<64x128xf32>
      %534 = arith.cmpf ogt, %533, %86 : vector<64x128xf32>
      %535 = vector.shape_cast %532 : vector<1x128xf32> to vector<1x128xf32>
      %536 = vector.broadcast %535 : vector<1x128xf32> to vector<64x128xf32>
      %537 = vector.broadcast %cst_27 : f32 to vector<64x128xf32>
      %538 = arith.select %534, %536, %537 : vector<64x128xi1>, vector<64x128xf32>
      %539 = arith.minimumf %531, %538 : vector<64x128xf32>
      %540 = vector.extract_strided_slice %499 {offsets = [5, 0], sizes = [1, 128], strides = [1, 1]} : vector<8x128xf32> to vector<1x128xf32>
      %541 = vector.broadcast %540 : vector<1x128xf32> to vector<64x128xf32>
      %542 = arith.cmpf ogt, %541, %86 : vector<64x128xf32>
      %543 = vector.shape_cast %540 : vector<1x128xf32> to vector<1x128xf32>
      %544 = vector.broadcast %543 : vector<1x128xf32> to vector<64x128xf32>
      %545 = vector.broadcast %cst_27 : f32 to vector<64x128xf32>
      %546 = arith.select %542, %544, %545 : vector<64x128xi1>, vector<64x128xf32>
      %547 = arith.minimumf %539, %546 : vector<64x128xf32>
      %548 = vector.extract_strided_slice %499 {offsets = [6, 0], sizes = [1, 128], strides = [1, 1]} : vector<8x128xf32> to vector<1x128xf32>
      %549 = vector.broadcast %548 : vector<1x128xf32> to vector<64x128xf32>
      %550 = arith.cmpf ogt, %549, %86 : vector<64x128xf32>
      %551 = vector.shape_cast %548 : vector<1x128xf32> to vector<1x128xf32>
      %552 = vector.broadcast %551 : vector<1x128xf32> to vector<64x128xf32>
      %553 = vector.broadcast %cst_27 : f32 to vector<64x128xf32>
      %554 = arith.select %550, %552, %553 : vector<64x128xi1>, vector<64x128xf32>
      %555 = arith.minimumf %547, %554 : vector<64x128xf32>
      %556 = vector.extract_strided_slice %499 {offsets = [7, 0], sizes = [1, 128], strides = [1, 1]} : vector<8x128xf32> to vector<1x128xf32>
      %557 = vector.broadcast %556 : vector<1x128xf32> to vector<64x128xf32>
      %558 = arith.cmpf ogt, %557, %86 : vector<64x128xf32>
      %559 = vector.shape_cast %556 : vector<1x128xf32> to vector<1x128xf32>
      %560 = vector.broadcast %559 : vector<1x128xf32> to vector<64x128xf32>
      %561 = vector.broadcast %cst_27 : f32 to vector<64x128xf32>
      %562 = arith.select %558, %560, %561 : vector<64x128xi1>, vector<64x128xf32>
      %563 = arith.minimumf %555, %562 : vector<64x128xf32>
      %c7_i32 = arith.constant 7 : i32
      %c8_i32_55 = arith.constant 8 : i32
      %564 = arith.muli %c7_i32, %c8_i32_55 : i32
      %565 = tpu.assume_multiple %564, 8 : i32
      %566 = arith.index_cast %565 : i32 to index
      %c0_56 = arith.constant 0 : index
      %567 = vector.load %arg9[%566, %c0_56] : memref<128x128xf32, #tpu.memory_space<vmem>>, vector<8x128xf32>
      %568 = vector.extract_strided_slice %567 {offsets = [0, 0], sizes = [1, 128], strides = [1, 1]} : vector<8x128xf32> to vector<1x128xf32>
      %569 = vector.broadcast %568 : vector<1x128xf32> to vector<64x128xf32>
      %570 = arith.cmpf ogt, %569, %86 : vector<64x128xf32>
      %571 = vector.shape_cast %568 : vector<1x128xf32> to vector<1x128xf32>
      %572 = vector.broadcast %571 : vector<1x128xf32> to vector<64x128xf32>
      %573 = vector.broadcast %cst_27 : f32 to vector<64x128xf32>
      %574 = arith.select %570, %572, %573 : vector<64x128xi1>, vector<64x128xf32>
      %575 = arith.minimumf %563, %574 : vector<64x128xf32>
      %576 = vector.extract_strided_slice %567 {offsets = [1, 0], sizes = [1, 128], strides = [1, 1]} : vector<8x128xf32> to vector<1x128xf32>
      %577 = vector.broadcast %576 : vector<1x128xf32> to vector<64x128xf32>
      %578 = arith.cmpf ogt, %577, %86 : vector<64x128xf32>
      %579 = vector.shape_cast %576 : vector<1x128xf32> to vector<1x128xf32>
      %580 = vector.broadcast %579 : vector<1x128xf32> to vector<64x128xf32>
      %581 = vector.broadcast %cst_27 : f32 to vector<64x128xf32>
      %582 = arith.select %578, %580, %581 : vector<64x128xi1>, vector<64x128xf32>
      %583 = arith.minimumf %575, %582 : vector<64x128xf32>
      %584 = vector.extract_strided_slice %567 {offsets = [2, 0], sizes = [1, 128], strides = [1, 1]} : vector<8x128xf32> to vector<1x128xf32>
      %585 = vector.broadcast %584 : vector<1x128xf32> to vector<64x128xf32>
      %586 = arith.cmpf ogt, %585, %86 : vector<64x128xf32>
      %587 = vector.shape_cast %584 : vector<1x128xf32> to vector<1x128xf32>
      %588 = vector.broadcast %587 : vector<1x128xf32> to vector<64x128xf32>
      %589 = vector.broadcast %cst_27 : f32 to vector<64x128xf32>
      %590 = arith.select %586, %588, %589 : vector<64x128xi1>, vector<64x128xf32>
      %591 = arith.minimumf %583, %590 : vector<64x128xf32>
      %592 = vector.extract_strided_slice %567 {offsets = [3, 0], sizes = [1, 128], strides = [1, 1]} : vector<8x128xf32> to vector<1x128xf32>
      %593 = vector.broadcast %592 : vector<1x128xf32> to vector<64x128xf32>
      %594 = arith.cmpf ogt, %593, %86 : vector<64x128xf32>
      %595 = vector.shape_cast %592 : vector<1x128xf32> to vector<1x128xf32>
      %596 = vector.broadcast %595 : vector<1x128xf32> to vector<64x128xf32>
      %597 = vector.broadcast %cst_27 : f32 to vector<64x128xf32>
      %598 = arith.select %594, %596, %597 : vector<64x128xi1>, vector<64x128xf32>
      %599 = arith.minimumf %591, %598 : vector<64x128xf32>
      %600 = vector.extract_strided_slice %567 {offsets = [4, 0], sizes = [1, 128], strides = [1, 1]} : vector<8x128xf32> to vector<1x128xf32>
      %601 = vector.broadcast %600 : vector<1x128xf32> to vector<64x128xf32>
      %602 = arith.cmpf ogt, %601, %86 : vector<64x128xf32>
      %603 = vector.shape_cast %600 : vector<1x128xf32> to vector<1x128xf32>
      %604 = vector.broadcast %603 : vector<1x128xf32> to vector<64x128xf32>
      %605 = vector.broadcast %cst_27 : f32 to vector<64x128xf32>
      %606 = arith.select %602, %604, %605 : vector<64x128xi1>, vector<64x128xf32>
      %607 = arith.minimumf %599, %606 : vector<64x128xf32>
      %608 = vector.extract_strided_slice %567 {offsets = [5, 0], sizes = [1, 128], strides = [1, 1]} : vector<8x128xf32> to vector<1x128xf32>
      %609 = vector.broadcast %608 : vector<1x128xf32> to vector<64x128xf32>
      %610 = arith.cmpf ogt, %609, %86 : vector<64x128xf32>
      %611 = vector.shape_cast %608 : vector<1x128xf32> to vector<1x128xf32>
      %612 = vector.broadcast %611 : vector<1x128xf32> to vector<64x128xf32>
      %613 = vector.broadcast %cst_27 : f32 to vector<64x128xf32>
      %614 = arith.select %610, %612, %613 : vector<64x128xi1>, vector<64x128xf32>
      %615 = arith.minimumf %607, %614 : vector<64x128xf32>
      %616 = vector.extract_strided_slice %567 {offsets = [6, 0], sizes = [1, 128], strides = [1, 1]} : vector<8x128xf32> to vector<1x128xf32>
      %617 = vector.broadcast %616 : vector<1x128xf32> to vector<64x128xf32>
      %618 = arith.cmpf ogt, %617, %86 : vector<64x128xf32>
      %619 = vector.shape_cast %616 : vector<1x128xf32> to vector<1x128xf32>
      %620 = vector.broadcast %619 : vector<1x128xf32> to vector<64x128xf32>
      %621 = vector.broadcast %cst_27 : f32 to vector<64x128xf32>
      %622 = arith.select %618, %620, %621 : vector<64x128xi1>, vector<64x128xf32>
      %623 = arith.minimumf %615, %622 : vector<64x128xf32>
      %624 = vector.extract_strided_slice %567 {offsets = [7, 0], sizes = [1, 128], strides = [1, 1]} : vector<8x128xf32> to vector<1x128xf32>
      %625 = vector.broadcast %624 : vector<1x128xf32> to vector<64x128xf32>
      %626 = arith.cmpf ogt, %625, %86 : vector<64x128xf32>
      %627 = vector.shape_cast %624 : vector<1x128xf32> to vector<1x128xf32>
      %628 = vector.broadcast %627 : vector<1x128xf32> to vector<64x128xf32>
      %629 = vector.broadcast %cst_27 : f32 to vector<64x128xf32>
      %630 = arith.select %626, %628, %629 : vector<64x128xi1>, vector<64x128xf32>
      %631 = arith.minimumf %623, %630 : vector<64x128xf32>
      %c8_i32_57 = arith.constant 8 : i32
      %c8_i32_58 = arith.constant 8 : i32
      %632 = arith.muli %c8_i32_57, %c8_i32_58 : i32
      %633 = tpu.assume_multiple %632, 8 : i32
      %634 = arith.index_cast %633 : i32 to index
      %c0_59 = arith.constant 0 : index
      %635 = vector.load %arg9[%634, %c0_59] : memref<128x128xf32, #tpu.memory_space<vmem>>, vector<8x128xf32>
      %636 = vector.extract_strided_slice %635 {offsets = [0, 0], sizes = [1, 128], strides = [1, 1]} : vector<8x128xf32> to vector<1x128xf32>
      %637 = vector.broadcast %636 : vector<1x128xf32> to vector<64x128xf32>
      %638 = arith.cmpf ogt, %637, %86 : vector<64x128xf32>
      %639 = vector.shape_cast %636 : vector<1x128xf32> to vector<1x128xf32>
      %640 = vector.broadcast %639 : vector<1x128xf32> to vector<64x128xf32>
      %641 = vector.broadcast %cst_27 : f32 to vector<64x128xf32>
      %642 = arith.select %638, %640, %641 : vector<64x128xi1>, vector<64x128xf32>
      %643 = arith.minimumf %631, %642 : vector<64x128xf32>
      %644 = vector.extract_strided_slice %635 {offsets = [1, 0], sizes = [1, 128], strides = [1, 1]} : vector<8x128xf32> to vector<1x128xf32>
      %645 = vector.broadcast %644 : vector<1x128xf32> to vector<64x128xf32>
      %646 = arith.cmpf ogt, %645, %86 : vector<64x128xf32>
      %647 = vector.shape_cast %644 : vector<1x128xf32> to vector<1x128xf32>
      %648 = vector.broadcast %647 : vector<1x128xf32> to vector<64x128xf32>
      %649 = vector.broadcast %cst_27 : f32 to vector<64x128xf32>
      %650 = arith.select %646, %648, %649 : vector<64x128xi1>, vector<64x128xf32>
      %651 = arith.minimumf %643, %650 : vector<64x128xf32>
      %652 = vector.extract_strided_slice %635 {offsets = [2, 0], sizes = [1, 128], strides = [1, 1]} : vector<8x128xf32> to vector<1x128xf32>
      %653 = vector.broadcast %652 : vector<1x128xf32> to vector<64x128xf32>
      %654 = arith.cmpf ogt, %653, %86 : vector<64x128xf32>
      %655 = vector.shape_cast %652 : vector<1x128xf32> to vector<1x128xf32>
      %656 = vector.broadcast %655 : vector<1x128xf32> to vector<64x128xf32>
      %657 = vector.broadcast %cst_27 : f32 to vector<64x128xf32>
      %658 = arith.select %654, %656, %657 : vector<64x128xi1>, vector<64x128xf32>
      %659 = arith.minimumf %651, %658 : vector<64x128xf32>
      %660 = vector.extract_strided_slice %635 {offsets = [3, 0], sizes = [1, 128], strides = [1, 1]} : vector<8x128xf32> to vector<1x128xf32>
      %661 = vector.broadcast %660 : vector<1x128xf32> to vector<64x128xf32>
      %662 = arith.cmpf ogt, %661, %86 : vector<64x128xf32>
      %663 = vector.shape_cast %660 : vector<1x128xf32> to vector<1x128xf32>
      %664 = vector.broadcast %663 : vector<1x128xf32> to vector<64x128xf32>
      %665 = vector.broadcast %cst_27 : f32 to vector<64x128xf32>
      %666 = arith.select %662, %664, %665 : vector<64x128xi1>, vector<64x128xf32>
      %667 = arith.minimumf %659, %666 : vector<64x128xf32>
      %668 = vector.extract_strided_slice %635 {offsets = [4, 0], sizes = [1, 128], strides = [1, 1]} : vector<8x128xf32> to vector<1x128xf32>
      %669 = vector.broadcast %668 : vector<1x128xf32> to vector<64x128xf32>
      %670 = arith.cmpf ogt, %669, %86 : vector<64x128xf32>
      %671 = vector.shape_cast %668 : vector<1x128xf32> to vector<1x128xf32>
      %672 = vector.broadcast %671 : vector<1x128xf32> to vector<64x128xf32>
      %673 = vector.broadcast %cst_27 : f32 to vector<64x128xf32>
      %674 = arith.select %670, %672, %673 : vector<64x128xi1>, vector<64x128xf32>
      %675 = arith.minimumf %667, %674 : vector<64x128xf32>
      %676 = vector.extract_strided_slice %635 {offsets = [5, 0], sizes = [1, 128], strides = [1, 1]} : vector<8x128xf32> to vector<1x128xf32>
      %677 = vector.broadcast %676 : vector<1x128xf32> to vector<64x128xf32>
      %678 = arith.cmpf ogt, %677, %86 : vector<64x128xf32>
      %679 = vector.shape_cast %676 : vector<1x128xf32> to vector<1x128xf32>
      %680 = vector.broadcast %679 : vector<1x128xf32> to vector<64x128xf32>
      %681 = vector.broadcast %cst_27 : f32 to vector<64x128xf32>
      %682 = arith.select %678, %680, %681 : vector<64x128xi1>, vector<64x128xf32>
      %683 = arith.minimumf %675, %682 : vector<64x128xf32>
      %684 = vector.extract_strided_slice %635 {offsets = [6, 0], sizes = [1, 128], strides = [1, 1]} : vector<8x128xf32> to vector<1x128xf32>
      %685 = vector.broadcast %684 : vector<1x128xf32> to vector<64x128xf32>
      %686 = arith.cmpf ogt, %685, %86 : vector<64x128xf32>
      %687 = vector.shape_cast %684 : vector<1x128xf32> to vector<1x128xf32>
      %688 = vector.broadcast %687 : vector<1x128xf32> to vector<64x128xf32>
      %689 = vector.broadcast %cst_27 : f32 to vector<64x128xf32>
      %690 = arith.select %686, %688, %689 : vector<64x128xi1>, vector<64x128xf32>
      %691 = arith.minimumf %683, %690 : vector<64x128xf32>
      %692 = vector.extract_strided_slice %635 {offsets = [7, 0], sizes = [1, 128], strides = [1, 1]} : vector<8x128xf32> to vector<1x128xf32>
      %693 = vector.broadcast %692 : vector<1x128xf32> to vector<64x128xf32>
      %694 = arith.cmpf ogt, %693, %86 : vector<64x128xf32>
      %695 = vector.shape_cast %692 : vector<1x128xf32> to vector<1x128xf32>
      %696 = vector.broadcast %695 : vector<1x128xf32> to vector<64x128xf32>
      %697 = vector.broadcast %cst_27 : f32 to vector<64x128xf32>
      %698 = arith.select %694, %696, %697 : vector<64x128xi1>, vector<64x128xf32>
      %699 = arith.minimumf %691, %698 : vector<64x128xf32>
      %c9_i32 = arith.constant 9 : i32
      %c8_i32_60 = arith.constant 8 : i32
      %700 = arith.muli %c9_i32, %c8_i32_60 : i32
      %701 = tpu.assume_multiple %700, 8 : i32
      %702 = arith.index_cast %701 : i32 to index
      %c0_61 = arith.constant 0 : index
      %703 = vector.load %arg9[%702, %c0_61] : memref<128x128xf32, #tpu.memory_space<vmem>>, vector<8x128xf32>
      %704 = vector.extract_strided_slice %703 {offsets = [0, 0], sizes = [1, 128], strides = [1, 1]} : vector<8x128xf32> to vector<1x128xf32>
      %705 = vector.broadcast %704 : vector<1x128xf32> to vector<64x128xf32>
      %706 = arith.cmpf ogt, %705, %86 : vector<64x128xf32>
      %707 = vector.shape_cast %704 : vector<1x128xf32> to vector<1x128xf32>
      %708 = vector.broadcast %707 : vector<1x128xf32> to vector<64x128xf32>
      %709 = vector.broadcast %cst_27 : f32 to vector<64x128xf32>
      %710 = arith.select %706, %708, %709 : vector<64x128xi1>, vector<64x128xf32>
      %711 = arith.minimumf %699, %710 : vector<64x128xf32>
      %712 = vector.extract_strided_slice %703 {offsets = [1, 0], sizes = [1, 128], strides = [1, 1]} : vector<8x128xf32> to vector<1x128xf32>
      %713 = vector.broadcast %712 : vector<1x128xf32> to vector<64x128xf32>
      %714 = arith.cmpf ogt, %713, %86 : vector<64x128xf32>
      %715 = vector.shape_cast %712 : vector<1x128xf32> to vector<1x128xf32>
      %716 = vector.broadcast %715 : vector<1x128xf32> to vector<64x128xf32>
      %717 = vector.broadcast %cst_27 : f32 to vector<64x128xf32>
      %718 = arith.select %714, %716, %717 : vector<64x128xi1>, vector<64x128xf32>
      %719 = arith.minimumf %711, %718 : vector<64x128xf32>
      %720 = vector.extract_strided_slice %703 {offsets = [2, 0], sizes = [1, 128], strides = [1, 1]} : vector<8x128xf32> to vector<1x128xf32>
      %721 = vector.broadcast %720 : vector<1x128xf32> to vector<64x128xf32>
      %722 = arith.cmpf ogt, %721, %86 : vector<64x128xf32>
      %723 = vector.shape_cast %720 : vector<1x128xf32> to vector<1x128xf32>
      %724 = vector.broadcast %723 : vector<1x128xf32> to vector<64x128xf32>
      %725 = vector.broadcast %cst_27 : f32 to vector<64x128xf32>
      %726 = arith.select %722, %724, %725 : vector<64x128xi1>, vector<64x128xf32>
      %727 = arith.minimumf %719, %726 : vector<64x128xf32>
      %728 = vector.extract_strided_slice %703 {offsets = [3, 0], sizes = [1, 128], strides = [1, 1]} : vector<8x128xf32> to vector<1x128xf32>
      %729 = vector.broadcast %728 : vector<1x128xf32> to vector<64x128xf32>
      %730 = arith.cmpf ogt, %729, %86 : vector<64x128xf32>
      %731 = vector.shape_cast %728 : vector<1x128xf32> to vector<1x128xf32>
      %732 = vector.broadcast %731 : vector<1x128xf32> to vector<64x128xf32>
      %733 = vector.broadcast %cst_27 : f32 to vector<64x128xf32>
      %734 = arith.select %730, %732, %733 : vector<64x128xi1>, vector<64x128xf32>
      %735 = arith.minimumf %727, %734 : vector<64x128xf32>
      %736 = vector.extract_strided_slice %703 {offsets = [4, 0], sizes = [1, 128], strides = [1, 1]} : vector<8x128xf32> to vector<1x128xf32>
      %737 = vector.broadcast %736 : vector<1x128xf32> to vector<64x128xf32>
      %738 = arith.cmpf ogt, %737, %86 : vector<64x128xf32>
      %739 = vector.shape_cast %736 : vector<1x128xf32> to vector<1x128xf32>
      %740 = vector.broadcast %739 : vector<1x128xf32> to vector<64x128xf32>
      %741 = vector.broadcast %cst_27 : f32 to vector<64x128xf32>
      %742 = arith.select %738, %740, %741 : vector<64x128xi1>, vector<64x128xf32>
      %743 = arith.minimumf %735, %742 : vector<64x128xf32>
      %744 = vector.extract_strided_slice %703 {offsets = [5, 0], sizes = [1, 128], strides = [1, 1]} : vector<8x128xf32> to vector<1x128xf32>
      %745 = vector.broadcast %744 : vector<1x128xf32> to vector<64x128xf32>
      %746 = arith.cmpf ogt, %745, %86 : vector<64x128xf32>
      %747 = vector.shape_cast %744 : vector<1x128xf32> to vector<1x128xf32>
      %748 = vector.broadcast %747 : vector<1x128xf32> to vector<64x128xf32>
      %749 = vector.broadcast %cst_27 : f32 to vector<64x128xf32>
      %750 = arith.select %746, %748, %749 : vector<64x128xi1>, vector<64x128xf32>
      %751 = arith.minimumf %743, %750 : vector<64x128xf32>
      %752 = vector.extract_strided_slice %703 {offsets = [6, 0], sizes = [1, 128], strides = [1, 1]} : vector<8x128xf32> to vector<1x128xf32>
      %753 = vector.broadcast %752 : vector<1x128xf32> to vector<64x128xf32>
      %754 = arith.cmpf ogt, %753, %86 : vector<64x128xf32>
      %755 = vector.shape_cast %752 : vector<1x128xf32> to vector<1x128xf32>
      %756 = vector.broadcast %755 : vector<1x128xf32> to vector<64x128xf32>
      %757 = vector.broadcast %cst_27 : f32 to vector<64x128xf32>
      %758 = arith.select %754, %756, %757 : vector<64x128xi1>, vector<64x128xf32>
      %759 = arith.minimumf %751, %758 : vector<64x128xf32>
      %760 = vector.extract_strided_slice %703 {offsets = [7, 0], sizes = [1, 128], strides = [1, 1]} : vector<8x128xf32> to vector<1x128xf32>
      %761 = vector.broadcast %760 : vector<1x128xf32> to vector<64x128xf32>
      %762 = arith.cmpf ogt, %761, %86 : vector<64x128xf32>
      %763 = vector.shape_cast %760 : vector<1x128xf32> to vector<1x128xf32>
      %764 = vector.broadcast %763 : vector<1x128xf32> to vector<64x128xf32>
      %765 = vector.broadcast %cst_27 : f32 to vector<64x128xf32>
      %766 = arith.select %762, %764, %765 : vector<64x128xi1>, vector<64x128xf32>
      %767 = arith.minimumf %759, %766 : vector<64x128xf32>
      %c10_i32 = arith.constant 10 : i32
      %c8_i32_62 = arith.constant 8 : i32
      %768 = arith.muli %c10_i32, %c8_i32_62 : i32
      %769 = tpu.assume_multiple %768, 8 : i32
      %770 = arith.index_cast %769 : i32 to index
      %c0_63 = arith.constant 0 : index
      %771 = vector.load %arg9[%770, %c0_63] : memref<128x128xf32, #tpu.memory_space<vmem>>, vector<8x128xf32>
      %772 = vector.extract_strided_slice %771 {offsets = [0, 0], sizes = [1, 128], strides = [1, 1]} : vector<8x128xf32> to vector<1x128xf32>
      %773 = vector.broadcast %772 : vector<1x128xf32> to vector<64x128xf32>
      %774 = arith.cmpf ogt, %773, %86 : vector<64x128xf32>
      %775 = vector.shape_cast %772 : vector<1x128xf32> to vector<1x128xf32>
      %776 = vector.broadcast %775 : vector<1x128xf32> to vector<64x128xf32>
      %777 = vector.broadcast %cst_27 : f32 to vector<64x128xf32>
      %778 = arith.select %774, %776, %777 : vector<64x128xi1>, vector<64x128xf32>
      %779 = arith.minimumf %767, %778 : vector<64x128xf32>
      %780 = vector.extract_strided_slice %771 {offsets = [1, 0], sizes = [1, 128], strides = [1, 1]} : vector<8x128xf32> to vector<1x128xf32>
      %781 = vector.broadcast %780 : vector<1x128xf32> to vector<64x128xf32>
      %782 = arith.cmpf ogt, %781, %86 : vector<64x128xf32>
      %783 = vector.shape_cast %780 : vector<1x128xf32> to vector<1x128xf32>
      %784 = vector.broadcast %783 : vector<1x128xf32> to vector<64x128xf32>
      %785 = vector.broadcast %cst_27 : f32 to vector<64x128xf32>
      %786 = arith.select %782, %784, %785 : vector<64x128xi1>, vector<64x128xf32>
      %787 = arith.minimumf %779, %786 : vector<64x128xf32>
      %788 = vector.extract_strided_slice %771 {offsets = [2, 0], sizes = [1, 128], strides = [1, 1]} : vector<8x128xf32> to vector<1x128xf32>
      %789 = vector.broadcast %788 : vector<1x128xf32> to vector<64x128xf32>
      %790 = arith.cmpf ogt, %789, %86 : vector<64x128xf32>
      %791 = vector.shape_cast %788 : vector<1x128xf32> to vector<1x128xf32>
      %792 = vector.broadcast %791 : vector<1x128xf32> to vector<64x128xf32>
      %793 = vector.broadcast %cst_27 : f32 to vector<64x128xf32>
      %794 = arith.select %790, %792, %793 : vector<64x128xi1>, vector<64x128xf32>
      %795 = arith.minimumf %787, %794 : vector<64x128xf32>
      %796 = vector.extract_strided_slice %771 {offsets = [3, 0], sizes = [1, 128], strides = [1, 1]} : vector<8x128xf32> to vector<1x128xf32>
      %797 = vector.broadcast %796 : vector<1x128xf32> to vector<64x128xf32>
      %798 = arith.cmpf ogt, %797, %86 : vector<64x128xf32>
      %799 = vector.shape_cast %796 : vector<1x128xf32> to vector<1x128xf32>
      %800 = vector.broadcast %799 : vector<1x128xf32> to vector<64x128xf32>
      %801 = vector.broadcast %cst_27 : f32 to vector<64x128xf32>
      %802 = arith.select %798, %800, %801 : vector<64x128xi1>, vector<64x128xf32>
      %803 = arith.minimumf %795, %802 : vector<64x128xf32>
      %804 = vector.extract_strided_slice %771 {offsets = [4, 0], sizes = [1, 128], strides = [1, 1]} : vector<8x128xf32> to vector<1x128xf32>
      %805 = vector.broadcast %804 : vector<1x128xf32> to vector<64x128xf32>
      %806 = arith.cmpf ogt, %805, %86 : vector<64x128xf32>
      %807 = vector.shape_cast %804 : vector<1x128xf32> to vector<1x128xf32>
      %808 = vector.broadcast %807 : vector<1x128xf32> to vector<64x128xf32>
      %809 = vector.broadcast %cst_27 : f32 to vector<64x128xf32>
      %810 = arith.select %806, %808, %809 : vector<64x128xi1>, vector<64x128xf32>
      %811 = arith.minimumf %803, %810 : vector<64x128xf32>
      %812 = vector.extract_strided_slice %771 {offsets = [5, 0], sizes = [1, 128], strides = [1, 1]} : vector<8x128xf32> to vector<1x128xf32>
      %813 = vector.broadcast %812 : vector<1x128xf32> to vector<64x128xf32>
      %814 = arith.cmpf ogt, %813, %86 : vector<64x128xf32>
      %815 = vector.shape_cast %812 : vector<1x128xf32> to vector<1x128xf32>
      %816 = vector.broadcast %815 : vector<1x128xf32> to vector<64x128xf32>
      %817 = vector.broadcast %cst_27 : f32 to vector<64x128xf32>
      %818 = arith.select %814, %816, %817 : vector<64x128xi1>, vector<64x128xf32>
      %819 = arith.minimumf %811, %818 : vector<64x128xf32>
      %820 = vector.extract_strided_slice %771 {offsets = [6, 0], sizes = [1, 128], strides = [1, 1]} : vector<8x128xf32> to vector<1x128xf32>
      %821 = vector.broadcast %820 : vector<1x128xf32> to vector<64x128xf32>
      %822 = arith.cmpf ogt, %821, %86 : vector<64x128xf32>
      %823 = vector.shape_cast %820 : vector<1x128xf32> to vector<1x128xf32>
      %824 = vector.broadcast %823 : vector<1x128xf32> to vector<64x128xf32>
      %825 = vector.broadcast %cst_27 : f32 to vector<64x128xf32>
      %826 = arith.select %822, %824, %825 : vector<64x128xi1>, vector<64x128xf32>
      %827 = arith.minimumf %819, %826 : vector<64x128xf32>
      %828 = vector.extract_strided_slice %771 {offsets = [7, 0], sizes = [1, 128], strides = [1, 1]} : vector<8x128xf32> to vector<1x128xf32>
      %829 = vector.broadcast %828 : vector<1x128xf32> to vector<64x128xf32>
      %830 = arith.cmpf ogt, %829, %86 : vector<64x128xf32>
      %831 = vector.shape_cast %828 : vector<1x128xf32> to vector<1x128xf32>
      %832 = vector.broadcast %831 : vector<1x128xf32> to vector<64x128xf32>
      %833 = vector.broadcast %cst_27 : f32 to vector<64x128xf32>
      %834 = arith.select %830, %832, %833 : vector<64x128xi1>, vector<64x128xf32>
      %835 = arith.minimumf %827, %834 : vector<64x128xf32>
      %c11_i32 = arith.constant 11 : i32
      %c8_i32_64 = arith.constant 8 : i32
      %836 = arith.muli %c11_i32, %c8_i32_64 : i32
      %837 = tpu.assume_multiple %836, 8 : i32
      %838 = arith.index_cast %837 : i32 to index
      %c0_65 = arith.constant 0 : index
      %839 = vector.load %arg9[%838, %c0_65] : memref<128x128xf32, #tpu.memory_space<vmem>>, vector<8x128xf32>
      %840 = vector.extract_strided_slice %839 {offsets = [0, 0], sizes = [1, 128], strides = [1, 1]} : vector<8x128xf32> to vector<1x128xf32>
      %841 = vector.broadcast %840 : vector<1x128xf32> to vector<64x128xf32>
      %842 = arith.cmpf ogt, %841, %86 : vector<64x128xf32>
      %843 = vector.shape_cast %840 : vector<1x128xf32> to vector<1x128xf32>
      %844 = vector.broadcast %843 : vector<1x128xf32> to vector<64x128xf32>
      %845 = vector.broadcast %cst_27 : f32 to vector<64x128xf32>
      %846 = arith.select %842, %844, %845 : vector<64x128xi1>, vector<64x128xf32>
      %847 = arith.minimumf %835, %846 : vector<64x128xf32>
      %848 = vector.extract_strided_slice %839 {offsets = [1, 0], sizes = [1, 128], strides = [1, 1]} : vector<8x128xf32> to vector<1x128xf32>
      %849 = vector.broadcast %848 : vector<1x128xf32> to vector<64x128xf32>
      %850 = arith.cmpf ogt, %849, %86 : vector<64x128xf32>
      %851 = vector.shape_cast %848 : vector<1x128xf32> to vector<1x128xf32>
      %852 = vector.broadcast %851 : vector<1x128xf32> to vector<64x128xf32>
      %853 = vector.broadcast %cst_27 : f32 to vector<64x128xf32>
      %854 = arith.select %850, %852, %853 : vector<64x128xi1>, vector<64x128xf32>
      %855 = arith.minimumf %847, %854 : vector<64x128xf32>
      %856 = vector.extract_strided_slice %839 {offsets = [2, 0], sizes = [1, 128], strides = [1, 1]} : vector<8x128xf32> to vector<1x128xf32>
      %857 = vector.broadcast %856 : vector<1x128xf32> to vector<64x128xf32>
      %858 = arith.cmpf ogt, %857, %86 : vector<64x128xf32>
      %859 = vector.shape_cast %856 : vector<1x128xf32> to vector<1x128xf32>
      %860 = vector.broadcast %859 : vector<1x128xf32> to vector<64x128xf32>
      %861 = vector.broadcast %cst_27 : f32 to vector<64x128xf32>
      %862 = arith.select %858, %860, %861 : vector<64x128xi1>, vector<64x128xf32>
      %863 = arith.minimumf %855, %862 : vector<64x128xf32>
      %864 = vector.extract_strided_slice %839 {offsets = [3, 0], sizes = [1, 128], strides = [1, 1]} : vector<8x128xf32> to vector<1x128xf32>
      %865 = vector.broadcast %864 : vector<1x128xf32> to vector<64x128xf32>
      %866 = arith.cmpf ogt, %865, %86 : vector<64x128xf32>
      %867 = vector.shape_cast %864 : vector<1x128xf32> to vector<1x128xf32>
      %868 = vector.broadcast %867 : vector<1x128xf32> to vector<64x128xf32>
      %869 = vector.broadcast %cst_27 : f32 to vector<64x128xf32>
      %870 = arith.select %866, %868, %869 : vector<64x128xi1>, vector<64x128xf32>
      %871 = arith.minimumf %863, %870 : vector<64x128xf32>
      %872 = vector.extract_strided_slice %839 {offsets = [4, 0], sizes = [1, 128], strides = [1, 1]} : vector<8x128xf32> to vector<1x128xf32>
      %873 = vector.broadcast %872 : vector<1x128xf32> to vector<64x128xf32>
      %874 = arith.cmpf ogt, %873, %86 : vector<64x128xf32>
      %875 = vector.shape_cast %872 : vector<1x128xf32> to vector<1x128xf32>
      %876 = vector.broadcast %875 : vector<1x128xf32> to vector<64x128xf32>
      %877 = vector.broadcast %cst_27 : f32 to vector<64x128xf32>
      %878 = arith.select %874, %876, %877 : vector<64x128xi1>, vector<64x128xf32>
      %879 = arith.minimumf %871, %878 : vector<64x128xf32>
      %880 = vector.extract_strided_slice %839 {offsets = [5, 0], sizes = [1, 128], strides = [1, 1]} : vector<8x128xf32> to vector<1x128xf32>
      %881 = vector.broadcast %880 : vector<1x128xf32> to vector<64x128xf32>
      %882 = arith.cmpf ogt, %881, %86 : vector<64x128xf32>
      %883 = vector.shape_cast %880 : vector<1x128xf32> to vector<1x128xf32>
      %884 = vector.broadcast %883 : vector<1x128xf32> to vector<64x128xf32>
      %885 = vector.broadcast %cst_27 : f32 to vector<64x128xf32>
      %886 = arith.select %882, %884, %885 : vector<64x128xi1>, vector<64x128xf32>
      %887 = arith.minimumf %879, %886 : vector<64x128xf32>
      %888 = vector.extract_strided_slice %839 {offsets = [6, 0], sizes = [1, 128], strides = [1, 1]} : vector<8x128xf32> to vector<1x128xf32>
      %889 = vector.broadcast %888 : vector<1x128xf32> to vector<64x128xf32>
      %890 = arith.cmpf ogt, %889, %86 : vector<64x128xf32>
      %891 = vector.shape_cast %888 : vector<1x128xf32> to vector<1x128xf32>
      %892 = vector.broadcast %891 : vector<1x128xf32> to vector<64x128xf32>
      %893 = vector.broadcast %cst_27 : f32 to vector<64x128xf32>
      %894 = arith.select %890, %892, %893 : vector<64x128xi1>, vector<64x128xf32>
      %895 = arith.minimumf %887, %894 : vector<64x128xf32>
      %896 = vector.extract_strided_slice %839 {offsets = [7, 0], sizes = [1, 128], strides = [1, 1]} : vector<8x128xf32> to vector<1x128xf32>
      %897 = vector.broadcast %896 : vector<1x128xf32> to vector<64x128xf32>
      %898 = arith.cmpf ogt, %897, %86 : vector<64x128xf32>
      %899 = vector.shape_cast %896 : vector<1x128xf32> to vector<1x128xf32>
      %900 = vector.broadcast %899 : vector<1x128xf32> to vector<64x128xf32>
      %901 = vector.broadcast %cst_27 : f32 to vector<64x128xf32>
      %902 = arith.select %898, %900, %901 : vector<64x128xi1>, vector<64x128xf32>
      %903 = arith.minimumf %895, %902 : vector<64x128xf32>
      %c12_i32 = arith.constant 12 : i32
      %c8_i32_66 = arith.constant 8 : i32
      %904 = arith.muli %c12_i32, %c8_i32_66 : i32
      %905 = tpu.assume_multiple %904, 8 : i32
      %906 = arith.index_cast %905 : i32 to index
      %c0_67 = arith.constant 0 : index
      %907 = vector.load %arg9[%906, %c0_67] : memref<128x128xf32, #tpu.memory_space<vmem>>, vector<8x128xf32>
      %908 = vector.extract_strided_slice %907 {offsets = [0, 0], sizes = [1, 128], strides = [1, 1]} : vector<8x128xf32> to vector<1x128xf32>
      %909 = vector.broadcast %908 : vector<1x128xf32> to vector<64x128xf32>
      %910 = arith.cmpf ogt, %909, %86 : vector<64x128xf32>
      %911 = vector.shape_cast %908 : vector<1x128xf32> to vector<1x128xf32>
      %912 = vector.broadcast %911 : vector<1x128xf32> to vector<64x128xf32>
      %913 = vector.broadcast %cst_27 : f32 to vector<64x128xf32>
      %914 = arith.select %910, %912, %913 : vector<64x128xi1>, vector<64x128xf32>
      %915 = arith.minimumf %903, %914 : vector<64x128xf32>
      %916 = vector.extract_strided_slice %907 {offsets = [1, 0], sizes = [1, 128], strides = [1, 1]} : vector<8x128xf32> to vector<1x128xf32>
      %917 = vector.broadcast %916 : vector<1x128xf32> to vector<64x128xf32>
      %918 = arith.cmpf ogt, %917, %86 : vector<64x128xf32>
      %919 = vector.shape_cast %916 : vector<1x128xf32> to vector<1x128xf32>
      %920 = vector.broadcast %919 : vector<1x128xf32> to vector<64x128xf32>
      %921 = vector.broadcast %cst_27 : f32 to vector<64x128xf32>
      %922 = arith.select %918, %920, %921 : vector<64x128xi1>, vector<64x128xf32>
      %923 = arith.minimumf %915, %922 : vector<64x128xf32>
      %924 = vector.extract_strided_slice %907 {offsets = [2, 0], sizes = [1, 128], strides = [1, 1]} : vector<8x128xf32> to vector<1x128xf32>
      %925 = vector.broadcast %924 : vector<1x128xf32> to vector<64x128xf32>
      %926 = arith.cmpf ogt, %925, %86 : vector<64x128xf32>
      %927 = vector.shape_cast %924 : vector<1x128xf32> to vector<1x128xf32>
      %928 = vector.broadcast %927 : vector<1x128xf32> to vector<64x128xf32>
      %929 = vector.broadcast %cst_27 : f32 to vector<64x128xf32>
      %930 = arith.select %926, %928, %929 : vector<64x128xi1>, vector<64x128xf32>
      %931 = arith.minimumf %923, %930 : vector<64x128xf32>
      %932 = vector.extract_strided_slice %907 {offsets = [3, 0], sizes = [1, 128], strides = [1, 1]} : vector<8x128xf32> to vector<1x128xf32>
      %933 = vector.broadcast %932 : vector<1x128xf32> to vector<64x128xf32>
      %934 = arith.cmpf ogt, %933, %86 : vector<64x128xf32>
      %935 = vector.shape_cast %932 : vector<1x128xf32> to vector<1x128xf32>
      %936 = vector.broadcast %935 : vector<1x128xf32> to vector<64x128xf32>
      %937 = vector.broadcast %cst_27 : f32 to vector<64x128xf32>
      %938 = arith.select %934, %936, %937 : vector<64x128xi1>, vector<64x128xf32>
      %939 = arith.minimumf %931, %938 : vector<64x128xf32>
      %940 = vector.extract_strided_slice %907 {offsets = [4, 0], sizes = [1, 128], strides = [1, 1]} : vector<8x128xf32> to vector<1x128xf32>
      %941 = vector.broadcast %940 : vector<1x128xf32> to vector<64x128xf32>
      %942 = arith.cmpf ogt, %941, %86 : vector<64x128xf32>
      %943 = vector.shape_cast %940 : vector<1x128xf32> to vector<1x128xf32>
      %944 = vector.broadcast %943 : vector<1x128xf32> to vector<64x128xf32>
      %945 = vector.broadcast %cst_27 : f32 to vector<64x128xf32>
      %946 = arith.select %942, %944, %945 : vector<64x128xi1>, vector<64x128xf32>
      %947 = arith.minimumf %939, %946 : vector<64x128xf32>
      %948 = vector.extract_strided_slice %907 {offsets = [5, 0], sizes = [1, 128], strides = [1, 1]} : vector<8x128xf32> to vector<1x128xf32>
      %949 = vector.broadcast %948 : vector<1x128xf32> to vector<64x128xf32>
      %950 = arith.cmpf ogt, %949, %86 : vector<64x128xf32>
      %951 = vector.shape_cast %948 : vector<1x128xf32> to vector<1x128xf32>
      %952 = vector.broadcast %951 : vector<1x128xf32> to vector<64x128xf32>
      %953 = vector.broadcast %cst_27 : f32 to vector<64x128xf32>
      %954 = arith.select %950, %952, %953 : vector<64x128xi1>, vector<64x128xf32>
      %955 = arith.minimumf %947, %954 : vector<64x128xf32>
      %956 = vector.extract_strided_slice %907 {offsets = [6, 0], sizes = [1, 128], strides = [1, 1]} : vector<8x128xf32> to vector<1x128xf32>
      %957 = vector.broadcast %956 : vector<1x128xf32> to vector<64x128xf32>
      %958 = arith.cmpf ogt, %957, %86 : vector<64x128xf32>
      %959 = vector.shape_cast %956 : vector<1x128xf32> to vector<1x128xf32>
      %960 = vector.broadcast %959 : vector<1x128xf32> to vector<64x128xf32>
      %961 = vector.broadcast %cst_27 : f32 to vector<64x128xf32>
      %962 = arith.select %958, %960, %961 : vector<64x128xi1>, vector<64x128xf32>
      %963 = arith.minimumf %955, %962 : vector<64x128xf32>
      %964 = vector.extract_strided_slice %907 {offsets = [7, 0], sizes = [1, 128], strides = [1, 1]} : vector<8x128xf32> to vector<1x128xf32>
      %965 = vector.broadcast %964 : vector<1x128xf32> to vector<64x128xf32>
      %966 = arith.cmpf ogt, %965, %86 : vector<64x128xf32>
      %967 = vector.shape_cast %964 : vector<1x128xf32> to vector<1x128xf32>
      %968 = vector.broadcast %967 : vector<1x128xf32> to vector<64x128xf32>
      %969 = vector.broadcast %cst_27 : f32 to vector<64x128xf32>
      %970 = arith.select %966, %968, %969 : vector<64x128xi1>, vector<64x128xf32>
      %971 = arith.minimumf %963, %970 : vector<64x128xf32>
      %c13_i32 = arith.constant 13 : i32
      %c8_i32_68 = arith.constant 8 : i32
      %972 = arith.muli %c13_i32, %c8_i32_68 : i32
      %973 = tpu.assume_multiple %972, 8 : i32
      %974 = arith.index_cast %973 : i32 to index
      %c0_69 = arith.constant 0 : index
      %975 = vector.load %arg9[%974, %c0_69] : memref<128x128xf32, #tpu.memory_space<vmem>>, vector<8x128xf32>
      %976 = vector.extract_strided_slice %975 {offsets = [0, 0], sizes = [1, 128], strides = [1, 1]} : vector<8x128xf32> to vector<1x128xf32>
      %977 = vector.broadcast %976 : vector<1x128xf32> to vector<64x128xf32>
      %978 = arith.cmpf ogt, %977, %86 : vector<64x128xf32>
      %979 = vector.shape_cast %976 : vector<1x128xf32> to vector<1x128xf32>
      %980 = vector.broadcast %979 : vector<1x128xf32> to vector<64x128xf32>
      %981 = vector.broadcast %cst_27 : f32 to vector<64x128xf32>
      %982 = arith.select %978, %980, %981 : vector<64x128xi1>, vector<64x128xf32>
      %983 = arith.minimumf %971, %982 : vector<64x128xf32>
      %984 = vector.extract_strided_slice %975 {offsets = [1, 0], sizes = [1, 128], strides = [1, 1]} : vector<8x128xf32> to vector<1x128xf32>
      %985 = vector.broadcast %984 : vector<1x128xf32> to vector<64x128xf32>
      %986 = arith.cmpf ogt, %985, %86 : vector<64x128xf32>
      %987 = vector.shape_cast %984 : vector<1x128xf32> to vector<1x128xf32>
      %988 = vector.broadcast %987 : vector<1x128xf32> to vector<64x128xf32>
      %989 = vector.broadcast %cst_27 : f32 to vector<64x128xf32>
      %990 = arith.select %986, %988, %989 : vector<64x128xi1>, vector<64x128xf32>
      %991 = arith.minimumf %983, %990 : vector<64x128xf32>
      %992 = vector.extract_strided_slice %975 {offsets = [2, 0], sizes = [1, 128], strides = [1, 1]} : vector<8x128xf32> to vector<1x128xf32>
      %993 = vector.broadcast %992 : vector<1x128xf32> to vector<64x128xf32>
      %994 = arith.cmpf ogt, %993, %86 : vector<64x128xf32>
      %995 = vector.shape_cast %992 : vector<1x128xf32> to vector<1x128xf32>
      %996 = vector.broadcast %995 : vector<1x128xf32> to vector<64x128xf32>
      %997 = vector.broadcast %cst_27 : f32 to vector<64x128xf32>
      %998 = arith.select %994, %996, %997 : vector<64x128xi1>, vector<64x128xf32>
      %999 = arith.minimumf %991, %998 : vector<64x128xf32>
      %1000 = vector.extract_strided_slice %975 {offsets = [3, 0], sizes = [1, 128], strides = [1, 1]} : vector<8x128xf32> to vector<1x128xf32>
      %1001 = vector.broadcast %1000 : vector<1x128xf32> to vector<64x128xf32>
      %1002 = arith.cmpf ogt, %1001, %86 : vector<64x128xf32>
      %1003 = vector.shape_cast %1000 : vector<1x128xf32> to vector<1x128xf32>
      %1004 = vector.broadcast %1003 : vector<1x128xf32> to vector<64x128xf32>
      %1005 = vector.broadcast %cst_27 : f32 to vector<64x128xf32>
      %1006 = arith.select %1002, %1004, %1005 : vector<64x128xi1>, vector<64x128xf32>
      %1007 = arith.minimumf %999, %1006 : vector<64x128xf32>
      %1008 = vector.extract_strided_slice %975 {offsets = [4, 0], sizes = [1, 128], strides = [1, 1]} : vector<8x128xf32> to vector<1x128xf32>
      %1009 = vector.broadcast %1008 : vector<1x128xf32> to vector<64x128xf32>
      %1010 = arith.cmpf ogt, %1009, %86 : vector<64x128xf32>
      %1011 = vector.shape_cast %1008 : vector<1x128xf32> to vector<1x128xf32>
      %1012 = vector.broadcast %1011 : vector<1x128xf32> to vector<64x128xf32>
      %1013 = vector.broadcast %cst_27 : f32 to vector<64x128xf32>
      %1014 = arith.select %1010, %1012, %1013 : vector<64x128xi1>, vector<64x128xf32>
      %1015 = arith.minimumf %1007, %1014 : vector<64x128xf32>
      %1016 = vector.extract_strided_slice %975 {offsets = [5, 0], sizes = [1, 128], strides = [1, 1]} : vector<8x128xf32> to vector<1x128xf32>
      %1017 = vector.broadcast %1016 : vector<1x128xf32> to vector<64x128xf32>
      %1018 = arith.cmpf ogt, %1017, %86 : vector<64x128xf32>
      %1019 = vector.shape_cast %1016 : vector<1x128xf32> to vector<1x128xf32>
      %1020 = vector.broadcast %1019 : vector<1x128xf32> to vector<64x128xf32>
      %1021 = vector.broadcast %cst_27 : f32 to vector<64x128xf32>
      %1022 = arith.select %1018, %1020, %1021 : vector<64x128xi1>, vector<64x128xf32>
      %1023 = arith.minimumf %1015, %1022 : vector<64x128xf32>
      %1024 = vector.extract_strided_slice %975 {offsets = [6, 0], sizes = [1, 128], strides = [1, 1]} : vector<8x128xf32> to vector<1x128xf32>
      %1025 = vector.broadcast %1024 : vector<1x128xf32> to vector<64x128xf32>
      %1026 = arith.cmpf ogt, %1025, %86 : vector<64x128xf32>
      %1027 = vector.shape_cast %1024 : vector<1x128xf32> to vector<1x128xf32>
      %1028 = vector.broadcast %1027 : vector<1x128xf32> to vector<64x128xf32>
      %1029 = vector.broadcast %cst_27 : f32 to vector<64x128xf32>
      %1030 = arith.select %1026, %1028, %1029 : vector<64x128xi1>, vector<64x128xf32>
      %1031 = arith.minimumf %1023, %1030 : vector<64x128xf32>
      %1032 = vector.extract_strided_slice %975 {offsets = [7, 0], sizes = [1, 128], strides = [1, 1]} : vector<8x128xf32> to vector<1x128xf32>
      %1033 = vector.broadcast %1032 : vector<1x128xf32> to vector<64x128xf32>
      %1034 = arith.cmpf ogt, %1033, %86 : vector<64x128xf32>
      %1035 = vector.shape_cast %1032 : vector<1x128xf32> to vector<1x128xf32>
      %1036 = vector.broadcast %1035 : vector<1x128xf32> to vector<64x128xf32>
      %1037 = vector.broadcast %cst_27 : f32 to vector<64x128xf32>
      %1038 = arith.select %1034, %1036, %1037 : vector<64x128xi1>, vector<64x128xf32>
      %1039 = arith.minimumf %1031, %1038 : vector<64x128xf32>
      %c14_i32 = arith.constant 14 : i32
      %c8_i32_70 = arith.constant 8 : i32
      %1040 = arith.muli %c14_i32, %c8_i32_70 : i32
      %1041 = tpu.assume_multiple %1040, 8 : i32
      %1042 = arith.index_cast %1041 : i32 to index
      %c0_71 = arith.constant 0 : index
      %1043 = vector.load %arg9[%1042, %c0_71] : memref<128x128xf32, #tpu.memory_space<vmem>>, vector<8x128xf32>
      %1044 = vector.extract_strided_slice %1043 {offsets = [0, 0], sizes = [1, 128], strides = [1, 1]} : vector<8x128xf32> to vector<1x128xf32>
      %1045 = vector.broadcast %1044 : vector<1x128xf32> to vector<64x128xf32>
      %1046 = arith.cmpf ogt, %1045, %86 : vector<64x128xf32>
      %1047 = vector.shape_cast %1044 : vector<1x128xf32> to vector<1x128xf32>
      %1048 = vector.broadcast %1047 : vector<1x128xf32> to vector<64x128xf32>
      %1049 = vector.broadcast %cst_27 : f32 to vector<64x128xf32>
      %1050 = arith.select %1046, %1048, %1049 : vector<64x128xi1>, vector<64x128xf32>
      %1051 = arith.minimumf %1039, %1050 : vector<64x128xf32>
      %1052 = vector.extract_strided_slice %1043 {offsets = [1, 0], sizes = [1, 128], strides = [1, 1]} : vector<8x128xf32> to vector<1x128xf32>
      %1053 = vector.broadcast %1052 : vector<1x128xf32> to vector<64x128xf32>
      %1054 = arith.cmpf ogt, %1053, %86 : vector<64x128xf32>
      %1055 = vector.shape_cast %1052 : vector<1x128xf32> to vector<1x128xf32>
      %1056 = vector.broadcast %1055 : vector<1x128xf32> to vector<64x128xf32>
      %1057 = vector.broadcast %cst_27 : f32 to vector<64x128xf32>
      %1058 = arith.select %1054, %1056, %1057 : vector<64x128xi1>, vector<64x128xf32>
      %1059 = arith.minimumf %1051, %1058 : vector<64x128xf32>
      %1060 = vector.extract_strided_slice %1043 {offsets = [2, 0], sizes = [1, 128], strides = [1, 1]} : vector<8x128xf32> to vector<1x128xf32>
      %1061 = vector.broadcast %1060 : vector<1x128xf32> to vector<64x128xf32>
      %1062 = arith.cmpf ogt, %1061, %86 : vector<64x128xf32>
      %1063 = vector.shape_cast %1060 : vector<1x128xf32> to vector<1x128xf32>
      %1064 = vector.broadcast %1063 : vector<1x128xf32> to vector<64x128xf32>
      %1065 = vector.broadcast %cst_27 : f32 to vector<64x128xf32>
      %1066 = arith.select %1062, %1064, %1065 : vector<64x128xi1>, vector<64x128xf32>
      %1067 = arith.minimumf %1059, %1066 : vector<64x128xf32>
      %1068 = vector.extract_strided_slice %1043 {offsets = [3, 0], sizes = [1, 128], strides = [1, 1]} : vector<8x128xf32> to vector<1x128xf32>
      %1069 = vector.broadcast %1068 : vector<1x128xf32> to vector<64x128xf32>
      %1070 = arith.cmpf ogt, %1069, %86 : vector<64x128xf32>
      %1071 = vector.shape_cast %1068 : vector<1x128xf32> to vector<1x128xf32>
      %1072 = vector.broadcast %1071 : vector<1x128xf32> to vector<64x128xf32>
      %1073 = vector.broadcast %cst_27 : f32 to vector<64x128xf32>
      %1074 = arith.select %1070, %1072, %1073 : vector<64x128xi1>, vector<64x128xf32>
      %1075 = arith.minimumf %1067, %1074 : vector<64x128xf32>
      %1076 = vector.extract_strided_slice %1043 {offsets = [4, 0], sizes = [1, 128], strides = [1, 1]} : vector<8x128xf32> to vector<1x128xf32>
      %1077 = vector.broadcast %1076 : vector<1x128xf32> to vector<64x128xf32>
      %1078 = arith.cmpf ogt, %1077, %86 : vector<64x128xf32>
      %1079 = vector.shape_cast %1076 : vector<1x128xf32> to vector<1x128xf32>
      %1080 = vector.broadcast %1079 : vector<1x128xf32> to vector<64x128xf32>
      %1081 = vector.broadcast %cst_27 : f32 to vector<64x128xf32>
      %1082 = arith.select %1078, %1080, %1081 : vector<64x128xi1>, vector<64x128xf32>
      %1083 = arith.minimumf %1075, %1082 : vector<64x128xf32>
      %1084 = vector.extract_strided_slice %1043 {offsets = [5, 0], sizes = [1, 128], strides = [1, 1]} : vector<8x128xf32> to vector<1x128xf32>
      %1085 = vector.broadcast %1084 : vector<1x128xf32> to vector<64x128xf32>
      %1086 = arith.cmpf ogt, %1085, %86 : vector<64x128xf32>
      %1087 = vector.shape_cast %1084 : vector<1x128xf32> to vector<1x128xf32>
      %1088 = vector.broadcast %1087 : vector<1x128xf32> to vector<64x128xf32>
      %1089 = vector.broadcast %cst_27 : f32 to vector<64x128xf32>
      %1090 = arith.select %1086, %1088, %1089 : vector<64x128xi1>, vector<64x128xf32>
      %1091 = arith.minimumf %1083, %1090 : vector<64x128xf32>
      %1092 = vector.extract_strided_slice %1043 {offsets = [6, 0], sizes = [1, 128], strides = [1, 1]} : vector<8x128xf32> to vector<1x128xf32>
      %1093 = vector.broadcast %1092 : vector<1x128xf32> to vector<64x128xf32>
      %1094 = arith.cmpf ogt, %1093, %86 : vector<64x128xf32>
      %1095 = vector.shape_cast %1092 : vector<1x128xf32> to vector<1x128xf32>
      %1096 = vector.broadcast %1095 : vector<1x128xf32> to vector<64x128xf32>
      %1097 = vector.broadcast %cst_27 : f32 to vector<64x128xf32>
      %1098 = arith.select %1094, %1096, %1097 : vector<64x128xi1>, vector<64x128xf32>
      %1099 = arith.minimumf %1091, %1098 : vector<64x128xf32>
      %1100 = vector.extract_strided_slice %1043 {offsets = [7, 0], sizes = [1, 128], strides = [1, 1]} : vector<8x128xf32> to vector<1x128xf32>
      %1101 = vector.broadcast %1100 : vector<1x128xf32> to vector<64x128xf32>
      %1102 = arith.cmpf ogt, %1101, %86 : vector<64x128xf32>
      %1103 = vector.shape_cast %1100 : vector<1x128xf32> to vector<1x128xf32>
      %1104 = vector.broadcast %1103 : vector<1x128xf32> to vector<64x128xf32>
      %1105 = vector.broadcast %cst_27 : f32 to vector<64x128xf32>
      %1106 = arith.select %1102, %1104, %1105 : vector<64x128xi1>, vector<64x128xf32>
      %1107 = arith.minimumf %1099, %1106 : vector<64x128xf32>
      %c15_i32 = arith.constant 15 : i32
      %c8_i32_72 = arith.constant 8 : i32
      %1108 = arith.muli %c15_i32, %c8_i32_72 : i32
      %1109 = tpu.assume_multiple %1108, 8 : i32
      %1110 = arith.index_cast %1109 : i32 to index
      %c0_73 = arith.constant 0 : index
      %1111 = vector.load %arg9[%1110, %c0_73] : memref<128x128xf32, #tpu.memory_space<vmem>>, vector<8x128xf32>
      %1112 = vector.extract_strided_slice %1111 {offsets = [0, 0], sizes = [1, 128], strides = [1, 1]} : vector<8x128xf32> to vector<1x128xf32>
      %1113 = vector.broadcast %1112 : vector<1x128xf32> to vector<64x128xf32>
      %1114 = arith.cmpf ogt, %1113, %86 : vector<64x128xf32>
      %1115 = vector.shape_cast %1112 : vector<1x128xf32> to vector<1x128xf32>
      %1116 = vector.broadcast %1115 : vector<1x128xf32> to vector<64x128xf32>
      %1117 = vector.broadcast %cst_27 : f32 to vector<64x128xf32>
      %1118 = arith.select %1114, %1116, %1117 : vector<64x128xi1>, vector<64x128xf32>
      %1119 = arith.minimumf %1107, %1118 : vector<64x128xf32>
      %1120 = vector.extract_strided_slice %1111 {offsets = [1, 0], sizes = [1, 128], strides = [1, 1]} : vector<8x128xf32> to vector<1x128xf32>
      %1121 = vector.broadcast %1120 : vector<1x128xf32> to vector<64x128xf32>
      %1122 = arith.cmpf ogt, %1121, %86 : vector<64x128xf32>
      %1123 = vector.shape_cast %1120 : vector<1x128xf32> to vector<1x128xf32>
      %1124 = vector.broadcast %1123 : vector<1x128xf32> to vector<64x128xf32>
      %1125 = vector.broadcast %cst_27 : f32 to vector<64x128xf32>
      %1126 = arith.select %1122, %1124, %1125 : vector<64x128xi1>, vector<64x128xf32>
      %1127 = arith.minimumf %1119, %1126 : vector<64x128xf32>
      %1128 = vector.extract_strided_slice %1111 {offsets = [2, 0], sizes = [1, 128], strides = [1, 1]} : vector<8x128xf32> to vector<1x128xf32>
      %1129 = vector.broadcast %1128 : vector<1x128xf32> to vector<64x128xf32>
      %1130 = arith.cmpf ogt, %1129, %86 : vector<64x128xf32>
      %1131 = vector.shape_cast %1128 : vector<1x128xf32> to vector<1x128xf32>
      %1132 = vector.broadcast %1131 : vector<1x128xf32> to vector<64x128xf32>
      %1133 = vector.broadcast %cst_27 : f32 to vector<64x128xf32>
      %1134 = arith.select %1130, %1132, %1133 : vector<64x128xi1>, vector<64x128xf32>
      %1135 = arith.minimumf %1127, %1134 : vector<64x128xf32>
      %1136 = vector.extract_strided_slice %1111 {offsets = [3, 0], sizes = [1, 128], strides = [1, 1]} : vector<8x128xf32> to vector<1x128xf32>
      %1137 = vector.broadcast %1136 : vector<1x128xf32> to vector<64x128xf32>
      %1138 = arith.cmpf ogt, %1137, %86 : vector<64x128xf32>
      %1139 = vector.shape_cast %1136 : vector<1x128xf32> to vector<1x128xf32>
      %1140 = vector.broadcast %1139 : vector<1x128xf32> to vector<64x128xf32>
      %1141 = vector.broadcast %cst_27 : f32 to vector<64x128xf32>
      %1142 = arith.select %1138, %1140, %1141 : vector<64x128xi1>, vector<64x128xf32>
      %1143 = arith.minimumf %1135, %1142 : vector<64x128xf32>
      %1144 = vector.extract_strided_slice %1111 {offsets = [4, 0], sizes = [1, 128], strides = [1, 1]} : vector<8x128xf32> to vector<1x128xf32>
      %1145 = vector.broadcast %1144 : vector<1x128xf32> to vector<64x128xf32>
      %1146 = arith.cmpf ogt, %1145, %86 : vector<64x128xf32>
      %1147 = vector.shape_cast %1144 : vector<1x128xf32> to vector<1x128xf32>
      %1148 = vector.broadcast %1147 : vector<1x128xf32> to vector<64x128xf32>
      %1149 = vector.broadcast %cst_27 : f32 to vector<64x128xf32>
      %1150 = arith.select %1146, %1148, %1149 : vector<64x128xi1>, vector<64x128xf32>
      %1151 = arith.minimumf %1143, %1150 : vector<64x128xf32>
      %1152 = vector.extract_strided_slice %1111 {offsets = [5, 0], sizes = [1, 128], strides = [1, 1]} : vector<8x128xf32> to vector<1x128xf32>
      %1153 = vector.broadcast %1152 : vector<1x128xf32> to vector<64x128xf32>
      %1154 = arith.cmpf ogt, %1153, %86 : vector<64x128xf32>
      %1155 = vector.shape_cast %1152 : vector<1x128xf32> to vector<1x128xf32>
      %1156 = vector.broadcast %1155 : vector<1x128xf32> to vector<64x128xf32>
      %1157 = vector.broadcast %cst_27 : f32 to vector<64x128xf32>
      %1158 = arith.select %1154, %1156, %1157 : vector<64x128xi1>, vector<64x128xf32>
      %1159 = arith.minimumf %1151, %1158 : vector<64x128xf32>
      %1160 = vector.extract_strided_slice %1111 {offsets = [6, 0], sizes = [1, 128], strides = [1, 1]} : vector<8x128xf32> to vector<1x128xf32>
      %1161 = vector.broadcast %1160 : vector<1x128xf32> to vector<64x128xf32>
      %1162 = arith.cmpf ogt, %1161, %86 : vector<64x128xf32>
      %1163 = vector.shape_cast %1160 : vector<1x128xf32> to vector<1x128xf32>
      %1164 = vector.broadcast %1163 : vector<1x128xf32> to vector<64x128xf32>
      %1165 = vector.broadcast %cst_27 : f32 to vector<64x128xf32>
      %1166 = arith.select %1162, %1164, %1165 : vector<64x128xi1>, vector<64x128xf32>
      %1167 = arith.minimumf %1159, %1166 : vector<64x128xf32>
      %1168 = vector.extract_strided_slice %1111 {offsets = [7, 0], sizes = [1, 128], strides = [1, 1]} : vector<8x128xf32> to vector<1x128xf32>
      %1169 = vector.broadcast %1168 : vector<1x128xf32> to vector<64x128xf32>
      %1170 = arith.cmpf ogt, %1169, %86 : vector<64x128xf32>
      %1171 = vector.shape_cast %1168 : vector<1x128xf32> to vector<1x128xf32>
      %1172 = vector.broadcast %1171 : vector<1x128xf32> to vector<64x128xf32>
      %1173 = vector.broadcast %cst_27 : f32 to vector<64x128xf32>
      %1174 = arith.select %1170, %1172, %1173 : vector<64x128xi1>, vector<64x128xf32>
      %1175 = arith.minimumf %1167, %1174 : vector<64x128xf32>
      %c16_i32 = arith.constant 16 : i32
      %1176 = vector.broadcast %cst_27 : f32 to vector<64x128xf32>
      %1177 = arith.cmpf olt, %1175, %1176 : vector<64x128xf32>
      %1178 = vector.shape_cast %51 : vector<1x128xf32> to vector<1x128xf32>
      %1179 = vector.broadcast %1178 : vector<1x128xf32> to vector<64x128xf32>
      %1180 = arith.select %1177, %1175, %1179 : vector<64x128xi1>, vector<64x128xf32>
      %cst_74 = arith.constant 1.000000e+00 : f32
      %1181 = vector.broadcast %cst_74 : f32 to vector<64x128xf32>
      %1182 = arith.addf %1181, %86 : vector<64x128xf32>
      %1183 = arith.subf %1182, %1180 : vector<64x128xf32>
      %cst_75 = arith.constant 0.000000e+00 : f32
      %1184 = vector.broadcast %cst_75 : f32 to vector<64x128xf32>
      %1185 = arith.maximumf %1183, %1184 : vector<64x128xf32>
      %1186 = arith.addf %arg11, %1185 : vector<64x128xf32>
      scf.yield %1186 : vector<64x128xf32>
    }
    %c2_i32_28 = arith.constant 2 : i32
    %61 = vector.shape_cast %60 : vector<64x128xf32> to vector<1x64x128xf32>
    %cst_29 = arith.constant dense<0.000000e+00> : vector<1xf32>
    %62 = vector.multi_reduction <add>, %61, %cst_29 [1, 2] : vector<1x64x128xf32> to vector<1xf32>
    %63 = vector.shape_cast %62 : vector<1xf32> to vector<1x1x1xf32>
    %64 = vector.extract %63[0, 0, 0] : f32 from vector<1x1x1xf32>
    %65 = tpu.iota {dimensions = array<i32: 0>} : vector<8x128xi32>
    %66 = tpu.iota {dimensions = array<i32: 1>} : vector<8x128xi32>
    %c0_i32_30 = arith.constant 0 : i32
    %67 = vector.broadcast %c0_i32_30 : i32 to vector<8x128xi32>
    %68 = arith.cmpi eq, %65, %67 : vector<8x128xi32>
    %c0_i32_31 = arith.constant 0 : i32
    %69 = vector.broadcast %c0_i32_31 : i32 to vector<8x128xi32>
    %70 = arith.cmpi eq, %66, %69 : vector<8x128xi32>
    %71 = arith.andi %68, %70 : vector<8x128xi1>
    %c0_i32_32 = arith.constant 0 : i32
    %72 = vector.broadcast %c0_i32_32 : i32 to vector<8x128xi32>
    %73 = arith.cmpi eq, %65, %72 : vector<8x128xi32>
    %c1_i32_33 = arith.constant 1 : i32
    %74 = vector.broadcast %c1_i32_33 : i32 to vector<8x128xi32>
    %75 = arith.cmpi eq, %66, %74 : vector<8x128xi32>
    %76 = arith.andi %73, %75 : vector<8x128xi1>
    %cst_34 = arith.constant 0.000000e+00 : f32
    %77 = vector.broadcast %41 : f32 to vector<8x128xf32>
    %78 = vector.broadcast %cst_34 : f32 to vector<8x128xf32>
    %79 = arith.select %76, %77, %78 : vector<8x128xi1>, vector<8x128xf32>
    %80 = vector.broadcast %64 : f32 to vector<8x128xf32>
    %81 = arith.select %71, %80, %79 : vector<8x128xi1>, vector<8x128xf32>
    %c0_35 = arith.constant 0 : index
    %c0_36 = arith.constant 0 : index
    %82 = vector.load %arg7[%c0_35, %c0_36] : memref<8x128xf32, #tpu.memory_space<vmem>>, vector<8x128xf32>
    tpu.vector_store %arg7[%c0_35, %c0_36], %81 {strides = array<i32>} : memref<8x128xf32, #tpu.memory_space<vmem>>, vector<8x128xf32>,
    return
  }
  func.func @transform_0(%arg0: i32) -> (i32, i32) {
    %c0_i32 = arith.constant 0 : i32
    %c0_i32_0 = arith.constant 0 : i32
    return %c0_i32, %arg0 : i32, i32
  }
  func.func @transform_1(%arg0: i32) -> (i32, i32) {
    %c0_i32 = arith.constant 0 : i32
    %c0_i32_0 = arith.constant 0 : i32
    %c0_i32_1 = arith.constant 0 : i32
    return %c0_i32, %c0_i32_0 : i32, i32
  }
  func.func @transform_2(%arg0: i32) -> (i32, i32) {
    %c0_i32 = arith.constant 0 : i32
    %c0_i32_0 = arith.constant 0 : i32
    %c0_i32_1 = arith.constant 0 : i32
    return %c0_i32, %c0_i32_0 : i32, i32
  }
  func.func @transform_3(%arg0: i32) -> (i32, i32) {
    %c0_i32 = arith.constant 0 : i32
    %c0_i32_0 = arith.constant 0 : i32
    return %c0_i32, %arg0 : i32, i32
  }
  func.func @transform_4(%arg0: i32) -> (i32, i32) {
    %c0_i32 = arith.constant 0 : i32
    %c0_i32_0 = arith.constant 0 : i32
    %c0_i32_1 = arith.constant 0 : i32
    return %c0_i32, %c0_i32_0 : i32, i32
  }
  func.func @transform_5(%arg0: i32) -> (i32, i32) {
    %c0_i32 = arith.constant 0 : i32
    %c0_i32_0 = arith.constant 0 : i32
    return %c0_i32, %arg0 : i32, i32
  }
  func.func @transform_6(%arg0: i32) -> (i32, i32) {
    %c0_i32 = arith.constant 0 : i32
    %c0_i32_0 = arith.constant 0 : i32
    return %arg0, %c0_i32 : i32, i32
  }
}

</mosaic_0001>

<bundles_post_ra>
// kernel: triplet_semihard_loss.1
= control target key start
LH: loop header
LB: loop body
LE: loop exit
PB: predicated region body
PF: predicated region fallthrough
CT: control target
= control target key end

     0   :  { %vm43_vm0 = vcmask 261120   ;;  %v4911_v0 = vmov 0   ;;  %v404_v39 = vlaneseq  ;;  %vm4912_vm3 = vmmov 1   ;;  %s5367_s18 = smov 0   ;;  %s8663_s4 = inlined_call_operand.vmem [shape: s32[128,1], index: 4, kind: input, shape index: {}]   ;;  %s8664_s0 = inlined_call_operand.vmem [shape: f32[32,128], index: 0, kind: input, shape index: {}]   ;;  %s8665_s6 = inlined_call_operand.vmem [shape: f32[8,128], index: 6, kind: output, shape index: {}]   ;;  %s8666_s1 = inlined_call_operand.vmem [shape: f32[128,32], index: 1, kind: input, shape index: {}]   ;;  %s8667_s2 = inlined_call_operand.vmem [shape: f32[128,1], index: 2, kind: input, shape index: {}]   ;;  %s8668_s5 = inlined_call_operand.vmem [shape: s32[1,128], index: 5, kind: input, shape index: {}]   ;;  %s8669_s3 = inlined_call_operand.vmem [shape: f32[1,128], index: 3, kind: input, shape index: {}]  }
   0x1   :  { %4789 = vset.pattern.permute.xlu0 %v4911_v0  ;;  %v491_v1 = vld [vmem:[%s8663_s4] sm:$0xff]  ;;  %v40_v3 = vld [vmem:[%s8664_s0 + $0x8] sm:$0xff]  ;;  %4790 = vset.pattern.permute.xlu1 %v4911_v0  ;;  %v41_v5 = vld [vmem:[%s8664_s0 + $0x10] sm:$0xff]  ;;  %v4913_v46 = vmov 0.0   ;;  %v4914_v62 = vmov -1.0   ;;  %v4915_v63 = vmov -inf  }
   0x2   :  { %v39_v2 = vld [vmem:[%s8664_s0] sm:$0xff]  ;;  %509 = vperm.xlu0 %4789, %v491_v1   ;;  %v42_v6 = vld [vmem:[%s8664_s0 + $0x18] sm:$0xff]  ;;  %v24_v11 = vld [vmem:[%s8666_s1 + $0x8] sm:$0xff]  ;;  %v5075_v40 = vshrl.u32 %v404_v39, 7  ;;  %v5077_v41 = vand.u32 127, %v404_v39  ;;  %836 = vst [vmem:[#allocation3 + $0x8] sm:$0xff] %v4914_v62 }
   0x3   :  { %v4696_v4 = vpack.c.bf16 %v40_v3, %v39_v2  ;;  %v23_v7 = vld [vmem:[%s8666_s1] sm:$0xff]  ;;  %v4700_v8 = vpack.c.bf16 %v42_v6, %v41_v5  ;;  %v32_v12 = vld [vmem:[%s8666_s1 + $0x48] sm:$0xff]  ;;  %v25_v13 = vld [vmem:[%s8666_s1 + $0x10] sm:$0xff]  ;;  %837 = vst [vmem:[#allocation3 + $0x10] sm:$0xff] %v4914_v62 }
   0x4   :  { %4672 = vmatprep.mubr.msk.f32.mxu0 %vm43_vm0, %v23_v7  ;;  %v31_v9 = vld [vmem:[%s8666_s1 + $0x40] sm:$0xff]  ;;  %v33_v14 = vld [vmem:[%s8666_s1 + $0x50] sm:$0xff]  ;;  %v238_v15 = vld [vmem:[%s8667_s2 + $0x8] sm:$0xff]  ;;  %vm426_vm1 = vcmp.eq.s32.totalorder %v5075_v40, %v5077_v41  ;;  %vm458_vm2 = vcmp.lt.s32.totalorder %v5077_v41, 8  ;;  %838 = vst [vmem:[#allocation3 + $0x18] sm:$0xff] %v4914_v62  ;;  %v5128_v1 = vadd.s32 8, %v5075_v40 }
   0x5   :  { %4697 = vmatprep.subr.bf16.mxu0 %v4696_v4  ;;  %4704 = vmatprep.subr.bf16.mxu1 %v4696_v4  ;;  %v237_v10 = vld [vmem:[%s8667_s2] sm:$0xff]  ;;  %v26_v16 = vld [vmem:[%s8666_s1 + $0x18] sm:$0xff]  ;;  %v239_v20 = vld [vmem:[%s8667_s2 + $0x10] sm:$0xff]  ;;  %839 = vst [vmem:[#allocation3 + $0x20] sm:$0xff] %v4914_v62  ;;  %v5137_v7 = vadd.s32 64, %v5075_v40 }
   0x6   :  { %4699 = vmatpush3.bf16.msra.mxu0 %v4696_v4  ;;  %4706 = vmatpush3.bf16.msra.mxu1 %v4696_v4  ;;  %v34_v17 = vld [vmem:[%s8666_s1 + $0x58] sm:$0xff]  ;;  %v27_v18 = vld [vmem:[%s8666_s1 + $0x20] sm:$0xff]  ;;  %v28_v21 = vld [vmem:[%s8666_s1 + $0x28] sm:$0xff]  ;;  %840 = vst [vmem:[#allocation3 + $0x28] sm:$0xff] %v4914_v62  ;;  %vm427_vm10 = vcmp.eq.s32.totalorder %v5128_v1, %v5077_v41 }
   0x7   :  { %4701 = vmatprep.subr.bf16.mxu0 %v4700_v8  ;;  %4705 = vmatprep.subr.bf16.mxu1 %v4700_v8  ;;  %v35_v19 = vld [vmem:[%s8666_s1 + $0x60] sm:$0xff]  ;;  %v36_v22 = vld [vmem:[%s8666_s1 + $0x68] sm:$0xff]  ;;  %v29_v23 = vld [vmem:[%s8666_s1 + $0x30] sm:$0xff]  ;;  %841 = vst [vmem:[#allocation3 + $0x30] sm:$0xff] %v4914_v62  ;;  %vm434_vm13 = vcmp.eq.s32.totalorder %v5137_v7, %v5077_v41 }
   0x8   :  { %4684 = vmatprep.mubr.msk.f32.mxu1 %vm43_vm0, %v31_v9  ;;  %256 = vperm.xlu1 %4790, %v237_v10   ;;  %v37_v24 = vld [vmem:[%s8666_s1 + $0x70] sm:$0xff]  ;;  %v240_v25 = vld [vmem:[%s8667_s2 + $0x18] sm:$0xff]  ;;  %v241_v28 = vld [vmem:[%s8667_s2 + $0x20] sm:$0xff]  ;;  %842 = vst [vmem:[#allocation3 + $0x38] sm:$0xff] %v4914_v62 }
   0x9   :  { %v30_v26 = vld [vmem:[%s8666_s1 + $0x38] sm:$0xff]  ;;  %v242_v29 = vld [vmem:[%s8667_s2 + $0x28] sm:$0xff]  ;;  %v243_v30 = vld [vmem:[%s8667_s2 + $0x30] sm:$0xff]  ;;  %843 = vst [vmem:[#allocation3 + $0x40] sm:$0xff] %v4914_v62 }
   0xa   :  { %4703 = vmatpush3.bf16.msra.mxu0 %v4700_v8  ;;  %4707 = vmatpush3.bf16.msra.mxu1 %v4700_v8  ;;  %v38_v27 = vld [vmem:[%s8666_s1 + $0x78] sm:$0xff]  ;;  %v245_v32 = vld [vmem:[%s8667_s2 + $0x40] sm:$0xff]  ;;  %v247_v33 = vld [vmem:[%s8667_s2 + $0x50] sm:$0xff]  ;;  %844 = vst [vmem:[#allocation3 + $0x48] sm:$0xff] %v4914_v62 }
   0xb   :  { %v244_v31 = vld [vmem:[%s8667_s2 + $0x38] sm:$0xff]  ;;  %v249_v35 = vld [vmem:[%s8667_s2 + $0x60] sm:$0xff]  ;;  %v250_v36 = vld [vmem:[%s8667_s2 + $0x68] sm:$0xff]  ;;  %845 = vst [vmem:[#allocation3 + $0x50] sm:$0xff] %v4914_v62 }
   0xc   :  { %261 = vperm.xlu1 %4790, %v238_v15   ;;  %v248_v34 = vld [vmem:[%s8667_s2 + $0x58] sm:$0xff]  ;;  %v251_v37 = vld [vmem:[%s8667_s2 + $0x70] sm:$0xff]  ;;  %v4640_v42 = vld [vmem:[%s8668_s5] ss:$0 sm:$0xff]  ;;  %846 = vst [vmem:[#allocation3 + $0x58] sm:$0xff] %v4914_v62  ;;  %v5151_v15 = vadd.s32 16, %v5075_v40 }
   0xd   :  { %4673 = vmatmul.mubr.msk.f32.vlgmr.msra.gmra.mrb[0].mxu0 %vm43_vm0, %v24_v11  ;;  %4685 = vmatmul.mubr.msk.f32.vlgmr.msra.gmra.mrb[0].mxu1 %vm43_vm0, %v32_v12  ;;  %v252_v38 = vld [vmem:[%s8667_s2 + $0x78] sm:$0xff]  ;;  %vm608_vm4 = vmxor %vm426_vm1, %vm4912_vm3  ;;  %v246_v50 = vld [vmem:[%s8667_s2 + $0x48] sm:$0xff]  ;;  %847 = vst [vmem:[#allocation3 + $0x60] sm:$0xff] %v4914_v62  ;;  %v5142_v11 = vadd.s32 24, %v5075_v40  ;;  %v5145_v12 = vadd.s32 88, %v5075_v40 }
   0xe   :  { %4675 = vmatprep.mubr.msk.f32.mxu0 %vm43_vm0, %v25_v13  ;;  %4687 = vmatprep.mubr.msk.f32.mxu1 %vm43_vm0, %v33_v14  ;;  %848 = vst [vmem:[#allocation3 + $0x68] sm:$0xff] %v4914_v62  ;;  %849 = vst [vmem:[#allocation3 + $0x70] sm:$0xff] %v4914_v62  ;;  %v5125_v0 = vld [vmem:[%s8669_s3] ss:$0 sm:$0xff]  ;;  %v5148_v13 = vadd.s32 40, %v5075_v40  ;;  %vm428_vm15 = vcmp.eq.s32.totalorder %v5151_v15, %v5077_v41 }
   0xf   :  { %850 = vst [vmem:[#allocation3 + $0x78] sm:$0xff] %v4914_v62  ;;  %868 = vst [vmem:[#allocation2 + $0x8] sm:$0xff] %v4915_v63  ;;  %vm429_vm14 = vcmp.eq.s32.totalorder %v5142_v11, %v5077_v41 }
  0x10   :  { %266 = vperm.xlu1 %4790, %v239_v20   ;;  %869 = vst [vmem:[#allocation2 + $0x10] sm:$0xff] %v4915_v63  ;;  %870 = vst [vmem:[#allocation2 + $0x18] sm:$0xff] %v4915_v63  ;;  %v5161_v20 = vadd.s32 96, %v5075_v40  ;;  %vm431_vm11 = vcmp.eq.s32.totalorder %v5148_v13, %v5077_v41 }
  0x11   :  { %4676 = vmatmul.mubr.msk.f32.gmra.mrb[2].mxu0 %vm43_vm0, %v26_v16  ;;  %4688 = vmatmul.mubr.msk.f32.gmra.mrb[2].mxu1 %vm43_vm0, %v34_v17  ;;  %871 = vst [vmem:[#allocation2 + $0x20] sm:$0xff] %v4915_v63  ;;  %872 = vst [vmem:[#allocation2 + $0x28] sm:$0xff] %v4915_v63  ;;  %v5154_v16 = vadd.s32 80, %v5075_v40  ;;  %v5157_v17 = vadd.s32 32, %v5075_v40 }
  0x12   :  { %4678 = vmatprep.mubr.msk.f32.mxu0 %vm43_vm0, %v27_v18  ;;  %4690 = vmatprep.mubr.msk.f32.mxu1 %vm43_vm0, %v35_v19  ;;  %873 = vst [vmem:[#allocation2 + $0x30] sm:$0xff] %v4915_v63  ;;  %874 = vst [vmem:[#allocation2 + $0x38] sm:$0xff] %v4915_v63 }
  0x13   :  { %875 = vst [vmem:[#allocation2 + $0x40] sm:$0xff] %v4915_v63  ;;  %876 = vst [vmem:[#allocation2 + $0x48] sm:$0xff] %v4915_v63  ;;  %vm430_vm12 = vcmp.eq.s32.totalorder %v5157_v17, %v5077_v41 }
  0x14   :  { %271 = vperm.xlu1 %4790, %v240_v25   ;;  %877 = vst [vmem:[#allocation2 + $0x50] sm:$0xff] %v4915_v63  ;;  %878 = vst [vmem:[#allocation2 + $0x58] sm:$0xff] %v4915_v63 }
  0x15   :  { %4679 = vmatmul.mubr.msk.f32.gmra.mrb[4].mxu0 %vm43_vm0, %v28_v21  ;;  %4691 = vmatmul.mubr.msk.f32.gmra.mrb[4].mxu1 %vm43_vm0, %v36_v22  ;;  %879 = vst [vmem:[#allocation2 + $0x60] sm:$0xff] %v4915_v63  ;;  %880 = vst [vmem:[#allocation2 + $0x68] sm:$0xff] %v4915_v63  ;;  %v5164_v21 = vadd.s32 56, %v5075_v40 }
  0x16   :  { %4681 = vmatprep.mubr.msk.f32.mxu0 %vm43_vm0, %v29_v23  ;;  %4693 = vmatprep.mubr.msk.f32.mxu1 %vm43_vm0, %v37_v24  ;;  %881 = vst [vmem:[#allocation2 + $0x70] sm:$0xff] %v4915_v63  ;;  %882 = vst [vmem:[#allocation2 + $0x78] sm:$0xff] %v4915_v63 }
  0x18   :  { %276 = vperm.xlu1 %4790, %v241_v28  }
  0x19   :  { %4682 = vmatmul.mubr.msk.f32.gmra.mrb[6].mxu0 %vm43_vm0, %v30_v26  ;;  %4694 = vmatmul.mubr.msk.f32.gmra.mrb[6].mxu1 %vm43_vm0, %v38_v27  ;;  %v5167_v26 = vadd.s32 120, %v5075_v40  ;;  %v5170_v27 = vadd.s32 48, %v5075_v40  ;;  %vm433_vm0 = vcmp.eq.s32.totalorder %v5164_v21, %v5077_v41 }
  0x1c   :  { %281 = vperm.xlu1 %4790, %v242_v29  }
  0x20   :  { %286 = vperm.xlu1 %4790, %v243_v30  }
  0x24   :  { %291 = vperm.xlu1 %4790, %v244_v31  }
  0x28   :  { %296 = vperm.xlu1 %4790, %v245_v32  }
  0x2c   :  { %306 = vperm.xlu1 %4790, %v247_v33   ;;  %v5185_v33 = vadd.s32 112, %v5075_v40 }
  0x30   :  { %311 = vperm.xlu1 %4790, %v248_v34  }
  0x34   :  { %316 = vperm.xlu1 %4790, %v249_v35  }
  0x38   :  { %321 = vperm.xlu1 %4790, %v250_v36  }
  0x3c   :  { %326 = vperm.xlu1 %4790, %v251_v37  }
  0x40   :  { %331 = vperm.xlu1 %4790, %v252_v38  }
  0x81   :  { %v510_v43 = vpop.permute.xlu0 %509 }
  0x82   :  { %vm560_vm5 = vcmp.eq.s32.totalorder %v510_v43, %v4640_v42 }
  0x83   :  { %vm576_vm6 = vmxor %vm560_vm5, %vm4912_vm3  ;;  %vm438_vm3 = vcmp.eq.s32.totalorder %v5161_v20, %v5077_v41 }
  0x84   :  { %vm5088_vm7 = vmand %vm576_vm6, %vm458_vm2  ;;  %vm440_vm6 = vcmp.eq.s32.totalorder %v5185_v33, %v5077_v41 }
  0x85   :  { %vm624_vm8 = vmand %vm560_vm5, %vm608_vm4  ;;  %vm436_vm4 = vcmp.eq.s32.totalorder %v5154_v16, %v5077_v41  ;;  %vm441_vm5 = vcmp.eq.s32.totalorder %v5167_v26, %v5077_v41 }
  0x86   :  { %vm5092_vm9 = vmand %vm624_vm8, %vm458_vm2  ;;  %vm437_vm2 = vcmp.eq.s32.totalorder %v5145_v12, %v5077_v41 }
  0x87   :  { %v4641_v47 = vsel %vm5092_vm9, 1.0, %v4913_v46  ;;  %v257_v48 = vpop.permute.xlu1 %256 }
  0x88   :  { %703 = vadd.xlane.f32.xlu0 %v4641_v47  ;;  %v340_v3 = vadd.f32 %v5125_v0, %v257_v48 }
  0x8b   :  { %v262_v49 = vpop.permute.xlu1 %261 }
  0x8c   :  { %v341_v4 = vadd.f32 %v5125_v0, %v262_v49 }
  0x8f   :  { %v5102_v51 = vpop.permute.xlu1 %266 }
  0x90   :  { %v5174_v28 = vadd.f32 %v5125_v0, %v5102_v51 }
  0x93   :  { %v5104_v52 = vpop.permute.xlu1 %271 }
  0x94   :  { %v343_v29 = vadd.f32 %v5125_v0, %v5104_v52 }
  0x97   :  { %v5106_v53 = vpop.permute.xlu1 %276 }
  0x98   :  { %v5180_v30 = vadd.f32 %v5125_v0, %v5106_v53 }
  0x9b   :  { %v5108_v54 = vpop.permute.xlu1 %281 }
  0x9c   :  { %v345_v34 = vadd.f32 %v5125_v0, %v5108_v54 }
  0x9e   :  { %301 = vperm.xlu0 %4789, %v246_v50  }
  0x9f   :  { %v5110_v55 = vpop.permute.xlu1 %286 }
  0xa0   :  { %v5191_v35 = vadd.f32 %v5125_v0, %v5110_v55 }
  0xa3   :  { %v5112_v56 = vpop.permute.xlu1 %291 }
  0xa4   :  { %v347_v54 = vadd.f32 %v5125_v0, %v5112_v56 }
  0xa7   :  { %v297_v57 = vpop.permute.xlu1 %296 }
  0xa8   :  { %v348_v18 = vadd.f32 %v5125_v0, %v297_v57 }
  0xab   :  { %v5114_v58 = vpop.permute.xlu1 %306 }
  0xac   :  { %v5197_v38 = vadd.f32 %v5125_v0, %v5114_v58 }
  0xaf   :  { %v5116_v59 = vpop.permute.xlu1 %311 }
  0xb0   :  { %v351_v39 = vadd.f32 %v5125_v0, %v5116_v59 }
  0xb3   :  { %v5118_v60 = vpop.permute.xlu1 %316 }
  0xb4   :  { %v352_v55 = vadd.f32 %v5125_v0, %v5118_v60 }
  0xb7   :  { %v5120_v61 = vpop.permute.xlu1 %321 }
  0xb8   :  { %v353_v26 = vadd.f32 %v5125_v0, %v5120_v61 }
  0xbb   :  { %v5130_v2 = vpop.permute.xlu1 %326 }
  0xbc   :  { %v354_v56 = vadd.f32 %v5125_v0, %v5130_v2 }
  0xbf   :  { %v332_v43 = vpop.permute.xlu1 %331 }
  0xc0   :  { %v355_v60 = vadd.f32 %v5125_v0, %v332_v43 }
  0xe0   :  { %v4674_v5 = vpop.f32.mrb[0].mxu0  ;;  %v5134_v6 = vpop.f32.mrb[0].mxu1 }
  0xe1   :  { %v357_v8 = vmul.f32 2.0, %v4674_v5  ;;  %v158_v9 = vpop.f32.mrb[1].mxu0  ;;  %v198_v10 = vpop.f32.mrb[1].mxu1 }
  0xe2   :  { %v356_v14 = vmul.f32 2.0, %v158_v9  ;;  %v364_v19 = vmul.f32 2.0, %v198_v10 }
  0xe3   :  { %v373_v22 = vsub.f32 %v341_v4, %v357_v8 }
  0xe4   :  { %v372_v23 = vsub.f32 %v340_v3, %v356_v14  ;;  %v4677_v24 = vpop.f32.mrb[2].mxu0  ;;  %v4689_v25 = vpop.f32.mrb[2].mxu1  ;;  %v380_v42 = vsub.f32 %v348_v18, %v364_v19 }
  0xe5   :  { %v168_v31 = vpop.f32.mrb[3].mxu0  ;;  %v208_v32 = vpop.f32.mrb[3].mxu1  ;;  %v359_v37 = vmul.f32 2.0, %v4677_v24  ;;  %v389_v48 = vmax.f32 %v373_v22, 0.0  ;;  %v367_v50 = vmul.f32 2.0, %v4689_v25 }
  0xe6   :  { %v388_v36 = vmax.f32 %v372_v23, 0.0  ;;  %v358_v47 = vmul.f32 2.0, %v168_v31  ;;  %v366_v51 = vmul.f32 2.0, %v208_v32  ;;  %v396_v45 = vmax.f32 %v380_v42, 0.0 }
  0xe7   :  { %v375_v63 = vsub.f32 %v343_v29, %v359_v37  ;;  %v5241_v2 = vsel %vm427_vm10, 0.0, %v389_v48  ;;  %v383_v9 = vsub.f32 %v351_v39, %v367_v50 }
  0xe8   :  { %v5206_v49 = vsel %vm426_vm1, 0.0, %v388_v36  ;;  %v4680_v52 = vpop.f32.mrb[4].mxu0  ;;  %v5212_v53 = vpop.f32.mrb[4].mxu1  ;;  %vm432_vm1 = vcmp.eq.s32.totalorder %v5170_v27, %v5077_v41  ;;  %v374_v4 = vsub.f32 %v5174_v28, %v358_v47  ;;  %v382_v10 = vsub.f32 %v5197_v38, %v366_v51 }
  0xe9   :  { %v819_v57 = vsel %vm5088_vm7, %v5206_v49, -1.0  ;;  %v851_v58 = vsel %vm5092_vm9, %v5206_v49, -inf  ;;  %v178_v59 = vpop.f32.mrb[5].mxu0  ;;  %v218_v62 = vpop.f32.mrb[5].mxu1  ;;  %v361_v3 = vmul.f32 2.0, %v4680_v52  ;;  %v391_v31 = vmax.f32 %v375_v63, 0.0 }
  0xea   :  { %835 = vst [vmem:[#allocation3] sm:$0xff] %v819_v57  ;;  %867 = vst [vmem:[#allocation2] sm:$0xff] %v851_v58  ;;  %v360_v5 = vmul.f32 2.0, %v178_v59  ;;  %v368_v8 = vmul.f32 2.0, %v218_v62  ;;  %v390_v37 = vmax.f32 %v374_v4, 0.0  ;;  %v399_v42 = vmax.f32 %v383_v9, 0.0 }
  0xeb   :  { %v377_v14 = vsub.f32 %v345_v34, %v361_v3  ;;  %v398_v13 = vmax.f32 %v382_v10, 0.0  ;;  %v5270_v57 = vsel %vm429_vm14, 0.0, %v391_v31  ;;  %v369_v10 = vmul.f32 2.0, %v5212_v53 }
  0xec   :  { %v4683_v18 = vpop.f32.mrb[6].mxu0  ;;  %v4695_v19 = vpop.f32.mrb[6].mxu1  ;;  %v376_v22 = vsub.f32 %v5180_v30, %v360_v5  ;;  %v384_v23 = vsub.f32 %v352_v55, %v368_v8  ;;  %v5275_v17 = vsel %vm428_vm15, 0.0, %v390_v37  ;;  %v5293_v15 = vsel %vm437_vm2, 0.0, %v399_v42 }
  0xed   :  { %v363_v24 = vmul.f32 2.0, %v4683_v18  ;;  %v371_v25 = vmul.f32 2.0, %v4695_v19  ;;  %v188_v28 = vpop.f32.mrb[7].mxu0  ;;  %v228_v29 = vpop.f32.mrb[7].mxu1  ;;  %v393_v1 = vmax.f32 %v377_v14, 0.0  ;;  %v5307_v27 = vsel %vm436_vm4, 0.0, %v398_v13 }
  0xee   :  { %v362_v32 = vmul.f32 2.0, %v188_v28  ;;  %v370_v36 = vmul.f32 2.0, %v228_v29  ;;  %v392_v39 = vmax.f32 %v376_v22, 0.0  ;;  %v400_v51 = vmax.f32 %v384_v23, 0.0 }
  0xef   :  { %v379_v38 = vsub.f32 %v347_v54, %v363_v24  ;;  %v387_v34 = vsub.f32 %v355_v60, %v371_v25  ;;  %v5250_v43 = vsel %vm431_vm11, 0.0, %v393_v1  ;;  %v5263_v54 = vsel %vm434_vm13, 0.0, %v396_v45 }
  0xf0   :  { %v378_v30 = vsub.f32 %v5191_v35, %v362_v32  ;;  %v386_v47 = vsub.f32 %v354_v56, %v370_v36  ;;  %v745_v48 = vmin.f32 %v5241_v2, %v5250_v43  ;;  %v5258_v50 = vsel %vm430_vm12, 0.0, %v392_v39 }
  0xf1   :  { %v395_v52 = vmax.f32 %v379_v38, 0.0  ;;  %v744_v35 = vmin.f32 %v5206_v49, %v5258_v50  ;;  %v403_v58 = vmax.f32 %v387_v34, 0.0  ;;  %v5298_v21 = vsel %vm438_vm3, 0.0, %v400_v51 }
  0xf2   :  { %v394_v55 = vmax.f32 %v378_v30, 0.0  ;;  %v402_v56 = vmax.f32 %v386_v47, 0.0  ;;  %v414_v19 = vadd.s32 72, %v5075_v40  ;;  %v365_v23 = vmul.f32 2.0, %v5134_v6 }
  0xf3   :  { %v5280_v7 = vsel %vm433_vm0, 0.0, %v395_v52  ;;  %v748_v59 = vmin.f32 %v744_v35, %v5263_v54  ;;  %v5314_v20 = vsel %vm441_vm5, 0.0, %v403_v58  ;;  %v385_v24 = vsub.f32 %v353_v26, %v369_v10 }
  0xf4   :  { %v747_v62 = vmin.f32 %v5270_v57, %v5280_v7  ;;  %v5288_v11 = vsel %vm432_vm1, 0.0, %v394_v55  ;;  %v5318_v4 = vsel %vm440_vm6, 0.0, %v402_v56  ;;  %v418_v29 = vadd.s32 104, %v5075_v40 }
  0xf5   :  { %v746_v63 = vmin.f32 %v5275_v17, %v5288_v11  ;;  %v752_v12 = vmin.f32 %v748_v59, %v5298_v21  ;;  %vm435_vm8 = vcmp.eq.s32.totalorder %v414_v19, %v5077_v41  ;;  %v401_v53 = vmax.f32 %v385_v24, 0.0 }
  0xf6   :  { %v751_v60 = vmin.f32 %v747_v62, %v5293_v15  ;;  %vm439_vm9 = vcmp.eq.s32.totalorder %v418_v29, %v5077_v41  ;;  %v4642_v52 = vsel %vm5088_vm7, 1.0, %v4913_v46 }
  0xf7   :  { %v750_v3 = vmin.f32 %v746_v63, %v5307_v27  ;;  %v488_v37 = vsel %vm439_vm9, 0.0, %v401_v53 }
  0xf8   :  { %v755_v45 = vmin.f32 %v751_v60, %v5314_v20 }
  0xf9   :  { %v754_v33 = vmin.f32 %v750_v3, %v5318_v4 }
  0xfb   :  { %v757_v16 = vmin.f32 %v754_v33, %v755_v45 }
 0x115   :  { %v704_v5 = vpop.xlane.xlu0 %703 }
 0x116   :  { %v705_v8 = vrot.slane %v704_v5, 4 }
 0x118   :  { %v706_v9 = vadd.f32 %v705_v8, %v704_v5 }
 0x11a   :  { %v707_v14 = vrot.slane %v706_v9, 2 }
 0x11c   :  { %v708_v18 = vadd.f32 %v707_v14, %v706_v9 }
 0x11d   :  { %v302_v22 = vpop.permute.xlu0 %301 }
 0x11e   :  { %v349_v25 = vadd.f32 %v5125_v0, %v302_v22  ;;  %v709_v28 = vrot.slane %v708_v18, 1 }
 0x120   :  { %v381_v31 = vsub.f32 %v349_v25, %v365_v23  ;;  %v710_v1 = vadd.f32 %v709_v28, %v708_v18 }
 0x122   :  { %v397_v32 = vmax.f32 %v381_v31, 0.0  ;;  %4708 = vpush %v710_v1 }
 0x124   :  { %v484_v61 = vsel %vm435_vm8, 0.0, %v397_v32 }
 0x125   :  { %v749_v36 = vmin.f32 %v745_v48, %v484_v61 }
 0x127   :  { %v753_v39 = vmin.f32 %v749_v36, %v488_v37 }
 0x129   :  { %v756_v6 = vmin.f32 %v752_v12, %v753_v39 }
 0x12b   :  { %v758_v38 = vmin.f32 %v756_v6, %v757_v16 }
 0x12d   :  { %v759_v34 = vrot.slane %v758_v38, 4 }
 0x12f   :  { %v760_v0 = vmin.f32 %v758_v38, %v759_v34  ;;  %v5351_v38 = vmov 0.0   ;;  %v5353_v34 = vmov 0.0  }
 0x131   :  { %v761_v42 = vrot.slane %v760_v0, 2 }
 0x133   :  { %v762_v30 = vmin.f32 %v760_v0, %v761_v42  ;;  %v5355_v0 = vmov 0.0   ;;  %v5357_v42 = vmov 0.0  }
 0x135   :  { %v763_v47 = vrot.slane %v762_v30, 1 }
 0x137   :  { %v764_v51 = vmin.f32 %v762_v30, %v763_v47  ;;  %v5359_v30 = vmov 0.0   ;;  %v5361_v47 = vmov 0.0  }
 0x139   :  { %v765_v13 = vsub.f32 %v5206_v49, %v764_v51  ;;  %v766_v35 = vsub.f32 %v5241_v2, %v764_v51  ;;  %v767_v48 = vsub.f32 %v5275_v17, %v764_v51  ;;  %v768_v55 = vsub.f32 %v5270_v57, %v764_v51 }
 0x13a   :  { %v769_v58 = vsub.f32 %v5258_v50, %v764_v51  ;;  %v770_v59 = vsub.f32 %v5250_v43, %v764_v51  ;;  %v771_v62 = vsub.f32 %v5288_v11, %v764_v51  ;;  %v772_v56 = vsub.f32 %v5280_v7, %v764_v51 }
 0x13b   :  { %v773_v63 = vsub.f32 %v5263_v54, %v764_v51  ;;  %v774_v44 = vsub.f32 %v484_v61, %v764_v51  ;;  %v775_v46 = vsub.f32 %v5307_v27, %v764_v51  ;;  %v776_v49 = vsub.f32 %v5293_v15, %v764_v51 }
 0x13c   :  { %v777_v2 = vsub.f32 %v5298_v21, %v764_v51  ;;  %v778_v17 = vsub.f32 %v488_v37, %v764_v51  ;;  %v779_v57 = vsub.f32 %v5318_v4, %v764_v51  ;;  %v780_v50 = vsub.f32 %v5314_v20, %v764_v51 }
 0x13d   :  { %v781_v12 = vmul.f32 %v4642_v52, %v765_v13  ;;  %v782_v43 = vmul.f32 0.0, %v766_v35  ;;  %v783_v60 = vmul.f32 0.0, %v767_v48  ;;  %v784_v11 = vmul.f32 0.0, %v768_v55 }
 0x13e   :  { %v785_v3 = vmul.f32 0.0, %v769_v58  ;;  %v786_v7 = vmul.f32 0.0, %v770_v59  ;;  %v787_v45 = vmul.f32 0.0, %v771_v62  ;;  %v788_v54 = vmul.f32 0.0, %v772_v56 }
 0x13f   :  { %v789_v33 = vmul.f32 0.0, %v773_v63  ;;  %v790_v16 = vmul.f32 0.0, %v774_v44  ;;  %v791_v27 = vmul.f32 0.0, %v775_v46  ;;  %v792_v5 = vmul.f32 0.0, %v776_v49 }
 0x140   :  { %v797_v15 = vmax.f32 %v781_v12, %v785_v3  ;;  %v798_v8 = vmax.f32 %v782_v43, %v786_v7  ;;  %v799_v21 = vmax.f32 %v783_v60, %v787_v45  ;;  %v800_v9 = vmax.f32 %v784_v11, %v788_v54 }
 0x141   :  { %v793_v10 = vmul.f32 0.0, %v777_v2  ;;  %v794_v4 = vmul.f32 0.0, %v778_v17  ;;  %v795_v14 = vmul.f32 0.0, %v779_v57  ;;  %v796_v20 = vmul.f32 0.0, %v780_v50 }
 0x142   :  { %v801_v26 = vmax.f32 %v797_v15, %v789_v33  ;;  %v802_v18 = vmax.f32 %v798_v8, %v790_v16  ;;  %v803_v19 = vmax.f32 %v799_v21, %v791_v27  ;;  %v804_v22 = vmax.f32 %v800_v9, %v792_v5 }
 0x143   :  { %v5363_v52 = vmov 0.0   ;;  %v5365_v13 = vmov 0.0  }
 0x144   :  { %v805_v23 = vmax.f32 %v801_v26, %v793_v10  ;;  %v806_v24 = vmax.f32 %v802_v18, %v794_v4  ;;  %v807_v25 = vmax.f32 %v803_v19, %v795_v14  ;;  %v808_v28 = vmax.f32 %v804_v22, %v796_v20 }
 0x146   :  { %v809_v29 = vmax.f32 %v805_v23, %v806_v24  ;;  %v810_v31 = vmax.f32 %v807_v25, %v808_v28 }
 0x148   :  { %v811_v1 = vmax.f32 %v809_v29, %v810_v31 }
 0x14a   :  { %v812_v53 = vrot.slane %v811_v1, 4 }
 0x14c   :  { %v813_v32 = vmax.f32 %v811_v1, %v812_v53 }
 0x14e   :  { %v814_v61 = vrot.slane %v813_v32, 2 }
 0x150   :  { %v815_v36 = vmax.f32 %v813_v32, %v814_v61 }
 0x152   :  { %v816_v37 = vrot.slane %v815_v36, 1 }
 0x153   :  { %s5347_s3 = spop %4708 }
 0x154   :  { %v817_v39 = vmax.f32 %v815_v36, %v816_v37 }
 0x156   :  { %v5349_v6 = vadd.f32 %v817_v39, %v764_v51 }
 0x157 LB: > { %s4643_s19 = sshll.u32 %s4909_s18, 6  ;;  %v5397_v51 = vld [vmem:[#allocation3] sm:$0xff]  ;;  %v5408_v55 = vsub.s32 0, %v5075_v40  ;;  %v5411_v58 = vsub.s32 1, %v5075_v40  ;;  %v5414_v59 = vsub.s32 2, %v5075_v40  ;;  %v5426_v44 = vsub.s32 3, %v5075_v40  ;;  %s4909_s18 = sphi %s5367_s18, %s888_s18   ;;  %v4905_v13 = vphi %v5365_v13, %v8681_v13   ;;  %v4901_v52 = vphi %v5363_v52, %v8680_v52   ;;  %v4897_v47 = vphi %v5361_v47, %v8679_v47   ;;  %v4893_v30 = vphi %v5359_v30, %v8678_v30   ;;  %v4889_v42 = vphi %v5357_v42, %v8677_v42   ;;  %v4885_v0 = vphi %v5355_v0, %v8676_v0   ;;  %v4881_v34 = vphi %v5353_v34, %v8675_v34   ;;  %v4877_v38 = vphi %v5351_v38, %v8674_v38  }
 0x158   : > { %s5399_s20 = scalar_lea.vmem [#allocation2], %s4643_s19  ;;  %v5429_v46 = vsub.s32 4, %v5075_v40  ;;  %v5432_v49 = vsub.s32 5, %v5075_v40  ;;  %v5450_v60 = vsub.s32 6, %v5075_v40  ;;  %v5465_v45 = vsub.s32 7, %v5075_v40  ;;  %s888_s18 = sadd.s32 1, %s4909_s18  }
 0x159   : > { %v5402_v35 = vld [vmem:[%s5399_s20] sm:$0xff]  ;;  %v5405_v48 = vld [vmem:[%s5399_s20 + $0x8] sm:$0xff]  ;;  %v5417_v62 = vld [vmem:[%s5399_s20 + $0x10] sm:$0xff]  ;;  %v911_v50 = vrot.slane %v5397_v51, %v5408_v55  ;;  %v931_v12 = vrot.slane %v5397_v51, %v5411_v58  ;;  %v959_v43 = vrot.slane %v5397_v51, %v5414_v59  ;;  %v5454_v11 = vrot.slane %v5397_v51, %v5426_v44  ;;  %p885_p0 = scmp.ge.s32.totalorder %s888_s18, 2  }
 0x15a   : > { %v5420_v56 = vld [vmem:[%s5399_s20 + $0x18] sm:$0xff]  ;;  %v5423_v63 = vld [vmem:[%s5399_s20 + $0x20] sm:$0xff]  ;;  %v5435_v2 = vld [vmem:[%s5399_s20 + $0x28] sm:$0xff]  ;;  %v5458_v3 = vrot.slane %v5397_v51, %v5429_v46  ;;  %v5462_v7 = vrot.slane %v5397_v51, %v5432_v49 }
 0x15b   : > { %v5438_v17 = vld [vmem:[%s5399_s20 + $0x30] sm:$0xff]  ;;  %v5441_v57 = vld [vmem:[%s5399_s20 + $0x38] sm:$0xff]  ;;  %vm912_vm7 = vcmp.gt.f32.partialorder %v911_v50, %v5402_v35  ;;  %vm913_vm10 = vcmp.gt.f32.partialorder %v911_v50, %v5405_v48  ;;  %vm914_vm11 = vcmp.gt.f32.partialorder %v911_v50, %v5417_v62  ;;  %vm915_vm12 = vcmp.gt.f32.partialorder %v911_v50, %v5420_v56 }
 0x15c   : > { %vm916_vm13 = vcmp.gt.f32.partialorder %v911_v50, %v5423_v63  ;;  %vm917_vm14 = vcmp.gt.f32.partialorder %v911_v50, %v5435_v2  ;;  %vm918_vm15 = vcmp.gt.f32.partialorder %v911_v50, %v5438_v17  ;;  %vm919_vm0 = vcmp.gt.f32.partialorder %v911_v50, %v5441_v57 }
 0x15d   : > { %v920_v54 = vsel %vm912_vm7, %v911_v50, inf  ;;  %v921_v33 = vsel %vm913_vm10, %v911_v50, inf  ;;  %v922_v16 = vsel %vm914_vm11, %v911_v50, inf  ;;  %v923_v27 = vsel %vm915_vm12, %v911_v50, inf }
 0x15e   : > { %v924_v5 = vsel %vm916_vm13, %v911_v50, inf  ;;  %v925_v15 = vsel %vm917_vm14, %v911_v50, inf  ;;  %v926_v8 = vsel %vm918_vm15, %v911_v50, inf  ;;  %v927_v21 = vsel %vm919_vm0, %v911_v50, inf }
 0x15f   : > { %vm932_vm1 = vcmp.gt.f32.partialorder %v931_v12, %v5402_v35  ;;  %vm933_vm2 = vcmp.gt.f32.partialorder %v931_v12, %v5405_v48  ;;  %vm934_vm3 = vcmp.gt.f32.partialorder %v931_v12, %v5417_v62  ;;  %vm935_vm4 = vcmp.gt.f32.partialorder %v931_v12, %v5420_v56 }
 0x160   : > { %vm936_vm5 = vcmp.gt.f32.partialorder %v931_v12, %v5423_v63  ;;  %vm937_vm6 = vcmp.gt.f32.partialorder %v931_v12, %v5435_v2  ;;  %vm938_vm8 = vcmp.gt.f32.partialorder %v931_v12, %v5438_v17  ;;  %vm939_vm9 = vcmp.gt.f32.partialorder %v931_v12, %v5441_v57 }
 0x161   : > { %v940_v9 = vsel %vm932_vm1, %v931_v12, inf  ;;  %v941_v10 = vsel %vm933_vm2, %v931_v12, inf  ;;  %v942_v4 = vsel %vm934_vm3, %v931_v12, inf  ;;  %v943_v14 = vsel %vm935_vm4, %v931_v12, inf }
 0x162   : > { %v944_v20 = vsel %vm936_vm5, %v931_v12, inf  ;;  %v945_v26 = vsel %vm937_vm6, %v931_v12, inf  ;;  %v946_v18 = vsel %vm938_vm8, %v931_v12, inf  ;;  %v947_v19 = vsel %vm939_vm9, %v931_v12, inf }
 0x163   : > { %v948_v22 = vmin.f32 %v920_v54, %v940_v9  ;;  %v949_v23 = vmin.f32 %v921_v33, %v941_v10  ;;  %v950_v24 = vmin.f32 %v922_v16, %v942_v4  ;;  %v951_v25 = vmin.f32 %v923_v27, %v943_v14 }
 0x164   : > { %v952_v28 = vmin.f32 %v924_v5, %v944_v20  ;;  %v953_v29 = vmin.f32 %v925_v15, %v945_v26  ;;  %v954_v31 = vmin.f32 %v926_v8, %v946_v18  ;;  %v955_v1 = vmin.f32 %v927_v21, %v947_v19 }
 0x165   : > { %vm960_vm7 = vcmp.gt.f32.partialorder %v959_v43, %v5402_v35  ;;  %vm961_vm10 = vcmp.gt.f32.partialorder %v959_v43, %v5405_v48  ;;  %vm962_vm11 = vcmp.gt.f32.partialorder %v959_v43, %v5417_v62  ;;  %vm963_vm12 = vcmp.gt.f32.partialorder %v959_v43, %v5420_v56 }
 0x166   : > { %vm964_vm13 = vcmp.gt.f32.partialorder %v959_v43, %v5423_v63  ;;  %vm965_vm14 = vcmp.gt.f32.partialorder %v959_v43, %v5435_v2  ;;  %vm966_vm15 = vcmp.gt.f32.partialorder %v959_v43, %v5438_v17  ;;  %vm967_vm0 = vcmp.gt.f32.partialorder %v959_v43, %v5441_v57 }
 0x167   : > { %v968_v53 = vsel %vm960_vm7, %v959_v43, inf  ;;  %v969_v32 = vsel %vm961_vm10, %v959_v43, inf  ;;  %v970_v61 = vsel %vm962_vm11, %v959_v43, inf  ;;  %v971_v36 = vsel %vm963_vm12, %v959_v43, inf }
 0x168   : > { %v972_v37 = vsel %vm964_vm13, %v959_v43, inf  ;;  %v973_v39 = vsel %vm965_vm14, %v959_v43, inf  ;;  %v974_v50 = vsel %vm966_vm15, %v959_v43, inf  ;;  %v975_v12 = vsel %vm967_vm0, %v959_v43, inf }
 0x169   : > { %v976_v54 = vmin.f32 %v948_v22, %v968_v53  ;;  %v977_v33 = vmin.f32 %v949_v23, %v969_v32  ;;  %v978_v16 = vmin.f32 %v950_v24, %v970_v61  ;;  %v979_v27 = vmin.f32 %v951_v25, %v971_v36 }
 0x16a   : > { %v980_v5 = vmin.f32 %v952_v28, %v972_v37  ;;  %v981_v15 = vmin.f32 %v953_v29, %v973_v39  ;;  %v982_v8 = vmin.f32 %v954_v31, %v974_v50  ;;  %v983_v21 = vmin.f32 %v955_v1, %v975_v12 }
 0x16b   : > { %vm988_vm1 = vcmp.gt.f32.partialorder %v5454_v11, %v5402_v35  ;;  %vm989_vm2 = vcmp.gt.f32.partialorder %v5454_v11, %v5405_v48  ;;  %vm990_vm3 = vcmp.gt.f32.partialorder %v5454_v11, %v5417_v62  ;;  %vm991_vm4 = vcmp.gt.f32.partialorder %v5454_v11, %v5420_v56 }
 0x16c   : > { %vm992_vm5 = vcmp.gt.f32.partialorder %v5454_v11, %v5423_v63  ;;  %vm993_vm6 = vcmp.gt.f32.partialorder %v5454_v11, %v5435_v2  ;;  %vm994_vm8 = vcmp.gt.f32.partialorder %v5454_v11, %v5438_v17  ;;  %vm995_vm9 = vcmp.gt.f32.partialorder %v5454_v11, %v5441_v57 }
 0x16d   : > { %v996_v43 = vsel %vm988_vm1, %v5454_v11, inf  ;;  %v997_v9 = vsel %vm989_vm2, %v5454_v11, inf  ;;  %v998_v10 = vsel %vm990_vm3, %v5454_v11, inf  ;;  %v999_v4 = vsel %vm991_vm4, %v5454_v11, inf }
 0x16e   : > { %v1000_v14 = vsel %vm992_vm5, %v5454_v11, inf  ;;  %v1001_v20 = vsel %vm993_vm6, %v5454_v11, inf  ;;  %v1002_v26 = vsel %vm994_vm8, %v5454_v11, inf  ;;  %v1003_v18 = vsel %vm995_vm9, %v5454_v11, inf }
 0x16f   : > { %v1004_v19 = vmin.f32 %v976_v54, %v996_v43  ;;  %v1005_v22 = vmin.f32 %v977_v33, %v997_v9  ;;  %v1006_v23 = vmin.f32 %v978_v16, %v998_v10  ;;  %v1007_v24 = vmin.f32 %v979_v27, %v999_v4 }
 0x170   : > { %v1008_v25 = vmin.f32 %v980_v5, %v1000_v14  ;;  %v1009_v28 = vmin.f32 %v981_v15, %v1001_v20  ;;  %v1010_v29 = vmin.f32 %v982_v8, %v1002_v26  ;;  %v1011_v31 = vmin.f32 %v983_v21, %v1003_v18  ;;  %v5563_v20 = vld [vmem:[#allocation3 + $0x8] sm:$0xff] }
 0x171   : > { %vm1016_vm7 = vcmp.gt.f32.partialorder %v5458_v3, %v5402_v35  ;;  %vm1017_vm10 = vcmp.gt.f32.partialorder %v5458_v3, %v5405_v48  ;;  %vm1018_vm11 = vcmp.gt.f32.partialorder %v5458_v3, %v5417_v62  ;;  %vm1019_vm12 = vcmp.gt.f32.partialorder %v5458_v3, %v5420_v56 }
 0x172   : > { %vm1020_vm13 = vcmp.gt.f32.partialorder %v5458_v3, %v5423_v63  ;;  %vm1021_vm14 = vcmp.gt.f32.partialorder %v5458_v3, %v5435_v2  ;;  %vm1022_vm15 = vcmp.gt.f32.partialorder %v5458_v3, %v5438_v17  ;;  %vm1023_vm0 = vcmp.gt.f32.partialorder %v5458_v3, %v5441_v57 }
 0x173   : > { %v1024_v11 = vsel %vm1016_vm7, %v5458_v3, inf  ;;  %v1025_v1 = vsel %vm1017_vm10, %v5458_v3, inf  ;;  %v1026_v53 = vsel %vm1018_vm11, %v5458_v3, inf  ;;  %v1027_v32 = vsel %vm1019_vm12, %v5458_v3, inf }
 0x174   : > { %v1028_v61 = vsel %vm1020_vm13, %v5458_v3, inf  ;;  %v1029_v36 = vsel %vm1021_vm14, %v5458_v3, inf  ;;  %v1030_v37 = vsel %vm1022_vm15, %v5458_v3, inf  ;;  %v1031_v39 = vsel %vm1023_vm0, %v5458_v3, inf }
 0x175   : > { %v1032_v50 = vmin.f32 %v1004_v19, %v1024_v11  ;;  %v1033_v12 = vmin.f32 %v1005_v22, %v1025_v1  ;;  %v1034_v54 = vmin.f32 %v1006_v23, %v1026_v53  ;;  %v1035_v33 = vmin.f32 %v1007_v24, %v1027_v32 }
 0x176   : > { %v1036_v16 = vmin.f32 %v1008_v25, %v1028_v61  ;;  %v1037_v27 = vmin.f32 %v1009_v28, %v1029_v36  ;;  %v1038_v5 = vmin.f32 %v1010_v29, %v1030_v37  ;;  %v1039_v15 = vmin.f32 %v1011_v31, %v1031_v39 }
 0x177   : > { %vm1044_vm1 = vcmp.gt.f32.partialorder %v5462_v7, %v5402_v35  ;;  %vm1045_vm2 = vcmp.gt.f32.partialorder %v5462_v7, %v5405_v48  ;;  %vm1046_vm3 = vcmp.gt.f32.partialorder %v5462_v7, %v5417_v62  ;;  %vm1047_vm4 = vcmp.gt.f32.partialorder %v5462_v7, %v5420_v56 }
 0x178   : > { %vm1048_vm5 = vcmp.gt.f32.partialorder %v5462_v7, %v5423_v63  ;;  %vm1049_vm6 = vcmp.gt.f32.partialorder %v5462_v7, %v5435_v2  ;;  %vm1050_vm8 = vcmp.gt.f32.partialorder %v5462_v7, %v5438_v17  ;;  %vm1051_vm9 = vcmp.gt.f32.partialorder %v5462_v7, %v5441_v57 }
 0x179   : > { %v1052_v3 = vsel %vm1044_vm1, %v5462_v7, inf  ;;  %v1053_v8 = vsel %vm1045_vm2, %v5462_v7, inf  ;;  %v1054_v21 = vsel %vm1046_vm3, %v5462_v7, inf  ;;  %v1055_v43 = vsel %vm1047_vm4, %v5462_v7, inf }
 0x17a   : > { %v1056_v9 = vsel %vm1048_vm5, %v5462_v7, inf  ;;  %v1057_v10 = vsel %vm1049_vm6, %v5462_v7, inf  ;;  %v1058_v4 = vsel %vm1050_vm8, %v5462_v7, inf  ;;  %v1059_v14 = vsel %vm1051_vm9, %v5462_v7, inf }
 0x17b   : > { %v1060_v26 = vmin.f32 %v1032_v50, %v1052_v3  ;;  %v1061_v18 = vmin.f32 %v1033_v12, %v1053_v8  ;;  %v1062_v19 = vmin.f32 %v1034_v54, %v1054_v21  ;;  %v1063_v22 = vmin.f32 %v1035_v33, %v1055_v43 }
 0x17c   : > { %v1064_v23 = vmin.f32 %v1036_v16, %v1056_v9  ;;  %v1065_v24 = vmin.f32 %v1037_v27, %v1057_v10  ;;  %v1066_v25 = vmin.f32 %v1038_v5, %v1058_v4  ;;  %v1067_v28 = vmin.f32 %v1039_v15, %v1059_v14 }
 0x17d   : > { %v1071_v29 = vrot.slane %v5397_v51, %v5450_v60  ;;  %v1099_v31 = vrot.slane %v5397_v51, %v5465_v45  ;;  %v5571_v11 = vrot.slane %v5563_v20, %v5408_v55  ;;  %v5575_v7 = vrot.slane %v5563_v20, %v5411_v58 }
 0x17e   : > { %v5579_v1 = vrot.slane %v5563_v20, %v5414_v59  ;;  %v5583_v53 = vrot.slane %v5563_v20, %v5426_v44  ;;  %v5587_v32 = vrot.slane %v5563_v20, %v5429_v46  ;;  %v5591_v51 = vrot.slane %v5563_v20, %v5432_v49 }
 0x17f   : > { %vm1072_vm7 = vcmp.gt.f32.partialorder %v1071_v29, %v5402_v35  ;;  %vm1073_vm10 = vcmp.gt.f32.partialorder %v1071_v29, %v5405_v48  ;;  %vm1074_vm11 = vcmp.gt.f32.partialorder %v1071_v29, %v5417_v62  ;;  %vm1075_vm12 = vcmp.gt.f32.partialorder %v1071_v29, %v5420_v56 }
 0x180   : > { %vm1076_vm13 = vcmp.gt.f32.partialorder %v1071_v29, %v5423_v63  ;;  %vm1077_vm14 = vcmp.gt.f32.partialorder %v1071_v29, %v5435_v2  ;;  %vm1078_vm15 = vcmp.gt.f32.partialorder %v1071_v29, %v5438_v17  ;;  %vm1079_vm0 = vcmp.gt.f32.partialorder %v1071_v29, %v5441_v57 }
 0x181   : > { %v1080_v61 = vsel %vm1072_vm7, %v1071_v29, inf  ;;  %v1081_v36 = vsel %vm1073_vm10, %v1071_v29, inf  ;;  %v1082_v37 = vsel %vm1074_vm11, %v1071_v29, inf  ;;  %v1083_v39 = vsel %vm1075_vm12, %v1071_v29, inf }
 0x182   : > { %v1084_v50 = vsel %vm1076_vm13, %v1071_v29, inf  ;;  %v1085_v12 = vsel %vm1077_vm14, %v1071_v29, inf  ;;  %v1086_v54 = vsel %vm1078_vm15, %v1071_v29, inf  ;;  %v1087_v33 = vsel %vm1079_vm0, %v1071_v29, inf }
 0x183   : > { %v1088_v16 = vmin.f32 %v1060_v26, %v1080_v61  ;;  %v1089_v27 = vmin.f32 %v1061_v18, %v1081_v36  ;;  %v1090_v5 = vmin.f32 %v1062_v19, %v1082_v37  ;;  %v1091_v15 = vmin.f32 %v1063_v22, %v1083_v39 }
 0x184   : > { %v1092_v3 = vmin.f32 %v1064_v23, %v1084_v50  ;;  %v1093_v8 = vmin.f32 %v1065_v24, %v1085_v12  ;;  %v1094_v21 = vmin.f32 %v1066_v25, %v1086_v54  ;;  %v1095_v43 = vmin.f32 %v1067_v28, %v1087_v33 }
 0x185   : > { %vm1100_vm1 = vcmp.gt.f32.partialorder %v1099_v31, %v5402_v35  ;;  %vm1101_vm2 = vcmp.gt.f32.partialorder %v1099_v31, %v5405_v48  ;;  %vm1102_vm3 = vcmp.gt.f32.partialorder %v1099_v31, %v5417_v62  ;;  %vm1103_vm4 = vcmp.gt.f32.partialorder %v1099_v31, %v5420_v56 }
 0x186   : > { %vm1104_vm5 = vcmp.gt.f32.partialorder %v1099_v31, %v5423_v63  ;;  %vm1105_vm6 = vcmp.gt.f32.partialorder %v1099_v31, %v5435_v2  ;;  %vm1106_vm8 = vcmp.gt.f32.partialorder %v1099_v31, %v5438_v17  ;;  %vm1107_vm9 = vcmp.gt.f32.partialorder %v1099_v31, %v5441_v57 }
 0x187   : > { %v1108_v9 = vsel %vm1100_vm1, %v1099_v31, inf  ;;  %v1109_v10 = vsel %vm1101_vm2, %v1099_v31, inf  ;;  %v1110_v4 = vsel %vm1102_vm3, %v1099_v31, inf  ;;  %v1111_v14 = vsel %vm1103_vm4, %v1099_v31, inf }
 0x188   : > { %v1112_v26 = vsel %vm1104_vm5, %v1099_v31, inf  ;;  %v1113_v18 = vsel %vm1105_vm6, %v1099_v31, inf  ;;  %v1114_v19 = vsel %vm1106_vm8, %v1099_v31, inf  ;;  %v1115_v22 = vsel %vm1107_vm9, %v1099_v31, inf }
 0x189   : > { %v1116_v23 = vmin.f32 %v1088_v16, %v1108_v9  ;;  %v1117_v24 = vmin.f32 %v1089_v27, %v1109_v10  ;;  %v1118_v25 = vmin.f32 %v1090_v5, %v1110_v4  ;;  %v1119_v28 = vmin.f32 %v1091_v15, %v1111_v14 }
 0x18a   : > { %v1120_v29 = vmin.f32 %v1092_v3, %v1112_v26  ;;  %v1121_v61 = vmin.f32 %v1093_v8, %v1113_v18  ;;  %v1122_v36 = vmin.f32 %v1094_v21, %v1114_v19  ;;  %v1123_v37 = vmin.f32 %v1095_v43, %v1115_v22 }
 0x18b   : > { %vm1130_vm7 = vcmp.gt.f32.partialorder %v5571_v11, %v5402_v35  ;;  %vm1131_vm10 = vcmp.gt.f32.partialorder %v5571_v11, %v5405_v48  ;;  %vm1132_vm11 = vcmp.gt.f32.partialorder %v5571_v11, %v5417_v62  ;;  %vm1133_vm12 = vcmp.gt.f32.partialorder %v5571_v11, %v5420_v56 }
 0x18c   : > { %vm1134_vm13 = vcmp.gt.f32.partialorder %v5571_v11, %v5423_v63  ;;  %vm1135_vm14 = vcmp.gt.f32.partialorder %v5571_v11, %v5435_v2  ;;  %vm1136_vm15 = vcmp.gt.f32.partialorder %v5571_v11, %v5438_v17  ;;  %vm1137_vm0 = vcmp.gt.f32.partialorder %v5571_v11, %v5441_v57 }
 0x18d   : > { %v1138_v31 = vsel %vm1130_vm7, %v5571_v11, inf  ;;  %v1139_v39 = vsel %vm1131_vm10, %v5571_v11, inf  ;;  %v1140_v50 = vsel %vm1132_vm11, %v5571_v11, inf  ;;  %v1141_v12 = vsel %vm1133_vm12, %v5571_v11, inf }
 0x18e   : > { %v1142_v54 = vsel %vm1134_vm13, %v5571_v11, inf  ;;  %v1143_v33 = vsel %vm1135_vm14, %v5571_v11, inf  ;;  %v1144_v16 = vsel %vm1136_vm15, %v5571_v11, inf  ;;  %v1145_v27 = vsel %vm1137_vm0, %v5571_v11, inf }
 0x18f   : > { %v1146_v5 = vmin.f32 %v1116_v23, %v1138_v31  ;;  %v1147_v15 = vmin.f32 %v1117_v24, %v1139_v39  ;;  %v1148_v3 = vmin.f32 %v1118_v25, %v1140_v50  ;;  %v1149_v8 = vmin.f32 %v1119_v28, %v1141_v12 }
 0x190   : > { %v1150_v21 = vmin.f32 %v1120_v29, %v1142_v54  ;;  %v1151_v43 = vmin.f32 %v1121_v61, %v1143_v33  ;;  %v1152_v9 = vmin.f32 %v1122_v36, %v1144_v16  ;;  %v1153_v10 = vmin.f32 %v1123_v37, %v1145_v27 }
 0x191   : > { %vm1158_vm1 = vcmp.gt.f32.partialorder %v5575_v7, %v5402_v35  ;;  %vm1159_vm2 = vcmp.gt.f32.partialorder %v5575_v7, %v5405_v48  ;;  %vm1160_vm3 = vcmp.gt.f32.partialorder %v5575_v7, %v5417_v62  ;;  %vm1161_vm4 = vcmp.gt.f32.partialorder %v5575_v7, %v5420_v56 }
 0x192   : > { %vm1162_vm5 = vcmp.gt.f32.partialorder %v5575_v7, %v5423_v63  ;;  %vm1163_vm6 = vcmp.gt.f32.partialorder %v5575_v7, %v5435_v2  ;;  %vm1164_vm8 = vcmp.gt.f32.partialorder %v5575_v7, %v5438_v17  ;;  %vm1165_vm9 = vcmp.gt.f32.partialorder %v5575_v7, %v5441_v57 }
 0x193   : > { %v1166_v11 = vsel %vm1158_vm1, %v5575_v7, inf  ;;  %v1167_v4 = vsel %vm1159_vm2, %v5575_v7, inf  ;;  %v1168_v14 = vsel %vm1160_vm3, %v5575_v7, inf  ;;  %v1169_v26 = vsel %vm1161_vm4, %v5575_v7, inf }
 0x194   : > { %v1170_v18 = vsel %vm1162_vm5, %v5575_v7, inf  ;;  %v1171_v19 = vsel %vm1163_vm6, %v5575_v7, inf  ;;  %v1172_v22 = vsel %vm1164_vm8, %v5575_v7, inf  ;;  %v1173_v23 = vsel %vm1165_vm9, %v5575_v7, inf }
 0x195   : > { %v1174_v24 = vmin.f32 %v1146_v5, %v1166_v11  ;;  %v1175_v25 = vmin.f32 %v1147_v15, %v1167_v4  ;;  %v1176_v28 = vmin.f32 %v1148_v3, %v1168_v14  ;;  %v1177_v29 = vmin.f32 %v1149_v8, %v1169_v26 }
 0x196   : > { %v1178_v61 = vmin.f32 %v1150_v21, %v1170_v18  ;;  %v1179_v36 = vmin.f32 %v1151_v43, %v1171_v19  ;;  %v1180_v37 = vmin.f32 %v1152_v9, %v1172_v22  ;;  %v1181_v31 = vmin.f32 %v1153_v10, %v1173_v23 }
 0x197   : > { %vm1186_vm7 = vcmp.gt.f32.partialorder %v5579_v1, %v5402_v35  ;;  %vm1187_vm10 = vcmp.gt.f32.partialorder %v5579_v1, %v5405_v48  ;;  %vm1188_vm11 = vcmp.gt.f32.partialorder %v5579_v1, %v5417_v62  ;;  %vm1189_vm12 = vcmp.gt.f32.partialorder %v5579_v1, %v5420_v56 }
 0x198   : > { %vm1190_vm13 = vcmp.gt.f32.partialorder %v5579_v1, %v5423_v63  ;;  %vm1191_vm14 = vcmp.gt.f32.partialorder %v5579_v1, %v5435_v2  ;;  %vm1192_vm15 = vcmp.gt.f32.partialorder %v5579_v1, %v5438_v17  ;;  %vm1193_vm0 = vcmp.gt.f32.partialorder %v5579_v1, %v5441_v57 }
 0x199   : > { %v1194_v7 = vsel %vm1186_vm7, %v5579_v1, inf  ;;  %v1195_v39 = vsel %vm1187_vm10, %v5579_v1, inf  ;;  %v1196_v50 = vsel %vm1188_vm11, %v5579_v1, inf  ;;  %v1197_v12 = vsel %vm1189_vm12, %v5579_v1, inf }
 0x19a   : > { %v1198_v54 = vsel %vm1190_vm13, %v5579_v1, inf  ;;  %v1199_v33 = vsel %vm1191_vm14, %v5579_v1, inf  ;;  %v1200_v16 = vsel %vm1192_vm15, %v5579_v1, inf  ;;  %v1201_v27 = vsel %vm1193_vm0, %v5579_v1, inf }
 0x19b   : > { %v1202_v5 = vmin.f32 %v1174_v24, %v1194_v7  ;;  %v1203_v15 = vmin.f32 %v1175_v25, %v1195_v39  ;;  %v1204_v3 = vmin.f32 %v1176_v28, %v1196_v50  ;;  %v1205_v8 = vmin.f32 %v1177_v29, %v1197_v12 }
 0x19c   : > { %v1206_v21 = vmin.f32 %v1178_v61, %v1198_v54  ;;  %v1207_v43 = vmin.f32 %v1179_v36, %v1199_v33  ;;  %v1208_v9 = vmin.f32 %v1180_v37, %v1200_v16  ;;  %v1209_v10 = vmin.f32 %v1181_v31, %v1201_v27 }
 0x19d   : > { %vm1214_vm1 = vcmp.gt.f32.partialorder %v5583_v53, %v5402_v35  ;;  %vm1215_vm2 = vcmp.gt.f32.partialorder %v5583_v53, %v5405_v48  ;;  %vm1216_vm3 = vcmp.gt.f32.partialorder %v5583_v53, %v5417_v62  ;;  %vm1217_vm4 = vcmp.gt.f32.partialorder %v5583_v53, %v5420_v56 }
 0x19e   : > { %vm1218_vm5 = vcmp.gt.f32.partialorder %v5583_v53, %v5423_v63  ;;  %vm1219_vm6 = vcmp.gt.f32.partialorder %v5583_v53, %v5435_v2  ;;  %vm1220_vm8 = vcmp.gt.f32.partialorder %v5583_v53, %v5438_v17  ;;  %vm1221_vm9 = vcmp.gt.f32.partialorder %v5583_v53, %v5441_v57 }
 0x19f   : > { %v1222_v1 = vsel %vm1214_vm1, %v5583_v53, inf  ;;  %v1223_v11 = vsel %vm1215_vm2, %v5583_v53, inf  ;;  %v1224_v4 = vsel %vm1216_vm3, %v5583_v53, inf  ;;  %v1225_v14 = vsel %vm1217_vm4, %v5583_v53, inf }
 0x1a0   : > { %v1226_v26 = vsel %vm1218_vm5, %v5583_v53, inf  ;;  %v1227_v18 = vsel %vm1219_vm6, %v5583_v53, inf  ;;  %v1228_v19 = vsel %vm1220_vm8, %v5583_v53, inf  ;;  %v1229_v22 = vsel %vm1221_vm9, %v5583_v53, inf }
 0x1a1   : > { %v1230_v23 = vmin.f32 %v1202_v5, %v1222_v1  ;;  %v1231_v24 = vmin.f32 %v1203_v15, %v1223_v11  ;;  %v1232_v25 = vmin.f32 %v1204_v3, %v1224_v4  ;;  %v1233_v28 = vmin.f32 %v1205_v8, %v1225_v14 }
 0x1a2   : > { %v1234_v29 = vmin.f32 %v1206_v21, %v1226_v26  ;;  %v1235_v61 = vmin.f32 %v1207_v43, %v1227_v18  ;;  %v1236_v36 = vmin.f32 %v1208_v9, %v1228_v19  ;;  %v1237_v37 = vmin.f32 %v1209_v10, %v1229_v22  ;;  %v5753_v18 = vld [vmem:[#allocation3 + $0x10] sm:$0xff] }
 0x1a3   : > { %vm1242_vm7 = vcmp.gt.f32.partialorder %v5587_v32, %v5402_v35  ;;  %vm1243_vm10 = vcmp.gt.f32.partialorder %v5587_v32, %v5405_v48  ;;  %vm1244_vm11 = vcmp.gt.f32.partialorder %v5587_v32, %v5417_v62  ;;  %vm1245_vm12 = vcmp.gt.f32.partialorder %v5587_v32, %v5420_v56 }
 0x1a4   : > { %vm1246_vm13 = vcmp.gt.f32.partialorder %v5587_v32, %v5423_v63  ;;  %vm1247_vm14 = vcmp.gt.f32.partialorder %v5587_v32, %v5435_v2  ;;  %vm1248_vm15 = vcmp.gt.f32.partialorder %v5587_v32, %v5438_v17  ;;  %vm1249_vm0 = vcmp.gt.f32.partialorder %v5587_v32, %v5441_v57 }
 0x1a5   : > { %v1250_v53 = vsel %vm1242_vm7, %v5587_v32, inf  ;;  %v1251_v31 = vsel %vm1243_vm10, %v5587_v32, inf  ;;  %v1252_v7 = vsel %vm1244_vm11, %v5587_v32, inf  ;;  %v1253_v39 = vsel %vm1245_vm12, %v5587_v32, inf }
 0x1a6   : > { %v1254_v50 = vsel %vm1246_vm13, %v5587_v32, inf  ;;  %v1255_v12 = vsel %vm1247_vm14, %v5587_v32, inf  ;;  %v1256_v54 = vsel %vm1248_vm15, %v5587_v32, inf  ;;  %v1257_v33 = vsel %vm1249_vm0, %v5587_v32, inf }
 0x1a7   : > { %v1258_v16 = vmin.f32 %v1230_v23, %v1250_v53  ;;  %v1259_v27 = vmin.f32 %v1231_v24, %v1251_v31  ;;  %v1260_v5 = vmin.f32 %v1232_v25, %v1252_v7  ;;  %v1261_v15 = vmin.f32 %v1233_v28, %v1253_v39 }
 0x1a8   : > { %v1262_v3 = vmin.f32 %v1234_v29, %v1254_v50  ;;  %v1263_v8 = vmin.f32 %v1235_v61, %v1255_v12  ;;  %v1264_v21 = vmin.f32 %v1236_v36, %v1256_v54  ;;  %v1265_v43 = vmin.f32 %v1237_v37, %v1257_v33 }
 0x1a9   : > { %vm1270_vm1 = vcmp.gt.f32.partialorder %v5591_v51, %v5402_v35  ;;  %vm1271_vm2 = vcmp.gt.f32.partialorder %v5591_v51, %v5405_v48  ;;  %vm1272_vm3 = vcmp.gt.f32.partialorder %v5591_v51, %v5417_v62  ;;  %vm1273_vm4 = vcmp.gt.f32.partialorder %v5591_v51, %v5420_v56 }
 0x1aa   : > { %vm1274_vm5 = vcmp.gt.f32.partialorder %v5591_v51, %v5423_v63  ;;  %vm1275_vm6 = vcmp.gt.f32.partialorder %v5591_v51, %v5435_v2  ;;  %vm1276_vm8 = vcmp.gt.f32.partialorder %v5591_v51, %v5438_v17  ;;  %vm1277_vm9 = vcmp.gt.f32.partialorder %v5591_v51, %v5441_v57 }
 0x1ab   : > { %v1278_v32 = vsel %vm1270_vm1, %v5591_v51, inf  ;;  %v1279_v9 = vsel %vm1271_vm2, %v5591_v51, inf  ;;  %v1280_v10 = vsel %vm1272_vm3, %v5591_v51, inf  ;;  %v1281_v1 = vsel %vm1273_vm4, %v5591_v51, inf }
 0x1ac   : > { %v1282_v11 = vsel %vm1274_vm5, %v5591_v51, inf  ;;  %v1283_v4 = vsel %vm1275_vm6, %v5591_v51, inf  ;;  %v1284_v14 = vsel %vm1276_vm8, %v5591_v51, inf  ;;  %v1285_v26 = vsel %vm1277_vm9, %v5591_v51, inf }
 0x1ad   : > { %v1286_v19 = vmin.f32 %v1258_v16, %v1278_v32  ;;  %v1287_v22 = vmin.f32 %v1259_v27, %v1279_v9  ;;  %v1288_v23 = vmin.f32 %v1260_v5, %v1280_v10  ;;  %v1289_v24 = vmin.f32 %v1261_v15, %v1281_v1 }
 0x1ae   : > { %v1290_v25 = vmin.f32 %v1262_v3, %v1282_v11  ;;  %v1291_v28 = vmin.f32 %v1263_v8, %v1283_v4  ;;  %v1292_v29 = vmin.f32 %v1264_v21, %v1284_v14  ;;  %v1293_v61 = vmin.f32 %v1265_v43, %v1285_v26 }
 0x1af   : > { %v1297_v36 = vrot.slane %v5563_v20, %v5450_v60  ;;  %v1325_v37 = vrot.slane %v5563_v20, %v5465_v45  ;;  %v5761_v53 = vrot.slane %v5753_v18, %v5408_v55  ;;  %v5765_v51 = vrot.slane %v5753_v18, %v5411_v58 }
 0x1b0   : > { %v5769_v31 = vrot.slane %v5753_v18, %v5414_v59  ;;  %v5773_v7 = vrot.slane %v5753_v18, %v5426_v44  ;;  %v5777_v39 = vrot.slane %v5753_v18, %v5429_v46  ;;  %v5781_v20 = vrot.slane %v5753_v18, %v5432_v49 }
 0x1b1   : > { %vm1298_vm7 = vcmp.gt.f32.partialorder %v1297_v36, %v5402_v35  ;;  %vm1299_vm10 = vcmp.gt.f32.partialorder %v1297_v36, %v5405_v48  ;;  %vm1300_vm11 = vcmp.gt.f32.partialorder %v1297_v36, %v5417_v62  ;;  %vm1301_vm12 = vcmp.gt.f32.partialorder %v1297_v36, %v5420_v56 }
 0x1b2   : > { %vm1302_vm13 = vcmp.gt.f32.partialorder %v1297_v36, %v5423_v63  ;;  %vm1303_vm14 = vcmp.gt.f32.partialorder %v1297_v36, %v5435_v2  ;;  %vm1304_vm15 = vcmp.gt.f32.partialorder %v1297_v36, %v5438_v17  ;;  %vm1305_vm0 = vcmp.gt.f32.partialorder %v1297_v36, %v5441_v57 }
 0x1b3   : > { %v1306_v50 = vsel %vm1298_vm7, %v1297_v36, inf  ;;  %v1307_v12 = vsel %vm1299_vm10, %v1297_v36, inf  ;;  %v1308_v54 = vsel %vm1300_vm11, %v1297_v36, inf  ;;  %v1309_v33 = vsel %vm1301_vm12, %v1297_v36, inf }
 0x1b4   : > { %v1310_v16 = vsel %vm1302_vm13, %v1297_v36, inf  ;;  %v1311_v27 = vsel %vm1303_vm14, %v1297_v36, inf  ;;  %v1312_v5 = vsel %vm1304_vm15, %v1297_v36, inf  ;;  %v1313_v15 = vsel %vm1305_vm0, %v1297_v36, inf }
 0x1b5   : > { %v1314_v3 = vmin.f32 %v1286_v19, %v1306_v50  ;;  %v1315_v8 = vmin.f32 %v1287_v22, %v1307_v12  ;;  %v1316_v21 = vmin.f32 %v1288_v23, %v1308_v54  ;;  %v1317_v43 = vmin.f32 %v1289_v24, %v1309_v33 }
 0x1b6   : > { %v1318_v32 = vmin.f32 %v1290_v25, %v1310_v16  ;;  %v1319_v9 = vmin.f32 %v1291_v28, %v1311_v27  ;;  %v1320_v10 = vmin.f32 %v1292_v29, %v1312_v5  ;;  %v1321_v1 = vmin.f32 %v1293_v61, %v1313_v15 }
 0x1b7   : > { %vm1326_vm1 = vcmp.gt.f32.partialorder %v1325_v37, %v5402_v35  ;;  %vm1327_vm2 = vcmp.gt.f32.partialorder %v1325_v37, %v5405_v48  ;;  %vm1328_vm3 = vcmp.gt.f32.partialorder %v1325_v37, %v5417_v62  ;;  %vm1329_vm4 = vcmp.gt.f32.partialorder %v1325_v37, %v5420_v56 }
 0x1b8   : > { %vm1330_vm5 = vcmp.gt.f32.partialorder %v1325_v37, %v5423_v63  ;;  %vm1331_vm6 = vcmp.gt.f32.partialorder %v1325_v37, %v5435_v2  ;;  %vm1332_vm8 = vcmp.gt.f32.partialorder %v1325_v37, %v5438_v17  ;;  %vm1333_vm9 = vcmp.gt.f32.partialorder %v1325_v37, %v5441_v57 }
 0x1b9   : > { %v1334_v11 = vsel %vm1326_vm1, %v1325_v37, inf  ;;  %v1335_v4 = vsel %vm1327_vm2, %v1325_v37, inf  ;;  %v1336_v14 = vsel %vm1328_vm3, %v1325_v37, inf  ;;  %v1337_v26 = vsel %vm1329_vm4, %v1325_v37, inf }
 0x1ba   : > { %v1338_v19 = vsel %vm1330_vm5, %v1325_v37, inf  ;;  %v1339_v22 = vsel %vm1331_vm6, %v1325_v37, inf  ;;  %v1340_v23 = vsel %vm1332_vm8, %v1325_v37, inf  ;;  %v1341_v24 = vsel %vm1333_vm9, %v1325_v37, inf }
 0x1bb   : > { %v1342_v25 = vmin.f32 %v1314_v3, %v1334_v11  ;;  %v1343_v28 = vmin.f32 %v1315_v8, %v1335_v4  ;;  %v1344_v29 = vmin.f32 %v1316_v21, %v1336_v14  ;;  %v1345_v61 = vmin.f32 %v1317_v43, %v1337_v26 }
 0x1bc   : > { %v1346_v36 = vmin.f32 %v1318_v32, %v1338_v19  ;;  %v1347_v50 = vmin.f32 %v1319_v9, %v1339_v22  ;;  %v1348_v12 = vmin.f32 %v1320_v10, %v1340_v23  ;;  %v1349_v54 = vmin.f32 %v1321_v1, %v1341_v24 }
 0x1bd   : > { %vm1356_vm7 = vcmp.gt.f32.partialorder %v5761_v53, %v5402_v35  ;;  %vm1357_vm10 = vcmp.gt.f32.partialorder %v5761_v53, %v5405_v48  ;;  %vm1358_vm11 = vcmp.gt.f32.partialorder %v5761_v53, %v5417_v62  ;;  %vm1359_vm12 = vcmp.gt.f32.partialorder %v5761_v53, %v5420_v56 }
 0x1be   : > { %vm1360_vm13 = vcmp.gt.f32.partialorder %v5761_v53, %v5423_v63  ;;  %vm1361_vm14 = vcmp.gt.f32.partialorder %v5761_v53, %v5435_v2  ;;  %vm1362_vm15 = vcmp.gt.f32.partialorder %v5761_v53, %v5438_v17  ;;  %vm1363_vm0 = vcmp.gt.f32.partialorder %v5761_v53, %v5441_v57 }
 0x1bf   : > { %v1364_v37 = vsel %vm1356_vm7, %v5761_v53, inf  ;;  %v1365_v33 = vsel %vm1357_vm10, %v5761_v53, inf  ;;  %v1366_v16 = vsel %vm1358_vm11, %v5761_v53, inf  ;;  %v1367_v27 = vsel %vm1359_vm12, %v5761_v53, inf }
 0x1c0   : > { %v1368_v5 = vsel %vm1360_vm13, %v5761_v53, inf  ;;  %v1369_v15 = vsel %vm1361_vm14, %v5761_v53, inf  ;;  %v1370_v3 = vsel %vm1362_vm15, %v5761_v53, inf  ;;  %v1371_v8 = vsel %vm1363_vm0, %v5761_v53, inf }
 0x1c1   : > { %v1372_v21 = vmin.f32 %v1342_v25, %v1364_v37  ;;  %v1373_v43 = vmin.f32 %v1343_v28, %v1365_v33  ;;  %v1374_v32 = vmin.f32 %v1344_v29, %v1366_v16  ;;  %v1375_v9 = vmin.f32 %v1345_v61, %v1367_v27 }
 0x1c2   : > { %v1376_v10 = vmin.f32 %v1346_v36, %v1368_v5  ;;  %v1377_v1 = vmin.f32 %v1347_v50, %v1369_v15  ;;  %v1378_v11 = vmin.f32 %v1348_v12, %v1370_v3  ;;  %v1379_v4 = vmin.f32 %v1349_v54, %v1371_v8 }
 0x1c3   : > { %vm1384_vm1 = vcmp.gt.f32.partialorder %v5765_v51, %v5402_v35  ;;  %vm1385_vm2 = vcmp.gt.f32.partialorder %v5765_v51, %v5405_v48  ;;  %vm1386_vm3 = vcmp.gt.f32.partialorder %v5765_v51, %v5417_v62  ;;  %vm1387_vm4 = vcmp.gt.f32.partialorder %v5765_v51, %v5420_v56 }
 0x1c4   : > { %vm1388_vm5 = vcmp.gt.f32.partialorder %v5765_v51, %v5423_v63  ;;  %vm1389_vm6 = vcmp.gt.f32.partialorder %v5765_v51, %v5435_v2  ;;  %vm1390_vm8 = vcmp.gt.f32.partialorder %v5765_v51, %v5438_v17  ;;  %vm1391_vm9 = vcmp.gt.f32.partialorder %v5765_v51, %v5441_v57 }
 0x1c5   : > { %v1392_v53 = vsel %vm1384_vm1, %v5765_v51, inf  ;;  %v1393_v14 = vsel %vm1385_vm2, %v5765_v51, inf  ;;  %v1394_v26 = vsel %vm1386_vm3, %v5765_v51, inf  ;;  %v1395_v19 = vsel %vm1387_vm4, %v5765_v51, inf }
 0x1c6   : > { %v1396_v22 = vsel %vm1388_vm5, %v5765_v51, inf  ;;  %v1397_v23 = vsel %vm1389_vm6, %v5765_v51, inf  ;;  %v1398_v24 = vsel %vm1390_vm8, %v5765_v51, inf  ;;  %v1399_v25 = vsel %vm1391_vm9, %v5765_v51, inf }
 0x1c7   : > { %v1400_v28 = vmin.f32 %v1372_v21, %v1392_v53  ;;  %v1401_v29 = vmin.f32 %v1373_v43, %v1393_v14  ;;  %v1402_v61 = vmin.f32 %v1374_v32, %v1394_v26  ;;  %v1403_v36 = vmin.f32 %v1375_v9, %v1395_v19 }
 0x1c8   : > { %v1404_v50 = vmin.f32 %v1376_v10, %v1396_v22  ;;  %v1405_v12 = vmin.f32 %v1377_v1, %v1397_v23  ;;  %v1406_v54 = vmin.f32 %v1378_v11, %v1398_v24  ;;  %v1407_v37 = vmin.f32 %v1379_v4, %v1399_v25 }
 0x1c9   : > { %vm1412_vm7 = vcmp.gt.f32.partialorder %v5769_v31, %v5402_v35  ;;  %vm1413_vm10 = vcmp.gt.f32.partialorder %v5769_v31, %v5405_v48  ;;  %vm1414_vm11 = vcmp.gt.f32.partialorder %v5769_v31, %v5417_v62  ;;  %vm1415_vm12 = vcmp.gt.f32.partialorder %v5769_v31, %v5420_v56 }
 0x1ca   : > { %vm1416_vm13 = vcmp.gt.f32.partialorder %v5769_v31, %v5423_v63  ;;  %vm1417_vm14 = vcmp.gt.f32.partialorder %v5769_v31, %v5435_v2  ;;  %vm1418_vm15 = vcmp.gt.f32.partialorder %v5769_v31, %v5438_v17  ;;  %vm1419_vm0 = vcmp.gt.f32.partialorder %v5769_v31, %v5441_v57 }
 0x1cb   : > { %v1420_v51 = vsel %vm1412_vm7, %v5769_v31, inf  ;;  %v1421_v33 = vsel %vm1413_vm10, %v5769_v31, inf  ;;  %v1422_v16 = vsel %vm1414_vm11, %v5769_v31, inf  ;;  %v1423_v27 = vsel %vm1415_vm12, %v5769_v31, inf }
 0x1cc   : > { %v1424_v5 = vsel %vm1416_vm13, %v5769_v31, inf  ;;  %v1425_v15 = vsel %vm1417_vm14, %v5769_v31, inf  ;;  %v1426_v3 = vsel %vm1418_vm15, %v5769_v31, inf  ;;  %v1427_v8 = vsel %vm1419_vm0, %v5769_v31, inf }
 0x1cd   : > { %v1428_v21 = vmin.f32 %v1400_v28, %v1420_v51  ;;  %v1429_v43 = vmin.f32 %v1401_v29, %v1421_v33  ;;  %v1430_v32 = vmin.f32 %v1402_v61, %v1422_v16  ;;  %v1431_v9 = vmin.f32 %v1403_v36, %v1423_v27 }
 0x1ce   : > { %v1432_v10 = vmin.f32 %v1404_v50, %v1424_v5  ;;  %v1433_v1 = vmin.f32 %v1405_v12, %v1425_v15  ;;  %v1434_v11 = vmin.f32 %v1406_v54, %v1426_v3  ;;  %v1435_v4 = vmin.f32 %v1407_v37, %v1427_v8  ;;  %v5896_v12 = vld [vmem:[%s5399_s20] sm:$0xff]  ;;  %v5901_v54 = vld [vmem:[%s5399_s20 + $0x8] sm:$0xff] }
 0x1cf   : > { %vm1440_vm1 = vcmp.gt.f32.partialorder %v5773_v7, %v5402_v35  ;;  %vm1441_vm2 = vcmp.gt.f32.partialorder %v5773_v7, %v5405_v48  ;;  %vm1442_vm3 = vcmp.gt.f32.partialorder %v5773_v7, %v5417_v62  ;;  %vm1443_vm4 = vcmp.gt.f32.partialorder %v5773_v7, %v5420_v56 }
 0x1d0   : > { %vm1444_vm5 = vcmp.gt.f32.partialorder %v5773_v7, %v5423_v63  ;;  %vm1445_vm6 = vcmp.gt.f32.partialorder %v5773_v7, %v5435_v2  ;;  %vm1446_vm8 = vcmp.gt.f32.partialorder %v5773_v7, %v5438_v17  ;;  %vm1447_vm9 = vcmp.gt.f32.partialorder %v5773_v7, %v5441_v57 }
 0x1d1   : > { %v1448_v35 = vsel %vm1440_vm1, %v5773_v7, inf  ;;  %v1449_v48 = vsel %vm1441_vm2, %v5773_v7, inf  ;;  %v1450_v31 = vsel %vm1442_vm3, %v5773_v7, inf  ;;  %v1451_v53 = vsel %vm1443_vm4, %v5773_v7, inf }
 0x1d2   : > { %v1452_v14 = vsel %vm1444_vm5, %v5773_v7, inf  ;;  %v1453_v26 = vsel %vm1445_vm6, %v5773_v7, inf  ;;  %v1454_v19 = vsel %vm1446_vm8, %v5773_v7, inf  ;;  %v1455_v22 = vsel %vm1447_vm9, %v5773_v7, inf }
 0x1d3   : > { %v1456_v23 = vmin.f32 %v1428_v21, %v1448_v35  ;;  %v1457_v24 = vmin.f32 %v1429_v43, %v1449_v48  ;;  %v1458_v25 = vmin.f32 %v1430_v32, %v1450_v31  ;;  %v1459_v28 = vmin.f32 %v1431_v9, %v1451_v53  ;;  %v5951_v21 = vld [vmem:[%s5399_s20 + $0x18] sm:$0xff]  ;;  %v5956_v43 = vld [vmem:[%s5399_s20 + $0x20] sm:$0xff]  ;;  %v5961_v32 = vld [vmem:[%s5399_s20 + $0x28] sm:$0xff] }
 0x1d4   : > { %v1460_v29 = vmin.f32 %v1432_v10, %v1452_v14  ;;  %v1461_v61 = vmin.f32 %v1433_v1, %v1453_v26  ;;  %v1462_v36 = vmin.f32 %v1434_v11, %v1454_v19  ;;  %v1463_v50 = vmin.f32 %v1435_v4, %v1455_v22  ;;  %v5966_v9 = vld [vmem:[%s5399_s20 + $0x30] sm:$0xff]  ;;  %v5971_v10 = vld [vmem:[%s5399_s20 + $0x38] sm:$0xff] }
 0x1d5   : > { %vm1468_vm7 = vcmp.gt.f32.partialorder %v5777_v39, %v5896_v12  ;;  %vm1469_vm10 = vcmp.gt.f32.partialorder %v5777_v39, %v5901_v54  ;;  %vm1470_vm11 = vcmp.gt.f32.partialorder %v5777_v39, %v5417_v62  ;;  %vm1471_vm12 = vcmp.gt.f32.partialorder %v5777_v39, %v5420_v56  ;;  %v5983_v26 = vld [vmem:[#allocation3 + $0x18] sm:$0xff] }
 0x1d6   : > { %vm1472_vm13 = vcmp.gt.f32.partialorder %v5777_v39, %v5423_v63  ;;  %vm1473_vm14 = vcmp.gt.f32.partialorder %v5777_v39, %v5435_v2  ;;  %vm1474_vm15 = vcmp.gt.f32.partialorder %v5777_v39, %v5438_v17  ;;  %vm1475_vm0 = vcmp.gt.f32.partialorder %v5777_v39, %v5441_v57 }
 0x1d7   : > { %v1476_v7 = vsel %vm1468_vm7, %v5777_v39, inf  ;;  %v1477_v37 = vsel %vm1469_vm10, %v5777_v39, inf  ;;  %v1478_v62 = vsel %vm1470_vm11, %v5777_v39, inf  ;;  %v1479_v56 = vsel %vm1471_vm12, %v5777_v39, inf }
 0x1d8   : > { %v1480_v63 = vsel %vm1472_vm13, %v5777_v39, inf  ;;  %v1481_v2 = vsel %vm1473_vm14, %v5777_v39, inf  ;;  %v1482_v51 = vsel %vm1474_vm15, %v5777_v39, inf  ;;  %v1483_v17 = vsel %vm1475_vm0, %v5777_v39, inf  ;;  %v5946_v39 = vld [vmem:[%s5399_s20 + $0x10] sm:$0xff] }
 0x1d9   : > { %v5925_v57 = vmin.f32 %v1456_v23, %v1476_v7  ;;  %v5927_v33 = vmin.f32 %v1457_v24, %v1477_v37  ;;  %v5929_v16 = vmin.f32 %v1458_v25, %v1478_v62  ;;  %v5931_v27 = vmin.f32 %v1459_v28, %v1479_v56 }
 0x1da   : > { %v5933_v5 = vmin.f32 %v1460_v29, %v1480_v63  ;;  %v5935_v15 = vmin.f32 %v1461_v61, %v1481_v2  ;;  %v5937_v3 = vmin.f32 %v1462_v36, %v1482_v51  ;;  %v5939_v8 = vmin.f32 %v1463_v50, %v1483_v17 }
 0x1db   : > { %vm1496_vm1 = vcmp.gt.f32.partialorder %v5781_v20, %v5896_v12  ;;  %vm1497_vm2 = vcmp.gt.f32.partialorder %v5781_v20, %v5901_v54  ;;  %vm1498_vm3 = vcmp.gt.f32.partialorder %v5781_v20, %v5946_v39  ;;  %vm1499_vm4 = vcmp.gt.f32.partialorder %v5781_v20, %v5951_v21 }
 0x1dc   : > { %vm1500_vm5 = vcmp.gt.f32.partialorder %v5781_v20, %v5956_v43  ;;  %vm1501_vm6 = vcmp.gt.f32.partialorder %v5781_v20, %v5961_v32  ;;  %vm1502_vm8 = vcmp.gt.f32.partialorder %v5781_v20, %v5966_v9  ;;  %vm1503_vm9 = vcmp.gt.f32.partialorder %v5781_v20, %v5971_v10 }
 0x1dd   : > { %v1504_v1 = vsel %vm1496_vm1, %v5781_v20, inf  ;;  %v1505_v11 = vsel %vm1497_vm2, %v5781_v20, inf  ;;  %v1506_v4 = vsel %vm1498_vm3, %v5781_v20, inf  ;;  %v1507_v35 = vsel %vm1499_vm4, %v5781_v20, inf }
 0x1de   : > { %v1508_v48 = vsel %vm1500_vm5, %v5781_v20, inf  ;;  %v1509_v31 = vsel %vm1501_vm6, %v5781_v20, inf  ;;  %v1510_v53 = vsel %vm1502_vm8, %v5781_v20, inf  ;;  %v1511_v14 = vsel %vm1503_vm9, %v5781_v20, inf }
 0x1df   : > { %v1512_v19 = vmin.f32 %v5925_v57, %v1504_v1  ;;  %v1513_v22 = vmin.f32 %v5927_v33, %v1505_v11  ;;  %v1514_v23 = vmin.f32 %v5929_v16, %v1506_v4  ;;  %v1515_v24 = vmin.f32 %v5931_v27, %v1507_v35 }
 0x1e0   : > { %v1516_v25 = vmin.f32 %v5933_v5, %v1508_v48  ;;  %v1517_v28 = vmin.f32 %v5935_v15, %v1509_v31  ;;  %v1518_v29 = vmin.f32 %v5937_v3, %v1510_v53  ;;  %v1519_v61 = vmin.f32 %v5939_v8, %v1511_v14 }
 0x1e1   : > { %v1523_v20 = vrot.slane %v5753_v18, %v5450_v60  ;;  %v1551_v36 = vrot.slane %v5753_v18, %v5465_v45  ;;  %v5999_v50 = vrot.slane %v5983_v26, %v5408_v55  ;;  %v6003_v7 = vrot.slane %v5983_v26, %v5411_v58 }
 0x1e2   : > { %v6007_v37 = vrot.slane %v5983_v26, %v5414_v59  ;;  %v6011_v62 = vrot.slane %v5983_v26, %v5426_v44  ;;  %v6015_v56 = vrot.slane %v5983_v26, %v5429_v46  ;;  %v6019_v18 = vrot.slane %v5983_v26, %v5432_v49 }
 0x1e3   : > { %vm1524_vm7 = vcmp.gt.f32.partialorder %v1523_v20, %v5896_v12  ;;  %vm1525_vm10 = vcmp.gt.f32.partialorder %v1523_v20, %v5901_v54  ;;  %vm1526_vm11 = vcmp.gt.f32.partialorder %v1523_v20, %v5946_v39  ;;  %vm1527_vm12 = vcmp.gt.f32.partialorder %v1523_v20, %v5951_v21 }
 0x1e4   : > { %vm1528_vm13 = vcmp.gt.f32.partialorder %v1523_v20, %v5956_v43  ;;  %vm1529_vm14 = vcmp.gt.f32.partialorder %v1523_v20, %v5961_v32  ;;  %vm1530_vm15 = vcmp.gt.f32.partialorder %v1523_v20, %v5966_v9  ;;  %vm1531_vm0 = vcmp.gt.f32.partialorder %v1523_v20, %v5971_v10 }
 0x1e5   : > { %v1532_v63 = vsel %vm1524_vm7, %v1523_v20, inf  ;;  %v1533_v2 = vsel %vm1525_vm10, %v1523_v20, inf  ;;  %v1534_v51 = vsel %vm1526_vm11, %v1523_v20, inf  ;;  %v1535_v17 = vsel %vm1527_vm12, %v1523_v20, inf }
 0x1e6   : > { %v1536_v57 = vsel %vm1528_vm13, %v1523_v20, inf  ;;  %v1537_v33 = vsel %vm1529_vm14, %v1523_v20, inf  ;;  %v1538_v16 = vsel %vm1530_vm15, %v1523_v20, inf  ;;  %v1539_v27 = vsel %vm1531_vm0, %v1523_v20, inf }
 0x1e7   : > { %v1540_v5 = vmin.f32 %v1512_v19, %v1532_v63  ;;  %v1541_v15 = vmin.f32 %v1513_v22, %v1533_v2  ;;  %v1542_v3 = vmin.f32 %v1514_v23, %v1534_v51  ;;  %v1543_v8 = vmin.f32 %v1515_v24, %v1535_v17 }
 0x1e8   : > { %v1544_v1 = vmin.f32 %v1516_v25, %v1536_v57  ;;  %v1545_v11 = vmin.f32 %v1517_v28, %v1537_v33  ;;  %v1546_v4 = vmin.f32 %v1518_v29, %v1538_v16  ;;  %v1547_v35 = vmin.f32 %v1519_v61, %v1539_v27 }
 0x1e9   : > { %vm1552_vm1 = vcmp.gt.f32.partialorder %v1551_v36, %v5896_v12  ;;  %vm1553_vm2 = vcmp.gt.f32.partialorder %v1551_v36, %v5901_v54  ;;  %vm1554_vm3 = vcmp.gt.f32.partialorder %v1551_v36, %v5946_v39  ;;  %vm1555_vm4 = vcmp.gt.f32.partialorder %v1551_v36, %v5951_v21 }
 0x1ea   : > { %vm1556_vm5 = vcmp.gt.f32.partialorder %v1551_v36, %v5956_v43  ;;  %vm1557_vm6 = vcmp.gt.f32.partialorder %v1551_v36, %v5961_v32  ;;  %vm1558_vm8 = vcmp.gt.f32.partialorder %v1551_v36, %v5966_v9  ;;  %vm1559_vm9 = vcmp.gt.f32.partialorder %v1551_v36, %v5971_v10 }
 0x1eb   : > { %v1560_v48 = vsel %vm1552_vm1, %v1551_v36, inf  ;;  %v1561_v31 = vsel %vm1553_vm2, %v1551_v36, inf  ;;  %v1562_v53 = vsel %vm1554_vm3, %v1551_v36, inf  ;;  %v1563_v14 = vsel %vm1555_vm4, %v1551_v36, inf }
 0x1ec   : > { %v1564_v19 = vsel %vm1556_vm5, %v1551_v36, inf  ;;  %v1565_v22 = vsel %vm1557_vm6, %v1551_v36, inf  ;;  %v1566_v23 = vsel %vm1558_vm8, %v1551_v36, inf  ;;  %v1567_v24 = vsel %vm1559_vm9, %v1551_v36, inf }
 0x1ed   : > { %v1568_v25 = vmin.f32 %v1540_v5, %v1560_v48  ;;  %v1569_v28 = vmin.f32 %v1541_v15, %v1561_v31  ;;  %v1570_v29 = vmin.f32 %v1542_v3, %v1562_v53  ;;  %v1571_v61 = vmin.f32 %v1543_v8, %v1563_v14 }
 0x1ee   : > { %v1572_v20 = vmin.f32 %v1544_v1, %v1564_v19  ;;  %v1573_v63 = vmin.f32 %v1545_v11, %v1565_v22  ;;  %v1574_v2 = vmin.f32 %v1546_v4, %v1566_v23  ;;  %v1575_v51 = vmin.f32 %v1547_v35, %v1567_v24 }
 0x1ef   : > { %vm1582_vm7 = vcmp.gt.f32.partialorder %v5999_v50, %v5896_v12  ;;  %vm1583_vm10 = vcmp.gt.f32.partialorder %v5999_v50, %v5901_v54  ;;  %vm1584_vm11 = vcmp.gt.f32.partialorder %v5999_v50, %v5946_v39  ;;  %vm1585_vm12 = vcmp.gt.f32.partialorder %v5999_v50, %v5951_v21 }
 0x1f0   : > { %vm1586_vm13 = vcmp.gt.f32.partialorder %v5999_v50, %v5956_v43  ;;  %vm1587_vm14 = vcmp.gt.f32.partialorder %v5999_v50, %v5961_v32  ;;  %vm1588_vm15 = vcmp.gt.f32.partialorder %v5999_v50, %v5966_v9  ;;  %vm1589_vm0 = vcmp.gt.f32.partialorder %v5999_v50, %v5971_v10 }
 0x1f1   : > { %v1590_v36 = vsel %vm1582_vm7, %v5999_v50, inf  ;;  %v1591_v17 = vsel %vm1583_vm10, %v5999_v50, inf  ;;  %v1592_v57 = vsel %vm1584_vm11, %v5999_v50, inf  ;;  %v1593_v33 = vsel %vm1585_vm12, %v5999_v50, inf }
 0x1f2   : > { %v1594_v16 = vsel %vm1586_vm13, %v5999_v50, inf  ;;  %v1595_v27 = vsel %vm1587_vm14, %v5999_v50, inf  ;;  %v1596_v5 = vsel %vm1588_vm15, %v5999_v50, inf  ;;  %v1597_v15 = vsel %vm1589_vm0, %v5999_v50, inf }
 0x1f3   : > { %v1598_v3 = vmin.f32 %v1568_v25, %v1590_v36  ;;  %v1599_v8 = vmin.f32 %v1569_v28, %v1591_v17  ;;  %v1600_v1 = vmin.f32 %v1570_v29, %v1592_v57  ;;  %v1601_v11 = vmin.f32 %v1571_v61, %v1593_v33 }
 0x1f4   : > { %v1602_v4 = vmin.f32 %v1572_v20, %v1594_v16  ;;  %v1603_v35 = vmin.f32 %v1573_v63, %v1595_v27  ;;  %v1604_v48 = vmin.f32 %v1574_v2, %v1596_v5  ;;  %v1605_v31 = vmin.f32 %v1575_v51, %v1597_v15 }
 0x1f5   : > { %vm1610_vm1 = vcmp.gt.f32.partialorder %v6003_v7, %v5896_v12  ;;  %vm1611_vm2 = vcmp.gt.f32.partialorder %v6003_v7, %v5901_v54  ;;  %vm1612_vm3 = vcmp.gt.f32.partialorder %v6003_v7, %v5946_v39  ;;  %vm1613_vm4 = vcmp.gt.f32.partialorder %v6003_v7, %v5951_v21 }
 0x1f6   : > { %vm1614_vm5 = vcmp.gt.f32.partialorder %v6003_v7, %v5956_v43  ;;  %vm1615_vm6 = vcmp.gt.f32.partialorder %v6003_v7, %v5961_v32  ;;  %vm1616_vm8 = vcmp.gt.f32.partialorder %v6003_v7, %v5966_v9  ;;  %vm1617_vm9 = vcmp.gt.f32.partialorder %v6003_v7, %v5971_v10 }
 0x1f7   : > { %v1618_v50 = vsel %vm1610_vm1, %v6003_v7, inf  ;;  %v1619_v53 = vsel %vm1611_vm2, %v6003_v7, inf  ;;  %v1620_v14 = vsel %vm1612_vm3, %v6003_v7, inf  ;;  %v1621_v19 = vsel %vm1613_vm4, %v6003_v7, inf }
 0x1f8   : > { %v1622_v22 = vsel %vm1614_vm5, %v6003_v7, inf  ;;  %v1623_v23 = vsel %vm1615_vm6, %v6003_v7, inf  ;;  %v1624_v24 = vsel %vm1616_vm8, %v6003_v7, inf  ;;  %v1625_v25 = vsel %vm1617_vm9, %v6003_v7, inf }
 0x1f9   : > { %v1626_v28 = vmin.f32 %v1598_v3, %v1618_v50  ;;  %v1627_v29 = vmin.f32 %v1599_v8, %v1619_v53  ;;  %v1628_v61 = vmin.f32 %v1600_v1, %v1620_v14  ;;  %v1629_v20 = vmin.f32 %v1601_v11, %v1621_v19 }
 0x1fa   : > { %v1630_v63 = vmin.f32 %v1602_v4, %v1622_v22  ;;  %v1631_v2 = vmin.f32 %v1603_v35, %v1623_v23  ;;  %v1632_v51 = vmin.f32 %v1604_v48, %v1624_v24  ;;  %v1633_v36 = vmin.f32 %v1605_v31, %v1625_v25 }
 0x1fb   : > { %vm1638_vm7 = vcmp.gt.f32.partialorder %v6007_v37, %v5896_v12  ;;  %vm1639_vm10 = vcmp.gt.f32.partialorder %v6007_v37, %v5901_v54  ;;  %vm1640_vm11 = vcmp.gt.f32.partialorder %v6007_v37, %v5946_v39  ;;  %vm1641_vm12 = vcmp.gt.f32.partialorder %v6007_v37, %v5951_v21 }
 0x1fc   : > { %vm1642_vm13 = vcmp.gt.f32.partialorder %v6007_v37, %v5956_v43  ;;  %vm1643_vm14 = vcmp.gt.f32.partialorder %v6007_v37, %v5961_v32  ;;  %vm1644_vm15 = vcmp.gt.f32.partialorder %v6007_v37, %v5966_v9  ;;  %vm1645_vm0 = vcmp.gt.f32.partialorder %v6007_v37, %v5971_v10 }
 0x1fd   : > { %v1646_v7 = vsel %vm1638_vm7, %v6007_v37, inf  ;;  %v1647_v17 = vsel %vm1639_vm10, %v6007_v37, inf  ;;  %v1648_v57 = vsel %vm1640_vm11, %v6007_v37, inf  ;;  %v1649_v33 = vsel %vm1641_vm12, %v6007_v37, inf }
 0x1fe   : > { %v1650_v16 = vsel %vm1642_vm13, %v6007_v37, inf  ;;  %v1651_v27 = vsel %vm1643_vm14, %v6007_v37, inf  ;;  %v1652_v5 = vsel %vm1644_vm15, %v6007_v37, inf  ;;  %v1653_v15 = vsel %vm1645_vm0, %v6007_v37, inf }
 0x1ff   : > { %v1654_v3 = vmin.f32 %v1626_v28, %v1646_v7  ;;  %v1655_v8 = vmin.f32 %v1627_v29, %v1647_v17  ;;  %v1656_v1 = vmin.f32 %v1628_v61, %v1648_v57  ;;  %v1657_v11 = vmin.f32 %v1629_v20, %v1649_v33 }
 0x200   : > { %v1658_v4 = vmin.f32 %v1630_v63, %v1650_v16  ;;  %v1659_v35 = vmin.f32 %v1631_v2, %v1651_v27  ;;  %v1660_v48 = vmin.f32 %v1632_v51, %v1652_v5  ;;  %v1661_v31 = vmin.f32 %v1633_v36, %v1653_v15 }
 0x201   : > { %vm1666_vm1 = vcmp.gt.f32.partialorder %v6011_v62, %v5896_v12  ;;  %vm1667_vm2 = vcmp.gt.f32.partialorder %v6011_v62, %v5901_v54  ;;  %vm1668_vm3 = vcmp.gt.f32.partialorder %v6011_v62, %v5946_v39  ;;  %vm1669_vm4 = vcmp.gt.f32.partialorder %v6011_v62, %v5951_v21 }
 0x202   : > { %vm1670_vm5 = vcmp.gt.f32.partialorder %v6011_v62, %v5956_v43  ;;  %vm1671_vm6 = vcmp.gt.f32.partialorder %v6011_v62, %v5961_v32  ;;  %vm1672_vm8 = vcmp.gt.f32.partialorder %v6011_v62, %v5966_v9  ;;  %vm1673_vm9 = vcmp.gt.f32.partialorder %v6011_v62, %v5971_v10 }
 0x203   : > { %v1674_v37 = vsel %vm1666_vm1, %v6011_v62, inf  ;;  %v1675_v50 = vsel %vm1667_vm2, %v6011_v62, inf  ;;  %v1676_v53 = vsel %vm1668_vm3, %v6011_v62, inf  ;;  %v1677_v14 = vsel %vm1669_vm4, %v6011_v62, inf }
 0x204   : > { %v1678_v19 = vsel %vm1670_vm5, %v6011_v62, inf  ;;  %v1679_v22 = vsel %vm1671_vm6, %v6011_v62, inf  ;;  %v1680_v23 = vsel %vm1672_vm8, %v6011_v62, inf  ;;  %v1681_v24 = vsel %vm1673_vm9, %v6011_v62, inf }
 0x205   : > { %v1682_v25 = vmin.f32 %v1654_v3, %v1674_v37  ;;  %v1683_v28 = vmin.f32 %v1655_v8, %v1675_v50  ;;  %v1684_v29 = vmin.f32 %v1656_v1, %v1676_v53  ;;  %v1685_v61 = vmin.f32 %v1657_v11, %v1677_v14 }
 0x206   : > { %v1686_v20 = vmin.f32 %v1658_v4, %v1678_v19  ;;  %v1687_v63 = vmin.f32 %v1659_v35, %v1679_v22  ;;  %v1688_v2 = vmin.f32 %v1660_v48, %v1680_v23  ;;  %v1689_v51 = vmin.f32 %v1661_v31, %v1681_v24  ;;  %v6181_v22 = vld [vmem:[#allocation3 + $0x20] sm:$0xff] }
 0x207   : > { %vm1694_vm7 = vcmp.gt.f32.partialorder %v6015_v56, %v5896_v12  ;;  %vm1695_vm10 = vcmp.gt.f32.partialorder %v6015_v56, %v5901_v54  ;;  %vm1696_vm11 = vcmp.gt.f32.partialorder %v6015_v56, %v5946_v39  ;;  %vm1697_vm12 = vcmp.gt.f32.partialorder %v6015_v56, %v5951_v21 }
 0x208   : > { %vm1698_vm13 = vcmp.gt.f32.partialorder %v6015_v56, %v5956_v43  ;;  %vm1699_vm14 = vcmp.gt.f32.partialorder %v6015_v56, %v5961_v32  ;;  %vm1700_vm15 = vcmp.gt.f32.partialorder %v6015_v56, %v5966_v9  ;;  %vm1701_vm0 = vcmp.gt.f32.partialorder %v6015_v56, %v5971_v10 }
 0x209   : > { %v1702_v62 = vsel %vm1694_vm7, %v6015_v56, inf  ;;  %v1703_v36 = vsel %vm1695_vm10, %v6015_v56, inf  ;;  %v1704_v7 = vsel %vm1696_vm11, %v6015_v56, inf  ;;  %v1705_v17 = vsel %vm1697_vm12, %v6015_v56, inf }
 0x20a   : > { %v1706_v57 = vsel %vm1698_vm13, %v6015_v56, inf  ;;  %v1707_v33 = vsel %vm1699_vm14, %v6015_v56, inf  ;;  %v1708_v16 = vsel %vm1700_vm15, %v6015_v56, inf  ;;  %v1709_v27 = vsel %vm1701_vm0, %v6015_v56, inf }
 0x20b   : > { %v1710_v5 = vmin.f32 %v1682_v25, %v1702_v62  ;;  %v1711_v15 = vmin.f32 %v1683_v28, %v1703_v36  ;;  %v1712_v3 = vmin.f32 %v1684_v29, %v1704_v7  ;;  %v1713_v8 = vmin.f32 %v1685_v61, %v1705_v17 }
 0x20c   : > { %v1714_v1 = vmin.f32 %v1686_v20, %v1706_v57  ;;  %v1715_v11 = vmin.f32 %v1687_v63, %v1707_v33  ;;  %v1716_v4 = vmin.f32 %v1688_v2, %v1708_v16  ;;  %v1717_v35 = vmin.f32 %v1689_v51, %v1709_v27 }
 0x20d   : > { %vm1722_vm1 = vcmp.gt.f32.partialorder %v6019_v18, %v5896_v12  ;;  %vm1723_vm2 = vcmp.gt.f32.partialorder %v6019_v18, %v5901_v54  ;;  %vm1724_vm3 = vcmp.gt.f32.partialorder %v6019_v18, %v5946_v39  ;;  %vm1725_vm4 = vcmp.gt.f32.partialorder %v6019_v18, %v5951_v21 }
 0x20e   : > { %vm1726_vm5 = vcmp.gt.f32.partialorder %v6019_v18, %v5956_v43  ;;  %vm1727_vm6 = vcmp.gt.f32.partialorder %v6019_v18, %v5961_v32  ;;  %vm1728_vm8 = vcmp.gt.f32.partialorder %v6019_v18, %v5966_v9  ;;  %vm1729_vm9 = vcmp.gt.f32.partialorder %v6019_v18, %v5971_v10 }
 0x20f   : > { %v1730_v56 = vsel %vm1722_vm1, %v6019_v18, inf  ;;  %v1731_v48 = vsel %vm1723_vm2, %v6019_v18, inf  ;;  %v1732_v31 = vsel %vm1724_vm3, %v6019_v18, inf  ;;  %v1733_v37 = vsel %vm1725_vm4, %v6019_v18, inf }
 0x210   : > { %v1734_v50 = vsel %vm1726_vm5, %v6019_v18, inf  ;;  %v1735_v53 = vsel %vm1727_vm6, %v6019_v18, inf  ;;  %v1736_v14 = vsel %vm1728_vm8, %v6019_v18, inf  ;;  %v1737_v19 = vsel %vm1729_vm9, %v6019_v18, inf }
 0x211   : > { %v1738_v23 = vmin.f32 %v1710_v5, %v1730_v56  ;;  %v1739_v24 = vmin.f32 %v1711_v15, %v1731_v48  ;;  %v1740_v25 = vmin.f32 %v1712_v3, %v1732_v31  ;;  %v1741_v28 = vmin.f32 %v1713_v8, %v1733_v37 }
 0x212   : > { %v1742_v29 = vmin.f32 %v1714_v1, %v1734_v50  ;;  %v1743_v61 = vmin.f32 %v1715_v11, %v1735_v53  ;;  %v1744_v20 = vmin.f32 %v1716_v4, %v1736_v14  ;;  %v1745_v63 = vmin.f32 %v1717_v35, %v1737_v19 }
 0x213   : > { %v1749_v2 = vrot.slane %v5983_v26, %v5450_v60  ;;  %v1777_v51 = vrot.slane %v5983_v26, %v5465_v45  ;;  %v6189_v62 = vrot.slane %v6181_v22, %v5408_v55  ;;  %v6193_v18 = vrot.slane %v6181_v22, %v5411_v58 }
 0x214   : > { %v6197_v36 = vrot.slane %v6181_v22, %v5414_v59  ;;  %v6201_v7 = vrot.slane %v6181_v22, %v5426_v44  ;;  %v6205_v17 = vrot.slane %v6181_v22, %v5429_v46  ;;  %v6209_v26 = vrot.slane %v6181_v22, %v5432_v49 }
 0x215   : > { %vm1750_vm7 = vcmp.gt.f32.partialorder %v1749_v2, %v5896_v12  ;;  %vm1751_vm10 = vcmp.gt.f32.partialorder %v1749_v2, %v5901_v54  ;;  %vm1752_vm11 = vcmp.gt.f32.partialorder %v1749_v2, %v5946_v39  ;;  %vm1753_vm12 = vcmp.gt.f32.partialorder %v1749_v2, %v5951_v21 }
 0x216   : > { %vm1754_vm13 = vcmp.gt.f32.partialorder %v1749_v2, %v5956_v43  ;;  %vm1755_vm14 = vcmp.gt.f32.partialorder %v1749_v2, %v5961_v32  ;;  %vm1756_vm15 = vcmp.gt.f32.partialorder %v1749_v2, %v5966_v9  ;;  %vm1757_vm0 = vcmp.gt.f32.partialorder %v1749_v2, %v5971_v10 }
 0x217   : > { %v1758_v57 = vsel %vm1750_vm7, %v1749_v2, inf  ;;  %v1759_v33 = vsel %vm1751_vm10, %v1749_v2, inf  ;;  %v1760_v16 = vsel %vm1752_vm11, %v1749_v2, inf  ;;  %v1761_v27 = vsel %vm1753_vm12, %v1749_v2, inf }
 0x218   : > { %v1762_v5 = vsel %vm1754_vm13, %v1749_v2, inf  ;;  %v1763_v15 = vsel %vm1755_vm14, %v1749_v2, inf  ;;  %v1764_v3 = vsel %vm1756_vm15, %v1749_v2, inf  ;;  %v1765_v8 = vsel %vm1757_vm0, %v1749_v2, inf }
 0x219   : > { %v1766_v1 = vmin.f32 %v1738_v23, %v1758_v57  ;;  %v1767_v11 = vmin.f32 %v1739_v24, %v1759_v33  ;;  %v1768_v4 = vmin.f32 %v1740_v25, %v1760_v16  ;;  %v1769_v35 = vmin.f32 %v1741_v28, %v1761_v27 }
 0x21a   : > { %v1770_v56 = vmin.f32 %v1742_v29, %v1762_v5  ;;  %v1771_v48 = vmin.f32 %v1743_v61, %v1763_v15  ;;  %v1772_v31 = vmin.f32 %v1744_v20, %v1764_v3  ;;  %v1773_v37 = vmin.f32 %v1745_v63, %v1765_v8 }
 0x21b   : > { %vm1778_vm1 = vcmp.gt.f32.partialorder %v1777_v51, %v5896_v12  ;;  %vm1779_vm2 = vcmp.gt.f32.partialorder %v1777_v51, %v5901_v54  ;;  %vm1780_vm3 = vcmp.gt.f32.partialorder %v1777_v51, %v5946_v39  ;;  %vm1781_vm4 = vcmp.gt.f32.partialorder %v1777_v51, %v5951_v21 }
 0x21c   : > { %vm1782_vm5 = vcmp.gt.f32.partialorder %v1777_v51, %v5956_v43  ;;  %vm1783_vm6 = vcmp.gt.f32.partialorder %v1777_v51, %v5961_v32  ;;  %vm1784_vm8 = vcmp.gt.f32.partialorder %v1777_v51, %v5966_v9  ;;  %vm1785_vm9 = vcmp.gt.f32.partialorder %v1777_v51, %v5971_v10 }
 0x21d   : > { %v1786_v50 = vsel %vm1778_vm1, %v1777_v51, inf  ;;  %v1787_v53 = vsel %vm1779_vm2, %v1777_v51, inf  ;;  %v1788_v14 = vsel %vm1780_vm3, %v1777_v51, inf  ;;  %v1789_v19 = vsel %vm1781_vm4, %v1777_v51, inf }
 0x21e   : > { %v1790_v23 = vsel %vm1782_vm5, %v1777_v51, inf  ;;  %v1791_v24 = vsel %vm1783_vm6, %v1777_v51, inf  ;;  %v1792_v25 = vsel %vm1784_vm8, %v1777_v51, inf  ;;  %v1793_v28 = vsel %vm1785_vm9, %v1777_v51, inf }
 0x21f   : > { %v1794_v29 = vmin.f32 %v1766_v1, %v1786_v50  ;;  %v1795_v61 = vmin.f32 %v1767_v11, %v1787_v53  ;;  %v1796_v20 = vmin.f32 %v1768_v4, %v1788_v14  ;;  %v1797_v63 = vmin.f32 %v1769_v35, %v1789_v19 }
 0x220   : > { %v1798_v2 = vmin.f32 %v1770_v56, %v1790_v23  ;;  %v1799_v57 = vmin.f32 %v1771_v48, %v1791_v24  ;;  %v1800_v33 = vmin.f32 %v1772_v31, %v1792_v25  ;;  %v1801_v16 = vmin.f32 %v1773_v37, %v1793_v28 }
 0x221   : > { %vm1808_vm7 = vcmp.gt.f32.partialorder %v6189_v62, %v5896_v12  ;;  %vm1809_vm10 = vcmp.gt.f32.partialorder %v6189_v62, %v5901_v54  ;;  %vm1810_vm11 = vcmp.gt.f32.partialorder %v6189_v62, %v5946_v39  ;;  %vm1811_vm12 = vcmp.gt.f32.partialorder %v6189_v62, %v5951_v21 }
 0x222   : > { %vm1812_vm13 = vcmp.gt.f32.partialorder %v6189_v62, %v5956_v43  ;;  %vm1813_vm14 = vcmp.gt.f32.partialorder %v6189_v62, %v5961_v32  ;;  %vm1814_vm15 = vcmp.gt.f32.partialorder %v6189_v62, %v5966_v9  ;;  %vm1815_vm0 = vcmp.gt.f32.partialorder %v6189_v62, %v5971_v10 }
 0x223   : > { %v1816_v51 = vsel %vm1808_vm7, %v6189_v62, inf  ;;  %v1817_v27 = vsel %vm1809_vm10, %v6189_v62, inf  ;;  %v1818_v5 = vsel %vm1810_vm11, %v6189_v62, inf  ;;  %v1819_v15 = vsel %vm1811_vm12, %v6189_v62, inf }
 0x224   : > { %v1820_v3 = vsel %vm1812_vm13, %v6189_v62, inf  ;;  %v1821_v8 = vsel %vm1813_vm14, %v6189_v62, inf  ;;  %v1822_v1 = vsel %vm1814_vm15, %v6189_v62, inf  ;;  %v1823_v11 = vsel %vm1815_vm0, %v6189_v62, inf }
 0x225   : > { %v1824_v4 = vmin.f32 %v1794_v29, %v1816_v51  ;;  %v1825_v35 = vmin.f32 %v1795_v61, %v1817_v27  ;;  %v1826_v56 = vmin.f32 %v1796_v20, %v1818_v5  ;;  %v1827_v48 = vmin.f32 %v1797_v63, %v1819_v15 }
 0x226   : > { %v1828_v31 = vmin.f32 %v1798_v2, %v1820_v3  ;;  %v1829_v37 = vmin.f32 %v1799_v57, %v1821_v8  ;;  %v1830_v50 = vmin.f32 %v1800_v33, %v1822_v1  ;;  %v1831_v53 = vmin.f32 %v1801_v16, %v1823_v11 }
 0x227   : > { %vm1836_vm1 = vcmp.gt.f32.partialorder %v6193_v18, %v5896_v12  ;;  %vm1837_vm2 = vcmp.gt.f32.partialorder %v6193_v18, %v5901_v54  ;;  %vm1838_vm3 = vcmp.gt.f32.partialorder %v6193_v18, %v5946_v39  ;;  %vm1839_vm4 = vcmp.gt.f32.partialorder %v6193_v18, %v5951_v21 }
 0x228   : > { %vm1840_vm5 = vcmp.gt.f32.partialorder %v6193_v18, %v5956_v43  ;;  %vm1841_vm6 = vcmp.gt.f32.partialorder %v6193_v18, %v5961_v32  ;;  %vm1842_vm8 = vcmp.gt.f32.partialorder %v6193_v18, %v5966_v9  ;;  %vm1843_vm9 = vcmp.gt.f32.partialorder %v6193_v18, %v5971_v10 }
 0x229   : > { %v1844_v62 = vsel %vm1836_vm1, %v6193_v18, inf  ;;  %v1845_v14 = vsel %vm1837_vm2, %v6193_v18, inf  ;;  %v1846_v19 = vsel %vm1838_vm3, %v6193_v18, inf  ;;  %v1847_v23 = vsel %vm1839_vm4, %v6193_v18, inf }
 0x22a   : > { %v1848_v24 = vsel %vm1840_vm5, %v6193_v18, inf  ;;  %v1849_v25 = vsel %vm1841_vm6, %v6193_v18, inf  ;;  %v1850_v28 = vsel %vm1842_vm8, %v6193_v18, inf  ;;  %v1851_v29 = vsel %vm1843_vm9, %v6193_v18, inf }
 0x22b   : > { %v1852_v61 = vmin.f32 %v1824_v4, %v1844_v62  ;;  %v1853_v20 = vmin.f32 %v1825_v35, %v1845_v14  ;;  %v1854_v63 = vmin.f32 %v1826_v56, %v1846_v19  ;;  %v1855_v2 = vmin.f32 %v1827_v48, %v1847_v23 }
 0x22c   : > { %v1856_v57 = vmin.f32 %v1828_v31, %v1848_v24  ;;  %v1857_v33 = vmin.f32 %v1829_v37, %v1849_v25  ;;  %v1858_v16 = vmin.f32 %v1830_v50, %v1850_v28  ;;  %v1859_v51 = vmin.f32 %v1831_v53, %v1851_v29 }
 0x22d   : > { %vm1864_vm7 = vcmp.gt.f32.partialorder %v6197_v36, %v5896_v12  ;;  %vm1865_vm10 = vcmp.gt.f32.partialorder %v6197_v36, %v5901_v54  ;;  %vm1866_vm11 = vcmp.gt.f32.partialorder %v6197_v36, %v5946_v39  ;;  %vm1867_vm12 = vcmp.gt.f32.partialorder %v6197_v36, %v5951_v21 }
 0x22e   : > { %vm1868_vm13 = vcmp.gt.f32.partialorder %v6197_v36, %v5956_v43  ;;  %vm1869_vm14 = vcmp.gt.f32.partialorder %v6197_v36, %v5961_v32  ;;  %vm1870_vm15 = vcmp.gt.f32.partialorder %v6197_v36, %v5966_v9  ;;  %vm1871_vm0 = vcmp.gt.f32.partialorder %v6197_v36, %v5971_v10 }
 0x22f   : > { %v1872_v18 = vsel %vm1864_vm7, %v6197_v36, inf  ;;  %v1873_v27 = vsel %vm1865_vm10, %v6197_v36, inf  ;;  %v1874_v5 = vsel %vm1866_vm11, %v6197_v36, inf  ;;  %v1875_v15 = vsel %vm1867_vm12, %v6197_v36, inf }
 0x230   : > { %v1876_v3 = vsel %vm1868_vm13, %v6197_v36, inf  ;;  %v1877_v8 = vsel %vm1869_vm14, %v6197_v36, inf  ;;  %v1878_v1 = vsel %vm1870_vm15, %v6197_v36, inf  ;;  %v1879_v11 = vsel %vm1871_vm0, %v6197_v36, inf }
 0x231   : > { %v1880_v4 = vmin.f32 %v1852_v61, %v1872_v18  ;;  %v1881_v35 = vmin.f32 %v1853_v20, %v1873_v27  ;;  %v1882_v56 = vmin.f32 %v1854_v63, %v1874_v5  ;;  %v1883_v48 = vmin.f32 %v1855_v2, %v1875_v15 }
 0x232   : > { %v1884_v31 = vmin.f32 %v1856_v57, %v1876_v3  ;;  %v1885_v37 = vmin.f32 %v1857_v33, %v1877_v8  ;;  %v1886_v50 = vmin.f32 %v1858_v16, %v1878_v1  ;;  %v1887_v53 = vmin.f32 %v1859_v51, %v1879_v11 }
 0x233   : > { %vm1892_vm1 = vcmp.gt.f32.partialorder %v6201_v7, %v5896_v12  ;;  %vm1893_vm2 = vcmp.gt.f32.partialorder %v6201_v7, %v5901_v54  ;;  %vm1894_vm3 = vcmp.gt.f32.partialorder %v6201_v7, %v5946_v39  ;;  %vm1895_vm4 = vcmp.gt.f32.partialorder %v6201_v7, %v5951_v21 }
 0x234   : > { %vm1896_vm5 = vcmp.gt.f32.partialorder %v6201_v7, %v5956_v43  ;;  %vm1897_vm6 = vcmp.gt.f32.partialorder %v6201_v7, %v5961_v32  ;;  %vm1898_vm8 = vcmp.gt.f32.partialorder %v6201_v7, %v5966_v9  ;;  %vm1899_vm9 = vcmp.gt.f32.partialorder %v6201_v7, %v5971_v10 }
 0x235   : > { %v1900_v36 = vsel %vm1892_vm1, %v6201_v7, inf  ;;  %v1901_v62 = vsel %vm1893_vm2, %v6201_v7, inf  ;;  %v1902_v14 = vsel %vm1894_vm3, %v6201_v7, inf  ;;  %v1903_v19 = vsel %vm1895_vm4, %v6201_v7, inf }
 0x236   : > { %v1904_v23 = vsel %vm1896_vm5, %v6201_v7, inf  ;;  %v1905_v24 = vsel %vm1897_vm6, %v6201_v7, inf  ;;  %v1906_v25 = vsel %vm1898_vm8, %v6201_v7, inf  ;;  %v1907_v28 = vsel %vm1899_vm9, %v6201_v7, inf }
 0x237   : > { %v1908_v29 = vmin.f32 %v1880_v4, %v1900_v36  ;;  %v1909_v61 = vmin.f32 %v1881_v35, %v1901_v62  ;;  %v1910_v20 = vmin.f32 %v1882_v56, %v1902_v14  ;;  %v1911_v63 = vmin.f32 %v1883_v48, %v1903_v19 }
 0x238   : > { %v1912_v2 = vmin.f32 %v1884_v31, %v1904_v23  ;;  %v1913_v57 = vmin.f32 %v1885_v37, %v1905_v24  ;;  %v1914_v33 = vmin.f32 %v1886_v50, %v1906_v25  ;;  %v1915_v16 = vmin.f32 %v1887_v53, %v1907_v28  ;;  %v6371_v24 = vld [vmem:[#allocation3 + $0x28] sm:$0xff] }
 0x239   : > { %vm1920_vm7 = vcmp.gt.f32.partialorder %v6205_v17, %v5896_v12  ;;  %vm1921_vm10 = vcmp.gt.f32.partialorder %v6205_v17, %v5901_v54  ;;  %vm1922_vm11 = vcmp.gt.f32.partialorder %v6205_v17, %v5946_v39  ;;  %vm1923_vm12 = vcmp.gt.f32.partialorder %v6205_v17, %v5951_v21 }
 0x23a   : > { %vm1924_vm13 = vcmp.gt.f32.partialorder %v6205_v17, %v5956_v43  ;;  %vm1925_vm14 = vcmp.gt.f32.partialorder %v6205_v17, %v5961_v32  ;;  %vm1926_vm15 = vcmp.gt.f32.partialorder %v6205_v17, %v5966_v9  ;;  %vm1927_vm0 = vcmp.gt.f32.partialorder %v6205_v17, %v5971_v10 }
 0x23b   : > { %v1928_v7 = vsel %vm1920_vm7, %v6205_v17, inf  ;;  %v1929_v51 = vsel %vm1921_vm10, %v6205_v17, inf  ;;  %v1930_v18 = vsel %vm1922_vm11, %v6205_v17, inf  ;;  %v1931_v27 = vsel %vm1923_vm12, %v6205_v17, inf }
 0x23c   : > { %v1932_v5 = vsel %vm1924_vm13, %v6205_v17, inf  ;;  %v1933_v15 = vsel %vm1925_vm14, %v6205_v17, inf  ;;  %v1934_v3 = vsel %vm1926_vm15, %v6205_v17, inf  ;;  %v1935_v8 = vsel %vm1927_vm0, %v6205_v17, inf }
 0x23d   : > { %v1936_v1 = vmin.f32 %v1908_v29, %v1928_v7  ;;  %v1937_v11 = vmin.f32 %v1909_v61, %v1929_v51  ;;  %v1938_v4 = vmin.f32 %v1910_v20, %v1930_v18  ;;  %v1939_v35 = vmin.f32 %v1911_v63, %v1931_v27 }
 0x23e   : > { %v1940_v56 = vmin.f32 %v1912_v2, %v1932_v5  ;;  %v1941_v48 = vmin.f32 %v1913_v57, %v1933_v15  ;;  %v1942_v31 = vmin.f32 %v1914_v33, %v1934_v3  ;;  %v1943_v37 = vmin.f32 %v1915_v16, %v1935_v8 }
 0x23f   : > { %vm1948_vm1 = vcmp.gt.f32.partialorder %v6209_v26, %v5896_v12  ;;  %vm1949_vm2 = vcmp.gt.f32.partialorder %v6209_v26, %v5901_v54  ;;  %vm1950_vm3 = vcmp.gt.f32.partialorder %v6209_v26, %v5946_v39  ;;  %vm1951_vm4 = vcmp.gt.f32.partialorder %v6209_v26, %v5951_v21 }
 0x240   : > { %vm1952_vm5 = vcmp.gt.f32.partialorder %v6209_v26, %v5956_v43  ;;  %vm1953_vm6 = vcmp.gt.f32.partialorder %v6209_v26, %v5961_v32  ;;  %vm1954_vm8 = vcmp.gt.f32.partialorder %v6209_v26, %v5966_v9  ;;  %vm1955_vm9 = vcmp.gt.f32.partialorder %v6209_v26, %v5971_v10 }
 0x241   : > { %v1956_v17 = vsel %vm1948_vm1, %v6209_v26, inf  ;;  %v1957_v50 = vsel %vm1949_vm2, %v6209_v26, inf  ;;  %v1958_v53 = vsel %vm1950_vm3, %v6209_v26, inf  ;;  %v1959_v36 = vsel %vm1951_vm4, %v6209_v26, inf }
 0x242   : > { %v1960_v62 = vsel %vm1952_vm5, %v6209_v26, inf  ;;  %v1961_v14 = vsel %vm1953_vm6, %v6209_v26, inf  ;;  %v1962_v19 = vsel %vm1954_vm8, %v6209_v26, inf  ;;  %v1963_v23 = vsel %vm1955_vm9, %v6209_v26, inf }
 0x243   : > { %v1964_v25 = vmin.f32 %v1936_v1, %v1956_v17  ;;  %v1965_v28 = vmin.f32 %v1937_v11, %v1957_v50  ;;  %v1966_v29 = vmin.f32 %v1938_v4, %v1958_v53  ;;  %v1967_v61 = vmin.f32 %v1939_v35, %v1959_v36 }
 0x244   : > { %v1968_v20 = vmin.f32 %v1940_v56, %v1960_v62  ;;  %v1969_v63 = vmin.f32 %v1941_v48, %v1961_v14  ;;  %v1970_v2 = vmin.f32 %v1942_v31, %v1962_v19  ;;  %v1971_v57 = vmin.f32 %v1943_v37, %v1963_v23 }
 0x245   : > { %v1975_v33 = vrot.slane %v6181_v22, %v5450_v60  ;;  %v2003_v16 = vrot.slane %v6181_v22, %v5465_v45  ;;  %v6379_v7 = vrot.slane %v6371_v24, %v5408_v55  ;;  %v6383_v26 = vrot.slane %v6371_v24, %v5411_v58 }
 0x246   : > { %v6387_v51 = vrot.slane %v6371_v24, %v5414_v59  ;;  %v6391_v18 = vrot.slane %v6371_v24, %v5426_v44  ;;  %v6395_v27 = vrot.slane %v6371_v24, %v5429_v46  ;;  %v6399_v22 = vrot.slane %v6371_v24, %v5432_v49 }
 0x247   : > { %vm1976_vm7 = vcmp.gt.f32.partialorder %v1975_v33, %v5896_v12  ;;  %vm1977_vm10 = vcmp.gt.f32.partialorder %v1975_v33, %v5901_v54  ;;  %vm1978_vm11 = vcmp.gt.f32.partialorder %v1975_v33, %v5946_v39  ;;  %vm1979_vm12 = vcmp.gt.f32.partialorder %v1975_v33, %v5951_v21 }
 0x248   : > { %vm1980_vm13 = vcmp.gt.f32.partialorder %v1975_v33, %v5956_v43  ;;  %vm1981_vm14 = vcmp.gt.f32.partialorder %v1975_v33, %v5961_v32  ;;  %vm1982_vm15 = vcmp.gt.f32.partialorder %v1975_v33, %v5966_v9  ;;  %vm1983_vm0 = vcmp.gt.f32.partialorder %v1975_v33, %v5971_v10 }
 0x249   : > { %v1984_v5 = vsel %vm1976_vm7, %v1975_v33, inf  ;;  %v1985_v15 = vsel %vm1977_vm10, %v1975_v33, inf  ;;  %v1986_v3 = vsel %vm1978_vm11, %v1975_v33, inf  ;;  %v1987_v8 = vsel %vm1979_vm12, %v1975_v33, inf }
 0x24a   : > { %v1988_v1 = vsel %vm1980_vm13, %v1975_v33, inf  ;;  %v1989_v11 = vsel %vm1981_vm14, %v1975_v33, inf  ;;  %v1990_v4 = vsel %vm1982_vm15, %v1975_v33, inf  ;;  %v1991_v35 = vsel %vm1983_vm0, %v1975_v33, inf }
 0x24b   : > { %v1992_v56 = vmin.f32 %v1964_v25, %v1984_v5  ;;  %v1993_v48 = vmin.f32 %v1965_v28, %v1985_v15  ;;  %v1994_v31 = vmin.f32 %v1966_v29, %v1986_v3  ;;  %v1995_v37 = vmin.f32 %v1967_v61, %v1987_v8 }
 0x24c   : > { %v1996_v17 = vmin.f32 %v1968_v20, %v1988_v1  ;;  %v1997_v50 = vmin.f32 %v1969_v63, %v1989_v11  ;;  %v1998_v53 = vmin.f32 %v1970_v2, %v1990_v4  ;;  %v1999_v36 = vmin.f32 %v1971_v57, %v1991_v35 }
 0x24d   : > { %vm2004_vm1 = vcmp.gt.f32.partialorder %v2003_v16, %v5896_v12  ;;  %vm2005_vm2 = vcmp.gt.f32.partialorder %v2003_v16, %v5901_v54  ;;  %vm2006_vm3 = vcmp.gt.f32.partialorder %v2003_v16, %v5946_v39  ;;  %vm2007_vm4 = vcmp.gt.f32.partialorder %v2003_v16, %v5951_v21 }
 0x24e   : > { %vm2008_vm5 = vcmp.gt.f32.partialorder %v2003_v16, %v5956_v43  ;;  %vm2009_vm6 = vcmp.gt.f32.partialorder %v2003_v16, %v5961_v32  ;;  %vm2010_vm8 = vcmp.gt.f32.partialorder %v2003_v16, %v5966_v9  ;;  %vm2011_vm9 = vcmp.gt.f32.partialorder %v2003_v16, %v5971_v10 }
 0x24f   : > { %v2012_v62 = vsel %vm2004_vm1, %v2003_v16, inf  ;;  %v2013_v14 = vsel %vm2005_vm2, %v2003_v16, inf  ;;  %v2014_v19 = vsel %vm2006_vm3, %v2003_v16, inf  ;;  %v2015_v23 = vsel %vm2007_vm4, %v2003_v16, inf }
 0x250   : > { %v2016_v25 = vsel %vm2008_vm5, %v2003_v16, inf  ;;  %v2017_v28 = vsel %vm2009_vm6, %v2003_v16, inf  ;;  %v2018_v29 = vsel %vm2010_vm8, %v2003_v16, inf  ;;  %v2019_v61 = vsel %vm2011_vm9, %v2003_v16, inf }
 0x251   : > { %v2020_v20 = vmin.f32 %v1992_v56, %v2012_v62  ;;  %v2021_v63 = vmin.f32 %v1993_v48, %v2013_v14  ;;  %v2022_v2 = vmin.f32 %v1994_v31, %v2014_v19  ;;  %v2023_v57 = vmin.f32 %v1995_v37, %v2015_v23  ;;  %v6442_v62 = vld [vmem:[%s5399_s20] sm:$0xff]  ;;  %v6447_v14 = vld [vmem:[%s5399_s20 + $0x8] sm:$0xff] }
 0x252   : > { %v2024_v33 = vmin.f32 %v1996_v17, %v2016_v25  ;;  %v2025_v5 = vmin.f32 %v1997_v50, %v2017_v28  ;;  %v2026_v15 = vmin.f32 %v1998_v53, %v2018_v29  ;;  %v2027_v3 = vmin.f32 %v1999_v36, %v2019_v61 }
 0x253   : > { %vm2034_vm7 = vcmp.gt.f32.partialorder %v6379_v7, %v5896_v12  ;;  %vm2035_vm10 = vcmp.gt.f32.partialorder %v6379_v7, %v5901_v54  ;;  %vm2036_vm11 = vcmp.gt.f32.partialorder %v6379_v7, %v5946_v39  ;;  %vm2037_vm12 = vcmp.gt.f32.partialorder %v6379_v7, %v5951_v21 }
 0x254   : > { %vm2038_vm13 = vcmp.gt.f32.partialorder %v6379_v7, %v5956_v43  ;;  %vm2039_vm14 = vcmp.gt.f32.partialorder %v6379_v7, %v5961_v32  ;;  %vm2040_vm15 = vcmp.gt.f32.partialorder %v6379_v7, %v5966_v9  ;;  %vm2041_vm0 = vcmp.gt.f32.partialorder %v6379_v7, %v5971_v10 }
 0x255   : > { %v2042_v12 = vsel %vm2034_vm7, %v6379_v7, inf  ;;  %v2043_v54 = vsel %vm2035_vm10, %v6379_v7, inf  ;;  %v2044_v16 = vsel %vm2036_vm11, %v6379_v7, inf  ;;  %v2045_v8 = vsel %vm2037_vm12, %v6379_v7, inf }
 0x256   : > { %v2046_v1 = vsel %vm2038_vm13, %v6379_v7, inf  ;;  %v2047_v11 = vsel %vm2039_vm14, %v6379_v7, inf  ;;  %v2048_v4 = vsel %vm2040_vm15, %v6379_v7, inf  ;;  %v2049_v35 = vsel %vm2041_vm0, %v6379_v7, inf }
 0x257   : > { %v2050_v56 = vmin.f32 %v2020_v20, %v2042_v12  ;;  %v2051_v48 = vmin.f32 %v2021_v63, %v2043_v54  ;;  %v2052_v31 = vmin.f32 %v2022_v2, %v2044_v16  ;;  %v2053_v37 = vmin.f32 %v2023_v57, %v2045_v8  ;;  %v6476_v57 = vld [vmem:[%s5399_s20 + $0x10] sm:$0xff] }
 0x258   : > { %v2054_v17 = vmin.f32 %v2024_v33, %v2046_v1  ;;  %v2055_v50 = vmin.f32 %v2025_v5, %v2047_v11  ;;  %v2056_v53 = vmin.f32 %v2026_v15, %v2048_v4  ;;  %v2057_v36 = vmin.f32 %v2027_v3, %v2049_v35  ;;  %v6486_v33 = vld [vmem:[%s5399_s20 + $0x20] sm:$0xff]  ;;  %v6491_v5 = vld [vmem:[%s5399_s20 + $0x28] sm:$0xff]  ;;  %v6496_v15 = vld [vmem:[%s5399_s20 + $0x30] sm:$0xff] }
 0x259   : > { %vm2062_vm1 = vcmp.gt.f32.partialorder %v6383_v26, %v6442_v62  ;;  %vm2063_vm2 = vcmp.gt.f32.partialorder %v6383_v26, %v6447_v14  ;;  %vm2064_vm3 = vcmp.gt.f32.partialorder %v6383_v26, %v5946_v39  ;;  %vm2065_vm4 = vcmp.gt.f32.partialorder %v6383_v26, %v5951_v21  ;;  %v6501_v3 = vld [vmem:[%s5399_s20 + $0x38] sm:$0xff] }
 0x25a   : > { %vm2066_vm5 = vcmp.gt.f32.partialorder %v6383_v26, %v5956_v43  ;;  %vm2067_vm6 = vcmp.gt.f32.partialorder %v6383_v26, %v5961_v32  ;;  %vm2068_vm8 = vcmp.gt.f32.partialorder %v6383_v26, %v5966_v9  ;;  %vm2069_vm9 = vcmp.gt.f32.partialorder %v6383_v26, %v5971_v10 }
 0x25b   : > { %v2070_v7 = vsel %vm2062_vm1, %v6383_v26, inf  ;;  %v2071_v19 = vsel %vm2063_vm2, %v6383_v26, inf  ;;  %v2072_v39 = vsel %vm2064_vm3, %v6383_v26, inf  ;;  %v2073_v21 = vsel %vm2065_vm4, %v6383_v26, inf }
 0x25c   : > { %v2074_v43 = vsel %vm2066_vm5, %v6383_v26, inf  ;;  %v2075_v32 = vsel %vm2067_vm6, %v6383_v26, inf  ;;  %v2076_v23 = vsel %vm2068_vm8, %v6383_v26, inf  ;;  %v2077_v9 = vsel %vm2069_vm9, %v6383_v26, inf  ;;  %v6481_v26 = vld [vmem:[%s5399_s20 + $0x18] sm:$0xff] }
 0x25d   : > { %v2078_v10 = vmin.f32 %v2050_v56, %v2070_v7  ;;  %v2079_v25 = vmin.f32 %v2051_v48, %v2071_v19  ;;  %v2080_v28 = vmin.f32 %v2052_v31, %v2072_v39  ;;  %v2081_v29 = vmin.f32 %v2053_v37, %v2073_v21 }
 0x25e   : > { %v2082_v61 = vmin.f32 %v2054_v17, %v2074_v43  ;;  %v2083_v20 = vmin.f32 %v2055_v50, %v2075_v32  ;;  %v2084_v63 = vmin.f32 %v2056_v53, %v2076_v23  ;;  %v2085_v2 = vmin.f32 %v2057_v36, %v2077_v9 }
 0x25f   : > { %vm2090_vm7 = vcmp.gt.f32.partialorder %v6387_v51, %v6442_v62  ;;  %vm2091_vm10 = vcmp.gt.f32.partialorder %v6387_v51, %v6447_v14  ;;  %vm2092_vm11 = vcmp.gt.f32.partialorder %v6387_v51, %v6476_v57  ;;  %vm2093_vm12 = vcmp.gt.f32.partialorder %v6387_v51, %v6481_v26 }
 0x260   : > { %vm2094_vm13 = vcmp.gt.f32.partialorder %v6387_v51, %v6486_v33  ;;  %vm2095_vm14 = vcmp.gt.f32.partialorder %v6387_v51, %v6491_v5  ;;  %vm2096_vm15 = vcmp.gt.f32.partialorder %v6387_v51, %v6496_v15  ;;  %vm2097_vm0 = vcmp.gt.f32.partialorder %v6387_v51, %v6501_v3 }
 0x261   : > { %v2098_v12 = vsel %vm2090_vm7, %v6387_v51, inf  ;;  %v2099_v54 = vsel %vm2091_vm10, %v6387_v51, inf  ;;  %v2100_v16 = vsel %vm2092_vm11, %v6387_v51, inf  ;;  %v2101_v8 = vsel %vm2093_vm12, %v6387_v51, inf }
 0x262   : > { %v2102_v1 = vsel %vm2094_vm13, %v6387_v51, inf  ;;  %v2103_v11 = vsel %vm2095_vm14, %v6387_v51, inf  ;;  %v2104_v4 = vsel %vm2096_vm15, %v6387_v51, inf  ;;  %v2105_v35 = vsel %vm2097_vm0, %v6387_v51, inf }
 0x263   : > { %v2106_v56 = vmin.f32 %v2078_v10, %v2098_v12  ;;  %v2107_v48 = vmin.f32 %v2079_v25, %v2099_v54  ;;  %v2108_v31 = vmin.f32 %v2080_v28, %v2100_v16  ;;  %v2109_v37 = vmin.f32 %v2081_v29, %v2101_v8 }
 0x264   : > { %v2110_v17 = vmin.f32 %v2082_v61, %v2102_v1  ;;  %v2111_v50 = vmin.f32 %v2083_v20, %v2103_v11  ;;  %v2112_v53 = vmin.f32 %v2084_v63, %v2104_v4  ;;  %v2113_v36 = vmin.f32 %v2085_v2, %v2105_v35 }
 0x265   : > { %vm2118_vm1 = vcmp.gt.f32.partialorder %v6391_v18, %v6442_v62  ;;  %vm2119_vm2 = vcmp.gt.f32.partialorder %v6391_v18, %v6447_v14  ;;  %vm2120_vm3 = vcmp.gt.f32.partialorder %v6391_v18, %v6476_v57  ;;  %vm2121_vm4 = vcmp.gt.f32.partialorder %v6391_v18, %v6481_v26 }
 0x266   : > { %vm2122_vm5 = vcmp.gt.f32.partialorder %v6391_v18, %v6486_v33  ;;  %vm2123_vm6 = vcmp.gt.f32.partialorder %v6391_v18, %v6491_v5  ;;  %vm2124_vm8 = vcmp.gt.f32.partialorder %v6391_v18, %v6496_v15  ;;  %vm2125_vm9 = vcmp.gt.f32.partialorder %v6391_v18, %v6501_v3 }
 0x267   : > { %v2126_v51 = vsel %vm2118_vm1, %v6391_v18, inf  ;;  %v2127_v7 = vsel %vm2119_vm2, %v6391_v18, inf  ;;  %v2128_v19 = vsel %vm2120_vm3, %v6391_v18, inf  ;;  %v2129_v39 = vsel %vm2121_vm4, %v6391_v18, inf }
 0x268   : > { %v2130_v21 = vsel %vm2122_vm5, %v6391_v18, inf  ;;  %v2131_v43 = vsel %vm2123_vm6, %v6391_v18, inf  ;;  %v2132_v32 = vsel %vm2124_vm8, %v6391_v18, inf  ;;  %v2133_v23 = vsel %vm2125_vm9, %v6391_v18, inf }
 0x269   : > { %v2134_v9 = vmin.f32 %v2106_v56, %v2126_v51  ;;  %v2135_v10 = vmin.f32 %v2107_v48, %v2127_v7  ;;  %v2136_v25 = vmin.f32 %v2108_v31, %v2128_v19  ;;  %v2137_v28 = vmin.f32 %v2109_v37, %v2129_v39 }
 0x26a   : > { %v2138_v29 = vmin.f32 %v2110_v17, %v2130_v21  ;;  %v2139_v61 = vmin.f32 %v2111_v50, %v2131_v43  ;;  %v2140_v20 = vmin.f32 %v2112_v53, %v2132_v32  ;;  %v2141_v63 = vmin.f32 %v2113_v36, %v2133_v23  ;;  %v6585_v43 = vld [vmem:[#allocation3 + $0x30] sm:$0xff] }
 0x26b   : > { %vm2146_vm7 = vcmp.gt.f32.partialorder %v6395_v27, %v6442_v62  ;;  %vm2147_vm10 = vcmp.gt.f32.partialorder %v6395_v27, %v6447_v14  ;;  %vm2148_vm11 = vcmp.gt.f32.partialorder %v6395_v27, %v6476_v57  ;;  %vm2149_vm12 = vcmp.gt.f32.partialorder %v6395_v27, %v6481_v26 }
 0x26c   : > { %vm2150_vm13 = vcmp.gt.f32.partialorder %v6395_v27, %v6486_v33  ;;  %vm2151_vm14 = vcmp.gt.f32.partialorder %v6395_v27, %v6491_v5  ;;  %vm2152_vm15 = vcmp.gt.f32.partialorder %v6395_v27, %v6496_v15  ;;  %vm2153_vm0 = vcmp.gt.f32.partialorder %v6395_v27, %v6501_v3 }
 0x26d   : > { %v2154_v18 = vsel %vm2146_vm7, %v6395_v27, inf  ;;  %v2155_v2 = vsel %vm2147_vm10, %v6395_v27, inf  ;;  %v2156_v12 = vsel %vm2148_vm11, %v6395_v27, inf  ;;  %v2157_v54 = vsel %vm2149_vm12, %v6395_v27, inf }
 0x26e   : > { %v2158_v16 = vsel %vm2150_vm13, %v6395_v27, inf  ;;  %v2159_v8 = vsel %vm2151_vm14, %v6395_v27, inf  ;;  %v2160_v1 = vsel %vm2152_vm15, %v6395_v27, inf  ;;  %v2161_v11 = vsel %vm2153_vm0, %v6395_v27, inf }
 0x26f   : > { %v2162_v4 = vmin.f32 %v2134_v9, %v2154_v18  ;;  %v2163_v35 = vmin.f32 %v2135_v10, %v2155_v2  ;;  %v2164_v56 = vmin.f32 %v2136_v25, %v2156_v12  ;;  %v2165_v48 = vmin.f32 %v2137_v28, %v2157_v54 }
 0x270   : > { %v2166_v31 = vmin.f32 %v2138_v29, %v2158_v16  ;;  %v2167_v37 = vmin.f32 %v2139_v61, %v2159_v8  ;;  %v2168_v17 = vmin.f32 %v2140_v20, %v2160_v1  ;;  %v2169_v50 = vmin.f32 %v2141_v63, %v2161_v11 }
 0x271   : > { %vm2174_vm1 = vcmp.gt.f32.partialorder %v6399_v22, %v6442_v62  ;;  %vm2175_vm2 = vcmp.gt.f32.partialorder %v6399_v22, %v6447_v14  ;;  %vm2176_vm3 = vcmp.gt.f32.partialorder %v6399_v22, %v6476_v57  ;;  %vm2177_vm4 = vcmp.gt.f32.partialorder %v6399_v22, %v6481_v26 }
 0x272   : > { %vm2178_vm5 = vcmp.gt.f32.partialorder %v6399_v22, %v6486_v33  ;;  %vm2179_vm6 = vcmp.gt.f32.partialorder %v6399_v22, %v6491_v5  ;;  %vm2180_vm8 = vcmp.gt.f32.partialorder %v6399_v22, %v6496_v15  ;;  %vm2181_vm9 = vcmp.gt.f32.partialorder %v6399_v22, %v6501_v3 }
 0x273   : > { %v2182_v27 = vsel %vm2174_vm1, %v6399_v22, inf  ;;  %v2183_v53 = vsel %vm2175_vm2, %v6399_v22, inf  ;;  %v2184_v36 = vsel %vm2176_vm3, %v6399_v22, inf  ;;  %v2185_v51 = vsel %vm2177_vm4, %v6399_v22, inf }
 0x274   : > { %v2186_v7 = vsel %vm2178_vm5, %v6399_v22, inf  ;;  %v2187_v19 = vsel %vm2179_vm6, %v6399_v22, inf  ;;  %v2188_v39 = vsel %vm2180_vm8, %v6399_v22, inf  ;;  %v2189_v21 = vsel %vm2181_vm9, %v6399_v22, inf }
 0x275   : > { %v2190_v32 = vmin.f32 %v2162_v4, %v2182_v27  ;;  %v2191_v23 = vmin.f32 %v2163_v35, %v2183_v53  ;;  %v2192_v9 = vmin.f32 %v2164_v56, %v2184_v36  ;;  %v2193_v10 = vmin.f32 %v2165_v48, %v2185_v51 }
 0x276   : > { %v2194_v25 = vmin.f32 %v2166_v31, %v2186_v7  ;;  %v2195_v28 = vmin.f32 %v2167_v37, %v2187_v19  ;;  %v2196_v29 = vmin.f32 %v2168_v17, %v2188_v39  ;;  %v2197_v61 = vmin.f32 %v2169_v50, %v2189_v21 }
 0x277   : > { %v2201_v20 = vrot.slane %v6371_v24, %v5450_v60  ;;  %v2229_v63 = vrot.slane %v6371_v24, %v5465_v45  ;;  %v6593_v18 = vrot.slane %v6585_v43, %v5408_v55  ;;  %v6597_v22 = vrot.slane %v6585_v43, %v5411_v58 }
 0x278   : > { %v6601_v2 = vrot.slane %v6585_v43, %v5414_v59  ;;  %v6605_v12 = vrot.slane %v6585_v43, %v5426_v44  ;;  %v6609_v54 = vrot.slane %v6585_v43, %v5429_v46  ;;  %v6613_v24 = vrot.slane %v6585_v43, %v5432_v49 }
 0x279   : > { %vm2202_vm7 = vcmp.gt.f32.partialorder %v2201_v20, %v6442_v62  ;;  %vm2203_vm10 = vcmp.gt.f32.partialorder %v2201_v20, %v6447_v14  ;;  %vm2204_vm11 = vcmp.gt.f32.partialorder %v2201_v20, %v6476_v57  ;;  %vm2205_vm12 = vcmp.gt.f32.partialorder %v2201_v20, %v6481_v26 }
 0x27a   : > { %vm2206_vm13 = vcmp.gt.f32.partialorder %v2201_v20, %v6486_v33  ;;  %vm2207_vm14 = vcmp.gt.f32.partialorder %v2201_v20, %v6491_v5  ;;  %vm2208_vm15 = vcmp.gt.f32.partialorder %v2201_v20, %v6496_v15  ;;  %vm2209_vm0 = vcmp.gt.f32.partialorder %v2201_v20, %v6501_v3 }
 0x27b   : > { %v2210_v16 = vsel %vm2202_vm7, %v2201_v20, inf  ;;  %v2211_v8 = vsel %vm2203_vm10, %v2201_v20, inf  ;;  %v2212_v1 = vsel %vm2204_vm11, %v2201_v20, inf  ;;  %v2213_v11 = vsel %vm2205_vm12, %v2201_v20, inf }
 0x27c   : > { %v2214_v4 = vsel %vm2206_vm13, %v2201_v20, inf  ;;  %v2215_v35 = vsel %vm2207_vm14, %v2201_v20, inf  ;;  %v2216_v56 = vsel %vm2208_vm15, %v2201_v20, inf  ;;  %v2217_v48 = vsel %vm2209_vm0, %v2201_v20, inf }
 0x27d   : > { %v2218_v31 = vmin.f32 %v2190_v32, %v2210_v16  ;;  %v2219_v37 = vmin.f32 %v2191_v23, %v2211_v8  ;;  %v2220_v17 = vmin.f32 %v2192_v9, %v2212_v1  ;;  %v2221_v50 = vmin.f32 %v2193_v10, %v2213_v11 }
 0x27e   : > { %v2222_v27 = vmin.f32 %v2194_v25, %v2214_v4  ;;  %v2223_v53 = vmin.f32 %v2195_v28, %v2215_v35  ;;  %v2224_v36 = vmin.f32 %v2196_v29, %v2216_v56  ;;  %v2225_v51 = vmin.f32 %v2197_v61, %v2217_v48 }
 0x27f   : > { %vm2230_vm1 = vcmp.gt.f32.partialorder %v2229_v63, %v6442_v62  ;;  %vm2231_vm2 = vcmp.gt.f32.partialorder %v2229_v63, %v6447_v14  ;;  %vm2232_vm3 = vcmp.gt.f32.partialorder %v2229_v63, %v6476_v57  ;;  %vm2233_vm4 = vcmp.gt.f32.partialorder %v2229_v63, %v6481_v26 }
 0x280   : > { %vm2234_vm5 = vcmp.gt.f32.partialorder %v2229_v63, %v6486_v33  ;;  %vm2235_vm6 = vcmp.gt.f32.partialorder %v2229_v63, %v6491_v5  ;;  %vm2236_vm8 = vcmp.gt.f32.partialorder %v2229_v63, %v6496_v15  ;;  %vm2237_vm9 = vcmp.gt.f32.partialorder %v2229_v63, %v6501_v3 }
 0x281   : > { %v2238_v7 = vsel %vm2230_vm1, %v2229_v63, inf  ;;  %v2239_v19 = vsel %vm2231_vm2, %v2229_v63, inf  ;;  %v2240_v39 = vsel %vm2232_vm3, %v2229_v63, inf  ;;  %v2241_v21 = vsel %vm2233_vm4, %v2229_v63, inf }
 0x282   : > { %v2242_v32 = vsel %vm2234_vm5, %v2229_v63, inf  ;;  %v2243_v23 = vsel %vm2235_vm6, %v2229_v63, inf  ;;  %v2244_v9 = vsel %vm2236_vm8, %v2229_v63, inf  ;;  %v2245_v10 = vsel %vm2237_vm9, %v2229_v63, inf }
 0x283   : > { %v2246_v25 = vmin.f32 %v2218_v31, %v2238_v7  ;;  %v2247_v28 = vmin.f32 %v2219_v37, %v2239_v19  ;;  %v2248_v29 = vmin.f32 %v2220_v17, %v2240_v39  ;;  %v2249_v61 = vmin.f32 %v2221_v50, %v2241_v21 }
 0x284   : > { %v2250_v20 = vmin.f32 %v2222_v27, %v2242_v32  ;;  %v2251_v16 = vmin.f32 %v2223_v53, %v2243_v23  ;;  %v2252_v8 = vmin.f32 %v2224_v36, %v2244_v9  ;;  %v2253_v1 = vmin.f32 %v2225_v51, %v2245_v10 }
 0x285   : > { %vm2260_vm7 = vcmp.gt.f32.partialorder %v6593_v18, %v6442_v62  ;;  %vm2261_vm10 = vcmp.gt.f32.partialorder %v6593_v18, %v6447_v14  ;;  %vm2262_vm11 = vcmp.gt.f32.partialorder %v6593_v18, %v6476_v57  ;;  %vm2263_vm12 = vcmp.gt.f32.partialorder %v6593_v18, %v6481_v26 }
 0x286   : > { %vm2264_vm13 = vcmp.gt.f32.partialorder %v6593_v18, %v6486_v33  ;;  %vm2265_vm14 = vcmp.gt.f32.partialorder %v6593_v18, %v6491_v5  ;;  %vm2266_vm15 = vcmp.gt.f32.partialorder %v6593_v18, %v6496_v15  ;;  %vm2267_vm0 = vcmp.gt.f32.partialorder %v6593_v18, %v6501_v3 }
 0x287   : > { %v2268_v63 = vsel %vm2260_vm7, %v6593_v18, inf  ;;  %v2269_v11 = vsel %vm2261_vm10, %v6593_v18, inf  ;;  %v2270_v4 = vsel %vm2262_vm11, %v6593_v18, inf  ;;  %v2271_v35 = vsel %vm2263_vm12, %v6593_v18, inf }
 0x288   : > { %v2272_v56 = vsel %vm2264_vm13, %v6593_v18, inf  ;;  %v2273_v48 = vsel %vm2265_vm14, %v6593_v18, inf  ;;  %v2274_v31 = vsel %vm2266_vm15, %v6593_v18, inf  ;;  %v2275_v37 = vsel %vm2267_vm0, %v6593_v18, inf }
 0x289   : > { %v2276_v17 = vmin.f32 %v2246_v25, %v2268_v63  ;;  %v2277_v50 = vmin.f32 %v2247_v28, %v2269_v11  ;;  %v2278_v27 = vmin.f32 %v2248_v29, %v2270_v4  ;;  %v2279_v53 = vmin.f32 %v2249_v61, %v2271_v35 }
 0x28a   : > { %v2280_v36 = vmin.f32 %v2250_v20, %v2272_v56  ;;  %v2281_v51 = vmin.f32 %v2251_v16, %v2273_v48  ;;  %v2282_v7 = vmin.f32 %v2252_v8, %v2274_v31  ;;  %v2283_v19 = vmin.f32 %v2253_v1, %v2275_v37 }
 0x28b   : > { %vm2288_vm1 = vcmp.gt.f32.partialorder %v6597_v22, %v6442_v62  ;;  %vm2289_vm2 = vcmp.gt.f32.partialorder %v6597_v22, %v6447_v14  ;;  %vm2290_vm3 = vcmp.gt.f32.partialorder %v6597_v22, %v6476_v57  ;;  %vm2291_vm4 = vcmp.gt.f32.partialorder %v6597_v22, %v6481_v26 }
 0x28c   : > { %vm2292_vm5 = vcmp.gt.f32.partialorder %v6597_v22, %v6486_v33  ;;  %vm2293_vm6 = vcmp.gt.f32.partialorder %v6597_v22, %v6491_v5  ;;  %vm2294_vm8 = vcmp.gt.f32.partialorder %v6597_v22, %v6496_v15  ;;  %vm2295_vm9 = vcmp.gt.f32.partialorder %v6597_v22, %v6501_v3 }
 0x28d   : > { %v2296_v18 = vsel %vm2288_vm1, %v6597_v22, inf  ;;  %v2297_v39 = vsel %vm2289_vm2, %v6597_v22, inf  ;;  %v2298_v21 = vsel %vm2290_vm3, %v6597_v22, inf  ;;  %v2299_v32 = vsel %vm2291_vm4, %v6597_v22, inf }
 0x28e   : > { %v2300_v23 = vsel %vm2292_vm5, %v6597_v22, inf  ;;  %v2301_v9 = vsel %vm2293_vm6, %v6597_v22, inf  ;;  %v2302_v10 = vsel %vm2294_vm8, %v6597_v22, inf  ;;  %v2303_v25 = vsel %vm2295_vm9, %v6597_v22, inf }
 0x28f   : > { %v2304_v28 = vmin.f32 %v2276_v17, %v2296_v18  ;;  %v2305_v29 = vmin.f32 %v2277_v50, %v2297_v39  ;;  %v2306_v61 = vmin.f32 %v2278_v27, %v2298_v21  ;;  %v2307_v20 = vmin.f32 %v2279_v53, %v2299_v32 }
 0x290   : > { %v2308_v16 = vmin.f32 %v2280_v36, %v2300_v23  ;;  %v2309_v8 = vmin.f32 %v2281_v51, %v2301_v9  ;;  %v2310_v1 = vmin.f32 %v2282_v7, %v2302_v10  ;;  %v2311_v63 = vmin.f32 %v2283_v19, %v2303_v25 }
 0x291   : > { %vm2316_vm7 = vcmp.gt.f32.partialorder %v6601_v2, %v6442_v62  ;;  %vm2317_vm10 = vcmp.gt.f32.partialorder %v6601_v2, %v6447_v14  ;;  %vm2318_vm11 = vcmp.gt.f32.partialorder %v6601_v2, %v6476_v57  ;;  %vm2319_vm12 = vcmp.gt.f32.partialorder %v6601_v2, %v6481_v26 }
 0x292   : > { %vm2320_vm13 = vcmp.gt.f32.partialorder %v6601_v2, %v6486_v33  ;;  %vm2321_vm14 = vcmp.gt.f32.partialorder %v6601_v2, %v6491_v5  ;;  %vm2322_vm15 = vcmp.gt.f32.partialorder %v6601_v2, %v6496_v15  ;;  %vm2323_vm0 = vcmp.gt.f32.partialorder %v6601_v2, %v6501_v3 }
 0x293   : > { %v2324_v22 = vsel %vm2316_vm7, %v6601_v2, inf  ;;  %v2325_v11 = vsel %vm2317_vm10, %v6601_v2, inf  ;;  %v2326_v4 = vsel %vm2318_vm11, %v6601_v2, inf  ;;  %v2327_v35 = vsel %vm2319_vm12, %v6601_v2, inf }
 0x294   : > { %v2328_v56 = vsel %vm2320_vm13, %v6601_v2, inf  ;;  %v2329_v48 = vsel %vm2321_vm14, %v6601_v2, inf  ;;  %v2330_v31 = vsel %vm2322_vm15, %v6601_v2, inf  ;;  %v2331_v37 = vsel %vm2323_vm0, %v6601_v2, inf }
 0x295   : > { %v2332_v17 = vmin.f32 %v2304_v28, %v2324_v22  ;;  %v2333_v50 = vmin.f32 %v2305_v29, %v2325_v11  ;;  %v2334_v27 = vmin.f32 %v2306_v61, %v2326_v4  ;;  %v2335_v53 = vmin.f32 %v2307_v20, %v2327_v35 }
 0x296   : > { %v2336_v36 = vmin.f32 %v2308_v16, %v2328_v56  ;;  %v2337_v51 = vmin.f32 %v2309_v8, %v2329_v48  ;;  %v2338_v7 = vmin.f32 %v2310_v1, %v2330_v31  ;;  %v2339_v19 = vmin.f32 %v2311_v63, %v2331_v37 }
 0x297   : > { %vm2344_vm1 = vcmp.gt.f32.partialorder %v6605_v12, %v6442_v62  ;;  %vm2345_vm2 = vcmp.gt.f32.partialorder %v6605_v12, %v6447_v14  ;;  %vm2346_vm3 = vcmp.gt.f32.partialorder %v6605_v12, %v6476_v57  ;;  %vm2347_vm4 = vcmp.gt.f32.partialorder %v6605_v12, %v6481_v26 }
 0x298   : > { %vm2348_vm5 = vcmp.gt.f32.partialorder %v6605_v12, %v6486_v33  ;;  %vm2349_vm6 = vcmp.gt.f32.partialorder %v6605_v12, %v6491_v5  ;;  %vm2350_vm8 = vcmp.gt.f32.partialorder %v6605_v12, %v6496_v15  ;;  %vm2351_vm9 = vcmp.gt.f32.partialorder %v6605_v12, %v6501_v3 }
 0x299   : > { %v2352_v2 = vsel %vm2344_vm1, %v6605_v12, inf  ;;  %v2353_v18 = vsel %vm2345_vm2, %v6605_v12, inf  ;;  %v2354_v39 = vsel %vm2346_vm3, %v6605_v12, inf  ;;  %v2355_v21 = vsel %vm2347_vm4, %v6605_v12, inf }
 0x29a   : > { %v2356_v32 = vsel %vm2348_vm5, %v6605_v12, inf  ;;  %v2357_v23 = vsel %vm2349_vm6, %v6605_v12, inf  ;;  %v2358_v9 = vsel %vm2350_vm8, %v6605_v12, inf  ;;  %v2359_v10 = vsel %vm2351_vm9, %v6605_v12, inf }
 0x29b   : > { %v2360_v25 = vmin.f32 %v2332_v17, %v2352_v2  ;;  %v2361_v28 = vmin.f32 %v2333_v50, %v2353_v18  ;;  %v2362_v29 = vmin.f32 %v2334_v27, %v2354_v39  ;;  %v2363_v61 = vmin.f32 %v2335_v53, %v2355_v21 }
 0x29c   : > { %v2364_v20 = vmin.f32 %v2336_v36, %v2356_v32  ;;  %v2365_v16 = vmin.f32 %v2337_v51, %v2357_v23  ;;  %v2366_v8 = vmin.f32 %v2338_v7, %v2358_v9  ;;  %v2367_v1 = vmin.f32 %v2339_v19, %v2359_v10  ;;  %v6775_v23 = vld [vmem:[#allocation3 + $0x38] sm:$0xff] }
 0x29d   : > { %vm2372_vm7 = vcmp.gt.f32.partialorder %v6609_v54, %v6442_v62  ;;  %vm2373_vm10 = vcmp.gt.f32.partialorder %v6609_v54, %v6447_v14  ;;  %vm2374_vm11 = vcmp.gt.f32.partialorder %v6609_v54, %v6476_v57  ;;  %vm2375_vm12 = vcmp.gt.f32.partialorder %v6609_v54, %v6481_v26 }
 0x29e   : > { %vm2376_vm13 = vcmp.gt.f32.partialorder %v6609_v54, %v6486_v33  ;;  %vm2377_vm14 = vcmp.gt.f32.partialorder %v6609_v54, %v6491_v5  ;;  %vm2378_vm15 = vcmp.gt.f32.partialorder %v6609_v54, %v6496_v15  ;;  %vm2379_vm0 = vcmp.gt.f32.partialorder %v6609_v54, %v6501_v3 }
 0x29f   : > { %v2380_v12 = vsel %vm2372_vm7, %v6609_v54, inf  ;;  %v2381_v63 = vsel %vm2373_vm10, %v6609_v54, inf  ;;  %v2382_v22 = vsel %vm2374_vm11, %v6609_v54, inf  ;;  %v2383_v11 = vsel %vm2375_vm12, %v6609_v54, inf }
 0x2a0   : > { %v2384_v4 = vsel %vm2376_vm13, %v6609_v54, inf  ;;  %v2385_v35 = vsel %vm2377_vm14, %v6609_v54, inf  ;;  %v2386_v56 = vsel %vm2378_vm15, %v6609_v54, inf  ;;  %v2387_v48 = vsel %vm2379_vm0, %v6609_v54, inf }
 0x2a1   : > { %v2388_v31 = vmin.f32 %v2360_v25, %v2380_v12  ;;  %v2389_v37 = vmin.f32 %v2361_v28, %v2381_v63  ;;  %v2390_v17 = vmin.f32 %v2362_v29, %v2382_v22  ;;  %v2391_v50 = vmin.f32 %v2363_v61, %v2383_v11 }
 0x2a2   : > { %v2392_v27 = vmin.f32 %v2364_v20, %v2384_v4  ;;  %v2393_v53 = vmin.f32 %v2365_v16, %v2385_v35  ;;  %v2394_v36 = vmin.f32 %v2366_v8, %v2386_v56  ;;  %v2395_v51 = vmin.f32 %v2367_v1, %v2387_v48 }
 0x2a3   : > { %vm2400_vm1 = vcmp.gt.f32.partialorder %v6613_v24, %v6442_v62  ;;  %vm2401_vm2 = vcmp.gt.f32.partialorder %v6613_v24, %v6447_v14  ;;  %vm2402_vm3 = vcmp.gt.f32.partialorder %v6613_v24, %v6476_v57  ;;  %vm2403_vm4 = vcmp.gt.f32.partialorder %v6613_v24, %v6481_v26 }
 0x2a4   : > { %vm2404_vm5 = vcmp.gt.f32.partialorder %v6613_v24, %v6486_v33  ;;  %vm2405_vm6 = vcmp.gt.f32.partialorder %v6613_v24, %v6491_v5  ;;  %vm2406_vm8 = vcmp.gt.f32.partialorder %v6613_v24, %v6496_v15  ;;  %vm2407_vm9 = vcmp.gt.f32.partialorder %v6613_v24, %v6501_v3 }
 0x2a5   : > { %v2408_v54 = vsel %vm2400_vm1, %v6613_v24, inf  ;;  %v2409_v7 = vsel %vm2401_vm2, %v6613_v24, inf  ;;  %v2410_v19 = vsel %vm2402_vm3, %v6613_v24, inf  ;;  %v2411_v2 = vsel %vm2403_vm4, %v6613_v24, inf }
 0x2a6   : > { %v2412_v18 = vsel %vm2404_vm5, %v6613_v24, inf  ;;  %v2413_v39 = vsel %vm2405_vm6, %v6613_v24, inf  ;;  %v2414_v21 = vsel %vm2406_vm8, %v6613_v24, inf  ;;  %v2415_v32 = vsel %vm2407_vm9, %v6613_v24, inf }
 0x2a7   : > { %v2416_v9 = vmin.f32 %v2388_v31, %v2408_v54  ;;  %v2417_v10 = vmin.f32 %v2389_v37, %v2409_v7  ;;  %v2418_v25 = vmin.f32 %v2390_v17, %v2410_v19  ;;  %v2419_v28 = vmin.f32 %v2391_v50, %v2411_v2 }
 0x2a8   : > { %v2420_v29 = vmin.f32 %v2392_v27, %v2412_v18  ;;  %v2421_v61 = vmin.f32 %v2393_v53, %v2413_v39  ;;  %v2422_v20 = vmin.f32 %v2394_v36, %v2414_v21  ;;  %v2423_v16 = vmin.f32 %v2395_v51, %v2415_v32 }
 0x2a9   : > { %v2427_v8 = vrot.slane %v6585_v43, %v5450_v60  ;;  %v2455_v1 = vrot.slane %v6585_v43, %v5465_v45  ;;  %v6783_v12 = vrot.slane %v6775_v23, %v5408_v55  ;;  %v6787_v24 = vrot.slane %v6775_v23, %v5411_v58 }
 0x2aa   : > { %v6791_v63 = vrot.slane %v6775_v23, %v5414_v59  ;;  %v6795_v22 = vrot.slane %v6775_v23, %v5426_v44  ;;  %v6799_v11 = vrot.slane %v6775_v23, %v5429_v46  ;;  %v6803_v43 = vrot.slane %v6775_v23, %v5432_v49 }
 0x2ab   : > { %vm2428_vm7 = vcmp.gt.f32.partialorder %v2427_v8, %v6442_v62  ;;  %vm2429_vm10 = vcmp.gt.f32.partialorder %v2427_v8, %v6447_v14  ;;  %vm2430_vm11 = vcmp.gt.f32.partialorder %v2427_v8, %v6476_v57  ;;  %vm2431_vm12 = vcmp.gt.f32.partialorder %v2427_v8, %v6481_v26 }
 0x2ac   : > { %vm2432_vm13 = vcmp.gt.f32.partialorder %v2427_v8, %v6486_v33  ;;  %vm2433_vm14 = vcmp.gt.f32.partialorder %v2427_v8, %v6491_v5  ;;  %vm2434_vm15 = vcmp.gt.f32.partialorder %v2427_v8, %v6496_v15  ;;  %vm2435_vm0 = vcmp.gt.f32.partialorder %v2427_v8, %v6501_v3 }
 0x2ad   : > { %v2436_v4 = vsel %vm2428_vm7, %v2427_v8, inf  ;;  %v2437_v35 = vsel %vm2429_vm10, %v2427_v8, inf  ;;  %v2438_v56 = vsel %vm2430_vm11, %v2427_v8, inf  ;;  %v2439_v48 = vsel %vm2431_vm12, %v2427_v8, inf }
 0x2ae   : > { %v2440_v31 = vsel %vm2432_vm13, %v2427_v8, inf  ;;  %v2441_v37 = vsel %vm2433_vm14, %v2427_v8, inf  ;;  %v2442_v17 = vsel %vm2434_vm15, %v2427_v8, inf  ;;  %v2443_v50 = vsel %vm2435_vm0, %v2427_v8, inf }
 0x2af   : > { %v2444_v27 = vmin.f32 %v2416_v9, %v2436_v4  ;;  %v2445_v53 = vmin.f32 %v2417_v10, %v2437_v35  ;;  %v2446_v36 = vmin.f32 %v2418_v25, %v2438_v56  ;;  %v2447_v51 = vmin.f32 %v2419_v28, %v2439_v48 }
 0x2b0   : > { %v2448_v54 = vmin.f32 %v2420_v29, %v2440_v31  ;;  %v2449_v7 = vmin.f32 %v2421_v61, %v2441_v37  ;;  %v2450_v19 = vmin.f32 %v2422_v20, %v2442_v17  ;;  %v2451_v2 = vmin.f32 %v2423_v16, %v2443_v50 }
 0x2b1   : > { %vm2456_vm1 = vcmp.gt.f32.partialorder %v2455_v1, %v6442_v62  ;;  %vm2457_vm2 = vcmp.gt.f32.partialorder %v2455_v1, %v6447_v14  ;;  %vm2458_vm3 = vcmp.gt.f32.partialorder %v2455_v1, %v6476_v57  ;;  %vm2459_vm4 = vcmp.gt.f32.partialorder %v2455_v1, %v6481_v26 }
 0x2b2   : > { %vm2460_vm5 = vcmp.gt.f32.partialorder %v2455_v1, %v6486_v33  ;;  %vm2461_vm6 = vcmp.gt.f32.partialorder %v2455_v1, %v6491_v5  ;;  %vm2462_vm8 = vcmp.gt.f32.partialorder %v2455_v1, %v6496_v15  ;;  %vm2463_vm9 = vcmp.gt.f32.partialorder %v2455_v1, %v6501_v3 }
 0x2b3   : > { %v2464_v18 = vsel %vm2456_vm1, %v2455_v1, inf  ;;  %v2465_v39 = vsel %vm2457_vm2, %v2455_v1, inf  ;;  %v2466_v21 = vsel %vm2458_vm3, %v2455_v1, inf  ;;  %v2467_v32 = vsel %vm2459_vm4, %v2455_v1, inf }
 0x2b4   : > { %v2468_v9 = vsel %vm2460_vm5, %v2455_v1, inf  ;;  %v2469_v10 = vsel %vm2461_vm6, %v2455_v1, inf  ;;  %v2470_v25 = vsel %vm2462_vm8, %v2455_v1, inf  ;;  %v2471_v28 = vsel %vm2463_vm9, %v2455_v1, inf }
 0x2b5   : > { %v2472_v29 = vmin.f32 %v2444_v27, %v2464_v18  ;;  %v2473_v61 = vmin.f32 %v2445_v53, %v2465_v39  ;;  %v2474_v20 = vmin.f32 %v2446_v36, %v2466_v21  ;;  %v2475_v16 = vmin.f32 %v2447_v51, %v2467_v32 }
 0x2b6   : > { %v2476_v8 = vmin.f32 %v2448_v54, %v2468_v9  ;;  %v2477_v4 = vmin.f32 %v2449_v7, %v2469_v10  ;;  %v2478_v35 = vmin.f32 %v2450_v19, %v2470_v25  ;;  %v2479_v56 = vmin.f32 %v2451_v2, %v2471_v28 }
 0x2b7   : > { %vm2486_vm7 = vcmp.gt.f32.partialorder %v6783_v12, %v6442_v62  ;;  %vm2487_vm10 = vcmp.gt.f32.partialorder %v6783_v12, %v6447_v14  ;;  %vm2488_vm11 = vcmp.gt.f32.partialorder %v6783_v12, %v6476_v57  ;;  %vm2489_vm12 = vcmp.gt.f32.partialorder %v6783_v12, %v6481_v26 }
 0x2b8   : > { %vm2490_vm13 = vcmp.gt.f32.partialorder %v6783_v12, %v6486_v33  ;;  %vm2491_vm14 = vcmp.gt.f32.partialorder %v6783_v12, %v6491_v5  ;;  %vm2492_vm15 = vcmp.gt.f32.partialorder %v6783_v12, %v6496_v15  ;;  %vm2493_vm0 = vcmp.gt.f32.partialorder %v6783_v12, %v6501_v3 }
 0x2b9   : > { %v2494_v1 = vsel %vm2486_vm7, %v6783_v12, inf  ;;  %v2495_v48 = vsel %vm2487_vm10, %v6783_v12, inf  ;;  %v2496_v31 = vsel %vm2488_vm11, %v6783_v12, inf  ;;  %v2497_v37 = vsel %vm2489_vm12, %v6783_v12, inf }
 0x2ba   : > { %v2498_v17 = vsel %vm2490_vm13, %v6783_v12, inf  ;;  %v2499_v50 = vsel %vm2491_vm14, %v6783_v12, inf  ;;  %v2500_v27 = vsel %vm2492_vm15, %v6783_v12, inf  ;;  %v2501_v53 = vsel %vm2493_vm0, %v6783_v12, inf }
 0x2bb   : > { %v2502_v36 = vmin.f32 %v2472_v29, %v2494_v1  ;;  %v2503_v51 = vmin.f32 %v2473_v61, %v2495_v48  ;;  %v2504_v54 = vmin.f32 %v2474_v20, %v2496_v31  ;;  %v2505_v7 = vmin.f32 %v2475_v16, %v2497_v37 }
 0x2bc   : > { %v2506_v19 = vmin.f32 %v2476_v8, %v2498_v17  ;;  %v2507_v2 = vmin.f32 %v2477_v4, %v2499_v50  ;;  %v2508_v18 = vmin.f32 %v2478_v35, %v2500_v27  ;;  %v2509_v39 = vmin.f32 %v2479_v56, %v2501_v53 }
 0x2bd   : > { %vm2514_vm1 = vcmp.gt.f32.partialorder %v6787_v24, %v6442_v62  ;;  %vm2515_vm2 = vcmp.gt.f32.partialorder %v6787_v24, %v6447_v14  ;;  %vm2516_vm3 = vcmp.gt.f32.partialorder %v6787_v24, %v6476_v57  ;;  %vm2517_vm4 = vcmp.gt.f32.partialorder %v6787_v24, %v6481_v26 }
 0x2be   : > { %vm2518_vm5 = vcmp.gt.f32.partialorder %v6787_v24, %v6486_v33  ;;  %vm2519_vm6 = vcmp.gt.f32.partialorder %v6787_v24, %v6491_v5  ;;  %vm2520_vm8 = vcmp.gt.f32.partialorder %v6787_v24, %v6496_v15  ;;  %vm2521_vm9 = vcmp.gt.f32.partialorder %v6787_v24, %v6501_v3 }
 0x2bf   : > { %v2522_v12 = vsel %vm2514_vm1, %v6787_v24, inf  ;;  %v2523_v21 = vsel %vm2515_vm2, %v6787_v24, inf  ;;  %v2524_v32 = vsel %vm2516_vm3, %v6787_v24, inf  ;;  %v2525_v9 = vsel %vm2517_vm4, %v6787_v24, inf }
 0x2c0   : > { %v2526_v10 = vsel %vm2518_vm5, %v6787_v24, inf  ;;  %v2527_v25 = vsel %vm2519_vm6, %v6787_v24, inf  ;;  %v2528_v28 = vsel %vm2520_vm8, %v6787_v24, inf  ;;  %v2529_v29 = vsel %vm2521_vm9, %v6787_v24, inf }
 0x2c1   : > { %v2530_v61 = vmin.f32 %v2502_v36, %v2522_v12  ;;  %v2531_v20 = vmin.f32 %v2503_v51, %v2523_v21  ;;  %v2532_v16 = vmin.f32 %v2504_v54, %v2524_v32  ;;  %v2533_v8 = vmin.f32 %v2505_v7, %v2525_v9 }
 0x2c2   : > { %v2534_v4 = vmin.f32 %v2506_v19, %v2526_v10  ;;  %v2535_v35 = vmin.f32 %v2507_v2, %v2527_v25  ;;  %v2536_v56 = vmin.f32 %v2508_v18, %v2528_v28  ;;  %v2537_v1 = vmin.f32 %v2509_v39, %v2529_v29 }
 0x2c3   : > { %vm2542_vm7 = vcmp.gt.f32.partialorder %v6791_v63, %v6442_v62  ;;  %vm2543_vm10 = vcmp.gt.f32.partialorder %v6791_v63, %v6447_v14  ;;  %vm2544_vm11 = vcmp.gt.f32.partialorder %v6791_v63, %v6476_v57  ;;  %vm2545_vm12 = vcmp.gt.f32.partialorder %v6791_v63, %v6481_v26 }
 0x2c4   : > { %vm2546_vm13 = vcmp.gt.f32.partialorder %v6791_v63, %v6486_v33  ;;  %vm2547_vm14 = vcmp.gt.f32.partialorder %v6791_v63, %v6491_v5  ;;  %vm2548_vm15 = vcmp.gt.f32.partialorder %v6791_v63, %v6496_v15  ;;  %vm2549_vm0 = vcmp.gt.f32.partialorder %v6791_v63, %v6501_v3 }
 0x2c5   : > { %v2550_v24 = vsel %vm2542_vm7, %v6791_v63, inf  ;;  %v2551_v48 = vsel %vm2543_vm10, %v6791_v63, inf  ;;  %v2552_v31 = vsel %vm2544_vm11, %v6791_v63, inf  ;;  %v2553_v37 = vsel %vm2545_vm12, %v6791_v63, inf }
 0x2c6   : > { %v2554_v17 = vsel %vm2546_vm13, %v6791_v63, inf  ;;  %v2555_v50 = vsel %vm2547_vm14, %v6791_v63, inf  ;;  %v2556_v27 = vsel %vm2548_vm15, %v6791_v63, inf  ;;  %v2557_v53 = vsel %vm2549_vm0, %v6791_v63, inf }
 0x2c7   : > { %v2558_v36 = vmin.f32 %v2530_v61, %v2550_v24  ;;  %v2559_v51 = vmin.f32 %v2531_v20, %v2551_v48  ;;  %v2560_v54 = vmin.f32 %v2532_v16, %v2552_v31  ;;  %v2561_v7 = vmin.f32 %v2533_v8, %v2553_v37 }
 0x2c8   : > { %v2562_v19 = vmin.f32 %v2534_v4, %v2554_v17  ;;  %v2563_v2 = vmin.f32 %v2535_v35, %v2555_v50  ;;  %v2564_v18 = vmin.f32 %v2536_v56, %v2556_v27  ;;  %v2565_v39 = vmin.f32 %v2537_v1, %v2557_v53 }
 0x2c9   : > { %vm2570_vm1 = vcmp.gt.f32.partialorder %v6795_v22, %v6442_v62  ;;  %vm2571_vm2 = vcmp.gt.f32.partialorder %v6795_v22, %v6447_v14  ;;  %vm2572_vm3 = vcmp.gt.f32.partialorder %v6795_v22, %v6476_v57  ;;  %vm2573_vm4 = vcmp.gt.f32.partialorder %v6795_v22, %v6481_v26 }
 0x2ca   : > { %vm2574_vm5 = vcmp.gt.f32.partialorder %v6795_v22, %v6486_v33  ;;  %vm2575_vm6 = vcmp.gt.f32.partialorder %v6795_v22, %v6491_v5  ;;  %vm2576_vm8 = vcmp.gt.f32.partialorder %v6795_v22, %v6496_v15  ;;  %vm2577_vm9 = vcmp.gt.f32.partialorder %v6795_v22, %v6501_v3 }
 0x2cb   : > { %v2578_v63 = vsel %vm2570_vm1, %v6795_v22, inf  ;;  %v2579_v12 = vsel %vm2571_vm2, %v6795_v22, inf  ;;  %v2580_v21 = vsel %vm2572_vm3, %v6795_v22, inf  ;;  %v2581_v32 = vsel %vm2573_vm4, %v6795_v22, inf }
 0x2cc   : > { %v2582_v9 = vsel %vm2574_vm5, %v6795_v22, inf  ;;  %v2583_v10 = vsel %vm2575_vm6, %v6795_v22, inf  ;;  %v2584_v25 = vsel %vm2576_vm8, %v6795_v22, inf  ;;  %v2585_v28 = vsel %vm2577_vm9, %v6795_v22, inf }
 0x2cd   : > { %v2586_v29 = vmin.f32 %v2558_v36, %v2578_v63  ;;  %v2587_v61 = vmin.f32 %v2559_v51, %v2579_v12  ;;  %v2588_v20 = vmin.f32 %v2560_v54, %v2580_v21  ;;  %v2589_v16 = vmin.f32 %v2561_v7, %v2581_v32  ;;  %v6965_v32 = vld [vmem:[#allocation3 + $0x40] sm:$0xff] }
 0x2ce   : > { %v2590_v8 = vmin.f32 %v2562_v19, %v2582_v9  ;;  %v2591_v4 = vmin.f32 %v2563_v2, %v2583_v10  ;;  %v2592_v35 = vmin.f32 %v2564_v18, %v2584_v25  ;;  %v2593_v56 = vmin.f32 %v2565_v39, %v2585_v28 }
 0x2cf   : > { %vm2598_vm7 = vcmp.gt.f32.partialorder %v6799_v11, %v6442_v62  ;;  %vm2599_vm10 = vcmp.gt.f32.partialorder %v6799_v11, %v6447_v14  ;;  %vm2600_vm11 = vcmp.gt.f32.partialorder %v6799_v11, %v6476_v57  ;;  %vm2601_vm12 = vcmp.gt.f32.partialorder %v6799_v11, %v6481_v26 }
 0x2d0   : > { %vm2602_vm13 = vcmp.gt.f32.partialorder %v6799_v11, %v6486_v33  ;;  %vm2603_vm14 = vcmp.gt.f32.partialorder %v6799_v11, %v6491_v5  ;;  %vm2604_vm15 = vcmp.gt.f32.partialorder %v6799_v11, %v6496_v15  ;;  %vm2605_vm0 = vcmp.gt.f32.partialorder %v6799_v11, %v6501_v3 }
 0x2d1   : > { %v2606_v22 = vsel %vm2598_vm7, %v6799_v11, inf  ;;  %v2607_v1 = vsel %vm2599_vm10, %v6799_v11, inf  ;;  %v2608_v24 = vsel %vm2600_vm11, %v6799_v11, inf  ;;  %v2609_v48 = vsel %vm2601_vm12, %v6799_v11, inf }
 0x2d2   : > { %v2610_v31 = vsel %vm2602_vm13, %v6799_v11, inf  ;;  %v2611_v37 = vsel %vm2603_vm14, %v6799_v11, inf  ;;  %v2612_v17 = vsel %vm2604_vm15, %v6799_v11, inf  ;;  %v2613_v50 = vsel %vm2605_vm0, %v6799_v11, inf }
 0x2d3   : > { %v2614_v27 = vmin.f32 %v2586_v29, %v2606_v22  ;;  %v2615_v53 = vmin.f32 %v2587_v61, %v2607_v1  ;;  %v2616_v36 = vmin.f32 %v2588_v20, %v2608_v24  ;;  %v2617_v51 = vmin.f32 %v2589_v16, %v2609_v48  ;;  %v6996_v24 = vld [vmem:[%s5399_s20] sm:$0xff]  ;;  %v7000_v48 = vld [vmem:[%s5399_s20 + $0x8] sm:$0xff] }
 0x2d4   : > { %v2618_v54 = vmin.f32 %v2590_v8, %v2610_v31  ;;  %v2619_v7 = vmin.f32 %v2591_v4, %v2611_v37  ;;  %v2620_v19 = vmin.f32 %v2592_v35, %v2612_v17  ;;  %v2621_v2 = vmin.f32 %v2593_v56, %v2613_v50 }
 0x2d5   : > { %vm2626_vm1 = vcmp.gt.f32.partialorder %v6803_v43, %v6442_v62  ;;  %vm2627_vm2 = vcmp.gt.f32.partialorder %v6803_v43, %v6447_v14  ;;  %vm2628_vm3 = vcmp.gt.f32.partialorder %v6803_v43, %v6476_v57  ;;  %vm2629_vm4 = vcmp.gt.f32.partialorder %v6803_v43, %v6481_v26 }
 0x2d6   : > { %vm2630_vm5 = vcmp.gt.f32.partialorder %v6803_v43, %v6486_v33  ;;  %vm2631_vm6 = vcmp.gt.f32.partialorder %v6803_v43, %v6491_v5  ;;  %vm2632_vm8 = vcmp.gt.f32.partialorder %v6803_v43, %v6496_v15  ;;  %vm2633_vm9 = vcmp.gt.f32.partialorder %v6803_v43, %v6501_v3 }
 0x2d7   : > { %v2634_v62 = vsel %vm2626_vm1, %v6803_v43, inf  ;;  %v2635_v14 = vsel %vm2627_vm2, %v6803_v43, inf  ;;  %v2636_v11 = vsel %vm2628_vm3, %v6803_v43, inf  ;;  %v2637_v18 = vsel %vm2629_vm4, %v6803_v43, inf }
 0x2d8   : > { %v2638_v39 = vsel %vm2630_vm5, %v6803_v43, inf  ;;  %v2639_v63 = vsel %vm2631_vm6, %v6803_v43, inf  ;;  %v2640_v12 = vsel %vm2632_vm8, %v6803_v43, inf  ;;  %v2641_v21 = vsel %vm2633_vm9, %v6803_v43, inf }
 0x2d9   : > { %v2642_v9 = vmin.f32 %v2614_v27, %v2634_v62  ;;  %v2643_v10 = vmin.f32 %v2615_v53, %v2635_v14  ;;  %v2644_v25 = vmin.f32 %v2616_v36, %v2636_v11  ;;  %v2645_v28 = vmin.f32 %v2617_v51, %v2637_v18  ;;  %v7020_v62 = vld [vmem:[%s5399_s20 + $0x20] sm:$0xff]  ;;  %v7024_v14 = vld [vmem:[%s5399_s20 + $0x28] sm:$0xff]  ;;  %v7028_v11 = vld [vmem:[%s5399_s20 + $0x30] sm:$0xff] }
 0x2da   : > { %v2646_v29 = vmin.f32 %v2618_v54, %v2638_v39  ;;  %v2647_v61 = vmin.f32 %v2619_v7, %v2639_v63  ;;  %v2648_v20 = vmin.f32 %v2620_v19, %v2640_v12  ;;  %v2649_v16 = vmin.f32 %v2621_v2, %v2641_v21  ;;  %v7012_v19 = vld [vmem:[%s5399_s20 + $0x10] sm:$0xff]  ;;  %v7016_v2 = vld [vmem:[%s5399_s20 + $0x18] sm:$0xff] }
 0x2db   : > { %v2653_v8 = vrot.slane %v6775_v23, %v5450_v60  ;;  %v2681_v4 = vrot.slane %v6775_v23, %v5465_v45  ;;  %v6973_v43 = vrot.slane %v6965_v32, %v5408_v55  ;;  %v6977_v35 = vrot.slane %v6965_v32, %v5411_v58  ;;  %v7032_v18 = vld [vmem:[%s5399_s20 + $0x38] sm:$0xff] }
 0x2dc   : > { %v6981_v56 = vrot.slane %v6965_v32, %v5414_v59  ;;  %v6985_v22 = vrot.slane %v6965_v32, %v5426_v44  ;;  %v6989_v1 = vrot.slane %v6965_v32, %v5429_v46  ;;  %v6993_v23 = vrot.slane %v6965_v32, %v5432_v49 }
 0x2dd   : > { %vm2654_vm7 = vcmp.gt.f32.partialorder %v2653_v8, %v6996_v24  ;;  %vm2655_vm10 = vcmp.gt.f32.partialorder %v2653_v8, %v7000_v48  ;;  %vm2656_vm11 = vcmp.gt.f32.partialorder %v2653_v8, %v6476_v57  ;;  %vm2657_vm12 = vcmp.gt.f32.partialorder %v2653_v8, %v6481_v26 }
 0x2de   : > { %vm2658_vm13 = vcmp.gt.f32.partialorder %v2653_v8, %v6486_v33  ;;  %vm2659_vm14 = vcmp.gt.f32.partialorder %v2653_v8, %v6491_v5  ;;  %vm2660_vm15 = vcmp.gt.f32.partialorder %v2653_v8, %v6496_v15  ;;  %vm2661_vm0 = vcmp.gt.f32.partialorder %v2653_v8, %v6501_v3 }
 0x2df   : > { %v2662_v31 = vsel %vm2654_vm7, %v2653_v8, inf  ;;  %v2663_v37 = vsel %vm2655_vm10, %v2653_v8, inf  ;;  %v2664_v17 = vsel %vm2656_vm11, %v2653_v8, inf  ;;  %v2665_v50 = vsel %vm2657_vm12, %v2653_v8, inf }
 0x2e0   : > { %v2666_v27 = vsel %vm2658_vm13, %v2653_v8, inf  ;;  %v2667_v53 = vsel %vm2659_vm14, %v2653_v8, inf  ;;  %v2668_v36 = vsel %vm2660_vm15, %v2653_v8, inf  ;;  %v2669_v57 = vsel %vm2661_vm0, %v2653_v8, inf }
 0x2e1   : > { %v2670_v26 = vmin.f32 %v2642_v9, %v2662_v31  ;;  %v2671_v33 = vmin.f32 %v2643_v10, %v2663_v37  ;;  %v2672_v51 = vmin.f32 %v2644_v25, %v2664_v17  ;;  %v2673_v5 = vmin.f32 %v2645_v28, %v2665_v50 }
 0x2e2   : > { %v2674_v15 = vmin.f32 %v2646_v29, %v2666_v27  ;;  %v2675_v3 = vmin.f32 %v2647_v61, %v2667_v53  ;;  %v2676_v54 = vmin.f32 %v2648_v20, %v2668_v36  ;;  %v2677_v7 = vmin.f32 %v2649_v16, %v2669_v57 }
 0x2e3   : > { %vm2682_vm1 = vcmp.gt.f32.partialorder %v2681_v4, %v6996_v24  ;;  %vm2683_vm2 = vcmp.gt.f32.partialorder %v2681_v4, %v7000_v48  ;;  %vm2684_vm3 = vcmp.gt.f32.partialorder %v2681_v4, %v7012_v19  ;;  %vm2685_vm4 = vcmp.gt.f32.partialorder %v2681_v4, %v7016_v2 }
 0x2e4   : > { %vm2686_vm5 = vcmp.gt.f32.partialorder %v2681_v4, %v7020_v62  ;;  %vm2687_vm6 = vcmp.gt.f32.partialorder %v2681_v4, %v7024_v14  ;;  %vm2688_vm8 = vcmp.gt.f32.partialorder %v2681_v4, %v7028_v11  ;;  %vm2689_vm9 = vcmp.gt.f32.partialorder %v2681_v4, %v7032_v18 }
 0x2e5   : > { %v2690_v39 = vsel %vm2682_vm1, %v2681_v4, inf  ;;  %v2691_v63 = vsel %vm2683_vm2, %v2681_v4, inf  ;;  %v2692_v12 = vsel %vm2684_vm3, %v2681_v4, inf  ;;  %v2693_v21 = vsel %vm2685_vm4, %v2681_v4, inf }
 0x2e6   : > { %v2694_v9 = vsel %vm2686_vm5, %v2681_v4, inf  ;;  %v2695_v10 = vsel %vm2687_vm6, %v2681_v4, inf  ;;  %v2696_v25 = vsel %vm2688_vm8, %v2681_v4, inf  ;;  %v2697_v28 = vsel %vm2689_vm9, %v2681_v4, inf }
 0x2e7   : > { %v2698_v29 = vmin.f32 %v2670_v26, %v2690_v39  ;;  %v2699_v61 = vmin.f32 %v2671_v33, %v2691_v63  ;;  %v2700_v20 = vmin.f32 %v2672_v51, %v2692_v12  ;;  %v2701_v16 = vmin.f32 %v2673_v5, %v2693_v21 }
 0x2e8   : > { %v2702_v8 = vmin.f32 %v2674_v15, %v2694_v9  ;;  %v2703_v31 = vmin.f32 %v2675_v3, %v2695_v10  ;;  %v2704_v37 = vmin.f32 %v2676_v54, %v2696_v25  ;;  %v2705_v17 = vmin.f32 %v2677_v7, %v2697_v28 }
 0x2e9   : > { %vm2712_vm7 = vcmp.gt.f32.partialorder %v6973_v43, %v6996_v24  ;;  %vm2713_vm10 = vcmp.gt.f32.partialorder %v6973_v43, %v7000_v48  ;;  %vm2714_vm11 = vcmp.gt.f32.partialorder %v6973_v43, %v7012_v19  ;;  %vm2715_vm12 = vcmp.gt.f32.partialorder %v6973_v43, %v7016_v2 }
 0x2ea   : > { %vm2716_vm13 = vcmp.gt.f32.partialorder %v6973_v43, %v7020_v62  ;;  %vm2717_vm14 = vcmp.gt.f32.partialorder %v6973_v43, %v7024_v14  ;;  %vm2718_vm15 = vcmp.gt.f32.partialorder %v6973_v43, %v7028_v11  ;;  %vm2719_vm0 = vcmp.gt.f32.partialorder %v6973_v43, %v7032_v18 }
 0x2eb   : > { %v2720_v4 = vsel %vm2712_vm7, %v6973_v43, inf  ;;  %v2721_v50 = vsel %vm2713_vm10, %v6973_v43, inf  ;;  %v2722_v27 = vsel %vm2714_vm11, %v6973_v43, inf  ;;  %v2723_v53 = vsel %vm2715_vm12, %v6973_v43, inf }
 0x2ec   : > { %v2724_v36 = vsel %vm2716_vm13, %v6973_v43, inf  ;;  %v2725_v57 = vsel %vm2717_vm14, %v6973_v43, inf  ;;  %v2726_v26 = vsel %vm2718_vm15, %v6973_v43, inf  ;;  %v2727_v33 = vsel %vm2719_vm0, %v6973_v43, inf }
 0x2ed   : > { %v2728_v51 = vmin.f32 %v2698_v29, %v2720_v4  ;;  %v2729_v5 = vmin.f32 %v2699_v61, %v2721_v50  ;;  %v2730_v15 = vmin.f32 %v2700_v20, %v2722_v27  ;;  %v2731_v3 = vmin.f32 %v2701_v16, %v2723_v53 }
 0x2ee   : > { %v2732_v54 = vmin.f32 %v2702_v8, %v2724_v36  ;;  %v2733_v7 = vmin.f32 %v2703_v31, %v2725_v57  ;;  %v2734_v39 = vmin.f32 %v2704_v37, %v2726_v26  ;;  %v2735_v63 = vmin.f32 %v2705_v17, %v2727_v33 }
 0x2ef   : > { %vm2740_vm1 = vcmp.gt.f32.partialorder %v6977_v35, %v6996_v24  ;;  %vm2741_vm2 = vcmp.gt.f32.partialorder %v6977_v35, %v7000_v48  ;;  %vm2742_vm3 = vcmp.gt.f32.partialorder %v6977_v35, %v7012_v19  ;;  %vm2743_vm4 = vcmp.gt.f32.partialorder %v6977_v35, %v7016_v2 }
 0x2f0   : > { %vm2744_vm5 = vcmp.gt.f32.partialorder %v6977_v35, %v7020_v62  ;;  %vm2745_vm6 = vcmp.gt.f32.partialorder %v6977_v35, %v7024_v14  ;;  %vm2746_vm8 = vcmp.gt.f32.partialorder %v6977_v35, %v7028_v11  ;;  %vm2747_vm9 = vcmp.gt.f32.partialorder %v6977_v35, %v7032_v18 }
 0x2f1   : > { %v2748_v43 = vsel %vm2740_vm1, %v6977_v35, inf  ;;  %v2749_v12 = vsel %vm2741_vm2, %v6977_v35, inf  ;;  %v2750_v21 = vsel %vm2742_vm3, %v6977_v35, inf  ;;  %v2751_v9 = vsel %vm2743_vm4, %v6977_v35, inf }
 0x2f2   : > { %v2752_v10 = vsel %vm2744_vm5, %v6977_v35, inf  ;;  %v2753_v25 = vsel %vm2745_vm6, %v6977_v35, inf  ;;  %v2754_v28 = vsel %vm2746_vm8, %v6977_v35, inf  ;;  %v2755_v29 = vsel %vm2747_vm9, %v6977_v35, inf }
 0x2f3   : > { %v2756_v61 = vmin.f32 %v2728_v51, %v2748_v43  ;;  %v2757_v20 = vmin.f32 %v2729_v5, %v2749_v12  ;;  %v2758_v16 = vmin.f32 %v2730_v15, %v2750_v21  ;;  %v2759_v8 = vmin.f32 %v2731_v3, %v2751_v9 }
 0x2f4   : > { %v2760_v31 = vmin.f32 %v2732_v54, %v2752_v10  ;;  %v2761_v37 = vmin.f32 %v2733_v7, %v2753_v25  ;;  %v2762_v17 = vmin.f32 %v2734_v39, %v2754_v28  ;;  %v2763_v4 = vmin.f32 %v2735_v63, %v2755_v29 }
 0x2f5   : > { %vm2768_vm7 = vcmp.gt.f32.partialorder %v6981_v56, %v6996_v24  ;;  %vm2769_vm10 = vcmp.gt.f32.partialorder %v6981_v56, %v7000_v48  ;;  %vm2770_vm11 = vcmp.gt.f32.partialorder %v6981_v56, %v7012_v19  ;;  %vm2771_vm12 = vcmp.gt.f32.partialorder %v6981_v56, %v7016_v2 }
 0x2f6   : > { %vm2772_vm13 = vcmp.gt.f32.partialorder %v6981_v56, %v7020_v62  ;;  %vm2773_vm14 = vcmp.gt.f32.partialorder %v6981_v56, %v7024_v14  ;;  %vm2774_vm15 = vcmp.gt.f32.partialorder %v6981_v56, %v7028_v11  ;;  %vm2775_vm0 = vcmp.gt.f32.partialorder %v6981_v56, %v7032_v18 }
 0x2f7   : > { %v2776_v35 = vsel %vm2768_vm7, %v6981_v56, inf  ;;  %v2777_v50 = vsel %vm2769_vm10, %v6981_v56, inf  ;;  %v2778_v27 = vsel %vm2770_vm11, %v6981_v56, inf  ;;  %v2779_v53 = vsel %vm2771_vm12, %v6981_v56, inf }
 0x2f8   : > { %v2780_v36 = vsel %vm2772_vm13, %v6981_v56, inf  ;;  %v2781_v57 = vsel %vm2773_vm14, %v6981_v56, inf  ;;  %v2782_v26 = vsel %vm2774_vm15, %v6981_v56, inf  ;;  %v2783_v33 = vsel %vm2775_vm0, %v6981_v56, inf }
 0x2f9   : > { %v2784_v51 = vmin.f32 %v2756_v61, %v2776_v35  ;;  %v2785_v5 = vmin.f32 %v2757_v20, %v2777_v50  ;;  %v2786_v15 = vmin.f32 %v2758_v16, %v2778_v27  ;;  %v2787_v3 = vmin.f32 %v2759_v8, %v2779_v53 }
 0x2fa   : > { %v2788_v54 = vmin.f32 %v2760_v31, %v2780_v36  ;;  %v2789_v7 = vmin.f32 %v2761_v37, %v2781_v57  ;;  %v2790_v39 = vmin.f32 %v2762_v17, %v2782_v26  ;;  %v2791_v63 = vmin.f32 %v2763_v4, %v2783_v33 }
 0x2fb   : > { %vm2796_vm1 = vcmp.gt.f32.partialorder %v6985_v22, %v6996_v24  ;;  %vm2797_vm2 = vcmp.gt.f32.partialorder %v6985_v22, %v7000_v48  ;;  %vm2798_vm3 = vcmp.gt.f32.partialorder %v6985_v22, %v7012_v19  ;;  %vm2799_vm4 = vcmp.gt.f32.partialorder %v6985_v22, %v7016_v2 }
 0x2fc   : > { %vm2800_vm5 = vcmp.gt.f32.partialorder %v6985_v22, %v7020_v62  ;;  %vm2801_vm6 = vcmp.gt.f32.partialorder %v6985_v22, %v7024_v14  ;;  %vm2802_vm8 = vcmp.gt.f32.partialorder %v6985_v22, %v7028_v11  ;;  %vm2803_vm9 = vcmp.gt.f32.partialorder %v6985_v22, %v7032_v18 }
 0x2fd   : > { %v2804_v56 = vsel %vm2796_vm1, %v6985_v22, inf  ;;  %v2805_v43 = vsel %vm2797_vm2, %v6985_v22, inf  ;;  %v2806_v12 = vsel %vm2798_vm3, %v6985_v22, inf  ;;  %v2807_v21 = vsel %vm2799_vm4, %v6985_v22, inf }
 0x2fe   : > { %v2808_v9 = vsel %vm2800_vm5, %v6985_v22, inf  ;;  %v2809_v10 = vsel %vm2801_vm6, %v6985_v22, inf  ;;  %v2810_v25 = vsel %vm2802_vm8, %v6985_v22, inf  ;;  %v2811_v28 = vsel %vm2803_vm9, %v6985_v22, inf }
 0x2ff   : > { %v2812_v29 = vmin.f32 %v2784_v51, %v2804_v56  ;;  %v2813_v61 = vmin.f32 %v2785_v5, %v2805_v43  ;;  %v2814_v20 = vmin.f32 %v2786_v15, %v2806_v12  ;;  %v2815_v16 = vmin.f32 %v2787_v3, %v2807_v21 }
 0x300   : > { %v2816_v8 = vmin.f32 %v2788_v54, %v2808_v9  ;;  %v2817_v31 = vmin.f32 %v2789_v7, %v2809_v10  ;;  %v2818_v37 = vmin.f32 %v2790_v39, %v2810_v25  ;;  %v2819_v17 = vmin.f32 %v2791_v63, %v2811_v28  ;;  %v7179_v10 = vld [vmem:[#allocation3 + $0x48] sm:$0xff] }
 0x301   : > { %vm2824_vm7 = vcmp.gt.f32.partialorder %v6989_v1, %v6996_v24  ;;  %vm2825_vm10 = vcmp.gt.f32.partialorder %v6989_v1, %v7000_v48  ;;  %vm2826_vm11 = vcmp.gt.f32.partialorder %v6989_v1, %v7012_v19  ;;  %vm2827_vm12 = vcmp.gt.f32.partialorder %v6989_v1, %v7016_v2 }
 0x302   : > { %vm2828_vm13 = vcmp.gt.f32.partialorder %v6989_v1, %v7020_v62  ;;  %vm2829_vm14 = vcmp.gt.f32.partialorder %v6989_v1, %v7024_v14  ;;  %vm2830_vm15 = vcmp.gt.f32.partialorder %v6989_v1, %v7028_v11  ;;  %vm2831_vm0 = vcmp.gt.f32.partialorder %v6989_v1, %v7032_v18 }
 0x303   : > { %v2832_v22 = vsel %vm2824_vm7, %v6989_v1, inf  ;;  %v2833_v4 = vsel %vm2825_vm10, %v6989_v1, inf  ;;  %v2834_v35 = vsel %vm2826_vm11, %v6989_v1, inf  ;;  %v2835_v50 = vsel %vm2827_vm12, %v6989_v1, inf }
 0x304   : > { %v2836_v27 = vsel %vm2828_vm13, %v6989_v1, inf  ;;  %v2837_v53 = vsel %vm2829_vm14, %v6989_v1, inf  ;;  %v2838_v36 = vsel %vm2830_vm15, %v6989_v1, inf  ;;  %v2839_v57 = vsel %vm2831_vm0, %v6989_v1, inf }
 0x305   : > { %v2840_v26 = vmin.f32 %v2812_v29, %v2832_v22  ;;  %v2841_v33 = vmin.f32 %v2813_v61, %v2833_v4  ;;  %v2842_v51 = vmin.f32 %v2814_v20, %v2834_v35  ;;  %v2843_v5 = vmin.f32 %v2815_v16, %v2835_v50 }
 0x306   : > { %v2844_v15 = vmin.f32 %v2816_v8, %v2836_v27  ;;  %v2845_v3 = vmin.f32 %v2817_v31, %v2837_v53  ;;  %v2846_v54 = vmin.f32 %v2818_v37, %v2838_v36  ;;  %v2847_v7 = vmin.f32 %v2819_v17, %v2839_v57 }
 0x307   : > { %vm2852_vm1 = vcmp.gt.f32.partialorder %v6993_v23, %v6996_v24  ;;  %vm2853_vm2 = vcmp.gt.f32.partialorder %v6993_v23, %v7000_v48  ;;  %vm2854_vm3 = vcmp.gt.f32.partialorder %v6993_v23, %v7012_v19  ;;  %vm2855_vm4 = vcmp.gt.f32.partialorder %v6993_v23, %v7016_v2 }
 0x308   : > { %vm2856_vm5 = vcmp.gt.f32.partialorder %v6993_v23, %v7020_v62  ;;  %vm2857_vm6 = vcmp.gt.f32.partialorder %v6993_v23, %v7024_v14  ;;  %vm2858_vm8 = vcmp.gt.f32.partialorder %v6993_v23, %v7028_v11  ;;  %vm2859_vm9 = vcmp.gt.f32.partialorder %v6993_v23, %v7032_v18 }
 0x309   : > { %v2860_v1 = vsel %vm2852_vm1, %v6993_v23, inf  ;;  %v2861_v39 = vsel %vm2853_vm2, %v6993_v23, inf  ;;  %v2862_v63 = vsel %vm2854_vm3, %v6993_v23, inf  ;;  %v2863_v56 = vsel %vm2855_vm4, %v6993_v23, inf }
 0x30a   : > { %v2864_v43 = vsel %vm2856_vm5, %v6993_v23, inf  ;;  %v2865_v12 = vsel %vm2857_vm6, %v6993_v23, inf  ;;  %v2866_v21 = vsel %vm2858_vm8, %v6993_v23, inf  ;;  %v2867_v9 = vsel %vm2859_vm9, %v6993_v23, inf }
 0x30b   : > { %v2868_v25 = vmin.f32 %v2840_v26, %v2860_v1  ;;  %v2869_v28 = vmin.f32 %v2841_v33, %v2861_v39  ;;  %v2870_v29 = vmin.f32 %v2842_v51, %v2862_v63  ;;  %v2871_v61 = vmin.f32 %v2843_v5, %v2863_v56 }
 0x30c   : > { %v2872_v20 = vmin.f32 %v2844_v15, %v2864_v43  ;;  %v2873_v16 = vmin.f32 %v2845_v3, %v2865_v12  ;;  %v2874_v8 = vmin.f32 %v2846_v54, %v2866_v21  ;;  %v2875_v31 = vmin.f32 %v2847_v7, %v2867_v9 }
 0x30d   : > { %v2879_v37 = vrot.slane %v6965_v32, %v5450_v60  ;;  %v2907_v17 = vrot.slane %v6965_v32, %v5465_v45  ;;  %v7187_v22 = vrot.slane %v7179_v10, %v5408_v55  ;;  %v7191_v23 = vrot.slane %v7179_v10, %v5411_v58 }
 0x30e   : > { %v7195_v4 = vrot.slane %v7179_v10, %v5414_v59  ;;  %v7199_v35 = vrot.slane %v7179_v10, %v5426_v44  ;;  %v7203_v50 = vrot.slane %v7179_v10, %v5429_v46  ;;  %v7207_v32 = vrot.slane %v7179_v10, %v5432_v49 }
 0x30f   : > { %vm2880_vm7 = vcmp.gt.f32.partialorder %v2879_v37, %v6996_v24  ;;  %vm2881_vm10 = vcmp.gt.f32.partialorder %v2879_v37, %v7000_v48  ;;  %vm2882_vm11 = vcmp.gt.f32.partialorder %v2879_v37, %v7012_v19  ;;  %vm2883_vm12 = vcmp.gt.f32.partialorder %v2879_v37, %v7016_v2 }
 0x310   : > { %vm2884_vm13 = vcmp.gt.f32.partialorder %v2879_v37, %v7020_v62  ;;  %vm2885_vm14 = vcmp.gt.f32.partialorder %v2879_v37, %v7024_v14  ;;  %vm2886_vm15 = vcmp.gt.f32.partialorder %v2879_v37, %v7028_v11  ;;  %vm2887_vm0 = vcmp.gt.f32.partialorder %v2879_v37, %v7032_v18 }
 0x311   : > { %v2888_v27 = vsel %vm2880_vm7, %v2879_v37, inf  ;;  %v2889_v53 = vsel %vm2881_vm10, %v2879_v37, inf  ;;  %v2890_v36 = vsel %vm2882_vm11, %v2879_v37, inf  ;;  %v2891_v57 = vsel %vm2883_vm12, %v2879_v37, inf }
 0x312   : > { %v2892_v26 = vsel %vm2884_vm13, %v2879_v37, inf  ;;  %v2893_v33 = vsel %vm2885_vm14, %v2879_v37, inf  ;;  %v2894_v51 = vsel %vm2886_vm15, %v2879_v37, inf  ;;  %v2895_v5 = vsel %vm2887_vm0, %v2879_v37, inf }
 0x313   : > { %v2896_v15 = vmin.f32 %v2868_v25, %v2888_v27  ;;  %v2897_v3 = vmin.f32 %v2869_v28, %v2889_v53  ;;  %v2898_v54 = vmin.f32 %v2870_v29, %v2890_v36  ;;  %v2899_v7 = vmin.f32 %v2871_v61, %v2891_v57 }
 0x314   : > { %v2900_v1 = vmin.f32 %v2872_v20, %v2892_v26  ;;  %v2901_v39 = vmin.f32 %v2873_v16, %v2893_v33  ;;  %v2902_v63 = vmin.f32 %v2874_v8, %v2894_v51  ;;  %v2903_v56 = vmin.f32 %v2875_v31, %v2895_v5 }
 0x315   : > { %vm2908_vm1 = vcmp.gt.f32.partialorder %v2907_v17, %v6996_v24  ;;  %vm2909_vm2 = vcmp.gt.f32.partialorder %v2907_v17, %v7000_v48  ;;  %vm2910_vm3 = vcmp.gt.f32.partialorder %v2907_v17, %v7012_v19  ;;  %vm2911_vm4 = vcmp.gt.f32.partialorder %v2907_v17, %v7016_v2 }
 0x316   : > { %vm2912_vm5 = vcmp.gt.f32.partialorder %v2907_v17, %v7020_v62  ;;  %vm2913_vm6 = vcmp.gt.f32.partialorder %v2907_v17, %v7024_v14  ;;  %vm2914_vm8 = vcmp.gt.f32.partialorder %v2907_v17, %v7028_v11  ;;  %vm2915_vm9 = vcmp.gt.f32.partialorder %v2907_v17, %v7032_v18 }
 0x317   : > { %v2916_v43 = vsel %vm2908_vm1, %v2907_v17, inf  ;;  %v2917_v12 = vsel %vm2909_vm2, %v2907_v17, inf  ;;  %v2918_v21 = vsel %vm2910_vm3, %v2907_v17, inf  ;;  %v2919_v9 = vsel %vm2911_vm4, %v2907_v17, inf }
 0x318   : > { %v2920_v25 = vsel %vm2912_vm5, %v2907_v17, inf  ;;  %v2921_v28 = vsel %vm2913_vm6, %v2907_v17, inf  ;;  %v2922_v29 = vsel %vm2914_vm8, %v2907_v17, inf  ;;  %v2923_v61 = vsel %vm2915_vm9, %v2907_v17, inf }
 0x319   : > { %v2924_v20 = vmin.f32 %v2896_v15, %v2916_v43  ;;  %v2925_v16 = vmin.f32 %v2897_v3, %v2917_v12  ;;  %v2926_v8 = vmin.f32 %v2898_v54, %v2918_v21  ;;  %v2927_v31 = vmin.f32 %v2899_v7, %v2919_v9 }
 0x31a   : > { %v2928_v37 = vmin.f32 %v2900_v1, %v2920_v25  ;;  %v2929_v27 = vmin.f32 %v2901_v39, %v2921_v28  ;;  %v2930_v53 = vmin.f32 %v2902_v63, %v2922_v29  ;;  %v2931_v36 = vmin.f32 %v2903_v56, %v2923_v61 }
 0x31b   : > { %vm2938_vm7 = vcmp.gt.f32.partialorder %v7187_v22, %v6996_v24  ;;  %vm2939_vm10 = vcmp.gt.f32.partialorder %v7187_v22, %v7000_v48  ;;  %vm2940_vm11 = vcmp.gt.f32.partialorder %v7187_v22, %v7012_v19  ;;  %vm2941_vm12 = vcmp.gt.f32.partialorder %v7187_v22, %v7016_v2 }
 0x31c   : > { %vm2942_vm13 = vcmp.gt.f32.partialorder %v7187_v22, %v7020_v62  ;;  %vm2943_vm14 = vcmp.gt.f32.partialorder %v7187_v22, %v7024_v14  ;;  %vm2944_vm15 = vcmp.gt.f32.partialorder %v7187_v22, %v7028_v11  ;;  %vm2945_vm0 = vcmp.gt.f32.partialorder %v7187_v22, %v7032_v18 }
 0x31d   : > { %v2946_v17 = vsel %vm2938_vm7, %v7187_v22, inf  ;;  %v2947_v57 = vsel %vm2939_vm10, %v7187_v22, inf  ;;  %v2948_v26 = vsel %vm2940_vm11, %v7187_v22, inf  ;;  %v2949_v33 = vsel %vm2941_vm12, %v7187_v22, inf }
 0x31e   : > { %v2950_v51 = vsel %vm2942_vm13, %v7187_v22, inf  ;;  %v2951_v5 = vsel %vm2943_vm14, %v7187_v22, inf  ;;  %v2952_v15 = vsel %vm2944_vm15, %v7187_v22, inf  ;;  %v2953_v3 = vsel %vm2945_vm0, %v7187_v22, inf }
 0x31f   : > { %v2954_v54 = vmin.f32 %v2924_v20, %v2946_v17  ;;  %v2955_v7 = vmin.f32 %v2925_v16, %v2947_v57  ;;  %v2956_v1 = vmin.f32 %v2926_v8, %v2948_v26  ;;  %v2957_v39 = vmin.f32 %v2927_v31, %v2949_v33 }
 0x320   : > { %v2958_v63 = vmin.f32 %v2928_v37, %v2950_v51  ;;  %v2959_v56 = vmin.f32 %v2929_v27, %v2951_v5  ;;  %v2960_v43 = vmin.f32 %v2930_v53, %v2952_v15  ;;  %v2961_v12 = vmin.f32 %v2931_v36, %v2953_v3 }
 0x321   : > { %vm2966_vm1 = vcmp.gt.f32.partialorder %v7191_v23, %v6996_v24  ;;  %vm2967_vm2 = vcmp.gt.f32.partialorder %v7191_v23, %v7000_v48  ;;  %vm2968_vm3 = vcmp.gt.f32.partialorder %v7191_v23, %v7012_v19  ;;  %vm2969_vm4 = vcmp.gt.f32.partialorder %v7191_v23, %v7016_v2 }
 0x322   : > { %vm2970_vm5 = vcmp.gt.f32.partialorder %v7191_v23, %v7020_v62  ;;  %vm2971_vm6 = vcmp.gt.f32.partialorder %v7191_v23, %v7024_v14  ;;  %vm2972_vm8 = vcmp.gt.f32.partialorder %v7191_v23, %v7028_v11  ;;  %vm2973_vm9 = vcmp.gt.f32.partialorder %v7191_v23, %v7032_v18 }
 0x323   : > { %v2974_v22 = vsel %vm2966_vm1, %v7191_v23, inf  ;;  %v2975_v21 = vsel %vm2967_vm2, %v7191_v23, inf  ;;  %v2976_v9 = vsel %vm2968_vm3, %v7191_v23, inf  ;;  %v2977_v25 = vsel %vm2969_vm4, %v7191_v23, inf }
 0x324   : > { %v2978_v28 = vsel %vm2970_vm5, %v7191_v23, inf  ;;  %v2979_v29 = vsel %vm2971_vm6, %v7191_v23, inf  ;;  %v2980_v61 = vsel %vm2972_vm8, %v7191_v23, inf  ;;  %v2981_v20 = vsel %vm2973_vm9, %v7191_v23, inf }
 0x325   : > { %v2982_v16 = vmin.f32 %v2954_v54, %v2974_v22  ;;  %v2983_v8 = vmin.f32 %v2955_v7, %v2975_v21  ;;  %v2984_v31 = vmin.f32 %v2956_v1, %v2976_v9  ;;  %v2985_v37 = vmin.f32 %v2957_v39, %v2977_v25 }
 0x326   : > { %v2986_v27 = vmin.f32 %v2958_v63, %v2978_v28  ;;  %v2987_v53 = vmin.f32 %v2959_v56, %v2979_v29  ;;  %v2988_v36 = vmin.f32 %v2960_v43, %v2980_v61  ;;  %v2989_v17 = vmin.f32 %v2961_v12, %v2981_v20 }
 0x327   : > { %vm2994_vm7 = vcmp.gt.f32.partialorder %v7195_v4, %v6996_v24  ;;  %vm2995_vm10 = vcmp.gt.f32.partialorder %v7195_v4, %v7000_v48  ;;  %vm2996_vm11 = vcmp.gt.f32.partialorder %v7195_v4, %v7012_v19  ;;  %vm2997_vm12 = vcmp.gt.f32.partialorder %v7195_v4, %v7016_v2 }
 0x328   : > { %vm2998_vm13 = vcmp.gt.f32.partialorder %v7195_v4, %v7020_v62  ;;  %vm2999_vm14 = vcmp.gt.f32.partialorder %v7195_v4, %v7024_v14  ;;  %vm3000_vm15 = vcmp.gt.f32.partialorder %v7195_v4, %v7028_v11  ;;  %vm3001_vm0 = vcmp.gt.f32.partialorder %v7195_v4, %v7032_v18 }
 0x329   : > { %v3002_v23 = vsel %vm2994_vm7, %v7195_v4, inf  ;;  %v3003_v57 = vsel %vm2995_vm10, %v7195_v4, inf  ;;  %v3004_v26 = vsel %vm2996_vm11, %v7195_v4, inf  ;;  %v3005_v33 = vsel %vm2997_vm12, %v7195_v4, inf }
 0x32a   : > { %v3006_v51 = vsel %vm2998_vm13, %v7195_v4, inf  ;;  %v3007_v5 = vsel %vm2999_vm14, %v7195_v4, inf  ;;  %v3008_v15 = vsel %vm3000_vm15, %v7195_v4, inf  ;;  %v3009_v3 = vsel %vm3001_vm0, %v7195_v4, inf }
 0x32b   : > { %v3010_v54 = vmin.f32 %v2982_v16, %v3002_v23  ;;  %v3011_v7 = vmin.f32 %v2983_v8, %v3003_v57  ;;  %v3012_v1 = vmin.f32 %v2984_v31, %v3004_v26  ;;  %v3013_v39 = vmin.f32 %v2985_v37, %v3005_v33 }
 0x32c   : > { %v3014_v63 = vmin.f32 %v2986_v27, %v3006_v51  ;;  %v3015_v56 = vmin.f32 %v2987_v53, %v3007_v5  ;;  %v3016_v43 = vmin.f32 %v2988_v36, %v3008_v15  ;;  %v3017_v12 = vmin.f32 %v2989_v17, %v3009_v3 }
 0x32d   : > { %vm3022_vm1 = vcmp.gt.f32.partialorder %v7199_v35, %v6996_v24  ;;  %vm3023_vm2 = vcmp.gt.f32.partialorder %v7199_v35, %v7000_v48  ;;  %vm3024_vm3 = vcmp.gt.f32.partialorder %v7199_v35, %v7012_v19  ;;  %vm3025_vm4 = vcmp.gt.f32.partialorder %v7199_v35, %v7016_v2 }
 0x32e   : > { %vm3026_vm5 = vcmp.gt.f32.partialorder %v7199_v35, %v7020_v62  ;;  %vm3027_vm6 = vcmp.gt.f32.partialorder %v7199_v35, %v7024_v14  ;;  %vm3028_vm8 = vcmp.gt.f32.partialorder %v7199_v35, %v7028_v11  ;;  %vm3029_vm9 = vcmp.gt.f32.partialorder %v7199_v35, %v7032_v18 }
 0x32f   : > { %v3030_v4 = vsel %vm3022_vm1, %v7199_v35, inf  ;;  %v3031_v22 = vsel %vm3023_vm2, %v7199_v35, inf  ;;  %v3032_v21 = vsel %vm3024_vm3, %v7199_v35, inf  ;;  %v3033_v9 = vsel %vm3025_vm4, %v7199_v35, inf }
 0x330   : > { %v3034_v25 = vsel %vm3026_vm5, %v7199_v35, inf  ;;  %v3035_v28 = vsel %vm3027_vm6, %v7199_v35, inf  ;;  %v3036_v29 = vsel %vm3028_vm8, %v7199_v35, inf  ;;  %v3037_v61 = vsel %vm3029_vm9, %v7199_v35, inf }
 0x331   : > { %v3038_v20 = vmin.f32 %v3010_v54, %v3030_v4  ;;  %v3039_v16 = vmin.f32 %v3011_v7, %v3031_v22  ;;  %v3040_v8 = vmin.f32 %v3012_v1, %v3032_v21  ;;  %v3041_v31 = vmin.f32 %v3013_v39, %v3033_v9 }
 0x332   : > { %v3042_v37 = vmin.f32 %v3014_v63, %v3034_v25  ;;  %v3043_v27 = vmin.f32 %v3015_v56, %v3035_v28  ;;  %v3044_v53 = vmin.f32 %v3016_v43, %v3036_v29  ;;  %v3045_v36 = vmin.f32 %v3017_v12, %v3037_v61  ;;  %v7369_v28 = vld [vmem:[#allocation3 + $0x50] sm:$0xff] }
 0x333   : > { %vm3050_vm7 = vcmp.gt.f32.partialorder %v7203_v50, %v6996_v24  ;;  %vm3051_vm10 = vcmp.gt.f32.partialorder %v7203_v50, %v7000_v48  ;;  %vm3052_vm11 = vcmp.gt.f32.partialorder %v7203_v50, %v7012_v19  ;;  %vm3053_vm12 = vcmp.gt.f32.partialorder %v7203_v50, %v7016_v2 }
 0x334   : > { %vm3054_vm13 = vcmp.gt.f32.partialorder %v7203_v50, %v7020_v62  ;;  %vm3055_vm14 = vcmp.gt.f32.partialorder %v7203_v50, %v7024_v14  ;;  %vm3056_vm15 = vcmp.gt.f32.partialorder %v7203_v50, %v7028_v11  ;;  %vm3057_vm0 = vcmp.gt.f32.partialorder %v7203_v50, %v7032_v18 }
 0x335   : > { %v3058_v35 = vsel %vm3050_vm7, %v7203_v50, inf  ;;  %v3059_v17 = vsel %vm3051_vm10, %v7203_v50, inf  ;;  %v3060_v23 = vsel %vm3052_vm11, %v7203_v50, inf  ;;  %v3061_v57 = vsel %vm3053_vm12, %v7203_v50, inf }
 0x336   : > { %v3062_v26 = vsel %vm3054_vm13, %v7203_v50, inf  ;;  %v3063_v33 = vsel %vm3055_vm14, %v7203_v50, inf  ;;  %v3064_v51 = vsel %vm3056_vm15, %v7203_v50, inf  ;;  %v3065_v5 = vsel %vm3057_vm0, %v7203_v50, inf }
 0x337   : > { %v3066_v15 = vmin.f32 %v3038_v20, %v3058_v35  ;;  %v3067_v3 = vmin.f32 %v3039_v16, %v3059_v17  ;;  %v3068_v54 = vmin.f32 %v3040_v8, %v3060_v23  ;;  %v3069_v7 = vmin.f32 %v3041_v31, %v3061_v57 }
 0x338   : > { %v3070_v1 = vmin.f32 %v3042_v37, %v3062_v26  ;;  %v3071_v39 = vmin.f32 %v3043_v27, %v3063_v33  ;;  %v3072_v63 = vmin.f32 %v3044_v53, %v3064_v51  ;;  %v3073_v56 = vmin.f32 %v3045_v36, %v3065_v5 }
 0x339   : > { %vm3078_vm1 = vcmp.gt.f32.partialorder %v7207_v32, %v6996_v24  ;;  %vm3079_vm2 = vcmp.gt.f32.partialorder %v7207_v32, %v7000_v48  ;;  %vm3080_vm3 = vcmp.gt.f32.partialorder %v7207_v32, %v7012_v19  ;;  %vm3081_vm4 = vcmp.gt.f32.partialorder %v7207_v32, %v7016_v2 }
 0x33a   : > { %vm3082_vm5 = vcmp.gt.f32.partialorder %v7207_v32, %v7020_v62  ;;  %vm3083_vm6 = vcmp.gt.f32.partialorder %v7207_v32, %v7024_v14  ;;  %vm3084_vm8 = vcmp.gt.f32.partialorder %v7207_v32, %v7028_v11  ;;  %vm3085_vm9 = vcmp.gt.f32.partialorder %v7207_v32, %v7032_v18 }
 0x33b   : > { %v3086_v50 = vsel %vm3078_vm1, %v7207_v32, inf  ;;  %v3087_v43 = vsel %vm3079_vm2, %v7207_v32, inf  ;;  %v3088_v12 = vsel %vm3080_vm3, %v7207_v32, inf  ;;  %v3089_v4 = vsel %vm3081_vm4, %v7207_v32, inf }
 0x33c   : > { %v3090_v22 = vsel %vm3082_vm5, %v7207_v32, inf  ;;  %v3091_v21 = vsel %vm3083_vm6, %v7207_v32, inf  ;;  %v3092_v9 = vsel %vm3084_vm8, %v7207_v32, inf  ;;  %v3093_v25 = vsel %vm3085_vm9, %v7207_v32, inf }
 0x33d   : > { %v3094_v29 = vmin.f32 %v3066_v15, %v3086_v50  ;;  %v3095_v61 = vmin.f32 %v3067_v3, %v3087_v43  ;;  %v3096_v20 = vmin.f32 %v3068_v54, %v3088_v12  ;;  %v3097_v16 = vmin.f32 %v3069_v7, %v3089_v4 }
 0x33e   : > { %v3098_v8 = vmin.f32 %v3070_v1, %v3090_v22  ;;  %v3099_v31 = vmin.f32 %v3071_v39, %v3091_v21  ;;  %v3100_v37 = vmin.f32 %v3072_v63, %v3092_v9  ;;  %v3101_v27 = vmin.f32 %v3073_v56, %v3093_v25 }
 0x33f   : > { %v3105_v53 = vrot.slane %v7179_v10, %v5450_v60  ;;  %v3133_v36 = vrot.slane %v7179_v10, %v5465_v45  ;;  %v7377_v35 = vrot.slane %v7369_v28, %v5408_v55  ;;  %v7381_v32 = vrot.slane %v7369_v28, %v5411_v58 }
 0x340   : > { %v7385_v17 = vrot.slane %v7369_v28, %v5414_v59  ;;  %v7389_v23 = vrot.slane %v7369_v28, %v5426_v44  ;;  %v7393_v57 = vrot.slane %v7369_v28, %v5429_v46  ;;  %v7397_v10 = vrot.slane %v7369_v28, %v5432_v49 }
 0x341   : > { %vm3106_vm7 = vcmp.gt.f32.partialorder %v3105_v53, %v6996_v24  ;;  %vm3107_vm10 = vcmp.gt.f32.partialorder %v3105_v53, %v7000_v48  ;;  %vm3108_vm11 = vcmp.gt.f32.partialorder %v3105_v53, %v7012_v19  ;;  %vm3109_vm12 = vcmp.gt.f32.partialorder %v3105_v53, %v7016_v2 }
 0x342   : > { %vm3110_vm13 = vcmp.gt.f32.partialorder %v3105_v53, %v7020_v62  ;;  %vm3111_vm14 = vcmp.gt.f32.partialorder %v3105_v53, %v7024_v14  ;;  %vm3112_vm15 = vcmp.gt.f32.partialorder %v3105_v53, %v7028_v11  ;;  %vm3113_vm0 = vcmp.gt.f32.partialorder %v3105_v53, %v7032_v18 }
 0x343   : > { %v3114_v26 = vsel %vm3106_vm7, %v3105_v53, inf  ;;  %v3115_v33 = vsel %vm3107_vm10, %v3105_v53, inf  ;;  %v3116_v51 = vsel %vm3108_vm11, %v3105_v53, inf  ;;  %v3117_v5 = vsel %vm3109_vm12, %v3105_v53, inf }
 0x344   : > { %v3118_v15 = vsel %vm3110_vm13, %v3105_v53, inf  ;;  %v3119_v3 = vsel %vm3111_vm14, %v3105_v53, inf  ;;  %v3120_v54 = vsel %vm3112_vm15, %v3105_v53, inf  ;;  %v3121_v7 = vsel %vm3113_vm0, %v3105_v53, inf }
 0x345   : > { %v3122_v1 = vmin.f32 %v3094_v29, %v3114_v26  ;;  %v3123_v39 = vmin.f32 %v3095_v61, %v3115_v33  ;;  %v3124_v63 = vmin.f32 %v3096_v20, %v3116_v51  ;;  %v3125_v56 = vmin.f32 %v3097_v16, %v3117_v5 }
 0x346   : > { %v3126_v50 = vmin.f32 %v3098_v8, %v3118_v15  ;;  %v3127_v43 = vmin.f32 %v3099_v31, %v3119_v3  ;;  %v3128_v12 = vmin.f32 %v3100_v37, %v3120_v54  ;;  %v3129_v4 = vmin.f32 %v3101_v27, %v3121_v7 }
 0x347   : > { %vm3134_vm1 = vcmp.gt.f32.partialorder %v3133_v36, %v6996_v24  ;;  %vm3135_vm2 = vcmp.gt.f32.partialorder %v3133_v36, %v7000_v48  ;;  %vm3136_vm3 = vcmp.gt.f32.partialorder %v3133_v36, %v7012_v19  ;;  %vm3137_vm4 = vcmp.gt.f32.partialorder %v3133_v36, %v7016_v2 }
 0x348   : > { %vm3138_vm5 = vcmp.gt.f32.partialorder %v3133_v36, %v7020_v62  ;;  %vm3139_vm6 = vcmp.gt.f32.partialorder %v3133_v36, %v7024_v14  ;;  %vm3140_vm8 = vcmp.gt.f32.partialorder %v3133_v36, %v7028_v11  ;;  %vm3141_vm9 = vcmp.gt.f32.partialorder %v3133_v36, %v7032_v18 }
 0x349   : > { %v3142_v22 = vsel %vm3134_vm1, %v3133_v36, inf  ;;  %v3143_v21 = vsel %vm3135_vm2, %v3133_v36, inf  ;;  %v3144_v9 = vsel %vm3136_vm3, %v3133_v36, inf  ;;  %v3145_v25 = vsel %vm3137_vm4, %v3133_v36, inf }
 0x34a   : > { %v3146_v29 = vsel %vm3138_vm5, %v3133_v36, inf  ;;  %v3147_v61 = vsel %vm3139_vm6, %v3133_v36, inf  ;;  %v3148_v20 = vsel %vm3140_vm8, %v3133_v36, inf  ;;  %v3149_v16 = vsel %vm3141_vm9, %v3133_v36, inf }
 0x34b   : > { %v3150_v8 = vmin.f32 %v3122_v1, %v3142_v22  ;;  %v3151_v31 = vmin.f32 %v3123_v39, %v3143_v21  ;;  %v3152_v37 = vmin.f32 %v3124_v63, %v3144_v9  ;;  %v3153_v27 = vmin.f32 %v3125_v56, %v3145_v25 }
 0x34c   : > { %v3154_v53 = vmin.f32 %v3126_v50, %v3146_v29  ;;  %v3155_v26 = vmin.f32 %v3127_v43, %v3147_v61  ;;  %v3156_v33 = vmin.f32 %v3128_v12, %v3148_v20  ;;  %v3157_v51 = vmin.f32 %v3129_v4, %v3149_v16 }
 0x34d   : > { %vm3164_vm7 = vcmp.gt.f32.partialorder %v7377_v35, %v6996_v24  ;;  %vm3165_vm10 = vcmp.gt.f32.partialorder %v7377_v35, %v7000_v48  ;;  %vm3166_vm11 = vcmp.gt.f32.partialorder %v7377_v35, %v7012_v19  ;;  %vm3167_vm12 = vcmp.gt.f32.partialorder %v7377_v35, %v7016_v2 }
 0x34e   : > { %vm3168_vm13 = vcmp.gt.f32.partialorder %v7377_v35, %v7020_v62  ;;  %vm3169_vm14 = vcmp.gt.f32.partialorder %v7377_v35, %v7024_v14  ;;  %vm3170_vm15 = vcmp.gt.f32.partialorder %v7377_v35, %v7028_v11  ;;  %vm3171_vm0 = vcmp.gt.f32.partialorder %v7377_v35, %v7032_v18 }
 0x34f   : > { %v3172_v36 = vsel %vm3164_vm7, %v7377_v35, inf  ;;  %v3173_v5 = vsel %vm3165_vm10, %v7377_v35, inf  ;;  %v3174_v15 = vsel %vm3166_vm11, %v7377_v35, inf  ;;  %v3175_v3 = vsel %vm3167_vm12, %v7377_v35, inf }
 0x350   : > { %v3176_v54 = vsel %vm3168_vm13, %v7377_v35, inf  ;;  %v3177_v7 = vsel %vm3169_vm14, %v7377_v35, inf  ;;  %v3178_v1 = vsel %vm3170_vm15, %v7377_v35, inf  ;;  %v3179_v39 = vsel %vm3171_vm0, %v7377_v35, inf }
 0x351   : > { %v3180_v63 = vmin.f32 %v3150_v8, %v3172_v36  ;;  %v3181_v56 = vmin.f32 %v3151_v31, %v3173_v5  ;;  %v3182_v50 = vmin.f32 %v3152_v37, %v3174_v15  ;;  %v3183_v43 = vmin.f32 %v3153_v27, %v3175_v3 }
 0x352   : > { %v3184_v12 = vmin.f32 %v3154_v53, %v3176_v54  ;;  %v3185_v4 = vmin.f32 %v3155_v26, %v3177_v7  ;;  %v3186_v22 = vmin.f32 %v3156_v33, %v3178_v1  ;;  %v3187_v21 = vmin.f32 %v3157_v51, %v3179_v39 }
 0x353   : > { %vm3192_vm1 = vcmp.gt.f32.partialorder %v7381_v32, %v6996_v24  ;;  %vm3193_vm2 = vcmp.gt.f32.partialorder %v7381_v32, %v7000_v48  ;;  %vm3194_vm3 = vcmp.gt.f32.partialorder %v7381_v32, %v7012_v19  ;;  %vm3195_vm4 = vcmp.gt.f32.partialorder %v7381_v32, %v7016_v2 }
 0x354   : > { %vm3196_vm5 = vcmp.gt.f32.partialorder %v7381_v32, %v7020_v62  ;;  %vm3197_vm6 = vcmp.gt.f32.partialorder %v7381_v32, %v7024_v14  ;;  %vm3198_vm8 = vcmp.gt.f32.partialorder %v7381_v32, %v7028_v11  ;;  %vm3199_vm9 = vcmp.gt.f32.partialorder %v7381_v32, %v7032_v18 }
 0x355   : > { %v3200_v35 = vsel %vm3192_vm1, %v7381_v32, inf  ;;  %v3201_v9 = vsel %vm3193_vm2, %v7381_v32, inf  ;;  %v3202_v25 = vsel %vm3194_vm3, %v7381_v32, inf  ;;  %v3203_v29 = vsel %vm3195_vm4, %v7381_v32, inf }
 0x356   : > { %v3204_v61 = vsel %vm3196_vm5, %v7381_v32, inf  ;;  %v3205_v20 = vsel %vm3197_vm6, %v7381_v32, inf  ;;  %v3206_v16 = vsel %vm3198_vm8, %v7381_v32, inf  ;;  %v3207_v8 = vsel %vm3199_vm9, %v7381_v32, inf }
 0x357   : > { %v3208_v31 = vmin.f32 %v3180_v63, %v3200_v35  ;;  %v3209_v37 = vmin.f32 %v3181_v56, %v3201_v9  ;;  %v3210_v27 = vmin.f32 %v3182_v50, %v3202_v25  ;;  %v3211_v53 = vmin.f32 %v3183_v43, %v3203_v29 }
 0x358   : > { %v3212_v26 = vmin.f32 %v3184_v12, %v3204_v61  ;;  %v3213_v33 = vmin.f32 %v3185_v4, %v3205_v20  ;;  %v3214_v51 = vmin.f32 %v3186_v22, %v3206_v16  ;;  %v3215_v36 = vmin.f32 %v3187_v21, %v3207_v8  ;;  %v7488_v22 = vld [vmem:[%s5399_s20] sm:$0xff]  ;;  %v7493_v21 = vld [vmem:[%s5399_s20 + $0x8] sm:$0xff] }
 0x359   : > { %vm3220_vm7 = vcmp.gt.f32.partialorder %v7385_v17, %v6996_v24  ;;  %vm3221_vm10 = vcmp.gt.f32.partialorder %v7385_v17, %v7000_v48  ;;  %vm3222_vm11 = vcmp.gt.f32.partialorder %v7385_v17, %v7012_v19  ;;  %vm3223_vm12 = vcmp.gt.f32.partialorder %v7385_v17, %v7016_v2 }
 0x35a   : > { %vm3224_vm13 = vcmp.gt.f32.partialorder %v7385_v17, %v7020_v62  ;;  %vm3225_vm14 = vcmp.gt.f32.partialorder %v7385_v17, %v7024_v14  ;;  %vm3226_vm15 = vcmp.gt.f32.partialorder %v7385_v17, %v7028_v11  ;;  %vm3227_vm0 = vcmp.gt.f32.partialorder %v7385_v17, %v7032_v18 }
 0x35b   : > { %v3228_v24 = vsel %vm3220_vm7, %v7385_v17, inf  ;;  %v3229_v48 = vsel %vm3221_vm10, %v7385_v17, inf  ;;  %v3230_v32 = vsel %vm3222_vm11, %v7385_v17, inf  ;;  %v3231_v5 = vsel %vm3223_vm12, %v7385_v17, inf }
 0x35c   : > { %v3232_v15 = vsel %vm3224_vm13, %v7385_v17, inf  ;;  %v3233_v3 = vsel %vm3225_vm14, %v7385_v17, inf  ;;  %v3234_v54 = vsel %vm3226_vm15, %v7385_v17, inf  ;;  %v3235_v7 = vsel %vm3227_vm0, %v7385_v17, inf }
 0x35d   : > { %v3236_v1 = vmin.f32 %v3208_v31, %v3228_v24  ;;  %v3237_v39 = vmin.f32 %v3209_v37, %v3229_v48  ;;  %v3238_v63 = vmin.f32 %v3210_v27, %v3230_v32  ;;  %v3239_v56 = vmin.f32 %v3211_v53, %v3231_v5  ;;  %v7522_v37 = vld [vmem:[%s5399_s20 + $0x10] sm:$0xff]  ;;  %v7532_v27 = vld [vmem:[%s5399_s20 + $0x20] sm:$0xff]  ;;  %v7537_v53 = vld [vmem:[%s5399_s20 + $0x28] sm:$0xff] }
 0x35e   : > { %v3240_v50 = vmin.f32 %v3212_v26, %v3232_v15  ;;  %v3241_v43 = vmin.f32 %v3213_v33, %v3233_v3  ;;  %v3242_v12 = vmin.f32 %v3214_v51, %v3234_v54  ;;  %v3243_v4 = vmin.f32 %v3215_v36, %v3235_v7  ;;  %v7542_v26 = vld [vmem:[%s5399_s20 + $0x30] sm:$0xff]  ;;  %v7547_v33 = vld [vmem:[%s5399_s20 + $0x38] sm:$0xff] }
 0x35f   : > { %vm3248_vm1 = vcmp.gt.f32.partialorder %v7389_v23, %v7488_v22  ;;  %vm3249_vm2 = vcmp.gt.f32.partialorder %v7389_v23, %v7493_v21  ;;  %vm3250_vm3 = vcmp.gt.f32.partialorder %v7389_v23, %v7012_v19  ;;  %vm3251_vm4 = vcmp.gt.f32.partialorder %v7389_v23, %v7016_v2 }
 0x360   : > { %vm3252_vm5 = vcmp.gt.f32.partialorder %v7389_v23, %v7020_v62  ;;  %vm3253_vm6 = vcmp.gt.f32.partialorder %v7389_v23, %v7024_v14  ;;  %vm3254_vm8 = vcmp.gt.f32.partialorder %v7389_v23, %v7028_v11  ;;  %vm3255_vm9 = vcmp.gt.f32.partialorder %v7389_v23, %v7032_v18 }
 0x361   : > { %v3256_v17 = vsel %vm3248_vm1, %v7389_v23, inf  ;;  %v3257_v35 = vsel %vm3249_vm2, %v7389_v23, inf  ;;  %v3258_v19 = vsel %vm3250_vm3, %v7389_v23, inf  ;;  %v3259_v2 = vsel %vm3251_vm4, %v7389_v23, inf }
 0x362   : > { %v3260_v62 = vsel %vm3252_vm5, %v7389_v23, inf  ;;  %v3261_v14 = vsel %vm3253_vm6, %v7389_v23, inf  ;;  %v3262_v9 = vsel %vm3254_vm8, %v7389_v23, inf  ;;  %v3263_v11 = vsel %vm3255_vm9, %v7389_v23, inf  ;;  %v7527_v23 = vld [vmem:[%s5399_s20 + $0x18] sm:$0xff] }
 0x363   : > { %v3264_v18 = vmin.f32 %v3236_v1, %v3256_v17  ;;  %v3265_v25 = vmin.f32 %v3237_v39, %v3257_v35  ;;  %v3266_v29 = vmin.f32 %v3238_v63, %v3258_v19  ;;  %v3267_v61 = vmin.f32 %v3239_v56, %v3259_v2 }
 0x364   : > { %v3268_v20 = vmin.f32 %v3240_v50, %v3260_v62  ;;  %v3269_v16 = vmin.f32 %v3241_v43, %v3261_v14  ;;  %v3270_v8 = vmin.f32 %v3242_v12, %v3262_v9  ;;  %v3271_v31 = vmin.f32 %v3243_v4, %v3263_v11  ;;  %v7583_v14 = vld [vmem:[#allocation3 + $0x58] sm:$0xff] }
 0x365   : > { %vm3276_vm7 = vcmp.gt.f32.partialorder %v7393_v57, %v7488_v22  ;;  %vm3277_vm10 = vcmp.gt.f32.partialorder %v7393_v57, %v7493_v21  ;;  %vm3278_vm11 = vcmp.gt.f32.partialorder %v7393_v57, %v7522_v37  ;;  %vm3279_vm12 = vcmp.gt.f32.partialorder %v7393_v57, %v7527_v23 }
 0x366   : > { %vm3280_vm13 = vcmp.gt.f32.partialorder %v7393_v57, %v7532_v27  ;;  %vm3281_vm14 = vcmp.gt.f32.partialorder %v7393_v57, %v7537_v53  ;;  %vm3282_vm15 = vcmp.gt.f32.partialorder %v7393_v57, %v7542_v26  ;;  %vm3283_vm0 = vcmp.gt.f32.partialorder %v7393_v57, %v7547_v33 }
 0x367   : > { %v3284_v51 = vsel %vm3276_vm7, %v7393_v57, inf  ;;  %v3285_v36 = vsel %vm3277_vm10, %v7393_v57, inf  ;;  %v3286_v24 = vsel %vm3278_vm11, %v7393_v57, inf  ;;  %v3287_v48 = vsel %vm3279_vm12, %v7393_v57, inf }
 0x368   : > { %v3288_v32 = vsel %vm3280_vm13, %v7393_v57, inf  ;;  %v3289_v5 = vsel %vm3281_vm14, %v7393_v57, inf  ;;  %v3290_v15 = vsel %vm3282_vm15, %v7393_v57, inf  ;;  %v3291_v3 = vsel %vm3283_vm0, %v7393_v57, inf }
 0x369   : > { %v3292_v54 = vmin.f32 %v3264_v18, %v3284_v51  ;;  %v3293_v7 = vmin.f32 %v3265_v25, %v3285_v36  ;;  %v3294_v1 = vmin.f32 %v3266_v29, %v3286_v24  ;;  %v3295_v39 = vmin.f32 %v3267_v61, %v3287_v48 }
 0x36a   : > { %v3296_v63 = vmin.f32 %v3268_v20, %v3288_v32  ;;  %v3297_v56 = vmin.f32 %v3269_v16, %v3289_v5  ;;  %v3298_v50 = vmin.f32 %v3270_v8, %v3290_v15  ;;  %v3299_v43 = vmin.f32 %v3271_v31, %v3291_v3 }
 0x36b   : > { %vm3304_vm1 = vcmp.gt.f32.partialorder %v7397_v10, %v7488_v22  ;;  %vm3305_vm2 = vcmp.gt.f32.partialorder %v7397_v10, %v7493_v21  ;;  %vm3306_vm3 = vcmp.gt.f32.partialorder %v7397_v10, %v7522_v37  ;;  %vm3307_vm4 = vcmp.gt.f32.partialorder %v7397_v10, %v7527_v23 }
 0x36c   : > { %vm3308_vm5 = vcmp.gt.f32.partialorder %v7397_v10, %v7532_v27  ;;  %vm3309_vm6 = vcmp.gt.f32.partialorder %v7397_v10, %v7537_v53  ;;  %vm3310_vm8 = vcmp.gt.f32.partialorder %v7397_v10, %v7542_v26  ;;  %vm3311_vm9 = vcmp.gt.f32.partialorder %v7397_v10, %v7547_v33 }
 0x36d   : > { %v3312_v57 = vsel %vm3304_vm1, %v7397_v10, inf  ;;  %v3313_v12 = vsel %vm3305_vm2, %v7397_v10, inf  ;;  %v3314_v4 = vsel %vm3306_vm3, %v7397_v10, inf  ;;  %v3315_v17 = vsel %vm3307_vm4, %v7397_v10, inf }
 0x36e   : > { %v3316_v35 = vsel %vm3308_vm5, %v7397_v10, inf  ;;  %v3317_v19 = vsel %vm3309_vm6, %v7397_v10, inf  ;;  %v3318_v2 = vsel %vm3310_vm8, %v7397_v10, inf  ;;  %v3319_v62 = vsel %vm3311_vm9, %v7397_v10, inf }
 0x36f   : > { %v3320_v9 = vmin.f32 %v3292_v54, %v3312_v57  ;;  %v3321_v11 = vmin.f32 %v3293_v7, %v3313_v12  ;;  %v3322_v18 = vmin.f32 %v3294_v1, %v3314_v4  ;;  %v3323_v25 = vmin.f32 %v3295_v39, %v3315_v17 }
 0x370   : > { %v3324_v29 = vmin.f32 %v3296_v63, %v3316_v35  ;;  %v3325_v61 = vmin.f32 %v3297_v56, %v3317_v19  ;;  %v3326_v20 = vmin.f32 %v3298_v50, %v3318_v2  ;;  %v3327_v16 = vmin.f32 %v3299_v43, %v3319_v62 }
 0x371   : > { %v3331_v8 = vrot.slane %v7369_v28, %v5450_v60  ;;  %v3359_v31 = vrot.slane %v7369_v28, %v5465_v45  ;;  %v7591_v51 = vrot.slane %v7583_v14, %v5408_v55  ;;  %v7595_v10 = vrot.slane %v7583_v14, %v5411_v58 }
 0x372   : > { %v7599_v36 = vrot.slane %v7583_v14, %v5414_v59  ;;  %v7603_v24 = vrot.slane %v7583_v14, %v5426_v44  ;;  %v7607_v48 = vrot.slane %v7583_v14, %v5429_v46  ;;  %v7611_v28 = vrot.slane %v7583_v14, %v5432_v49 }
 0x373   : > { %vm3332_vm7 = vcmp.gt.f32.partialorder %v3331_v8, %v7488_v22  ;;  %vm3333_vm10 = vcmp.gt.f32.partialorder %v3331_v8, %v7493_v21  ;;  %vm3334_vm11 = vcmp.gt.f32.partialorder %v3331_v8, %v7522_v37  ;;  %vm3335_vm12 = vcmp.gt.f32.partialorder %v3331_v8, %v7527_v23 }
 0x374   : > { %vm3336_vm13 = vcmp.gt.f32.partialorder %v3331_v8, %v7532_v27  ;;  %vm3337_vm14 = vcmp.gt.f32.partialorder %v3331_v8, %v7537_v53  ;;  %vm3338_vm15 = vcmp.gt.f32.partialorder %v3331_v8, %v7542_v26  ;;  %vm3339_vm0 = vcmp.gt.f32.partialorder %v3331_v8, %v7547_v33 }
 0x375   : > { %v3340_v32 = vsel %vm3332_vm7, %v3331_v8, inf  ;;  %v3341_v5 = vsel %vm3333_vm10, %v3331_v8, inf  ;;  %v3342_v15 = vsel %vm3334_vm11, %v3331_v8, inf  ;;  %v3343_v3 = vsel %vm3335_vm12, %v3331_v8, inf }
 0x376   : > { %v3344_v54 = vsel %vm3336_vm13, %v3331_v8, inf  ;;  %v3345_v7 = vsel %vm3337_vm14, %v3331_v8, inf  ;;  %v3346_v1 = vsel %vm3338_vm15, %v3331_v8, inf  ;;  %v3347_v39 = vsel %vm3339_vm0, %v3331_v8, inf }
 0x377   : > { %v3348_v63 = vmin.f32 %v3320_v9, %v3340_v32  ;;  %v3349_v56 = vmin.f32 %v3321_v11, %v3341_v5  ;;  %v3350_v50 = vmin.f32 %v3322_v18, %v3342_v15  ;;  %v3351_v43 = vmin.f32 %v3323_v25, %v3343_v3 }
 0x378   : > { %v3352_v57 = vmin.f32 %v3324_v29, %v3344_v54  ;;  %v3353_v12 = vmin.f32 %v3325_v61, %v3345_v7  ;;  %v3354_v4 = vmin.f32 %v3326_v20, %v3346_v1  ;;  %v3355_v17 = vmin.f32 %v3327_v16, %v3347_v39 }
 0x379   : > { %vm3360_vm1 = vcmp.gt.f32.partialorder %v3359_v31, %v7488_v22  ;;  %vm3361_vm2 = vcmp.gt.f32.partialorder %v3359_v31, %v7493_v21  ;;  %vm3362_vm3 = vcmp.gt.f32.partialorder %v3359_v31, %v7522_v37  ;;  %vm3363_vm4 = vcmp.gt.f32.partialorder %v3359_v31, %v7527_v23 }
 0x37a   : > { %vm3364_vm5 = vcmp.gt.f32.partialorder %v3359_v31, %v7532_v27  ;;  %vm3365_vm6 = vcmp.gt.f32.partialorder %v3359_v31, %v7537_v53  ;;  %vm3366_vm8 = vcmp.gt.f32.partialorder %v3359_v31, %v7542_v26  ;;  %vm3367_vm9 = vcmp.gt.f32.partialorder %v3359_v31, %v7547_v33 }
 0x37b   : > { %v3368_v35 = vsel %vm3360_vm1, %v3359_v31, inf  ;;  %v3369_v19 = vsel %vm3361_vm2, %v3359_v31, inf  ;;  %v3370_v2 = vsel %vm3362_vm3, %v3359_v31, inf  ;;  %v3371_v62 = vsel %vm3363_vm4, %v3359_v31, inf }
 0x37c   : > { %v3372_v9 = vsel %vm3364_vm5, %v3359_v31, inf  ;;  %v3373_v11 = vsel %vm3365_vm6, %v3359_v31, inf  ;;  %v3374_v18 = vsel %vm3366_vm8, %v3359_v31, inf  ;;  %v3375_v25 = vsel %vm3367_vm9, %v3359_v31, inf }
 0x37d   : > { %v3376_v29 = vmin.f32 %v3348_v63, %v3368_v35  ;;  %v3377_v61 = vmin.f32 %v3349_v56, %v3369_v19  ;;  %v3378_v20 = vmin.f32 %v3350_v50, %v3370_v2  ;;  %v3379_v16 = vmin.f32 %v3351_v43, %v3371_v62 }
 0x37e   : > { %v3380_v8 = vmin.f32 %v3352_v57, %v3372_v9  ;;  %v3381_v32 = vmin.f32 %v3353_v12, %v3373_v11  ;;  %v3382_v5 = vmin.f32 %v3354_v4, %v3374_v18  ;;  %v3383_v15 = vmin.f32 %v3355_v17, %v3375_v25 }
 0x37f   : > { %vm3390_vm7 = vcmp.gt.f32.partialorder %v7591_v51, %v7488_v22  ;;  %vm3391_vm10 = vcmp.gt.f32.partialorder %v7591_v51, %v7493_v21  ;;  %vm3392_vm11 = vcmp.gt.f32.partialorder %v7591_v51, %v7522_v37  ;;  %vm3393_vm12 = vcmp.gt.f32.partialorder %v7591_v51, %v7527_v23 }
 0x380   : > { %vm3394_vm13 = vcmp.gt.f32.partialorder %v7591_v51, %v7532_v27  ;;  %vm3395_vm14 = vcmp.gt.f32.partialorder %v7591_v51, %v7537_v53  ;;  %vm3396_vm15 = vcmp.gt.f32.partialorder %v7591_v51, %v7542_v26  ;;  %vm3397_vm0 = vcmp.gt.f32.partialorder %v7591_v51, %v7547_v33 }
 0x381   : > { %v3398_v31 = vsel %vm3390_vm7, %v7591_v51, inf  ;;  %v3399_v3 = vsel %vm3391_vm10, %v7591_v51, inf  ;;  %v3400_v54 = vsel %vm3392_vm11, %v7591_v51, inf  ;;  %v3401_v7 = vsel %vm3393_vm12, %v7591_v51, inf }
 0x382   : > { %v3402_v1 = vsel %vm3394_vm13, %v7591_v51, inf  ;;  %v3403_v39 = vsel %vm3395_vm14, %v7591_v51, inf  ;;  %v3404_v63 = vsel %vm3396_vm15, %v7591_v51, inf  ;;  %v3405_v56 = vsel %vm3397_vm0, %v7591_v51, inf }
 0x383   : > { %v3406_v50 = vmin.f32 %v3376_v29, %v3398_v31  ;;  %v3407_v43 = vmin.f32 %v3377_v61, %v3399_v3  ;;  %v3408_v57 = vmin.f32 %v3378_v20, %v3400_v54  ;;  %v3409_v12 = vmin.f32 %v3379_v16, %v3401_v7 }
 0x384   : > { %v3410_v4 = vmin.f32 %v3380_v8, %v3402_v1  ;;  %v3411_v17 = vmin.f32 %v3381_v32, %v3403_v39  ;;  %v3412_v35 = vmin.f32 %v3382_v5, %v3404_v63  ;;  %v3413_v19 = vmin.f32 %v3383_v15, %v3405_v56 }
 0x385   : > { %vm3418_vm1 = vcmp.gt.f32.partialorder %v7595_v10, %v7488_v22  ;;  %vm3419_vm2 = vcmp.gt.f32.partialorder %v7595_v10, %v7493_v21  ;;  %vm3420_vm3 = vcmp.gt.f32.partialorder %v7595_v10, %v7522_v37  ;;  %vm3421_vm4 = vcmp.gt.f32.partialorder %v7595_v10, %v7527_v23 }
 0x386   : > { %vm3422_vm5 = vcmp.gt.f32.partialorder %v7595_v10, %v7532_v27  ;;  %vm3423_vm6 = vcmp.gt.f32.partialorder %v7595_v10, %v7537_v53  ;;  %vm3424_vm8 = vcmp.gt.f32.partialorder %v7595_v10, %v7542_v26  ;;  %vm3425_vm9 = vcmp.gt.f32.partialorder %v7595_v10, %v7547_v33 }
 0x387   : > { %v3426_v51 = vsel %vm3418_vm1, %v7595_v10, inf  ;;  %v3427_v2 = vsel %vm3419_vm2, %v7595_v10, inf  ;;  %v3428_v62 = vsel %vm3420_vm3, %v7595_v10, inf  ;;  %v3429_v9 = vsel %vm3421_vm4, %v7595_v10, inf }
 0x388   : > { %v3430_v11 = vsel %vm3422_vm5, %v7595_v10, inf  ;;  %v3431_v18 = vsel %vm3423_vm6, %v7595_v10, inf  ;;  %v3432_v25 = vsel %vm3424_vm8, %v7595_v10, inf  ;;  %v3433_v29 = vsel %vm3425_vm9, %v7595_v10, inf }
 0x389   : > { %v3434_v61 = vmin.f32 %v3406_v50, %v3426_v51  ;;  %v3435_v20 = vmin.f32 %v3407_v43, %v3427_v2  ;;  %v3436_v16 = vmin.f32 %v3408_v57, %v3428_v62  ;;  %v3437_v8 = vmin.f32 %v3409_v12, %v3429_v9 }
 0x38a   : > { %v3438_v32 = vmin.f32 %v3410_v4, %v3430_v11  ;;  %v3439_v5 = vmin.f32 %v3411_v17, %v3431_v18  ;;  %v3440_v15 = vmin.f32 %v3412_v35, %v3432_v25  ;;  %v3441_v31 = vmin.f32 %v3413_v19, %v3433_v29 }
 0x38b   : > { %vm3446_vm7 = vcmp.gt.f32.partialorder %v7599_v36, %v7488_v22  ;;  %vm3447_vm10 = vcmp.gt.f32.partialorder %v7599_v36, %v7493_v21  ;;  %vm3448_vm11 = vcmp.gt.f32.partialorder %v7599_v36, %v7522_v37  ;;  %vm3449_vm12 = vcmp.gt.f32.partialorder %v7599_v36, %v7527_v23 }
 0x38c   : > { %vm3450_vm13 = vcmp.gt.f32.partialorder %v7599_v36, %v7532_v27  ;;  %vm3451_vm14 = vcmp.gt.f32.partialorder %v7599_v36, %v7537_v53  ;;  %vm3452_vm15 = vcmp.gt.f32.partialorder %v7599_v36, %v7542_v26  ;;  %vm3453_vm0 = vcmp.gt.f32.partialorder %v7599_v36, %v7547_v33 }
 0x38d   : > { %v3454_v10 = vsel %vm3446_vm7, %v7599_v36, inf  ;;  %v3455_v3 = vsel %vm3447_vm10, %v7599_v36, inf  ;;  %v3456_v54 = vsel %vm3448_vm11, %v7599_v36, inf  ;;  %v3457_v7 = vsel %vm3449_vm12, %v7599_v36, inf }
 0x38e   : > { %v3458_v1 = vsel %vm3450_vm13, %v7599_v36, inf  ;;  %v3459_v39 = vsel %vm3451_vm14, %v7599_v36, inf  ;;  %v3460_v63 = vsel %vm3452_vm15, %v7599_v36, inf  ;;  %v3461_v56 = vsel %vm3453_vm0, %v7599_v36, inf }
 0x38f   : > { %v3462_v50 = vmin.f32 %v3434_v61, %v3454_v10  ;;  %v3463_v43 = vmin.f32 %v3435_v20, %v3455_v3  ;;  %v3464_v57 = vmin.f32 %v3436_v16, %v3456_v54  ;;  %v3465_v12 = vmin.f32 %v3437_v8, %v3457_v7 }
 0x390   : > { %v3466_v4 = vmin.f32 %v3438_v32, %v3458_v1  ;;  %v3467_v17 = vmin.f32 %v3439_v5, %v3459_v39  ;;  %v3468_v35 = vmin.f32 %v3440_v15, %v3460_v63  ;;  %v3469_v19 = vmin.f32 %v3441_v31, %v3461_v56 }
 0x391   : > { %vm3474_vm1 = vcmp.gt.f32.partialorder %v7603_v24, %v7488_v22  ;;  %vm3475_vm2 = vcmp.gt.f32.partialorder %v7603_v24, %v7493_v21  ;;  %vm3476_vm3 = vcmp.gt.f32.partialorder %v7603_v24, %v7522_v37  ;;  %vm3477_vm4 = vcmp.gt.f32.partialorder %v7603_v24, %v7527_v23 }
 0x392   : > { %vm3478_vm5 = vcmp.gt.f32.partialorder %v7603_v24, %v7532_v27  ;;  %vm3479_vm6 = vcmp.gt.f32.partialorder %v7603_v24, %v7537_v53  ;;  %vm3480_vm8 = vcmp.gt.f32.partialorder %v7603_v24, %v7542_v26  ;;  %vm3481_vm9 = vcmp.gt.f32.partialorder %v7603_v24, %v7547_v33 }
 0x393   : > { %v3482_v36 = vsel %vm3474_vm1, %v7603_v24, inf  ;;  %v3483_v51 = vsel %vm3475_vm2, %v7603_v24, inf  ;;  %v3484_v2 = vsel %vm3476_vm3, %v7603_v24, inf  ;;  %v3485_v62 = vsel %vm3477_vm4, %v7603_v24, inf }
 0x394   : > { %v3486_v9 = vsel %vm3478_vm5, %v7603_v24, inf  ;;  %v3487_v11 = vsel %vm3479_vm6, %v7603_v24, inf  ;;  %v3488_v18 = vsel %vm3480_vm8, %v7603_v24, inf  ;;  %v3489_v25 = vsel %vm3481_vm9, %v7603_v24, inf }
 0x395   : > { %v3490_v29 = vmin.f32 %v3462_v50, %v3482_v36  ;;  %v3491_v61 = vmin.f32 %v3463_v43, %v3483_v51  ;;  %v3492_v20 = vmin.f32 %v3464_v57, %v3484_v2  ;;  %v3493_v16 = vmin.f32 %v3465_v12, %v3485_v62 }
 0x396   : > { %v3494_v8 = vmin.f32 %v3466_v4, %v3486_v9  ;;  %v3495_v32 = vmin.f32 %v3467_v17, %v3487_v11  ;;  %v3496_v5 = vmin.f32 %v3468_v35, %v3488_v18  ;;  %v3497_v15 = vmin.f32 %v3469_v19, %v3489_v25  ;;  %v7773_v11 = vld [vmem:[#allocation3 + $0x60] sm:$0xff] }
 0x397   : > { %vm3502_vm7 = vcmp.gt.f32.partialorder %v7607_v48, %v7488_v22  ;;  %vm3503_vm10 = vcmp.gt.f32.partialorder %v7607_v48, %v7493_v21  ;;  %vm3504_vm11 = vcmp.gt.f32.partialorder %v7607_v48, %v7522_v37  ;;  %vm3505_vm12 = vcmp.gt.f32.partialorder %v7607_v48, %v7527_v23 }
 0x398   : > { %vm3506_vm13 = vcmp.gt.f32.partialorder %v7607_v48, %v7532_v27  ;;  %vm3507_vm14 = vcmp.gt.f32.partialorder %v7607_v48, %v7537_v53  ;;  %vm3508_vm15 = vcmp.gt.f32.partialorder %v7607_v48, %v7542_v26  ;;  %vm3509_vm0 = vcmp.gt.f32.partialorder %v7607_v48, %v7547_v33 }
 0x399   : > { %v3510_v24 = vsel %vm3502_vm7, %v7607_v48, inf  ;;  %v3511_v31 = vsel %vm3503_vm10, %v7607_v48, inf  ;;  %v3512_v10 = vsel %vm3504_vm11, %v7607_v48, inf  ;;  %v3513_v3 = vsel %vm3505_vm12, %v7607_v48, inf }
 0x39a   : > { %v3514_v54 = vsel %vm3506_vm13, %v7607_v48, inf  ;;  %v3515_v7 = vsel %vm3507_vm14, %v7607_v48, inf  ;;  %v3516_v1 = vsel %vm3508_vm15, %v7607_v48, inf  ;;  %v3517_v39 = vsel %vm3509_vm0, %v7607_v48, inf }
 0x39b   : > { %v3518_v63 = vmin.f32 %v3490_v29, %v3510_v24  ;;  %v3519_v56 = vmin.f32 %v3491_v61, %v3511_v31  ;;  %v3520_v50 = vmin.f32 %v3492_v20, %v3512_v10  ;;  %v3521_v43 = vmin.f32 %v3493_v16, %v3513_v3 }
 0x39c   : > { %v3522_v57 = vmin.f32 %v3494_v8, %v3514_v54  ;;  %v3523_v12 = vmin.f32 %v3495_v32, %v3515_v7  ;;  %v3524_v4 = vmin.f32 %v3496_v5, %v3516_v1  ;;  %v3525_v17 = vmin.f32 %v3497_v15, %v3517_v39 }
 0x39d   : > { %vm3530_vm1 = vcmp.gt.f32.partialorder %v7611_v28, %v7488_v22  ;;  %vm3531_vm2 = vcmp.gt.f32.partialorder %v7611_v28, %v7493_v21  ;;  %vm3532_vm3 = vcmp.gt.f32.partialorder %v7611_v28, %v7522_v37  ;;  %vm3533_vm4 = vcmp.gt.f32.partialorder %v7611_v28, %v7527_v23 }
 0x39e   : > { %vm3534_vm5 = vcmp.gt.f32.partialorder %v7611_v28, %v7532_v27  ;;  %vm3535_vm6 = vcmp.gt.f32.partialorder %v7611_v28, %v7537_v53  ;;  %vm3536_vm8 = vcmp.gt.f32.partialorder %v7611_v28, %v7542_v26  ;;  %vm3537_vm9 = vcmp.gt.f32.partialorder %v7611_v28, %v7547_v33 }
 0x39f   : > { %v3538_v48 = vsel %vm3530_vm1, %v7611_v28, inf  ;;  %v3539_v35 = vsel %vm3531_vm2, %v7611_v28, inf  ;;  %v3540_v19 = vsel %vm3532_vm3, %v7611_v28, inf  ;;  %v3541_v36 = vsel %vm3533_vm4, %v7611_v28, inf }
 0x3a0   : > { %v3542_v51 = vsel %vm3534_vm5, %v7611_v28, inf  ;;  %v3543_v2 = vsel %vm3535_vm6, %v7611_v28, inf  ;;  %v3544_v62 = vsel %vm3536_vm8, %v7611_v28, inf  ;;  %v3545_v9 = vsel %vm3537_vm9, %v7611_v28, inf }
 0x3a1   : > { %v3546_v18 = vmin.f32 %v3518_v63, %v3538_v48  ;;  %v3547_v25 = vmin.f32 %v3519_v56, %v3539_v35  ;;  %v3548_v29 = vmin.f32 %v3520_v50, %v3540_v19  ;;  %v3549_v61 = vmin.f32 %v3521_v43, %v3541_v36 }
 0x3a2   : > { %v3550_v20 = vmin.f32 %v3522_v57, %v3542_v51  ;;  %v3551_v16 = vmin.f32 %v3523_v12, %v3543_v2  ;;  %v3552_v8 = vmin.f32 %v3524_v4, %v3544_v62  ;;  %v3553_v32 = vmin.f32 %v3525_v17, %v3545_v9 }
 0x3a3   : > { %v3557_v5 = vrot.slane %v7583_v14, %v5450_v60  ;;  %v3585_v15 = vrot.slane %v7583_v14, %v5465_v45  ;;  %v7781_v24 = vrot.slane %v7773_v11, %v5408_v55  ;;  %v7785_v28 = vrot.slane %v7773_v11, %v5411_v58 }
 0x3a4   : > { %v7789_v31 = vrot.slane %v7773_v11, %v5414_v59  ;;  %v7793_v10 = vrot.slane %v7773_v11, %v5426_v44  ;;  %v7797_v3 = vrot.slane %v7773_v11, %v5429_v46  ;;  %v7801_v14 = vrot.slane %v7773_v11, %v5432_v49 }
 0x3a5   : > { %vm3558_vm7 = vcmp.gt.f32.partialorder %v3557_v5, %v7488_v22  ;;  %vm3559_vm10 = vcmp.gt.f32.partialorder %v3557_v5, %v7493_v21  ;;  %vm3560_vm11 = vcmp.gt.f32.partialorder %v3557_v5, %v7522_v37  ;;  %vm3561_vm12 = vcmp.gt.f32.partialorder %v3557_v5, %v7527_v23 }
 0x3a6   : > { %vm3562_vm13 = vcmp.gt.f32.partialorder %v3557_v5, %v7532_v27  ;;  %vm3563_vm14 = vcmp.gt.f32.partialorder %v3557_v5, %v7537_v53  ;;  %vm3564_vm15 = vcmp.gt.f32.partialorder %v3557_v5, %v7542_v26  ;;  %vm3565_vm0 = vcmp.gt.f32.partialorder %v3557_v5, %v7547_v33 }
 0x3a7   : > { %v3566_v54 = vsel %vm3558_vm7, %v3557_v5, inf  ;;  %v3567_v7 = vsel %vm3559_vm10, %v3557_v5, inf  ;;  %v3568_v1 = vsel %vm3560_vm11, %v3557_v5, inf  ;;  %v3569_v39 = vsel %vm3561_vm12, %v3557_v5, inf }
 0x3a8   : > { %v3570_v63 = vsel %vm3562_vm13, %v3557_v5, inf  ;;  %v3571_v56 = vsel %vm3563_vm14, %v3557_v5, inf  ;;  %v3572_v50 = vsel %vm3564_vm15, %v3557_v5, inf  ;;  %v3573_v43 = vsel %vm3565_vm0, %v3557_v5, inf }
 0x3a9   : > { %v3574_v57 = vmin.f32 %v3546_v18, %v3566_v54  ;;  %v3575_v12 = vmin.f32 %v3547_v25, %v3567_v7  ;;  %v3576_v4 = vmin.f32 %v3548_v29, %v3568_v1  ;;  %v3577_v17 = vmin.f32 %v3549_v61, %v3569_v39 }
 0x3aa   : > { %v3578_v48 = vmin.f32 %v3550_v20, %v3570_v63  ;;  %v3579_v35 = vmin.f32 %v3551_v16, %v3571_v56  ;;  %v3580_v19 = vmin.f32 %v3552_v8, %v3572_v50  ;;  %v3581_v36 = vmin.f32 %v3553_v32, %v3573_v43 }
 0x3ab   : > { %vm3586_vm1 = vcmp.gt.f32.partialorder %v3585_v15, %v7488_v22  ;;  %vm3587_vm2 = vcmp.gt.f32.partialorder %v3585_v15, %v7493_v21  ;;  %vm3588_vm3 = vcmp.gt.f32.partialorder %v3585_v15, %v7522_v37  ;;  %vm3589_vm4 = vcmp.gt.f32.partialorder %v3585_v15, %v7527_v23 }
 0x3ac   : > { %vm3590_vm5 = vcmp.gt.f32.partialorder %v3585_v15, %v7532_v27  ;;  %vm3591_vm6 = vcmp.gt.f32.partialorder %v3585_v15, %v7537_v53  ;;  %vm3592_vm8 = vcmp.gt.f32.partialorder %v3585_v15, %v7542_v26  ;;  %vm3593_vm9 = vcmp.gt.f32.partialorder %v3585_v15, %v7547_v33 }
 0x3ad   : > { %v3594_v51 = vsel %vm3586_vm1, %v3585_v15, inf  ;;  %v3595_v2 = vsel %vm3587_vm2, %v3585_v15, inf  ;;  %v3596_v62 = vsel %vm3588_vm3, %v3585_v15, inf  ;;  %v3597_v9 = vsel %vm3589_vm4, %v3585_v15, inf }
 0x3ae   : > { %v3598_v18 = vsel %vm3590_vm5, %v3585_v15, inf  ;;  %v3599_v25 = vsel %vm3591_vm6, %v3585_v15, inf  ;;  %v3600_v29 = vsel %vm3592_vm8, %v3585_v15, inf  ;;  %v3601_v61 = vsel %vm3593_vm9, %v3585_v15, inf }
 0x3af   : > { %v3602_v20 = vmin.f32 %v3574_v57, %v3594_v51  ;;  %v3603_v16 = vmin.f32 %v3575_v12, %v3595_v2  ;;  %v3604_v8 = vmin.f32 %v3576_v4, %v3596_v62  ;;  %v3605_v32 = vmin.f32 %v3577_v17, %v3597_v9 }
 0x3b0   : > { %v3606_v5 = vmin.f32 %v3578_v48, %v3598_v18  ;;  %v3607_v54 = vmin.f32 %v3579_v35, %v3599_v25  ;;  %v3608_v7 = vmin.f32 %v3580_v19, %v3600_v29  ;;  %v3609_v1 = vmin.f32 %v3581_v36, %v3601_v61 }
 0x3b1   : > { %vm3616_vm7 = vcmp.gt.f32.partialorder %v7781_v24, %v7488_v22  ;;  %vm3617_vm10 = vcmp.gt.f32.partialorder %v7781_v24, %v7493_v21  ;;  %vm3618_vm11 = vcmp.gt.f32.partialorder %v7781_v24, %v7522_v37  ;;  %vm3619_vm12 = vcmp.gt.f32.partialorder %v7781_v24, %v7527_v23 }
 0x3b2   : > { %vm3620_vm13 = vcmp.gt.f32.partialorder %v7781_v24, %v7532_v27  ;;  %vm3621_vm14 = vcmp.gt.f32.partialorder %v7781_v24, %v7537_v53  ;;  %vm3622_vm15 = vcmp.gt.f32.partialorder %v7781_v24, %v7542_v26  ;;  %vm3623_vm0 = vcmp.gt.f32.partialorder %v7781_v24, %v7547_v33 }
 0x3b3   : > { %v3624_v15 = vsel %vm3616_vm7, %v7781_v24, inf  ;;  %v3625_v39 = vsel %vm3617_vm10, %v7781_v24, inf  ;;  %v3626_v63 = vsel %vm3618_vm11, %v7781_v24, inf  ;;  %v3627_v56 = vsel %vm3619_vm12, %v7781_v24, inf }
 0x3b4   : > { %v3628_v50 = vsel %vm3620_vm13, %v7781_v24, inf  ;;  %v3629_v43 = vsel %vm3621_vm14, %v7781_v24, inf  ;;  %v3630_v57 = vsel %vm3622_vm15, %v7781_v24, inf  ;;  %v3631_v12 = vsel %vm3623_vm0, %v7781_v24, inf }
 0x3b5   : > { %v3632_v4 = vmin.f32 %v3602_v20, %v3624_v15  ;;  %v3633_v17 = vmin.f32 %v3603_v16, %v3625_v39  ;;  %v3634_v48 = vmin.f32 %v3604_v8, %v3626_v63  ;;  %v3635_v35 = vmin.f32 %v3605_v32, %v3627_v56 }
 0x3b6   : > { %v3636_v19 = vmin.f32 %v3606_v5, %v3628_v50  ;;  %v3637_v36 = vmin.f32 %v3607_v54, %v3629_v43  ;;  %v3638_v51 = vmin.f32 %v3608_v7, %v3630_v57  ;;  %v3639_v2 = vmin.f32 %v3609_v1, %v3631_v12 }
 0x3b7   : > { %vm3644_vm1 = vcmp.gt.f32.partialorder %v7785_v28, %v7488_v22  ;;  %vm3645_vm2 = vcmp.gt.f32.partialorder %v7785_v28, %v7493_v21  ;;  %vm3646_vm3 = vcmp.gt.f32.partialorder %v7785_v28, %v7522_v37  ;;  %vm3647_vm4 = vcmp.gt.f32.partialorder %v7785_v28, %v7527_v23 }
 0x3b8   : > { %vm3648_vm5 = vcmp.gt.f32.partialorder %v7785_v28, %v7532_v27  ;;  %vm3649_vm6 = vcmp.gt.f32.partialorder %v7785_v28, %v7537_v53  ;;  %vm3650_vm8 = vcmp.gt.f32.partialorder %v7785_v28, %v7542_v26  ;;  %vm3651_vm9 = vcmp.gt.f32.partialorder %v7785_v28, %v7547_v33 }
 0x3b9   : > { %v3652_v24 = vsel %vm3644_vm1, %v7785_v28, inf  ;;  %v3653_v62 = vsel %vm3645_vm2, %v7785_v28, inf  ;;  %v3654_v9 = vsel %vm3646_vm3, %v7785_v28, inf  ;;  %v3655_v18 = vsel %vm3647_vm4, %v7785_v28, inf }
 0x3ba   : > { %v3656_v25 = vsel %vm3648_vm5, %v7785_v28, inf  ;;  %v3657_v29 = vsel %vm3649_vm6, %v7785_v28, inf  ;;  %v3658_v61 = vsel %vm3650_vm8, %v7785_v28, inf  ;;  %v3659_v20 = vsel %vm3651_vm9, %v7785_v28, inf }
 0x3bb   : > { %v3660_v16 = vmin.f32 %v3632_v4, %v3652_v24  ;;  %v3661_v8 = vmin.f32 %v3633_v17, %v3653_v62  ;;  %v3662_v32 = vmin.f32 %v3634_v48, %v3654_v9  ;;  %v3663_v5 = vmin.f32 %v3635_v35, %v3655_v18 }
 0x3bc   : > { %v3664_v54 = vmin.f32 %v3636_v19, %v3656_v25  ;;  %v3665_v7 = vmin.f32 %v3637_v36, %v3657_v29  ;;  %v3666_v1 = vmin.f32 %v3638_v51, %v3658_v61  ;;  %v3667_v15 = vmin.f32 %v3639_v2, %v3659_v20 }
 0x3bd   : > { %vm3672_vm7 = vcmp.gt.f32.partialorder %v7789_v31, %v7488_v22  ;;  %vm3673_vm10 = vcmp.gt.f32.partialorder %v7789_v31, %v7493_v21  ;;  %vm3674_vm11 = vcmp.gt.f32.partialorder %v7789_v31, %v7522_v37  ;;  %vm3675_vm12 = vcmp.gt.f32.partialorder %v7789_v31, %v7527_v23 }
 0x3be   : > { %vm3676_vm13 = vcmp.gt.f32.partialorder %v7789_v31, %v7532_v27  ;;  %vm3677_vm14 = vcmp.gt.f32.partialorder %v7789_v31, %v7537_v53  ;;  %vm3678_vm15 = vcmp.gt.f32.partialorder %v7789_v31, %v7542_v26  ;;  %vm3679_vm0 = vcmp.gt.f32.partialorder %v7789_v31, %v7547_v33 }
 0x3bf   : > { %v3680_v28 = vsel %vm3672_vm7, %v7789_v31, inf  ;;  %v3681_v39 = vsel %vm3673_vm10, %v7789_v31, inf  ;;  %v3682_v63 = vsel %vm3674_vm11, %v7789_v31, inf  ;;  %v3683_v56 = vsel %vm3675_vm12, %v7789_v31, inf }
 0x3c0   : > { %v3684_v50 = vsel %vm3676_vm13, %v7789_v31, inf  ;;  %v3685_v43 = vsel %vm3677_vm14, %v7789_v31, inf  ;;  %v3686_v57 = vsel %vm3678_vm15, %v7789_v31, inf  ;;  %v3687_v12 = vsel %vm3679_vm0, %v7789_v31, inf }
 0x3c1   : > { %v3688_v4 = vmin.f32 %v3660_v16, %v3680_v28  ;;  %v3689_v17 = vmin.f32 %v3661_v8, %v3681_v39  ;;  %v3690_v48 = vmin.f32 %v3662_v32, %v3682_v63  ;;  %v3691_v35 = vmin.f32 %v3663_v5, %v3683_v56 }
 0x3c2   : > { %v3692_v19 = vmin.f32 %v3664_v54, %v3684_v50  ;;  %v3693_v36 = vmin.f32 %v3665_v7, %v3685_v43  ;;  %v3694_v51 = vmin.f32 %v3666_v1, %v3686_v57  ;;  %v3695_v2 = vmin.f32 %v3667_v15, %v3687_v12 }
 0x3c3   : > { %vm3700_vm1 = vcmp.gt.f32.partialorder %v7793_v10, %v7488_v22  ;;  %vm3701_vm2 = vcmp.gt.f32.partialorder %v7793_v10, %v7493_v21  ;;  %vm3702_vm3 = vcmp.gt.f32.partialorder %v7793_v10, %v7522_v37  ;;  %vm3703_vm4 = vcmp.gt.f32.partialorder %v7793_v10, %v7527_v23 }
 0x3c4   : > { %vm3704_vm5 = vcmp.gt.f32.partialorder %v7793_v10, %v7532_v27  ;;  %vm3705_vm6 = vcmp.gt.f32.partialorder %v7793_v10, %v7537_v53  ;;  %vm3706_vm8 = vcmp.gt.f32.partialorder %v7793_v10, %v7542_v26  ;;  %vm3707_vm9 = vcmp.gt.f32.partialorder %v7793_v10, %v7547_v33 }
 0x3c5   : > { %v3708_v31 = vsel %vm3700_vm1, %v7793_v10, inf  ;;  %v3709_v24 = vsel %vm3701_vm2, %v7793_v10, inf  ;;  %v3710_v62 = vsel %vm3702_vm3, %v7793_v10, inf  ;;  %v3711_v9 = vsel %vm3703_vm4, %v7793_v10, inf }
 0x3c6   : > { %v3712_v18 = vsel %vm3704_vm5, %v7793_v10, inf  ;;  %v3713_v25 = vsel %vm3705_vm6, %v7793_v10, inf  ;;  %v3714_v29 = vsel %vm3706_vm8, %v7793_v10, inf  ;;  %v3715_v61 = vsel %vm3707_vm9, %v7793_v10, inf }
 0x3c7   : > { %v3716_v20 = vmin.f32 %v3688_v4, %v3708_v31  ;;  %v3717_v16 = vmin.f32 %v3689_v17, %v3709_v24  ;;  %v3718_v8 = vmin.f32 %v3690_v48, %v3710_v62  ;;  %v3719_v32 = vmin.f32 %v3691_v35, %v3711_v9 }
 0x3c8   : > { %v3720_v5 = vmin.f32 %v3692_v19, %v3712_v18  ;;  %v3721_v54 = vmin.f32 %v3693_v36, %v3713_v25  ;;  %v3722_v7 = vmin.f32 %v3694_v51, %v3714_v29  ;;  %v3723_v1 = vmin.f32 %v3695_v2, %v3715_v61  ;;  %v7963_v25 = vld [vmem:[#allocation3 + $0x68] sm:$0xff] }
 0x3c9   : > { %vm3728_vm7 = vcmp.gt.f32.partialorder %v7797_v3, %v7488_v22  ;;  %vm3729_vm10 = vcmp.gt.f32.partialorder %v7797_v3, %v7493_v21  ;;  %vm3730_vm11 = vcmp.gt.f32.partialorder %v7797_v3, %v7522_v37  ;;  %vm3731_vm12 = vcmp.gt.f32.partialorder %v7797_v3, %v7527_v23 }
 0x3ca   : > { %vm3732_vm13 = vcmp.gt.f32.partialorder %v7797_v3, %v7532_v27  ;;  %vm3733_vm14 = vcmp.gt.f32.partialorder %v7797_v3, %v7537_v53  ;;  %vm3734_vm15 = vcmp.gt.f32.partialorder %v7797_v3, %v7542_v26  ;;  %vm3735_vm0 = vcmp.gt.f32.partialorder %v7797_v3, %v7547_v33 }
 0x3cb   : > { %v3736_v10 = vsel %vm3728_vm7, %v7797_v3, inf  ;;  %v3737_v15 = vsel %vm3729_vm10, %v7797_v3, inf  ;;  %v3738_v28 = vsel %vm3730_vm11, %v7797_v3, inf  ;;  %v3739_v39 = vsel %vm3731_vm12, %v7797_v3, inf }
 0x3cc   : > { %v3740_v63 = vsel %vm3732_vm13, %v7797_v3, inf  ;;  %v3741_v56 = vsel %vm3733_vm14, %v7797_v3, inf  ;;  %v3742_v50 = vsel %vm3734_vm15, %v7797_v3, inf  ;;  %v3743_v43 = vsel %vm3735_vm0, %v7797_v3, inf }
 0x3cd   : > { %v3744_v57 = vmin.f32 %v3716_v20, %v3736_v10  ;;  %v3745_v12 = vmin.f32 %v3717_v16, %v3737_v15  ;;  %v3746_v4 = vmin.f32 %v3718_v8, %v3738_v28  ;;  %v3747_v17 = vmin.f32 %v3719_v32, %v3739_v39 }
 0x3ce   : > { %v3748_v48 = vmin.f32 %v3720_v5, %v3740_v63  ;;  %v3749_v35 = vmin.f32 %v3721_v54, %v3741_v56  ;;  %v3750_v19 = vmin.f32 %v3722_v7, %v3742_v50  ;;  %v3751_v36 = vmin.f32 %v3723_v1, %v3743_v43 }
 0x3cf   : > { %vm3756_vm1 = vcmp.gt.f32.partialorder %v7801_v14, %v7488_v22  ;;  %vm3757_vm2 = vcmp.gt.f32.partialorder %v7801_v14, %v7493_v21  ;;  %vm3758_vm3 = vcmp.gt.f32.partialorder %v7801_v14, %v7522_v37  ;;  %vm3759_vm4 = vcmp.gt.f32.partialorder %v7801_v14, %v7527_v23 }
 0x3d0   : > { %vm3760_vm5 = vcmp.gt.f32.partialorder %v7801_v14, %v7532_v27  ;;  %vm3761_vm6 = vcmp.gt.f32.partialorder %v7801_v14, %v7537_v53  ;;  %vm3762_vm8 = vcmp.gt.f32.partialorder %v7801_v14, %v7542_v26  ;;  %vm3763_vm9 = vcmp.gt.f32.partialorder %v7801_v14, %v7547_v33 }
 0x3d1   : > { %v3764_v3 = vsel %vm3756_vm1, %v7801_v14, inf  ;;  %v3765_v51 = vsel %vm3757_vm2, %v7801_v14, inf  ;;  %v3766_v2 = vsel %vm3758_vm3, %v7801_v14, inf  ;;  %v3767_v31 = vsel %vm3759_vm4, %v7801_v14, inf }
 0x3d2   : > { %v3768_v24 = vsel %vm3760_vm5, %v7801_v14, inf  ;;  %v3769_v62 = vsel %vm3761_vm6, %v7801_v14, inf  ;;  %v3770_v9 = vsel %vm3762_vm8, %v7801_v14, inf  ;;  %v3771_v18 = vsel %vm3763_vm9, %v7801_v14, inf }
 0x3d3   : > { %v3772_v29 = vmin.f32 %v3744_v57, %v3764_v3  ;;  %v3773_v61 = vmin.f32 %v3745_v12, %v3765_v51  ;;  %v3774_v20 = vmin.f32 %v3746_v4, %v3766_v2  ;;  %v3775_v16 = vmin.f32 %v3747_v17, %v3767_v31 }
 0x3d4   : > { %v3776_v8 = vmin.f32 %v3748_v48, %v3768_v24  ;;  %v3777_v32 = vmin.f32 %v3749_v35, %v3769_v62  ;;  %v3778_v5 = vmin.f32 %v3750_v19, %v3770_v9  ;;  %v3779_v54 = vmin.f32 %v3751_v36, %v3771_v18 }
 0x3d5   : > { %v3783_v7 = vrot.slane %v7773_v11, %v5450_v60  ;;  %v3811_v1 = vrot.slane %v7773_v11, %v5465_v45  ;;  %v7971_v10 = vrot.slane %v7963_v25, %v5408_v55  ;;  %v7975_v14 = vrot.slane %v7963_v25, %v5411_v58 }
 0x3d6   : > { %v7979_v15 = vrot.slane %v7963_v25, %v5414_v59  ;;  %v7983_v28 = vrot.slane %v7963_v25, %v5426_v44  ;;  %v7987_v39 = vrot.slane %v7963_v25, %v5429_v46  ;;  %v7991_v11 = vrot.slane %v7963_v25, %v5432_v49 }
 0x3d7   : > { %vm3784_vm7 = vcmp.gt.f32.partialorder %v3783_v7, %v7488_v22  ;;  %vm3785_vm10 = vcmp.gt.f32.partialorder %v3783_v7, %v7493_v21  ;;  %vm3786_vm11 = vcmp.gt.f32.partialorder %v3783_v7, %v7522_v37  ;;  %vm3787_vm12 = vcmp.gt.f32.partialorder %v3783_v7, %v7527_v23 }
 0x3d8   : > { %vm3788_vm13 = vcmp.gt.f32.partialorder %v3783_v7, %v7532_v27  ;;  %vm3789_vm14 = vcmp.gt.f32.partialorder %v3783_v7, %v7537_v53  ;;  %vm3790_vm15 = vcmp.gt.f32.partialorder %v3783_v7, %v7542_v26  ;;  %vm3791_vm0 = vcmp.gt.f32.partialorder %v3783_v7, %v7547_v33 }
 0x3d9   : > { %v3792_v63 = vsel %vm3784_vm7, %v3783_v7, inf  ;;  %v3793_v56 = vsel %vm3785_vm10, %v3783_v7, inf  ;;  %v3794_v50 = vsel %vm3786_vm11, %v3783_v7, inf  ;;  %v3795_v43 = vsel %vm3787_vm12, %v3783_v7, inf }
 0x3da   : > { %v3796_v57 = vsel %vm3788_vm13, %v3783_v7, inf  ;;  %v3797_v12 = vsel %vm3789_vm14, %v3783_v7, inf  ;;  %v3798_v4 = vsel %vm3790_vm15, %v3783_v7, inf  ;;  %v3799_v17 = vsel %vm3791_vm0, %v3783_v7, inf }
 0x3db   : > { %v3800_v48 = vmin.f32 %v3772_v29, %v3792_v63  ;;  %v3801_v35 = vmin.f32 %v3773_v61, %v3793_v56  ;;  %v3802_v19 = vmin.f32 %v3774_v20, %v3794_v50  ;;  %v3803_v36 = vmin.f32 %v3775_v16, %v3795_v43  ;;  %v8010_v56 = vld [vmem:[%s5399_s20] sm:$0xff]  ;;  %v8015_v50 = vld [vmem:[%s5399_s20 + $0x8] sm:$0xff] }
 0x3dc   : > { %v3804_v3 = vmin.f32 %v3776_v8, %v3796_v57  ;;  %v3805_v51 = vmin.f32 %v3777_v32, %v3797_v12  ;;  %v3806_v2 = vmin.f32 %v3778_v5, %v3798_v4  ;;  %v3807_v31 = vmin.f32 %v3779_v54, %v3799_v17 }
 0x3dd   : > { %vm3812_vm1 = vcmp.gt.f32.partialorder %v3811_v1, %v7488_v22  ;;  %vm3813_vm2 = vcmp.gt.f32.partialorder %v3811_v1, %v7493_v21  ;;  %vm3814_vm3 = vcmp.gt.f32.partialorder %v3811_v1, %v7522_v37  ;;  %vm3815_vm4 = vcmp.gt.f32.partialorder %v3811_v1, %v7527_v23 }
 0x3de   : > { %vm3816_vm5 = vcmp.gt.f32.partialorder %v3811_v1, %v7532_v27  ;;  %vm3817_vm6 = vcmp.gt.f32.partialorder %v3811_v1, %v7537_v53  ;;  %vm3818_vm8 = vcmp.gt.f32.partialorder %v3811_v1, %v7542_v26  ;;  %vm3819_vm9 = vcmp.gt.f32.partialorder %v3811_v1, %v7547_v33 }
 0x3df   : > { %v3820_v24 = vsel %vm3812_vm1, %v3811_v1, inf  ;;  %v3821_v62 = vsel %vm3813_vm2, %v3811_v1, inf  ;;  %v3822_v9 = vsel %vm3814_vm3, %v3811_v1, inf  ;;  %v3823_v22 = vsel %vm3815_vm4, %v3811_v1, inf }
 0x3e0   : > { %v3824_v18 = vsel %vm3816_vm5, %v3811_v1, inf  ;;  %v3825_v21 = vsel %vm3817_vm6, %v3811_v1, inf  ;;  %v3826_v29 = vsel %vm3818_vm8, %v3811_v1, inf  ;;  %v3827_v61 = vsel %vm3819_vm9, %v3811_v1, inf }
 0x3e1   : > { %v3828_v20 = vmin.f32 %v3800_v48, %v3820_v24  ;;  %v3829_v16 = vmin.f32 %v3801_v35, %v3821_v62  ;;  %v3830_v8 = vmin.f32 %v3802_v19, %v3822_v9  ;;  %v3831_v32 = vmin.f32 %v3803_v36, %v3823_v22  ;;  %v8069_v24 = vld [vmem:[%s5399_s20 + $0x38] sm:$0xff] }
 0x3e2   : > { %v3832_v5 = vmin.f32 %v3804_v3, %v3824_v18  ;;  %v3833_v54 = vmin.f32 %v3805_v51, %v3825_v21  ;;  %v3834_v7 = vmin.f32 %v3806_v2, %v3826_v29  ;;  %v3835_v63 = vmin.f32 %v3807_v31, %v3827_v61  ;;  %v8044_v3 = vld [vmem:[%s5399_s20 + $0x10] sm:$0xff]  ;;  %v8054_v51 = vld [vmem:[%s5399_s20 + $0x20] sm:$0xff]  ;;  %v8059_v2 = vld [vmem:[%s5399_s20 + $0x28] sm:$0xff] }
 0x3e3   : > { %vm3842_vm7 = vcmp.gt.f32.partialorder %v7971_v10, %v8010_v56  ;;  %vm3843_vm10 = vcmp.gt.f32.partialorder %v7971_v10, %v8015_v50  ;;  %vm3844_vm11 = vcmp.gt.f32.partialorder %v7971_v10, %v7522_v37  ;;  %vm3845_vm12 = vcmp.gt.f32.partialorder %v7971_v10, %v7527_v23  ;;  %v8064_v31 = vld [vmem:[%s5399_s20 + $0x30] sm:$0xff] }
 0x3e4   : > { %vm3846_vm13 = vcmp.gt.f32.partialorder %v7971_v10, %v7532_v27  ;;  %vm3847_vm14 = vcmp.gt.f32.partialorder %v7971_v10, %v7537_v53  ;;  %vm3848_vm15 = vcmp.gt.f32.partialorder %v7971_v10, %v7542_v26  ;;  %vm3849_vm0 = vcmp.gt.f32.partialorder %v7971_v10, %v7547_v33 }
 0x3e5   : > { %v3850_v1 = vsel %vm3842_vm7, %v7971_v10, inf  ;;  %v3851_v43 = vsel %vm3843_vm10, %v7971_v10, inf  ;;  %v3852_v37 = vsel %vm3844_vm11, %v7971_v10, inf  ;;  %v3853_v23 = vsel %vm3845_vm12, %v7971_v10, inf }
 0x3e6   : > { %v3854_v27 = vsel %vm3846_vm13, %v7971_v10, inf  ;;  %v3855_v53 = vsel %vm3847_vm14, %v7971_v10, inf  ;;  %v3856_v57 = vsel %vm3848_vm15, %v7971_v10, inf  ;;  %v3857_v26 = vsel %vm3849_vm0, %v7971_v10, inf  ;;  %v8049_v10 = vld [vmem:[%s5399_s20 + $0x18] sm:$0xff] }
 0x3e7   : > { %v3858_v33 = vmin.f32 %v3828_v20, %v3850_v1  ;;  %v3859_v12 = vmin.f32 %v3829_v16, %v3851_v43  ;;  %v3860_v4 = vmin.f32 %v3830_v8, %v3852_v37  ;;  %v3861_v17 = vmin.f32 %v3831_v32, %v3853_v23 }
 0x3e8   : > { %v3862_v48 = vmin.f32 %v3832_v5, %v3854_v27  ;;  %v3863_v35 = vmin.f32 %v3833_v54, %v3855_v53  ;;  %v3864_v19 = vmin.f32 %v3834_v7, %v3856_v57  ;;  %v3865_v36 = vmin.f32 %v3835_v63, %v3857_v26 }
 0x3e9   : > { %vm3870_vm1 = vcmp.gt.f32.partialorder %v7975_v14, %v8010_v56  ;;  %vm3871_vm2 = vcmp.gt.f32.partialorder %v7975_v14, %v8015_v50  ;;  %vm3872_vm3 = vcmp.gt.f32.partialorder %v7975_v14, %v8044_v3  ;;  %vm3873_vm4 = vcmp.gt.f32.partialorder %v7975_v14, %v8049_v10 }
 0x3ea   : > { %vm3874_vm5 = vcmp.gt.f32.partialorder %v7975_v14, %v8054_v51  ;;  %vm3875_vm6 = vcmp.gt.f32.partialorder %v7975_v14, %v8059_v2  ;;  %vm3876_vm8 = vcmp.gt.f32.partialorder %v7975_v14, %v8064_v31  ;;  %vm3877_vm9 = vcmp.gt.f32.partialorder %v7975_v14, %v8069_v24 }
 0x3eb   : > { %v3878_v62 = vsel %vm3870_vm1, %v7975_v14, inf  ;;  %v3879_v9 = vsel %vm3871_vm2, %v7975_v14, inf  ;;  %v3880_v22 = vsel %vm3872_vm3, %v7975_v14, inf  ;;  %v3881_v18 = vsel %vm3873_vm4, %v7975_v14, inf }
 0x3ec   : > { %v3882_v21 = vsel %vm3874_vm5, %v7975_v14, inf  ;;  %v3883_v29 = vsel %vm3875_vm6, %v7975_v14, inf  ;;  %v3884_v61 = vsel %vm3876_vm8, %v7975_v14, inf  ;;  %v3885_v20 = vsel %vm3877_vm9, %v7975_v14, inf }
 0x3ed   : > { %v3886_v16 = vmin.f32 %v3858_v33, %v3878_v62  ;;  %v3887_v8 = vmin.f32 %v3859_v12, %v3879_v9  ;;  %v3888_v32 = vmin.f32 %v3860_v4, %v3880_v22  ;;  %v3889_v5 = vmin.f32 %v3861_v17, %v3881_v18 }
 0x3ee   : > { %v3890_v54 = vmin.f32 %v3862_v48, %v3882_v21  ;;  %v3891_v7 = vmin.f32 %v3863_v35, %v3883_v29  ;;  %v3892_v63 = vmin.f32 %v3864_v19, %v3884_v61  ;;  %v3893_v1 = vmin.f32 %v3865_v36, %v3885_v20 }
 0x3ef   : > { %vm3898_vm7 = vcmp.gt.f32.partialorder %v7979_v15, %v8010_v56  ;;  %vm3899_vm10 = vcmp.gt.f32.partialorder %v7979_v15, %v8015_v50  ;;  %vm3900_vm11 = vcmp.gt.f32.partialorder %v7979_v15, %v8044_v3  ;;  %vm3901_vm12 = vcmp.gt.f32.partialorder %v7979_v15, %v8049_v10 }
 0x3f0   : > { %vm3902_vm13 = vcmp.gt.f32.partialorder %v7979_v15, %v8054_v51  ;;  %vm3903_vm14 = vcmp.gt.f32.partialorder %v7979_v15, %v8059_v2  ;;  %vm3904_vm15 = vcmp.gt.f32.partialorder %v7979_v15, %v8064_v31  ;;  %vm3905_vm0 = vcmp.gt.f32.partialorder %v7979_v15, %v8069_v24 }
 0x3f1   : > { %v3906_v14 = vsel %vm3898_vm7, %v7979_v15, inf  ;;  %v3907_v43 = vsel %vm3899_vm10, %v7979_v15, inf  ;;  %v3908_v37 = vsel %vm3900_vm11, %v7979_v15, inf  ;;  %v3909_v23 = vsel %vm3901_vm12, %v7979_v15, inf }
 0x3f2   : > { %v3910_v27 = vsel %vm3902_vm13, %v7979_v15, inf  ;;  %v3911_v53 = vsel %vm3903_vm14, %v7979_v15, inf  ;;  %v3912_v57 = vsel %vm3904_vm15, %v7979_v15, inf  ;;  %v3913_v26 = vsel %vm3905_vm0, %v7979_v15, inf }
 0x3f3   : > { %v3914_v33 = vmin.f32 %v3886_v16, %v3906_v14  ;;  %v3915_v12 = vmin.f32 %v3887_v8, %v3907_v43  ;;  %v3916_v4 = vmin.f32 %v3888_v32, %v3908_v37  ;;  %v3917_v17 = vmin.f32 %v3889_v5, %v3909_v23 }
 0x3f4   : > { %v3918_v48 = vmin.f32 %v3890_v54, %v3910_v27  ;;  %v3919_v35 = vmin.f32 %v3891_v7, %v3911_v53  ;;  %v3920_v19 = vmin.f32 %v3892_v63, %v3912_v57  ;;  %v3921_v36 = vmin.f32 %v3893_v1, %v3913_v26 }
 0x3f5   : > { %vm3926_vm1 = vcmp.gt.f32.partialorder %v7983_v28, %v8010_v56  ;;  %vm3927_vm2 = vcmp.gt.f32.partialorder %v7983_v28, %v8015_v50  ;;  %vm3928_vm3 = vcmp.gt.f32.partialorder %v7983_v28, %v8044_v3  ;;  %vm3929_vm4 = vcmp.gt.f32.partialorder %v7983_v28, %v8049_v10 }
 0x3f6   : > { %vm3930_vm5 = vcmp.gt.f32.partialorder %v7983_v28, %v8054_v51  ;;  %vm3931_vm6 = vcmp.gt.f32.partialorder %v7983_v28, %v8059_v2  ;;  %vm3932_vm8 = vcmp.gt.f32.partialorder %v7983_v28, %v8064_v31  ;;  %vm3933_vm9 = vcmp.gt.f32.partialorder %v7983_v28, %v8069_v24 }
 0x3f7   : > { %v3934_v15 = vsel %vm3926_vm1, %v7983_v28, inf  ;;  %v3935_v62 = vsel %vm3927_vm2, %v7983_v28, inf  ;;  %v3936_v9 = vsel %vm3928_vm3, %v7983_v28, inf  ;;  %v3937_v22 = vsel %vm3929_vm4, %v7983_v28, inf }
 0x3f8   : > { %v3938_v18 = vsel %vm3930_vm5, %v7983_v28, inf  ;;  %v3939_v21 = vsel %vm3931_vm6, %v7983_v28, inf  ;;  %v3940_v29 = vsel %vm3932_vm8, %v7983_v28, inf  ;;  %v3941_v61 = vsel %vm3933_vm9, %v7983_v28, inf }
 0x3f9   : > { %v3942_v20 = vmin.f32 %v3914_v33, %v3934_v15  ;;  %v3943_v16 = vmin.f32 %v3915_v12, %v3935_v62  ;;  %v3944_v8 = vmin.f32 %v3916_v4, %v3936_v9  ;;  %v3945_v32 = vmin.f32 %v3917_v17, %v3937_v22 }
 0x3fa   : > { %v3946_v5 = vmin.f32 %v3918_v48, %v3938_v18  ;;  %v3947_v54 = vmin.f32 %v3919_v35, %v3939_v21  ;;  %v3948_v7 = vmin.f32 %v3920_v19, %v3940_v29  ;;  %v3949_v63 = vmin.f32 %v3921_v36, %v3941_v61  ;;  %v8177_v21 = vld [vmem:[#allocation3 + $0x70] sm:$0xff] }
 0x3fb   : > { %vm3954_vm7 = vcmp.gt.f32.partialorder %v7987_v39, %v8010_v56  ;;  %vm3955_vm10 = vcmp.gt.f32.partialorder %v7987_v39, %v8015_v50  ;;  %vm3956_vm11 = vcmp.gt.f32.partialorder %v7987_v39, %v8044_v3  ;;  %vm3957_vm12 = vcmp.gt.f32.partialorder %v7987_v39, %v8049_v10 }
 0x3fc   : > { %vm3958_vm13 = vcmp.gt.f32.partialorder %v7987_v39, %v8054_v51  ;;  %vm3959_vm14 = vcmp.gt.f32.partialorder %v7987_v39, %v8059_v2  ;;  %vm3960_vm15 = vcmp.gt.f32.partialorder %v7987_v39, %v8064_v31  ;;  %vm3961_vm0 = vcmp.gt.f32.partialorder %v7987_v39, %v8069_v24 }
 0x3fd   : > { %v3962_v28 = vsel %vm3954_vm7, %v7987_v39, inf  ;;  %v3963_v1 = vsel %vm3955_vm10, %v7987_v39, inf  ;;  %v3964_v14 = vsel %vm3956_vm11, %v7987_v39, inf  ;;  %v3965_v43 = vsel %vm3957_vm12, %v7987_v39, inf }
 0x3fe   : > { %v3966_v37 = vsel %vm3958_vm13, %v7987_v39, inf  ;;  %v3967_v23 = vsel %vm3959_vm14, %v7987_v39, inf  ;;  %v3968_v27 = vsel %vm3960_vm15, %v7987_v39, inf  ;;  %v3969_v53 = vsel %vm3961_vm0, %v7987_v39, inf }
 0x3ff   : > { %v3970_v57 = vmin.f32 %v3942_v20, %v3962_v28  ;;  %v3971_v26 = vmin.f32 %v3943_v16, %v3963_v1  ;;  %v3972_v33 = vmin.f32 %v3944_v8, %v3964_v14  ;;  %v3973_v12 = vmin.f32 %v3945_v32, %v3965_v43 }
 0x400   : > { %v3974_v4 = vmin.f32 %v3946_v5, %v3966_v37  ;;  %v3975_v17 = vmin.f32 %v3947_v54, %v3967_v23  ;;  %v3976_v48 = vmin.f32 %v3948_v7, %v3968_v27  ;;  %v3977_v35 = vmin.f32 %v3949_v63, %v3969_v53 }
 0x401   : > { %vm3982_vm1 = vcmp.gt.f32.partialorder %v7991_v11, %v8010_v56  ;;  %vm3983_vm2 = vcmp.gt.f32.partialorder %v7991_v11, %v8015_v50  ;;  %vm3984_vm3 = vcmp.gt.f32.partialorder %v7991_v11, %v8044_v3  ;;  %vm3985_vm4 = vcmp.gt.f32.partialorder %v7991_v11, %v8049_v10 }
 0x402   : > { %vm3986_vm5 = vcmp.gt.f32.partialorder %v7991_v11, %v8054_v51  ;;  %vm3987_vm6 = vcmp.gt.f32.partialorder %v7991_v11, %v8059_v2  ;;  %vm3988_vm8 = vcmp.gt.f32.partialorder %v7991_v11, %v8064_v31  ;;  %vm3989_vm9 = vcmp.gt.f32.partialorder %v7991_v11, %v8069_v24 }
 0x403   : > { %v3990_v39 = vsel %vm3982_vm1, %v7991_v11, inf  ;;  %v3991_v19 = vsel %vm3983_vm2, %v7991_v11, inf  ;;  %v3992_v36 = vsel %vm3984_vm3, %v7991_v11, inf  ;;  %v3993_v15 = vsel %vm3985_vm4, %v7991_v11, inf }
 0x404   : > { %v3994_v62 = vsel %vm3986_vm5, %v7991_v11, inf  ;;  %v3995_v9 = vsel %vm3987_vm6, %v7991_v11, inf  ;;  %v3996_v22 = vsel %vm3988_vm8, %v7991_v11, inf  ;;  %v3997_v18 = vsel %vm3989_vm9, %v7991_v11, inf }
 0x405   : > { %v3998_v29 = vmin.f32 %v3970_v57, %v3990_v39  ;;  %v3999_v61 = vmin.f32 %v3971_v26, %v3991_v19  ;;  %v4000_v20 = vmin.f32 %v3972_v33, %v3992_v36  ;;  %v4001_v16 = vmin.f32 %v3973_v12, %v3993_v15 }
 0x406   : > { %v4002_v8 = vmin.f32 %v3974_v4, %v3994_v62  ;;  %v4003_v32 = vmin.f32 %v3975_v17, %v3995_v9  ;;  %v4004_v5 = vmin.f32 %v3976_v48, %v3996_v22  ;;  %v4005_v54 = vmin.f32 %v3977_v35, %v3997_v18 }
 0x407   : > { %v4009_v7 = vrot.slane %v7963_v25, %v5450_v60  ;;  %v4037_v63 = vrot.slane %v7963_v25, %v5465_v45  ;;  %v8185_v28 = vrot.slane %v8177_v21, %v5408_v55  ;;  %v8189_v11 = vrot.slane %v8177_v21, %v5411_v58 }
 0x408   : > { %v8193_v1 = vrot.slane %v8177_v21, %v5414_v59  ;;  %v8197_v14 = vrot.slane %v8177_v21, %v5426_v44  ;;  %v8201_v43 = vrot.slane %v8177_v21, %v5429_v46  ;;  %v8205_v25 = vrot.slane %v8177_v21, %v5432_v49 }
 0x409   : > { %vm4010_vm7 = vcmp.gt.f32.partialorder %v4009_v7, %v8010_v56  ;;  %vm4011_vm10 = vcmp.gt.f32.partialorder %v4009_v7, %v8015_v50  ;;  %vm4012_vm11 = vcmp.gt.f32.partialorder %v4009_v7, %v8044_v3  ;;  %vm4013_vm12 = vcmp.gt.f32.partialorder %v4009_v7, %v8049_v10 }
 0x40a   : > { %vm4014_vm13 = vcmp.gt.f32.partialorder %v4009_v7, %v8054_v51  ;;  %vm4015_vm14 = vcmp.gt.f32.partialorder %v4009_v7, %v8059_v2  ;;  %vm4016_vm15 = vcmp.gt.f32.partialorder %v4009_v7, %v8064_v31  ;;  %vm4017_vm0 = vcmp.gt.f32.partialorder %v4009_v7, %v8069_v24 }
 0x40b   : > { %v4018_v37 = vsel %vm4010_vm7, %v4009_v7, inf  ;;  %v4019_v23 = vsel %vm4011_vm10, %v4009_v7, inf  ;;  %v4020_v27 = vsel %vm4012_vm11, %v4009_v7, inf  ;;  %v4021_v53 = vsel %vm4013_vm12, %v4009_v7, inf }
 0x40c   : > { %v4022_v57 = vsel %vm4014_vm13, %v4009_v7, inf  ;;  %v4023_v26 = vsel %vm4015_vm14, %v4009_v7, inf  ;;  %v4024_v33 = vsel %vm4016_vm15, %v4009_v7, inf  ;;  %v4025_v12 = vsel %vm4017_vm0, %v4009_v7, inf }
 0x40d   : > { %v4026_v4 = vmin.f32 %v3998_v29, %v4018_v37  ;;  %v4027_v17 = vmin.f32 %v3999_v61, %v4019_v23  ;;  %v4028_v48 = vmin.f32 %v4000_v20, %v4020_v27  ;;  %v4029_v35 = vmin.f32 %v4001_v16, %v4021_v53 }
 0x40e   : > { %v4030_v39 = vmin.f32 %v4002_v8, %v4022_v57  ;;  %v4031_v19 = vmin.f32 %v4003_v32, %v4023_v26  ;;  %v4032_v36 = vmin.f32 %v4004_v5, %v4024_v33  ;;  %v4033_v15 = vmin.f32 %v4005_v54, %v4025_v12 }
 0x40f   : > { %vm4038_vm1 = vcmp.gt.f32.partialorder %v4037_v63, %v8010_v56  ;;  %vm4039_vm2 = vcmp.gt.f32.partialorder %v4037_v63, %v8015_v50  ;;  %vm4040_vm3 = vcmp.gt.f32.partialorder %v4037_v63, %v8044_v3  ;;  %vm4041_vm4 = vcmp.gt.f32.partialorder %v4037_v63, %v8049_v10 }
 0x410   : > { %vm4042_vm5 = vcmp.gt.f32.partialorder %v4037_v63, %v8054_v51  ;;  %vm4043_vm6 = vcmp.gt.f32.partialorder %v4037_v63, %v8059_v2  ;;  %vm4044_vm8 = vcmp.gt.f32.partialorder %v4037_v63, %v8064_v31  ;;  %vm4045_vm9 = vcmp.gt.f32.partialorder %v4037_v63, %v8069_v24 }
 0x411   : > { %v4046_v62 = vsel %vm4038_vm1, %v4037_v63, inf  ;;  %v4047_v9 = vsel %vm4039_vm2, %v4037_v63, inf  ;;  %v4048_v22 = vsel %vm4040_vm3, %v4037_v63, inf  ;;  %v4049_v18 = vsel %vm4041_vm4, %v4037_v63, inf }
 0x412   : > { %v4050_v29 = vsel %vm4042_vm5, %v4037_v63, inf  ;;  %v4051_v61 = vsel %vm4043_vm6, %v4037_v63, inf  ;;  %v4052_v20 = vsel %vm4044_vm8, %v4037_v63, inf  ;;  %v4053_v16 = vsel %vm4045_vm9, %v4037_v63, inf }
 0x413   : > { %v4054_v8 = vmin.f32 %v4026_v4, %v4046_v62  ;;  %v4055_v32 = vmin.f32 %v4027_v17, %v4047_v9  ;;  %v4056_v5 = vmin.f32 %v4028_v48, %v4048_v22  ;;  %v4057_v54 = vmin.f32 %v4029_v35, %v4049_v18 }
 0x414   : > { %v4058_v7 = vmin.f32 %v4030_v39, %v4050_v29  ;;  %v4059_v37 = vmin.f32 %v4031_v19, %v4051_v61  ;;  %v4060_v23 = vmin.f32 %v4032_v36, %v4052_v20  ;;  %v4061_v27 = vmin.f32 %v4033_v15, %v4053_v16 }
 0x415   : > { %vm4068_vm7 = vcmp.gt.f32.partialorder %v8185_v28, %v8010_v56  ;;  %vm4069_vm10 = vcmp.gt.f32.partialorder %v8185_v28, %v8015_v50  ;;  %vm4070_vm11 = vcmp.gt.f32.partialorder %v8185_v28, %v8044_v3  ;;  %vm4071_vm12 = vcmp.gt.f32.partialorder %v8185_v28, %v8049_v10 }
 0x416   : > { %vm4072_vm13 = vcmp.gt.f32.partialorder %v8185_v28, %v8054_v51  ;;  %vm4073_vm14 = vcmp.gt.f32.partialorder %v8185_v28, %v8059_v2  ;;  %vm4074_vm15 = vcmp.gt.f32.partialorder %v8185_v28, %v8064_v31  ;;  %vm4075_vm0 = vcmp.gt.f32.partialorder %v8185_v28, %v8069_v24 }
 0x417   : > { %v4076_v63 = vsel %vm4068_vm7, %v8185_v28, inf  ;;  %v4077_v53 = vsel %vm4069_vm10, %v8185_v28, inf  ;;  %v4078_v57 = vsel %vm4070_vm11, %v8185_v28, inf  ;;  %v4079_v26 = vsel %vm4071_vm12, %v8185_v28, inf }
 0x418   : > { %v4080_v33 = vsel %vm4072_vm13, %v8185_v28, inf  ;;  %v4081_v12 = vsel %vm4073_vm14, %v8185_v28, inf  ;;  %v4082_v4 = vsel %vm4074_vm15, %v8185_v28, inf  ;;  %v4083_v17 = vsel %vm4075_vm0, %v8185_v28, inf }
 0x419   : > { %v4084_v48 = vmin.f32 %v4054_v8, %v4076_v63  ;;  %v4085_v35 = vmin.f32 %v4055_v32, %v4077_v53  ;;  %v4086_v39 = vmin.f32 %v4056_v5, %v4078_v57  ;;  %v4087_v19 = vmin.f32 %v4057_v54, %v4079_v26 }
 0x41a   : > { %v4088_v36 = vmin.f32 %v4058_v7, %v4080_v33  ;;  %v4089_v15 = vmin.f32 %v4059_v37, %v4081_v12  ;;  %v4090_v62 = vmin.f32 %v4060_v23, %v4082_v4  ;;  %v4091_v9 = vmin.f32 %v4061_v27, %v4083_v17 }
 0x41b   : > { %vm4096_vm1 = vcmp.gt.f32.partialorder %v8189_v11, %v8010_v56  ;;  %vm4097_vm2 = vcmp.gt.f32.partialorder %v8189_v11, %v8015_v50  ;;  %vm4098_vm3 = vcmp.gt.f32.partialorder %v8189_v11, %v8044_v3  ;;  %vm4099_vm4 = vcmp.gt.f32.partialorder %v8189_v11, %v8049_v10 }
 0x41c   : > { %vm4100_vm5 = vcmp.gt.f32.partialorder %v8189_v11, %v8054_v51  ;;  %vm4101_vm6 = vcmp.gt.f32.partialorder %v8189_v11, %v8059_v2  ;;  %vm4102_vm8 = vcmp.gt.f32.partialorder %v8189_v11, %v8064_v31  ;;  %vm4103_vm9 = vcmp.gt.f32.partialorder %v8189_v11, %v8069_v24 }
 0x41d   : > { %v4104_v28 = vsel %vm4096_vm1, %v8189_v11, inf  ;;  %v4105_v22 = vsel %vm4097_vm2, %v8189_v11, inf  ;;  %v4106_v18 = vsel %vm4098_vm3, %v8189_v11, inf  ;;  %v4107_v29 = vsel %vm4099_vm4, %v8189_v11, inf }
 0x41e   : > { %v4108_v61 = vsel %vm4100_vm5, %v8189_v11, inf  ;;  %v4109_v20 = vsel %vm4101_vm6, %v8189_v11, inf  ;;  %v4110_v16 = vsel %vm4102_vm8, %v8189_v11, inf  ;;  %v4111_v8 = vsel %vm4103_vm9, %v8189_v11, inf }
 0x41f   : > { %v4112_v32 = vmin.f32 %v4084_v48, %v4104_v28  ;;  %v4113_v5 = vmin.f32 %v4085_v35, %v4105_v22  ;;  %v4114_v54 = vmin.f32 %v4086_v39, %v4106_v18  ;;  %v4115_v7 = vmin.f32 %v4087_v19, %v4107_v29 }
 0x420   : > { %v4116_v37 = vmin.f32 %v4088_v36, %v4108_v61  ;;  %v4117_v23 = vmin.f32 %v4089_v15, %v4109_v20  ;;  %v4118_v27 = vmin.f32 %v4090_v62, %v4110_v16  ;;  %v4119_v63 = vmin.f32 %v4091_v9, %v4111_v8 }
 0x421   : > { %vm4124_vm7 = vcmp.gt.f32.partialorder %v8193_v1, %v8010_v56  ;;  %vm4125_vm10 = vcmp.gt.f32.partialorder %v8193_v1, %v8015_v50  ;;  %vm4126_vm11 = vcmp.gt.f32.partialorder %v8193_v1, %v8044_v3  ;;  %vm4127_vm12 = vcmp.gt.f32.partialorder %v8193_v1, %v8049_v10 }
 0x422   : > { %vm4128_vm13 = vcmp.gt.f32.partialorder %v8193_v1, %v8054_v51  ;;  %vm4129_vm14 = vcmp.gt.f32.partialorder %v8193_v1, %v8059_v2  ;;  %vm4130_vm15 = vcmp.gt.f32.partialorder %v8193_v1, %v8064_v31  ;;  %vm4131_vm0 = vcmp.gt.f32.partialorder %v8193_v1, %v8069_v24 }
 0x423   : > { %v4132_v11 = vsel %vm4124_vm7, %v8193_v1, inf  ;;  %v4133_v53 = vsel %vm4125_vm10, %v8193_v1, inf  ;;  %v4134_v57 = vsel %vm4126_vm11, %v8193_v1, inf  ;;  %v4135_v26 = vsel %vm4127_vm12, %v8193_v1, inf }
 0x424   : > { %v4136_v33 = vsel %vm4128_vm13, %v8193_v1, inf  ;;  %v4137_v12 = vsel %vm4129_vm14, %v8193_v1, inf  ;;  %v4138_v4 = vsel %vm4130_vm15, %v8193_v1, inf  ;;  %v4139_v17 = vsel %vm4131_vm0, %v8193_v1, inf }
 0x425   : > { %v4140_v48 = vmin.f32 %v4112_v32, %v4132_v11  ;;  %v4141_v35 = vmin.f32 %v4113_v5, %v4133_v53  ;;  %v4142_v39 = vmin.f32 %v4114_v54, %v4134_v57  ;;  %v4143_v19 = vmin.f32 %v4115_v7, %v4135_v26 }
 0x426   : > { %v4144_v36 = vmin.f32 %v4116_v37, %v4136_v33  ;;  %v4145_v15 = vmin.f32 %v4117_v23, %v4137_v12  ;;  %v4146_v62 = vmin.f32 %v4118_v27, %v4138_v4  ;;  %v4147_v9 = vmin.f32 %v4119_v63, %v4139_v17 }
 0x427   : > { %vm4152_vm1 = vcmp.gt.f32.partialorder %v8197_v14, %v8010_v56  ;;  %vm4153_vm2 = vcmp.gt.f32.partialorder %v8197_v14, %v8015_v50  ;;  %vm4154_vm3 = vcmp.gt.f32.partialorder %v8197_v14, %v8044_v3  ;;  %vm4155_vm4 = vcmp.gt.f32.partialorder %v8197_v14, %v8049_v10 }
 0x428   : > { %vm4156_vm5 = vcmp.gt.f32.partialorder %v8197_v14, %v8054_v51  ;;  %vm4157_vm6 = vcmp.gt.f32.partialorder %v8197_v14, %v8059_v2  ;;  %vm4158_vm8 = vcmp.gt.f32.partialorder %v8197_v14, %v8064_v31  ;;  %vm4159_vm9 = vcmp.gt.f32.partialorder %v8197_v14, %v8069_v24 }
 0x429   : > { %v4160_v1 = vsel %vm4152_vm1, %v8197_v14, inf  ;;  %v4161_v28 = vsel %vm4153_vm2, %v8197_v14, inf  ;;  %v4162_v22 = vsel %vm4154_vm3, %v8197_v14, inf  ;;  %v4163_v18 = vsel %vm4155_vm4, %v8197_v14, inf }
 0x42a   : > { %v4164_v29 = vsel %vm4156_vm5, %v8197_v14, inf  ;;  %v4165_v61 = vsel %vm4157_vm6, %v8197_v14, inf  ;;  %v4166_v20 = vsel %vm4158_vm8, %v8197_v14, inf  ;;  %v4167_v16 = vsel %vm4159_vm9, %v8197_v14, inf }
 0x42b   : > { %v4168_v8 = vmin.f32 %v4140_v48, %v4160_v1  ;;  %v4169_v32 = vmin.f32 %v4141_v35, %v4161_v28  ;;  %v4170_v5 = vmin.f32 %v4142_v39, %v4162_v22  ;;  %v4171_v54 = vmin.f32 %v4143_v19, %v4163_v18 }
 0x42c   : > { %v4172_v7 = vmin.f32 %v4144_v36, %v4164_v29  ;;  %v4173_v37 = vmin.f32 %v4145_v15, %v4165_v61  ;;  %v4174_v23 = vmin.f32 %v4146_v62, %v4166_v20  ;;  %v4175_v27 = vmin.f32 %v4147_v9, %v4167_v16  ;;  %v8367_v61 = vld [vmem:[#allocation3 + $0x78] sm:$0xff] }
 0x42d   : > { %vm4180_vm7 = vcmp.gt.f32.partialorder %v8201_v43, %v8010_v56  ;;  %vm4181_vm10 = vcmp.gt.f32.partialorder %v8201_v43, %v8015_v50  ;;  %vm4182_vm11 = vcmp.gt.f32.partialorder %v8201_v43, %v8044_v3  ;;  %vm4183_vm12 = vcmp.gt.f32.partialorder %v8201_v43, %v8049_v10 }
 0x42e   : > { %vm4184_vm13 = vcmp.gt.f32.partialorder %v8201_v43, %v8054_v51  ;;  %vm4185_vm14 = vcmp.gt.f32.partialorder %v8201_v43, %v8059_v2  ;;  %vm4186_vm15 = vcmp.gt.f32.partialorder %v8201_v43, %v8064_v31  ;;  %vm4187_vm0 = vcmp.gt.f32.partialorder %v8201_v43, %v8069_v24 }
 0x42f   : > { %v4188_v14 = vsel %vm4180_vm7, %v8201_v43, inf  ;;  %v4189_v63 = vsel %vm4181_vm10, %v8201_v43, inf  ;;  %v4190_v11 = vsel %vm4182_vm11, %v8201_v43, inf  ;;  %v4191_v53 = vsel %vm4183_vm12, %v8201_v43, inf }
 0x430   : > { %v4192_v57 = vsel %vm4184_vm13, %v8201_v43, inf  ;;  %v4193_v26 = vsel %vm4185_vm14, %v8201_v43, inf  ;;  %v4194_v33 = vsel %vm4186_vm15, %v8201_v43, inf  ;;  %v4195_v12 = vsel %vm4187_vm0, %v8201_v43, inf }
 0x431   : > { %v4196_v4 = vmin.f32 %v4168_v8, %v4188_v14  ;;  %v4197_v17 = vmin.f32 %v4169_v32, %v4189_v63  ;;  %v4198_v48 = vmin.f32 %v4170_v5, %v4190_v11  ;;  %v4199_v35 = vmin.f32 %v4171_v54, %v4191_v53 }
 0x432   : > { %v4200_v39 = vmin.f32 %v4172_v7, %v4192_v57  ;;  %v4201_v19 = vmin.f32 %v4173_v37, %v4193_v26  ;;  %v4202_v36 = vmin.f32 %v4174_v23, %v4194_v33  ;;  %v4203_v15 = vmin.f32 %v4175_v27, %v4195_v12 }
 0x433   : > { %vm4208_vm1 = vcmp.gt.f32.partialorder %v8205_v25, %v8010_v56  ;;  %vm4209_vm2 = vcmp.gt.f32.partialorder %v8205_v25, %v8015_v50  ;;  %vm4210_vm3 = vcmp.gt.f32.partialorder %v8205_v25, %v8044_v3  ;;  %vm4211_vm4 = vcmp.gt.f32.partialorder %v8205_v25, %v8049_v10 }
 0x434   : > { %vm4212_vm5 = vcmp.gt.f32.partialorder %v8205_v25, %v8054_v51  ;;  %vm4213_vm6 = vcmp.gt.f32.partialorder %v8205_v25, %v8059_v2  ;;  %vm4214_vm8 = vcmp.gt.f32.partialorder %v8205_v25, %v8064_v31  ;;  %vm4215_vm9 = vcmp.gt.f32.partialorder %v8205_v25, %v8069_v24 }
 0x435   : > { %v4216_v43 = vsel %vm4208_vm1, %v8205_v25, inf  ;;  %v4217_v62 = vsel %vm4209_vm2, %v8205_v25, inf  ;;  %v4218_v9 = vsel %vm4210_vm3, %v8205_v25, inf  ;;  %v4219_v1 = vsel %vm4211_vm4, %v8205_v25, inf }
 0x436   : > { %v4220_v28 = vsel %vm4212_vm5, %v8205_v25, inf  ;;  %v4221_v22 = vsel %vm4213_vm6, %v8205_v25, inf  ;;  %v4222_v18 = vsel %vm4214_vm8, %v8205_v25, inf  ;;  %v4223_v29 = vsel %vm4215_vm9, %v8205_v25, inf }
 0x437   : > { %v4224_v20 = vmin.f32 %v4196_v4, %v4216_v43  ;;  %v4225_v16 = vmin.f32 %v4197_v17, %v4217_v62  ;;  %v4226_v8 = vmin.f32 %v4198_v48, %v4218_v9  ;;  %v4227_v32 = vmin.f32 %v4199_v35, %v4219_v1 }
 0x438   : > { %v4228_v5 = vmin.f32 %v4200_v39, %v4220_v28  ;;  %v4229_v54 = vmin.f32 %v4201_v19, %v4221_v22  ;;  %v4230_v7 = vmin.f32 %v4202_v36, %v4222_v18  ;;  %v4231_v37 = vmin.f32 %v4203_v15, %v4223_v29 }
 0x439   : > { %v4235_v23 = vrot.slane %v8177_v21, %v5450_v60  ;;  %v4263_v27 = vrot.slane %v8177_v21, %v5465_v45  ;;  %v8375_v14 = vrot.slane %v8367_v61, %v5408_v55  ;;  %v8379_v25 = vrot.slane %v8367_v61, %v5411_v58 }
 0x43a   : > { %v8383_v63 = vrot.slane %v8367_v61, %v5414_v59  ;;  %v8387_v11 = vrot.slane %v8367_v61, %v5426_v44  ;;  %v8391_v53 = vrot.slane %v8367_v61, %v5429_v46  ;;  %v8395_v55 = vrot.slane %v8367_v61, %v5432_v49 }
 0x43b   : > { %vm4236_vm7 = vcmp.gt.f32.partialorder %v4235_v23, %v8010_v56  ;;  %vm4237_vm10 = vcmp.gt.f32.partialorder %v4235_v23, %v8015_v50  ;;  %vm4238_vm11 = vcmp.gt.f32.partialorder %v4235_v23, %v8044_v3  ;;  %vm4239_vm12 = vcmp.gt.f32.partialorder %v4235_v23, %v8049_v10 }
 0x43c   : > { %vm4240_vm13 = vcmp.gt.f32.partialorder %v4235_v23, %v8054_v51  ;;  %vm4241_vm14 = vcmp.gt.f32.partialorder %v4235_v23, %v8059_v2  ;;  %vm4242_vm15 = vcmp.gt.f32.partialorder %v4235_v23, %v8064_v31  ;;  %vm4243_vm0 = vcmp.gt.f32.partialorder %v4235_v23, %v8069_v24 }
 0x43d   : > { %v4244_v58 = vsel %vm4236_vm7, %v4235_v23, inf  ;;  %v4245_v59 = vsel %vm4237_vm10, %v4235_v23, inf  ;;  %v4246_v44 = vsel %vm4238_vm11, %v4235_v23, inf  ;;  %v4247_v46 = vsel %vm4239_vm12, %v4235_v23, inf }
 0x43e   : > { %v4248_v49 = vsel %vm4240_vm13, %v4235_v23, inf  ;;  %v4249_v21 = vsel %vm4241_vm14, %v4235_v23, inf  ;;  %v4250_v57 = vsel %vm4242_vm15, %v4235_v23, inf  ;;  %v4251_v26 = vsel %vm4243_vm0, %v4235_v23, inf }
 0x43f   : > { %v4252_v33 = vmin.f32 %v4224_v20, %v4244_v58  ;;  %v4253_v12 = vmin.f32 %v4225_v16, %v4245_v59  ;;  %v4254_v4 = vmin.f32 %v4226_v8, %v4246_v44  ;;  %v4255_v17 = vmin.f32 %v4227_v32, %v4247_v46 }
 0x440   : > { %v4256_v48 = vmin.f32 %v4228_v5, %v4248_v49  ;;  %v4257_v35 = vmin.f32 %v4229_v54, %v4249_v21  ;;  %v4258_v39 = vmin.f32 %v4230_v7, %v4250_v57  ;;  %v4259_v19 = vmin.f32 %v4231_v37, %v4251_v26 }
 0x441   : > { %vm4264_vm1 = vcmp.gt.f32.partialorder %v4263_v27, %v8010_v56  ;;  %vm4265_vm2 = vcmp.gt.f32.partialorder %v4263_v27, %v8015_v50  ;;  %vm4266_vm3 = vcmp.gt.f32.partialorder %v4263_v27, %v8044_v3  ;;  %vm4267_vm4 = vcmp.gt.f32.partialorder %v4263_v27, %v8049_v10 }
 0x442   : > { %vm4268_vm5 = vcmp.gt.f32.partialorder %v4263_v27, %v8054_v51  ;;  %vm4269_vm6 = vcmp.gt.f32.partialorder %v4263_v27, %v8059_v2  ;;  %vm4270_vm8 = vcmp.gt.f32.partialorder %v4263_v27, %v8064_v31  ;;  %vm4271_vm9 = vcmp.gt.f32.partialorder %v4263_v27, %v8069_v24 }
 0x443   : > { %v4272_v36 = vsel %vm4264_vm1, %v4263_v27, inf  ;;  %v4273_v15 = vsel %vm4265_vm2, %v4263_v27, inf  ;;  %v4274_v43 = vsel %vm4266_vm3, %v4263_v27, inf  ;;  %v4275_v62 = vsel %vm4267_vm4, %v4263_v27, inf }
 0x444   : > { %v4276_v9 = vsel %vm4268_vm5, %v4263_v27, inf  ;;  %v4277_v1 = vsel %vm4269_vm6, %v4263_v27, inf  ;;  %v4278_v28 = vsel %vm4270_vm8, %v4263_v27, inf  ;;  %v4279_v22 = vsel %vm4271_vm9, %v4263_v27, inf }
 0x445   : > { %v4280_v18 = vmin.f32 %v4252_v33, %v4272_v36  ;;  %v4281_v29 = vmin.f32 %v4253_v12, %v4273_v15  ;;  %v4282_v20 = vmin.f32 %v4254_v4, %v4274_v43  ;;  %v4283_v16 = vmin.f32 %v4255_v17, %v4275_v62 }
 0x446   : > { %v4284_v8 = vmin.f32 %v4256_v48, %v4276_v9  ;;  %v4285_v32 = vmin.f32 %v4257_v35, %v4277_v1  ;;  %v4286_v5 = vmin.f32 %v4258_v39, %v4278_v28  ;;  %v4287_v54 = vmin.f32 %v4259_v19, %v4279_v22 }
 0x447   : > { %vm4294_vm7 = vcmp.gt.f32.partialorder %v8375_v14, %v8010_v56  ;;  %vm4295_vm10 = vcmp.gt.f32.partialorder %v8375_v14, %v8015_v50  ;;  %vm4296_vm11 = vcmp.gt.f32.partialorder %v8375_v14, %v8044_v3  ;;  %vm4297_vm12 = vcmp.gt.f32.partialorder %v8375_v14, %v8049_v10 }
 0x448   : > { %vm4298_vm13 = vcmp.gt.f32.partialorder %v8375_v14, %v8054_v51  ;;  %vm4299_vm14 = vcmp.gt.f32.partialorder %v8375_v14, %v8059_v2  ;;  %vm4300_vm15 = vcmp.gt.f32.partialorder %v8375_v14, %v8064_v31  ;;  %vm4301_vm0 = vcmp.gt.f32.partialorder %v8375_v14, %v8069_v24 }
 0x449   : > { %v4302_v7 = vsel %vm4294_vm7, %v8375_v14, inf  ;;  %v4303_v37 = vsel %vm4295_vm10, %v8375_v14, inf  ;;  %v4304_v23 = vsel %vm4296_vm11, %v8375_v14, inf  ;;  %v4305_v27 = vsel %vm4297_vm12, %v8375_v14, inf }
 0x44a   : > { %v4306_v58 = vsel %vm4298_vm13, %v8375_v14, inf  ;;  %v4307_v59 = vsel %vm4299_vm14, %v8375_v14, inf  ;;  %v4308_v44 = vsel %vm4300_vm15, %v8375_v14, inf  ;;  %v4309_v46 = vsel %vm4301_vm0, %v8375_v14, inf }
 0x44b   : > { %v4310_v49 = vmin.f32 %v4280_v18, %v4302_v7  ;;  %v4311_v21 = vmin.f32 %v4281_v29, %v4303_v37  ;;  %v4312_v57 = vmin.f32 %v4282_v20, %v4304_v23  ;;  %v4313_v26 = vmin.f32 %v4283_v16, %v4305_v27 }
 0x44c   : > { %v4314_v33 = vmin.f32 %v4284_v8, %v4306_v58  ;;  %v4315_v12 = vmin.f32 %v4285_v32, %v4307_v59  ;;  %v4316_v4 = vmin.f32 %v4286_v5, %v4308_v44  ;;  %v4317_v17 = vmin.f32 %v4287_v54, %v4309_v46 }
 0x44d   : > { %vm4322_vm1 = vcmp.gt.f32.partialorder %v8379_v25, %v8010_v56  ;;  %vm4323_vm2 = vcmp.gt.f32.partialorder %v8379_v25, %v8015_v50  ;;  %vm4324_vm3 = vcmp.gt.f32.partialorder %v8379_v25, %v8044_v3  ;;  %vm4325_vm4 = vcmp.gt.f32.partialorder %v8379_v25, %v8049_v10 }
 0x44e   : > { %vm4326_vm5 = vcmp.gt.f32.partialorder %v8379_v25, %v8054_v51  ;;  %vm4327_vm6 = vcmp.gt.f32.partialorder %v8379_v25, %v8059_v2  ;;  %vm4328_vm8 = vcmp.gt.f32.partialorder %v8379_v25, %v8064_v31  ;;  %vm4329_vm9 = vcmp.gt.f32.partialorder %v8379_v25, %v8069_v24 }
 0x44f   : > { %v4330_v14 = vsel %vm4322_vm1, %v8379_v25, inf  ;;  %v4331_v48 = vsel %vm4323_vm2, %v8379_v25, inf  ;;  %v4332_v35 = vsel %vm4324_vm3, %v8379_v25, inf  ;;  %v4333_v39 = vsel %vm4325_vm4, %v8379_v25, inf }
 0x450   : > { %v4334_v19 = vsel %vm4326_vm5, %v8379_v25, inf  ;;  %v4335_v36 = vsel %vm4327_vm6, %v8379_v25, inf  ;;  %v4336_v15 = vsel %vm4328_vm8, %v8379_v25, inf  ;;  %v4337_v43 = vsel %vm4329_vm9, %v8379_v25, inf }
 0x451   : > { %v4338_v62 = vmin.f32 %v4310_v49, %v4330_v14  ;;  %v4339_v9 = vmin.f32 %v4311_v21, %v4331_v48  ;;  %v4340_v1 = vmin.f32 %v4312_v57, %v4332_v35  ;;  %v4341_v28 = vmin.f32 %v4313_v26, %v4333_v39 }
 0x452   : > { %v4342_v22 = vmin.f32 %v4314_v33, %v4334_v19  ;;  %v4343_v18 = vmin.f32 %v4315_v12, %v4335_v36  ;;  %v4344_v29 = vmin.f32 %v4316_v4, %v4336_v15  ;;  %v4345_v20 = vmin.f32 %v4317_v17, %v4337_v43 }
 0x453   : > { %vm4350_vm7 = vcmp.gt.f32.partialorder %v8383_v63, %v8010_v56  ;;  %vm4351_vm10 = vcmp.gt.f32.partialorder %v8383_v63, %v8015_v50  ;;  %vm4352_vm11 = vcmp.gt.f32.partialorder %v8383_v63, %v8044_v3  ;;  %vm4353_vm12 = vcmp.gt.f32.partialorder %v8383_v63, %v8049_v10 }
 0x454   : > { %vm4354_vm13 = vcmp.gt.f32.partialorder %v8383_v63, %v8054_v51  ;;  %vm4355_vm14 = vcmp.gt.f32.partialorder %v8383_v63, %v8059_v2  ;;  %vm4356_vm15 = vcmp.gt.f32.partialorder %v8383_v63, %v8064_v31  ;;  %vm4357_vm0 = vcmp.gt.f32.partialorder %v8383_v63, %v8069_v24 }
 0x455   : > { %v4358_v25 = vsel %vm4350_vm7, %v8383_v63, inf  ;;  %v4359_v16 = vsel %vm4351_vm10, %v8383_v63, inf  ;;  %v4360_v8 = vsel %vm4352_vm11, %v8383_v63, inf  ;;  %v4361_v32 = vsel %vm4353_vm12, %v8383_v63, inf }
 0x456   : > { %v4362_v5 = vsel %vm4354_vm13, %v8383_v63, inf  ;;  %v4363_v54 = vsel %vm4355_vm14, %v8383_v63, inf  ;;  %v4364_v7 = vsel %vm4356_vm15, %v8383_v63, inf  ;;  %v4365_v37 = vsel %vm4357_vm0, %v8383_v63, inf }
 0x457   : > { %v4366_v23 = vmin.f32 %v4338_v62, %v4358_v25  ;;  %v4367_v27 = vmin.f32 %v4339_v9, %v4359_v16  ;;  %v4368_v58 = vmin.f32 %v4340_v1, %v4360_v8  ;;  %v4369_v59 = vmin.f32 %v4341_v28, %v4361_v32 }
 0x458   : > { %v4370_v44 = vmin.f32 %v4342_v22, %v4362_v5  ;;  %v4371_v46 = vmin.f32 %v4343_v18, %v4363_v54  ;;  %v4372_v49 = vmin.f32 %v4344_v29, %v4364_v7  ;;  %v4373_v21 = vmin.f32 %v4345_v20, %v4365_v37  ;;  %v8550_v7 = vld [vmem:[%s5399_s20] sm:$0xff] }
 0x459   : > { %vm4378_vm1 = vcmp.gt.f32.partialorder %v8387_v11, %v8010_v56  ;;  %vm4379_vm2 = vcmp.gt.f32.partialorder %v8387_v11, %v8015_v50  ;;  %vm4380_vm3 = vcmp.gt.f32.partialorder %v8387_v11, %v8044_v3  ;;  %vm4381_vm4 = vcmp.gt.f32.partialorder %v8387_v11, %v8049_v10 }
 0x45a   : > { %vm4382_vm5 = vcmp.gt.f32.partialorder %v8387_v11, %v8054_v51  ;;  %vm4383_vm6 = vcmp.gt.f32.partialorder %v8387_v11, %v8059_v2  ;;  %vm4384_vm8 = vcmp.gt.f32.partialorder %v8387_v11, %v8064_v31  ;;  %vm4385_vm9 = vcmp.gt.f32.partialorder %v8387_v11, %v8069_v24 }
 0x45b   : > { %v4386_v63 = vsel %vm4378_vm1, %v8387_v11, inf  ;;  %v4387_v57 = vsel %vm4379_vm2, %v8387_v11, inf  ;;  %v4388_v26 = vsel %vm4380_vm3, %v8387_v11, inf  ;;  %v4389_v33 = vsel %vm4381_vm4, %v8387_v11, inf }
 0x45c   : > { %v4390_v12 = vsel %vm4382_vm5, %v8387_v11, inf  ;;  %v4391_v4 = vsel %vm4383_vm6, %v8387_v11, inf  ;;  %v4392_v17 = vsel %vm4384_vm8, %v8387_v11, inf  ;;  %v4393_v14 = vsel %vm4385_vm9, %v8387_v11, inf }
 0x45d   : > { %v4394_v48 = vmin.f32 %v4366_v23, %v4386_v63  ;;  %v4395_v35 = vmin.f32 %v4367_v27, %v4387_v57  ;;  %v4396_v39 = vmin.f32 %v4368_v58, %v4388_v26  ;;  %v4397_v19 = vmin.f32 %v4369_v59, %v4389_v33 }
 0x45e   : > { %v4398_v36 = vmin.f32 %v4370_v44, %v4390_v12  ;;  %v4399_v15 = vmin.f32 %v4371_v46, %v4391_v4  ;;  %v4400_v43 = vmin.f32 %v4372_v49, %v4392_v17  ;;  %v4401_v62 = vmin.f32 %v4373_v21, %v4393_v14  ;;  %v4833_v12 = vld [vmem:[%s5399_s20 + $0x10] sm:$0xff]  ;;  %v4834_v17 = vld [vmem:[%s5399_s20 + $0x18] sm:$0xff] }
 0x45f   : > { %vm4406_vm7 = vcmp.gt.f32.partialorder %v8391_v53, %v8010_v56  ;;  %vm4407_vm10 = vcmp.gt.f32.partialorder %v8391_v53, %v8015_v50  ;;  %vm4408_vm11 = vcmp.gt.f32.partialorder %v8391_v53, %v8044_v3  ;;  %vm4409_vm12 = vcmp.gt.f32.partialorder %v8391_v53, %v8049_v10 }
 0x460   : > { %vm4410_vm13 = vcmp.gt.f32.partialorder %v8391_v53, %v8054_v51  ;;  %vm4411_vm14 = vcmp.gt.f32.partialorder %v8391_v53, %v8059_v2  ;;  %vm4412_vm15 = vcmp.gt.f32.partialorder %v8391_v53, %v8064_v31  ;;  %vm4413_vm0 = vcmp.gt.f32.partialorder %v8391_v53, %v8069_v24 }
 0x461   : > { %v4414_v56 = vsel %vm4406_vm7, %v8391_v53, inf  ;;  %v4415_v50 = vsel %vm4407_vm10, %v8391_v53, inf  ;;  %v4416_v11 = vsel %vm4408_vm11, %v8391_v53, inf  ;;  %v4417_v9 = vsel %vm4409_vm12, %v8391_v53, inf }
 0x462   : > { %v4418_v1 = vsel %vm4410_vm13, %v8391_v53, inf  ;;  %v4419_v28 = vsel %vm4411_vm14, %v8391_v53, inf  ;;  %v4420_v22 = vsel %vm4412_vm15, %v8391_v53, inf  ;;  %v4421_v18 = vsel %vm4413_vm0, %v8391_v53, inf  ;;  %v8555_v53 = vld [vmem:[%s5399_s20 + $0x8] sm:$0xff] }
 0x463   : > { %v8533_v29 = vmin.f32 %v4394_v48, %v4414_v56  ;;  %v8535_v20 = vmin.f32 %v4395_v35, %v4415_v50  ;;  %v8537_v25 = vmin.f32 %v4396_v39, %v4416_v11  ;;  %v8539_v16 = vmin.f32 %v4397_v19, %v4417_v9  ;;  %v4835_v48 = vld [vmem:[%s5399_s20 + $0x20] sm:$0xff] }
 0x464   : > { %v8541_v8 = vmin.f32 %v4398_v36, %v4418_v1  ;;  %v8543_v32 = vmin.f32 %v4399_v15, %v4419_v28  ;;  %v8545_v5 = vmin.f32 %v4400_v43, %v4420_v22  ;;  %v8547_v54 = vmin.f32 %v4401_v62, %v4421_v18 }
 0x465   : > { %vm4434_vm1 = vcmp.gt.f32.partialorder %v8395_v55, %v8550_v7  ;;  %vm4435_vm2 = vcmp.gt.f32.partialorder %v8395_v55, %v8555_v53  ;;  %vm4436_vm3 = vcmp.gt.f32.partialorder %v8395_v55, %v8044_v3  ;;  %vm4437_vm4 = vcmp.gt.f32.partialorder %v8395_v55, %v8049_v10 }
 0x466   : > { %vm4438_vm5 = vcmp.gt.f32.partialorder %v8395_v55, %v8054_v51  ;;  %vm4439_vm6 = vcmp.gt.f32.partialorder %v8395_v55, %v8059_v2  ;;  %vm4440_vm8 = vcmp.gt.f32.partialorder %v8395_v55, %v8064_v31  ;;  %vm4441_vm9 = vcmp.gt.f32.partialorder %v8395_v55, %v8069_v24 }
 0x467   : > { %v4442_v37 = vsel %vm4434_vm1, %v8395_v55, inf  ;;  %v4443_v23 = vsel %vm4435_vm2, %v8395_v55, inf  ;;  %v4444_v3 = vsel %vm4436_vm3, %v8395_v55, inf  ;;  %v4445_v10 = vsel %vm4437_vm4, %v8395_v55, inf }
 0x468   : > { %v4446_v27 = vsel %vm4438_vm5, %v8395_v55, inf  ;;  %v4447_v51 = vsel %vm4439_vm6, %v8395_v55, inf  ;;  %v4448_v2 = vsel %vm4440_vm8, %v8395_v55, inf  ;;  %v4449_v31 = vsel %vm4441_vm9, %v8395_v55, inf }
 0x469   : > { %v4450_v24 = vmin.f32 %v8533_v29, %v4442_v37  ;;  %v4451_v58 = vmin.f32 %v8535_v20, %v4443_v23  ;;  %v4452_v59 = vmin.f32 %v8537_v25, %v4444_v3  ;;  %v4453_v44 = vmin.f32 %v8539_v16, %v4445_v10 }
 0x46a   : > { %v4454_v46 = vmin.f32 %v8541_v8, %v4446_v27  ;;  %v4455_v49 = vmin.f32 %v8543_v32, %v4447_v51  ;;  %v4456_v21 = vmin.f32 %v8545_v5, %v4448_v2  ;;  %v4457_v63 = vmin.f32 %v8547_v54, %v4449_v31 }
 0x46b   : > { %v4461_v55 = vrot.slane %v8367_v61, %v5450_v60  ;;  %v4489_v57 = vrot.slane %v8367_v61, %v5465_v45  ;;  %v8592_v26 = vadd.f32 1.0, %v8550_v7  ;;  %v8595_v33 = vadd.f32 1.0, %v8555_v53  ;;  %v4836_v60 = vld [vmem:[%s5399_s20 + $0x28] sm:$0xff]  ;;  %v4837_v45 = vld [vmem:[%s5399_s20 + $0x30] sm:$0xff]  ;;  %v4838_v61 = vld [vmem:[%s5399_s20 + $0x38] sm:$0xff] }
 0x46c   : > { %v8598_v4 = vadd.f32 1.0, %v4833_v12  ;;  %v8601_v14 = vadd.f32 1.0, %v4834_v17  ;;  %v8604_v35 = vadd.f32 1.0, %v4835_v48  ;;  %v8607_v39 = vadd.f32 1.0, %v4836_v60 }
 0x46d   : > { %vm4462_vm7 = vcmp.gt.f32.partialorder %v4461_v55, %v8550_v7  ;;  %vm4463_vm10 = vcmp.gt.f32.partialorder %v4461_v55, %v8555_v53  ;;  %vm4464_vm11 = vcmp.gt.f32.partialorder %v4461_v55, %v4833_v12  ;;  %vm4465_vm12 = vcmp.gt.f32.partialorder %v4461_v55, %v4834_v17 }
 0x46e   : > { %vm4466_vm13 = vcmp.gt.f32.partialorder %v4461_v55, %v4835_v48  ;;  %vm4467_vm14 = vcmp.gt.f32.partialorder %v4461_v55, %v4836_v60  ;;  %vm4468_vm15 = vcmp.gt.f32.partialorder %v4461_v55, %v4837_v45  ;;  %vm4469_vm0 = vcmp.gt.f32.partialorder %v4461_v55, %v4838_v61 }
 0x46f   : > { %v4470_v19 = vsel %vm4462_vm7, %v4461_v55, inf  ;;  %v4471_v36 = vsel %vm4463_vm10, %v4461_v55, inf  ;;  %v4472_v15 = vsel %vm4464_vm11, %v4461_v55, inf  ;;  %v4473_v43 = vsel %vm4465_vm12, %v4461_v55, inf }
 0x470   : > { %v4474_v62 = vsel %vm4466_vm13, %v4461_v55, inf  ;;  %v4475_v56 = vsel %vm4467_vm14, %v4461_v55, inf  ;;  %v4476_v50 = vsel %vm4468_vm15, %v4461_v55, inf  ;;  %v4477_v11 = vsel %vm4469_vm0, %v4461_v55, inf }
 0x471   : > { %v4478_v9 = vmin.f32 %v4450_v24, %v4470_v19  ;;  %v4479_v1 = vmin.f32 %v4451_v58, %v4471_v36  ;;  %v4480_v28 = vmin.f32 %v4452_v59, %v4472_v15  ;;  %v4481_v22 = vmin.f32 %v4453_v44, %v4473_v43 }
 0x472   : > { %v4482_v18 = vmin.f32 %v4454_v46, %v4474_v62  ;;  %v4483_v29 = vmin.f32 %v4455_v49, %v4475_v56  ;;  %v4484_v20 = vmin.f32 %v4456_v21, %v4476_v50  ;;  %v4485_v25 = vmin.f32 %v4457_v63, %v4477_v11 }
 0x473   : > { %vm4490_vm1 = vcmp.gt.f32.partialorder %v4489_v57, %v8550_v7  ;;  %vm4491_vm2 = vcmp.gt.f32.partialorder %v4489_v57, %v8555_v53  ;;  %vm4492_vm3 = vcmp.gt.f32.partialorder %v4489_v57, %v4833_v12  ;;  %vm4493_vm4 = vcmp.gt.f32.partialorder %v4489_v57, %v4834_v17 }
 0x474   : > { %vm4494_vm5 = vcmp.gt.f32.partialorder %v4489_v57, %v4835_v48  ;;  %vm4495_vm6 = vcmp.gt.f32.partialorder %v4489_v57, %v4836_v60  ;;  %vm4496_vm8 = vcmp.gt.f32.partialorder %v4489_v57, %v4837_v45  ;;  %vm4497_vm9 = vcmp.gt.f32.partialorder %v4489_v57, %v4838_v61 }
 0x475   : > { %v4498_v16 = vsel %vm4490_vm1, %v4489_v57, inf  ;;  %v4499_v8 = vsel %vm4491_vm2, %v4489_v57, inf  ;;  %v4500_v32 = vsel %vm4492_vm3, %v4489_v57, inf  ;;  %v4501_v5 = vsel %vm4493_vm4, %v4489_v57, inf }
 0x476   : > { %v4502_v54 = vsel %vm4494_vm5, %v4489_v57, inf  ;;  %v4503_v37 = vsel %vm4495_vm6, %v4489_v57, inf  ;;  %v4504_v23 = vsel %vm4496_vm8, %v4489_v57, inf  ;;  %v4505_v3 = vsel %vm4497_vm9, %v4489_v57, inf }
 0x477   : > { %v4506_v10 = vmin.f32 %v4478_v9, %v4498_v16  ;;  %v4507_v27 = vmin.f32 %v4479_v1, %v4499_v8  ;;  %v4508_v51 = vmin.f32 %v4480_v28, %v4500_v32  ;;  %v4509_v7 = vmin.f32 %v4481_v22, %v4501_v5 }
 0x478   : > { %v4510_v2 = vmin.f32 %v4482_v18, %v4502_v54  ;;  %v4511_v53 = vmin.f32 %v4483_v29, %v4503_v37  ;;  %v4512_v31 = vmin.f32 %v4484_v20, %v4504_v23  ;;  %v4513_v24 = vmin.f32 %v4485_v25, %v4505_v3 }
 0x479   : > { %vm4514_vm7 = vcmp.lt.f32.partialorder %v4506_v10, inf  ;;  %vm4515_vm10 = vcmp.lt.f32.partialorder %v4507_v27, inf  ;;  %vm4516_vm11 = vcmp.lt.f32.partialorder %v4508_v51, inf  ;;  %vm4517_vm12 = vcmp.lt.f32.partialorder %v4509_v7, inf }
 0x47a   : > { %vm4518_vm13 = vcmp.lt.f32.partialorder %v4510_v2, inf  ;;  %vm4519_vm14 = vcmp.lt.f32.partialorder %v4511_v53, inf  ;;  %vm4520_vm15 = vcmp.lt.f32.partialorder %v4512_v31, inf  ;;  %vm4521_vm0 = vcmp.lt.f32.partialorder %v4513_v24, inf }
 0x47b   : > { %v4522_v58 = vsel %vm4514_vm7, %v4506_v10, %v5349_v6  ;;  %v4523_v59 = vsel %vm4515_vm10, %v4507_v27, %v5349_v6  ;;  %v4524_v44 = vsel %vm4516_vm11, %v4508_v51, %v5349_v6  ;;  %v4525_v46 = vsel %vm4517_vm12, %v4509_v7, %v5349_v6 }
 0x47c   : > { %v4526_v49 = vsel %vm4518_vm13, %v4510_v2, %v5349_v6  ;;  %v4527_v21 = vsel %vm4519_vm14, %v4511_v53, %v5349_v6  ;;  %v4528_v63 = vsel %vm4520_vm15, %v4512_v31, %v5349_v6  ;;  %v4529_v55 = vsel %vm4521_vm0, %v4513_v24, %v5349_v6 }
 0x47d   : > { %v4536_v57 = vadd.f32 1.0, %v4837_v45  ;;  %v4537_v12 = vadd.f32 1.0, %v4838_v61  ;;  %v4538_v17 = vsub.f32 %v8592_v26, %v4522_v58  ;;  %v4539_v48 = vsub.f32 %v8595_v33, %v4523_v59 }
 0x47e   : > { %v4540_v60 = vsub.f32 %v8598_v4, %v4524_v44  ;;  %v4541_v19 = vsub.f32 %v8601_v14, %v4525_v46  ;;  %v4542_v36 = vsub.f32 %v8604_v35, %v4526_v49  ;;  %v4543_v15 = vsub.f32 %v8607_v39, %v4527_v21 }
 0x47f   : > { %v4544_v43 = vsub.f32 %v4536_v57, %v4528_v63  ;;  %v4545_v62 = vsub.f32 %v4537_v12, %v4529_v55  ;;  %v4546_v56 = vmax.f32 %v4538_v17, 0.0  ;;  %v4547_v50 = vmax.f32 %v4539_v48, 0.0  ;;  %887 = sbr.rel (!%p885_p0) target bundleno = 343 (0x157), region = 67 }
 0x480   : > { %v4548_v11 = vmax.f32 %v4540_v60, 0.0  ;;  %v4549_v9 = vmax.f32 %v4541_v19, 0.0  ;;  %v4550_v45 = vmax.f32 %v4542_v36, 0.0  ;;  %v4551_v61 = vmax.f32 %v4543_v15, 0.0 }
 0x481   : > { %v4552_v1 = vmax.f32 %v4544_v43, 0.0  ;;  %v4553_v26 = vmax.f32 %v4545_v62, 0.0  ;;  %v4554_v33 = vadd.f32 %v4905_v13, %v4546_v56   ;;  %v4555_v4 = vadd.f32 %v4901_v52, %v4547_v50  }
 0x482   : > { %v4556_v14 = vadd.f32 %v4897_v47, %v4548_v11   ;;  %v4557_v35 = vadd.f32 %v4893_v30, %v4549_v9   ;;  %v4558_v39 = vadd.f32 %v4889_v42, %v4550_v45   ;;  %v4559_v28 = vadd.f32 %v4885_v0, %v4551_v61  }
 0x483   : > { %v4560_v22 = vadd.f32 %v4881_v34, %v4552_v1   ;;  %v4561_v18 = vadd.f32 %v4877_v38, %v4553_v26   ;;  %v8680_v52 = vmov %v4555_v4  ;;  %v8681_v13 = vmov %v4554_v33 }
 0x484   : > { %v8676_v0 = vmov %v4559_v28  ;;  %v8677_v42 = vmov %v4558_v39  ;;  %v8678_v30 = vmov %v4557_v35  ;;  %v8679_v47 = vmov %v4556_v14 }
 0x485   : > { %v8674_v38 = vmov %v4561_v18  ;;  %v8675_v34 = vmov %v4560_v22  ;;  %v4562_v13 = vadd.f32 (%p885_p0), %v4555_v4, %v4554_v33  ;;  %vm4578_vm1 = vcmp.eq.s32.totalorder (%p885_p0), %v5075_v40, 0 }
 0x486   :  { %vm4581_vm2 = vcmp.eq.s32.totalorder %v5077_v41, 1  ;;  %vm4579_vm3 = vcmp.eq.s32.totalorder %v5077_v41, 0  ;;  %v4583_v6 = vstv %s5347_s3 }
 0x487   :  { %v4563_v29 = vadd.f32 %v4562_v13, %v4556_v14  ;;  %vm4582_vm4 = vmand %vm4578_vm1, %vm4581_vm2 }
 0x488   :  { %vm4580_vm5 = vmand %vm4578_vm1, %vm4579_vm3  ;;  %v4584_v38 = vsel %vm4582_vm4, %v4583_v6, 0.0 }
 0x489   :  { %v4564_v20 = vadd.f32 %v4563_v29, %v4557_v35 }
 0x48b   :  { %v4565_v25 = vadd.f32 %v4564_v20, %v4558_v39 }
 0x48d   :  { %v4566_v16 = vadd.f32 %v4565_v25, %v4559_v28 }
 0x48f   :  { %v4567_v8 = vadd.f32 %v4566_v16, %v4560_v22 }
 0x491   :  { %v4568_v32 = vadd.f32 %v4567_v8, %v4561_v18 }
 0x493   :  { %4569 = vadd.xlane.f32.xlu0 %v4568_v32 }
 0x520   :  { %v4570_v5 = vpop.xlane.xlu0 %4569 }
 0x521   :  { %v4571_v54 = vrot.slane %v4570_v5, 4 }
 0x523   :  { %v4572_v37 = vadd.f32 %v4571_v54, %v4570_v5 }
 0x525   :  { %v4573_v23 = vrot.slane %v4572_v37, 2 }
 0x527   :  { %v4574_v3 = vadd.f32 %v4573_v23, %v4572_v37 }
 0x529   :  { %v4575_v10 = vrot.slane %v4574_v3, 1 }
 0x52b   :  { %v4576_v27 = vadd.f32 %v4575_v10, %v4574_v3 }
 0x52d   :  { %4710 = vpush %v4576_v27 }
 0x55e   :  { %s4711_s21 = spop %4710 }
 0x55f   :  { %v4585_v34 = vstv %s4711_s21 }
 0x560   :  { %v4586_v0 = vsel %vm4580_vm5, %v4585_v34, %v4584_v38 }
 0x561   :  { %4587 = vst [vmem:[%s8665_s6] sm:$0xff] %v4586_v0 }

</bundles_post_ra>
